<compile_context>
chip_gen: v6e
topology: v6e:2x2x1
jax: 0.10.0
libtpu: 0.0.40
codegen_flags: <defaults>
</compile_context>

<pallas_src>
import numpy as np
import jax
import jax.numpy as jnp
from jax.experimental import pallas as pl
from jax.experimental.pallas import tpu as pltpu


# --------------------------------------------------------------------------
# Static (host-side) helpers
# --------------------------------------------------------------------------

def _make_join_idx(column):
    C = column
    num_joins = 2 ** (C - 2)
    join_idx = [[C - 2, C - 1] for _ in range(num_joins)]
    for c in range(C - 2 - 1, -1, -1):
        for j in range(num_joins):
            if (j + 1) % 2 ** (C - 2 - c) == 0:
                join_idx[j].insert(0, c)
    return join_idx


def _make_layer_schedule(column):
    """Per fractal layer: ([(col, conv_idx_within_col), ...], join_cols|None)."""
    join_idx = _make_join_idx(column) if column >= 2 else []
    layers = []
    for layer_idx in range(2 ** (column - 1)):
        convs = []
        for c in range(column):
            if (layer_idx + 1) % 2 ** (column - 1 - c) == 0:
                within = (layer_idx + 1) // 2 ** (column - 1 - c) - 1
                convs.append((c, within))
        join = (tuple(join_idx[layer_idx // 2])
                if (layer_idx + 1) % 2 == 0 else None)
        layers.append((convs, join))
    return layers


def _make_masks_and_shifts(H, W, imgs_per_group, lane_len):
    """3x3 boundary masks over the folded lane axis + per-tap flat shifts."""
    ii, jj = np.meshgrid(np.arange(H), np.arange(W), indexing="ij")
    hw = H * W
    rows, shifts = [], []
    for dh in (-1, 0, 1):
        for dw in (-1, 0, 1):
            valid = ((ii + dh >= 0) & (ii + dh < H) &
                     (jj + dw >= 0) & (jj + dw < W)).reshape(-1)
            row = np.zeros((lane_len,), np.float32)
            row[:imgs_per_group * hw] = np.tile(valid.astype(np.float32),
                                                imgs_per_group)
            rows.append(row)
            shifts.append(dh * W + dw)
    return jnp.asarray(np.stack(rows)), tuple(shifts)


def _default_num_groups(N):
    """2 grid groups on v7x (2 TensorCores/chip), 1 otherwise."""
    try:
        kind = jax.devices()[0].device_kind.lower()
    except Exception:
        kind = ""
    if ("v7" in kind or "7x" in kind) and N % 2 == 0:
        return 2
    return 1


# --------------------------------------------------------------------------
# Fused Pallas kernel (one grid step = one group of folded batch images)
# --------------------------------------------------------------------------

def _build_fractal_kernel(layer_sched, shifts, lane_len, c_pad, column):
    n_layers = len(layer_sched)
    n_taps = len(shifts)
    kc = n_taps * c_pad          # im2col rows per conv block
    bias_rows = 8                # sublane-aligned bias block (ones row + zeros)

    def kernel(*refs):
        x_ref, m_ref = refs[0], refs[1]
        w_refs = refs[2:2 + n_layers]
        o_ref = refs[2 + n_layers]
        cols_ref = refs[3 + n_layers]          # (column, c_pad, lane_len)
        stk_ref = refs[4 + n_layers]           # (bias_rows + column*kc, lane_len)

        x = x_ref[0].astype(jnp.float32)       # (c_pad, lane_len)

        # Hoisted: load boundary masks once, slice the 9 rows once, reuse for
        # every conv in the schedule.
        masks = m_ref[...]                     # (9, lane_len)
        mask_rows = [masks[t:t + 1, :] for t in range(n_taps)]

        # Bias block of the im2col scratch (row 0 = ones): written once.
        row_id = jax.lax.broadcasted_iota(jnp.int32, (bias_rows, lane_len), 0)
        stk_ref[0:bias_rows, :] = (row_id == 0).astype(jnp.float32)

        for col in range(column):
            cols_ref[col] = x

        wrote_out = False
        for li, (convs, join) in enumerate(layer_sched):
            n_active = len(convs)

            # im2col: one aligned (c_pad, lane_len) tap plane per (conv, tap),
            # written straight into the persistent VMEM scratch.
            for b, (c, _w) in enumerate(convs):
                cur = cols_ref[c]
                base = bias_rows + b * kc
                for t in range(n_taps):
                    s = shifts[t]
                    if s == 0:
                        plane = cur
                    else:
                        plane = (pltpu.roll(cur, (-s) % lane_len, 1)
                                 * mask_rows[t])
                    stk_ref[base + t * c_pad: base + (t + 1) * c_pad, :] = plane

            # One block-diagonal MXU matmul for all convs firing this layer
            # (bias folded in via the ones row of the im2col stack).
            k_l = bias_rows + n_active * kc
            y = jnp.dot(w_refs[li][...], stk_ref[0:k_l, :],
                        preferred_element_type=jnp.float32)
            y_blocks = {c: y[b * c_pad:(b + 1) * c_pad, :]
                        for b, (c, _w) in enumerate(convs)}

            final_direct = (li == n_layers - 1 and join is not None
                            and 0 in join)
            if final_direct:
                # Last join only feeds the output: skip the column writes and
                # the trailing copy; average the fresh matmul blocks directly.
                def col_val(i):
                    return y_blocks[i] if i in y_blocks else cols_ref[i]
                acc = col_val(join[0])
                for i in join[1:]:
                    acc = acc + col_val(i)
                o_ref[0] = (acc * (1.0 / float(len(join)))).astype(o_ref.dtype)
                wrote_out = True
            else:
                for c, blk in y_blocks.items():
                    cols_ref[c] = blk
                if join is not None:
                    acc = cols_ref[join[0]]
                    for i in join[1:]:
                        acc = acc + cols_ref[i]
                    temp = acc * (1.0 / float(len(join)))
                    for i in join:
                        cols_ref[i] = temp

        if not wrote_out:
            o_ref[0] = cols_ref[0].astype(o_ref.dtype)

    return kernel


# --------------------------------------------------------------------------
# Module wrapper
# --------------------------------------------------------------------------

class FractalBlockPallas:
    """Pallas implementation of FractalBlock (eval-mode forward), fully fused."""

    def __init__(self, column, in_channels, key):
        self.column = column
        self.in_channels = in_channels
        self.c_pad = ((in_channels + 7) // 8) * 8
        self.layer_sched = _make_layer_schedule(column)

        fan_in = in_channels * 3 * 3
        bound = 1.0 / np.sqrt(fan_in)        # PyTorch default Conv2d init range
        # layers[c] holds 2**c convs, each (w: OIHW (C, C, 3, 3), b: (C,))
        self.layers = []
        for col in range(column):
            convs = []
            for _ in range(2 ** col):
                key, k1, k2 = jax.random.split(key, 3)
                w = jax.random.uniform(k1, (in_channels, in_channels, 3, 3),
                                       jnp.float32, -bound, bound)
                b = jax.random.uniform(k2, (in_channels,), jnp.float32,
                                       -bound, bound)
                convs.append((w, b))
            self.layers.append(convs)

        # Per fractal layer: one block-diagonal packed weight matrix.
        #   rows: n_active * c_pad (conv outputs; padded channel rows -> 0)
        #   cols: 8 (bias block, bias in col 0) + n_active * 9 * c_pad (im2col)
        C, Cp = in_channels, self.c_pad
        kc = 9 * Cp
        self.w_layers = []
        for convs, _join in self.layer_sched:
            n_active = len(convs)
            wm = np.zeros((n_active * Cp, 8 + n_active * kc), np.float32)
            for b, (c, kidx) in enumerate(convs):
                w, bias = self.layers[c][kidx]
                w = np.asarray(w)
                wm[b * Cp:b * Cp + C, 0] = np.asarray(bias)
                for kh in range(3):
                    for kw in range(3):
                        t = kh * 3 + kw
                        col0 = 8 + b * kc + t * Cp
                        wm[b * Cp:b * Cp + C, col0:col0 + C] = w[:, :, kh, kw]
            self.w_layers.append(jnp.asarray(wm))

    def __call__(self, x_nchw, num_groups=None):
        N, C, H, W = x_nchw.shape
        assert C == self.in_channels
        Cp = self.c_pad
        G = _default_num_groups(N) if num_groups is None else num_groups
        if N % G != 0:
            G = 1
        n_per_g = N // G
        hw = H * W
        lanes = n_per_g * hw
        lanes_p = ((lanes + 127) // 128) * 128     # lane-dense output slab

        masks, shifts = _make_masks_and_shifts(H, W, n_per_g, lanes_p)
        kernel = _build_fractal_kernel(self.layer_sched, shifts, lanes_p, Cp,
                                       self.column)

        # Fold batch into the lane axis: (G, Cp, n_per_g*H*W), zero-padded.
        x_f = jnp.transpose(x_nchw.reshape(G, n_per_g, C, hw), (0, 2, 1, 3))
        x_f = x_f.reshape(G, C, lanes)
        x_f = jnp.pad(x_f, ((0, 0), (0, Cp - C), (0, lanes_p - lanes)))

        # VMEM budget check (v7x: 64 MiB physical, 32 MiB default scoped).
        f32 = 4
        stack_rows = 8 + self.column * 9 * Cp
        scratch_bytes = (self.column * Cp * lanes_p + stack_rows * lanes_p) * f32
        io_bytes = ((2 * 2 * Cp * lanes_p + 2 * 9 * lanes_p) * f32
                    + 2 * sum(int(w.size) for w in self.w_layers) * f32)
        vmem_limit = 32 * 1024 * 1024
        # TODO(synk): tile the lane axis if this ever trips at large C/H/W/N.
        assert scratch_bytes + io_bytes < vmem_limit, "VMEM budget exceeded"

        in_specs = ([pl.BlockSpec((1, Cp, lanes_p), lambda g: (g, 0, 0)),
                     pl.BlockSpec((9, lanes_p), lambda g: (0, 0))]
                    + [pl.BlockSpec(tuple(w.shape), lambda g: (0, 0))
                       for w in self.w_layers])

        out = pl.pallas_call(
            kernel,
            out_shape=jax.ShapeDtypeStruct((G, Cp, lanes_p), x_nchw.dtype),
            grid=(G,),
            in_specs=in_specs,
            out_specs=pl.BlockSpec((1, Cp, lanes_p), lambda g: (g, 0, 0)),
            scratch_shapes=[
                pltpu.VMEM((self.column, Cp, lanes_p), jnp.float32),  # columns
                pltpu.VMEM((stack_rows, lanes_p), jnp.float32),       # im2col
            ],
            compiler_params=pltpu.CompilerParams(
                dimension_semantics=("parallel",),
                vmem_limit_bytes=vmem_limit),
        )(x_f, masks, *self.w_layers)

        out = out[:, :C, :lanes].reshape(G, C, n_per_g, hw)
        out = jnp.transpose(out, (0, 2, 1, 3)).reshape(N, C, H, W)
        return out


# --------------------------------------------------------------------------
# Pure-JAX reference (for correctness check)
# --------------------------------------------------------------------------

def _ref_conv(x_nchw, w_oihw, b):
    y = jax.lax.conv_general_dilated(
        x_nchw, w_oihw, window_strides=(1, 1), padding=((1, 1), (1, 1)),
        dimension_numbers=("NCHW", "OIHW", "NCHW"))
    return y + b[None, :, None, None]


def _ref_forward(block, x_nchw):
    C = block.column
    join_idx = _make_join_idx(C)
    out_layers = [x_nchw for _ in range(C)]
    for layer_idx in range(2 ** (C - 1)):
        for c in range(C):
            if (layer_idx + 1) % 2 ** (C - 1 - c) == 0:
                w, b = block.layers[c][(layer_idx + 1) // 2 ** (C - 1 - c) - 1]
                out_layers[c] = _ref_conv(out_layers[c], w, b)
        if (layer_idx + 1) % 2 == 0:
            idxs = join_idx[layer_idx // 2]
            temp = jnp.mean(jnp.stack([out_layers[i] for i in idxs]), axis=0)
            for i in idxs:
                out_layers[i] = temp
    return out_layers[0]


# --------------------------------------------------------------------------
# main
# --------------------------------------------------------------------------

if __name__ == "__main__":
    key = jax.random.PRNGKey(0)
    k_x, k_w = jax.random.split(key)

    column = 4
    in_channels = 4
    N, H, W = 2, 16, 16

    x = jax.random.normal(k_x, (N, in_channels, H, W), jnp.float32)  # NCHW

    block = FractalBlockPallas(column, in_channels, k_w)

    out = jax.block_until_ready(block(x))
    ref = jax.block_until_ready(_ref_forward(block, x))

    np.testing.assert_allclose(np.asarray(out), np.asarray(ref),
                               rtol=1e-4, atol=1e-4)
    print("KERNEL_OK")
</pallas_src>

<mosaic_0001>
module attributes {stable_mosaic.version = 11 : i64} {
  func.func @kernel(%arg0: i32, %arg1: memref<1x8x512xf32, #tpu.memory_space<vmem>>, %arg2: memref<9x512xf32, #tpu.memory_space<vmem>>, %arg3: memref<8x80xf32, #tpu.memory_space<vmem>>, %arg4: memref<16x152xf32, #tpu.memory_space<vmem>>, %arg5: memref<8x80xf32, #tpu.memory_space<vmem>>, %arg6: memref<24x224xf32, #tpu.memory_space<vmem>>, %arg7: memref<8x80xf32, #tpu.memory_space<vmem>>, %arg8: memref<16x152xf32, #tpu.memory_space<vmem>>, %arg9: memref<8x80xf32, #tpu.memory_space<vmem>>, %arg10: memref<32x296xf32, #tpu.memory_space<vmem>>, %arg11: memref<1x8x512xf32, #tpu.memory_space<vmem>>, %arg12: memref<4x8x512xf32, #tpu.memory_space<vmem>>, %arg13: memref<296x512xf32, #tpu.memory_space<vmem>>) attributes {dimension_semantics = [#tpu.dimension_semantics<parallel>], iteration_bounds = array<i64: 1>, scalar_prefetch = 0 : i64, scratch_operands = 2 : i64, tpu.core_type = #tpu.core_type<tc>, window_params = [{transform_indices = @transform_0, window_bounds = array<i64: 1, 8, 512>}, {pipeline_mode = #tpu.pipeline_mode<synchronous>, transform_indices = @transform_1, window_bounds = array<i64: 9, 512>}, {pipeline_mode = #tpu.pipeline_mode<synchronous>, transform_indices = @transform_2, window_bounds = array<i64: 8, 80>}, {pipeline_mode = #tpu.pipeline_mode<synchronous>, transform_indices = @transform_3, window_bounds = array<i64: 16, 152>}, {pipeline_mode = #tpu.pipeline_mode<synchronous>, transform_indices = @transform_4, window_bounds = array<i64: 8, 80>}, {pipeline_mode = #tpu.pipeline_mode<synchronous>, transform_indices = @transform_5, window_bounds = array<i64: 24, 224>}, {pipeline_mode = #tpu.pipeline_mode<synchronous>, transform_indices = @transform_6, window_bounds = array<i64: 8, 80>}, {pipeline_mode = #tpu.pipeline_mode<synchronous>, transform_indices = @transform_7, window_bounds = array<i64: 16, 152>}, {pipeline_mode = #tpu.pipeline_mode<synchronous>, transform_indices = @transform_8, window_bounds = array<i64: 8, 80>}, {pipeline_mode = #tpu.pipeline_mode<synchronous>, transform_indices = @transform_9, window_bounds = array<i64: 32, 296>}, {transform_indices = @transform_10, window_bounds = array<i64: 1, 8, 512>}]} {
    %c0 = arith.constant 0 : index
    %c0_0 = arith.constant 0 : index
    %c0_1 = arith.constant 0 : index
    %0 = vector.load %arg1[%c0, %c0_0, %c0_1] : memref<1x8x512xf32, #tpu.memory_space<vmem>>, vector<1x8x512xf32>
    %1 = vector.shape_cast %0 : vector<1x8x512xf32> to vector<8x512xf32>
    %c0_2 = arith.constant 0 : index
    %c0_3 = arith.constant 0 : index
    %2 = vector.load %arg2[%c0_2, %c0_3] : memref<9x512xf32, #tpu.memory_space<vmem>>, vector<9x512xf32>
    %3 = vector.extract_strided_slice %2 {offsets = [0, 0], sizes = [1, 512], strides = [1, 1]} : vector<9x512xf32> to vector<1x512xf32>
    %4 = vector.extract_strided_slice %2 {offsets = [1, 0], sizes = [1, 512], strides = [1, 1]} : vector<9x512xf32> to vector<1x512xf32>
    %5 = vector.extract_strided_slice %2 {offsets = [2, 0], sizes = [1, 512], strides = [1, 1]} : vector<9x512xf32> to vector<1x512xf32>
    %6 = vector.extract_strided_slice %2 {offsets = [3, 0], sizes = [1, 512], strides = [1, 1]} : vector<9x512xf32> to vector<1x512xf32>
    %7 = vector.extract_strided_slice %2 {offsets = [5, 0], sizes = [1, 512], strides = [1, 1]} : vector<9x512xf32> to vector<1x512xf32>
    %8 = vector.extract_strided_slice %2 {offsets = [6, 0], sizes = [1, 512], strides = [1, 1]} : vector<9x512xf32> to vector<1x512xf32>
    %9 = vector.extract_strided_slice %2 {offsets = [7, 0], sizes = [1, 512], strides = [1, 1]} : vector<9x512xf32> to vector<1x512xf32>
    %10 = vector.extract_strided_slice %2 {offsets = [8, 0], sizes = [1, 512], strides = [1, 1]} : vector<9x512xf32> to vector<1x512xf32>
    %11 = tpu.iota {dimensions = array<i32: 0>} : vector<8x512xi32>
    %c0_i32 = arith.constant 0 : i32
    %12 = vector.broadcast %c0_i32 : i32 to vector<8x512xi32>
    %13 = arith.cmpi eq, %11, %12 : vector<8x512xi32>
    %14 = arith.extui %13 : vector<8x512xi1> to vector<8x512xi32>
    %15 = arith.sitofp %14 : vector<8x512xi32> to vector<8x512xf32>
    %c0_4 = arith.constant 0 : index
    %c0_5 = arith.constant 0 : index
    %16 = vector.load %arg13[%c0_4, %c0_5] : memref<296x512xf32, #tpu.memory_space<vmem>>, vector<8x512xf32>
    tpu.vector_store %arg13[%c0_4, %c0_5], %15 {strides = array<i32>} : memref<296x512xf32, #tpu.memory_space<vmem>>, vector<8x512xf32>,
    %c0_6 = arith.constant 0 : index
    %c0_7 = arith.constant 0 : index
    %c0_8 = arith.constant 0 : index
    %17 = vector.load %arg12[%c0_6, %c0_7, %c0_8] : memref<4x8x512xf32, #tpu.memory_space<vmem>>, vector<1x8x512xf32>
    %18 = vector.shape_cast %17 : vector<1x8x512xf32> to vector<8x512xf32>
    %19 = vector.shape_cast %1 : vector<8x512xf32> to vector<1x8x512xf32>
    tpu.vector_store %arg12[%c0_6, %c0_7, %c0_8], %19 {strides = array<i32>} : memref<4x8x512xf32, #tpu.memory_space<vmem>>, vector<1x8x512xf32>,
    %c1 = arith.constant 1 : index
    %c0_9 = arith.constant 0 : index
    %c0_10 = arith.constant 0 : index
    %20 = vector.load %arg12[%c1, %c0_9, %c0_10] : memref<4x8x512xf32, #tpu.memory_space<vmem>>, vector<1x8x512xf32>
    %21 = vector.shape_cast %20 : vector<1x8x512xf32> to vector<8x512xf32>
    %22 = vector.shape_cast %1 : vector<8x512xf32> to vector<1x8x512xf32>
    tpu.vector_store %arg12[%c1, %c0_9, %c0_10], %22 {strides = array<i32>} : memref<4x8x512xf32, #tpu.memory_space<vmem>>, vector<1x8x512xf32>,
    %c2 = arith.constant 2 : index
    %c0_11 = arith.constant 0 : index
    %c0_12 = arith.constant 0 : index
    %23 = vector.load %arg12[%c2, %c0_11, %c0_12] : memref<4x8x512xf32, #tpu.memory_space<vmem>>, vector<1x8x512xf32>
    %24 = vector.shape_cast %23 : vector<1x8x512xf32> to vector<8x512xf32>
    %25 = vector.shape_cast %1 : vector<8x512xf32> to vector<1x8x512xf32>
    tpu.vector_store %arg12[%c2, %c0_11, %c0_12], %25 {strides = array<i32>} : memref<4x8x512xf32, #tpu.memory_space<vmem>>, vector<1x8x512xf32>,
    %c3 = arith.constant 3 : index
    %c0_13 = arith.constant 0 : index
    %c0_14 = arith.constant 0 : index
    %26 = vector.load %arg12[%c3, %c0_13, %c0_14] : memref<4x8x512xf32, #tpu.memory_space<vmem>>, vector<1x8x512xf32>
    %27 = vector.shape_cast %26 : vector<1x8x512xf32> to vector<8x512xf32>
    %28 = vector.shape_cast %1 : vector<8x512xf32> to vector<1x8x512xf32>
    tpu.vector_store %arg12[%c3, %c0_13, %c0_14], %28 {strides = array<i32>} : memref<4x8x512xf32, #tpu.memory_space<vmem>>, vector<1x8x512xf32>,
    %c3_15 = arith.constant 3 : index
    %c0_16 = arith.constant 0 : index
    %c0_17 = arith.constant 0 : index
    %29 = vector.load %arg12[%c3_15, %c0_16, %c0_17] : memref<4x8x512xf32, #tpu.memory_space<vmem>>, vector<1x8x512xf32>
    %30 = vector.shape_cast %29 : vector<1x8x512xf32> to vector<8x512xf32>
    %c17_i32 = arith.constant 17 : i32
    %31 = tpu.dynamic_rotate %30 by %c17_i32 dim 1 : vector<8x512xf32>, i32 -> vector<8x512xf32>
    %32 = vector.broadcast %3 : vector<1x512xf32> to vector<8x512xf32>
    %33 = arith.mulf %31, %32 : vector<8x512xf32>
    %c8 = arith.constant 8 : index
    %c0_18 = arith.constant 0 : index
    %34 = vector.load %arg13[%c8, %c0_18] : memref<296x512xf32, #tpu.memory_space<vmem>>, vector<8x512xf32>
    tpu.vector_store %arg13[%c8, %c0_18], %33 {strides = array<i32>} : memref<296x512xf32, #tpu.memory_space<vmem>>, vector<8x512xf32>,
    %c16_i32 = arith.constant 16 : i32
    %35 = tpu.dynamic_rotate %30 by %c16_i32 dim 1 : vector<8x512xf32>, i32 -> vector<8x512xf32>
    %36 = vector.broadcast %4 : vector<1x512xf32> to vector<8x512xf32>
    %37 = arith.mulf %35, %36 : vector<8x512xf32>
    %c16 = arith.constant 16 : index
    %c0_19 = arith.constant 0 : index
    %38 = vector.load %arg13[%c16, %c0_19] : memref<296x512xf32, #tpu.memory_space<vmem>>, vector<8x512xf32>
    tpu.vector_store %arg13[%c16, %c0_19], %37 {strides = array<i32>} : memref<296x512xf32, #tpu.memory_space<vmem>>, vector<8x512xf32>,
    %c15_i32 = arith.constant 15 : i32
    %39 = tpu.dynamic_rotate %30 by %c15_i32 dim 1 : vector<8x512xf32>, i32 -> vector<8x512xf32>
    %40 = vector.broadcast %5 : vector<1x512xf32> to vector<8x512xf32>
    %41 = arith.mulf %39, %40 : vector<8x512xf32>
    %c24 = arith.constant 24 : index
    %c0_20 = arith.constant 0 : index
    %42 = vector.load %arg13[%c24, %c0_20] : memref<296x512xf32, #tpu.memory_space<vmem>>, vector<8x512xf32>
    tpu.vector_store %arg13[%c24, %c0_20], %41 {strides = array<i32>} : memref<296x512xf32, #tpu.memory_space<vmem>>, vector<8x512xf32>,
    %c1_i32 = arith.constant 1 : i32
    %43 = tpu.dynamic_rotate %30 by %c1_i32 dim 1 : vector<8x512xf32>, i32 -> vector<8x512xf32>
    %44 = vector.broadcast %6 : vector<1x512xf32> to vector<8x512xf32>
    %45 = arith.mulf %43, %44 : vector<8x512xf32>
    %c32 = arith.constant 32 : index
    %c0_21 = arith.constant 0 : index
    %46 = vector.load %arg13[%c32, %c0_21] : memref<296x512xf32, #tpu.memory_space<vmem>>, vector<8x512xf32>
    tpu.vector_store %arg13[%c32, %c0_21], %45 {strides = array<i32>} : memref<296x512xf32, #tpu.memory_space<vmem>>, vector<8x512xf32>,
    %c40 = arith.constant 40 : index
    %c0_22 = arith.constant 0 : index
    %47 = vector.load %arg13[%c40, %c0_22] : memref<296x512xf32, #tpu.memory_space<vmem>>, vector<8x512xf32>
    tpu.vector_store %arg13[%c40, %c0_22], %30 {strides = array<i32>} : memref<296x512xf32, #tpu.memory_space<vmem>>, vector<8x512xf32>,
    %c511_i32 = arith.constant 511 : i32
    %48 = tpu.dynamic_rotate %30 by %c511_i32 dim 1 : vector<8x512xf32>, i32 -> vector<8x512xf32>
    %49 = vector.broadcast %7 : vector<1x512xf32> to vector<8x512xf32>
    %50 = arith.mulf %48, %49 : vector<8x512xf32>
    %c48 = arith.constant 48 : index
    %c0_23 = arith.constant 0 : index
    %51 = vector.load %arg13[%c48, %c0_23] : memref<296x512xf32, #tpu.memory_space<vmem>>, vector<8x512xf32>
    tpu.vector_store %arg13[%c48, %c0_23], %50 {strides = array<i32>} : memref<296x512xf32, #tpu.memory_space<vmem>>, vector<8x512xf32>,
    %c497_i32 = arith.constant 497 : i32
    %52 = tpu.dynamic_rotate %30 by %c497_i32 dim 1 : vector<8x512xf32>, i32 -> vector<8x512xf32>
    %53 = vector.broadcast %8 : vector<1x512xf32> to vector<8x512xf32>
    %54 = arith.mulf %52, %53 : vector<8x512xf32>
    %c56 = arith.constant 56 : index
    %c0_24 = arith.constant 0 : index
    %55 = vector.load %arg13[%c56, %c0_24] : memref<296x512xf32, #tpu.memory_space<vmem>>, vector<8x512xf32>
    tpu.vector_store %arg13[%c56, %c0_24], %54 {strides = array<i32>} : memref<296x512xf32, #tpu.memory_space<vmem>>, vector<8x512xf32>,
    %c496_i32 = arith.constant 496 : i32
    %56 = tpu.dynamic_rotate %30 by %c496_i32 dim 1 : vector<8x512xf32>, i32 -> vector<8x512xf32>
    %57 = vector.broadcast %9 : vector<1x512xf32> to vector<8x512xf32>
    %58 = arith.mulf %56, %57 : vector<8x512xf32>
    %c64 = arith.constant 64 : index
    %c0_25 = arith.constant 0 : index
    %59 = vector.load %arg13[%c64, %c0_25] : memref<296x512xf32, #tpu.memory_space<vmem>>, vector<8x512xf32>
    tpu.vector_store %arg13[%c64, %c0_25], %58 {strides = array<i32>} : memref<296x512xf32, #tpu.memory_space<vmem>>, vector<8x512xf32>,
    %c495_i32 = arith.constant 495 : i32
    %60 = tpu.dynamic_rotate %30 by %c495_i32 dim 1 : vector<8x512xf32>, i32 -> vector<8x512xf32>
    %61 = vector.broadcast %10 : vector<1x512xf32> to vector<8x512xf32>
    %62 = arith.mulf %60, %61 : vector<8x512xf32>
    %c72 = arith.constant 72 : index
    %c0_26 = arith.constant 0 : index
    %63 = vector.load %arg13[%c72, %c0_26] : memref<296x512xf32, #tpu.memory_space<vmem>>, vector<8x512xf32>
    tpu.vector_store %arg13[%c72, %c0_26], %62 {strides = array<i32>} : memref<296x512xf32, #tpu.memory_space<vmem>>, vector<8x512xf32>,
    %c0_27 = arith.constant 0 : index
    %c0_28 = arith.constant 0 : index
    %64 = vector.load %arg3[%c0_27, %c0_28] : memref<8x80xf32, #tpu.memory_space<vmem>>, vector<8x80xf32>
    %c0_29 = arith.constant 0 : index
    %c0_30 = arith.constant 0 : index
    %65 = vector.load %arg13[%c0_29, %c0_30] : memref<296x512xf32, #tpu.memory_space<vmem>>, vector<80x512xf32>
    %cst = arith.constant dense<0.000000e+00> : vector<8x512xf32>
    %66 = tpu.matmul %64, %65, %cst {dimension_numbers = #tpu.dot_dimension_numbers<[1], [0], [0], [1], [0, 0, 1, 1], [], []>} : vector<8x80xf32>, vector<80x512xf32>, vector<8x512xf32> -> vector<8x512xf32>
    %c3_31 = arith.constant 3 : index
    %c0_32 = arith.constant 0 : index
    %c0_33 = arith.constant 0 : index
    %67 = vector.load %arg12[%c3_31, %c0_32, %c0_33] : memref<4x8x512xf32, #tpu.memory_space<vmem>>, vector<1x8x512xf32>
    %68 = vector.shape_cast %67 : vector<1x8x512xf32> to vector<8x512xf32>
    %69 = vector.shape_cast %66 : vector<8x512xf32> to vector<1x8x512xf32>
    tpu.vector_store %arg12[%c3_31, %c0_32, %c0_33], %69 {strides = array<i32>} : memref<4x8x512xf32, #tpu.memory_space<vmem>>, vector<1x8x512xf32>,
    %c2_34 = arith.constant 2 : index
    %c0_35 = arith.constant 0 : index
    %c0_36 = arith.constant 0 : index
    %70 = vector.load %arg12[%c2_34, %c0_35, %c0_36] : memref<4x8x512xf32, #tpu.memory_space<vmem>>, vector<1x8x512xf32>
    %71 = vector.shape_cast %70 : vector<1x8x512xf32> to vector<8x512xf32>
    %c17_i32_37 = arith.constant 17 : i32
    %72 = tpu.dynamic_rotate %71 by %c17_i32_37 dim 1 : vector<8x512xf32>, i32 -> vector<8x512xf32>
    %73 = vector.broadcast %3 : vector<1x512xf32> to vector<8x512xf32>
    %74 = arith.mulf %72, %73 : vector<8x512xf32>
    %c8_38 = arith.constant 8 : index
    %c0_39 = arith.constant 0 : index
    %75 = vector.load %arg13[%c8_38, %c0_39] : memref<296x512xf32, #tpu.memory_space<vmem>>, vector<8x512xf32>
    tpu.vector_store %arg13[%c8_38, %c0_39], %74 {strides = array<i32>} : memref<296x512xf32, #tpu.memory_space<vmem>>, vector<8x512xf32>,
    %c16_i32_40 = arith.constant 16 : i32
    %76 = tpu.dynamic_rotate %71 by %c16_i32_40 dim 1 : vector<8x512xf32>, i32 -> vector<8x512xf32>
    %77 = vector.broadcast %4 : vector<1x512xf32> to vector<8x512xf32>
    %78 = arith.mulf %76, %77 : vector<8x512xf32>
    %c16_41 = arith.constant 16 : index
    %c0_42 = arith.constant 0 : index
    %79 = vector.load %arg13[%c16_41, %c0_42] : memref<296x512xf32, #tpu.memory_space<vmem>>, vector<8x512xf32>
    tpu.vector_store %arg13[%c16_41, %c0_42], %78 {strides = array<i32>} : memref<296x512xf32, #tpu.memory_space<vmem>>, vector<8x512xf32>,
    %c15_i32_43 = arith.constant 15 : i32
    %80 = tpu.dynamic_rotate %71 by %c15_i32_43 dim 1 : vector<8x512xf32>, i32 -> vector<8x512xf32>
    %81 = vector.broadcast %5 : vector<1x512xf32> to vector<8x512xf32>
    %82 = arith.mulf %80, %81 : vector<8x512xf32>
    %c24_44 = arith.constant 24 : index
    %c0_45 = arith.constant 0 : index
    %83 = vector.load %arg13[%c24_44, %c0_45] : memref<296x512xf32, #tpu.memory_space<vmem>>, vector<8x512xf32>
    tpu.vector_store %arg13[%c24_44, %c0_45], %82 {strides = array<i32>} : memref<296x512xf32, #tpu.memory_space<vmem>>, vector<8x512xf32>,
    %c1_i32_46 = arith.constant 1 : i32
    %84 = tpu.dynamic_rotate %71 by %c1_i32_46 dim 1 : vector<8x512xf32>, i32 -> vector<8x512xf32>
    %85 = vector.broadcast %6 : vector<1x512xf32> to vector<8x512xf32>
    %86 = arith.mulf %84, %85 : vector<8x512xf32>
    %c32_47 = arith.constant 32 : index
    %c0_48 = arith.constant 0 : index
    %87 = vector.load %arg13[%c32_47, %c0_48] : memref<296x512xf32, #tpu.memory_space<vmem>>, vector<8x512xf32>
    tpu.vector_store %arg13[%c32_47, %c0_48], %86 {strides = array<i32>} : memref<296x512xf32, #tpu.memory_space<vmem>>, vector<8x512xf32>,
    %c40_49 = arith.constant 40 : index
    %c0_50 = arith.constant 0 : index
    %88 = vector.load %arg13[%c40_49, %c0_50] : memref<296x512xf32, #tpu.memory_space<vmem>>, vector<8x512xf32>
    tpu.vector_store %arg13[%c40_49, %c0_50], %71 {strides = array<i32>} : memref<296x512xf32, #tpu.memory_space<vmem>>, vector<8x512xf32>,
    %c511_i32_51 = arith.constant 511 : i32
    %89 = tpu.dynamic_rotate %71 by %c511_i32_51 dim 1 : vector<8x512xf32>, i32 -> vector<8x512xf32>
    %90 = vector.broadcast %7 : vector<1x512xf32> to vector<8x512xf32>
    %91 = arith.mulf %89, %90 : vector<8x512xf32>
    %c48_52 = arith.constant 48 : index
    %c0_53 = arith.constant 0 : index
    %92 = vector.load %arg13[%c48_52, %c0_53] : memref<296x512xf32, #tpu.memory_space<vmem>>, vector<8x512xf32>
    tpu.vector_store %arg13[%c48_52, %c0_53], %91 {strides = array<i32>} : memref<296x512xf32, #tpu.memory_space<vmem>>, vector<8x512xf32>,
    %c497_i32_54 = arith.constant 497 : i32
    %93 = tpu.dynamic_rotate %71 by %c497_i32_54 dim 1 : vector<8x512xf32>, i32 -> vector<8x512xf32>
    %94 = vector.broadcast %8 : vector<1x512xf32> to vector<8x512xf32>
    %95 = arith.mulf %93, %94 : vector<8x512xf32>
    %c56_55 = arith.constant 56 : index
    %c0_56 = arith.constant 0 : index
    %96 = vector.load %arg13[%c56_55, %c0_56] : memref<296x512xf32, #tpu.memory_space<vmem>>, vector<8x512xf32>
    tpu.vector_store %arg13[%c56_55, %c0_56], %95 {strides = array<i32>} : memref<296x512xf32, #tpu.memory_space<vmem>>, vector<8x512xf32>,
    %c496_i32_57 = arith.constant 496 : i32
    %97 = tpu.dynamic_rotate %71 by %c496_i32_57 dim 1 : vector<8x512xf32>, i32 -> vector<8x512xf32>
    %98 = vector.broadcast %9 : vector<1x512xf32> to vector<8x512xf32>
    %99 = arith.mulf %97, %98 : vector<8x512xf32>
    %c64_58 = arith.constant 64 : index
    %c0_59 = arith.constant 0 : index
    %100 = vector.load %arg13[%c64_58, %c0_59] : memref<296x512xf32, #tpu.memory_space<vmem>>, vector<8x512xf32>
    tpu.vector_store %arg13[%c64_58, %c0_59], %99 {strides = array<i32>} : memref<296x512xf32, #tpu.memory_space<vmem>>, vector<8x512xf32>,
    %c495_i32_60 = arith.constant 495 : i32
    %101 = tpu.dynamic_rotate %71 by %c495_i32_60 dim 1 : vector<8x512xf32>, i32 -> vector<8x512xf32>
    %102 = vector.broadcast %10 : vector<1x512xf32> to vector<8x512xf32>
    %103 = arith.mulf %101, %102 : vector<8x512xf32>
    %c72_61 = arith.constant 72 : index
    %c0_62 = arith.constant 0 : index
    %104 = vector.load %arg13[%c72_61, %c0_62] : memref<296x512xf32, #tpu.memory_space<vmem>>, vector<8x512xf32>
    tpu.vector_store %arg13[%c72_61, %c0_62], %103 {strides = array<i32>} : memref<296x512xf32, #tpu.memory_space<vmem>>, vector<8x512xf32>,
    %c3_63 = arith.constant 3 : index
    %c0_64 = arith.constant 0 : index
    %c0_65 = arith.constant 0 : index
    %105 = vector.load %arg12[%c3_63, %c0_64, %c0_65] : memref<4x8x512xf32, #tpu.memory_space<vmem>>, vector<1x8x512xf32>
    %106 = vector.shape_cast %105 : vector<1x8x512xf32> to vector<8x512xf32>
    %c17_i32_66 = arith.constant 17 : i32
    %107 = tpu.dynamic_rotate %106 by %c17_i32_66 dim 1 : vector<8x512xf32>, i32 -> vector<8x512xf32>
    %108 = vector.broadcast %3 : vector<1x512xf32> to vector<8x512xf32>
    %109 = arith.mulf %107, %108 : vector<8x512xf32>
    %c80 = arith.constant 80 : index
    %c0_67 = arith.constant 0 : index
    %110 = vector.load %arg13[%c80, %c0_67] : memref<296x512xf32, #tpu.memory_space<vmem>>, vector<8x512xf32>
    tpu.vector_store %arg13[%c80, %c0_67], %109 {strides = array<i32>} : memref<296x512xf32, #tpu.memory_space<vmem>>, vector<8x512xf32>,
    %c16_i32_68 = arith.constant 16 : i32
    %111 = tpu.dynamic_rotate %106 by %c16_i32_68 dim 1 : vector<8x512xf32>, i32 -> vector<8x512xf32>
    %112 = vector.broadcast %4 : vector<1x512xf32> to vector<8x512xf32>
    %113 = arith.mulf %111, %112 : vector<8x512xf32>
    %c88 = arith.constant 88 : index
    %c0_69 = arith.constant 0 : index
    %114 = vector.load %arg13[%c88, %c0_69] : memref<296x512xf32, #tpu.memory_space<vmem>>, vector<8x512xf32>
    tpu.vector_store %arg13[%c88, %c0_69], %113 {strides = array<i32>} : memref<296x512xf32, #tpu.memory_space<vmem>>, vector<8x512xf32>,
    %c15_i32_70 = arith.constant 15 : i32
    %115 = tpu.dynamic_rotate %106 by %c15_i32_70 dim 1 : vector<8x512xf32>, i32 -> vector<8x512xf32>
    %116 = vector.broadcast %5 : vector<1x512xf32> to vector<8x512xf32>
    %117 = arith.mulf %115, %116 : vector<8x512xf32>
    %c96 = arith.constant 96 : index
    %c0_71 = arith.constant 0 : index
    %118 = vector.load %arg13[%c96, %c0_71] : memref<296x512xf32, #tpu.memory_space<vmem>>, vector<8x512xf32>
    tpu.vector_store %arg13[%c96, %c0_71], %117 {strides = array<i32>} : memref<296x512xf32, #tpu.memory_space<vmem>>, vector<8x512xf32>,
    %c1_i32_72 = arith.constant 1 : i32
    %119 = tpu.dynamic_rotate %106 by %c1_i32_72 dim 1 : vector<8x512xf32>, i32 -> vector<8x512xf32>
    %120 = vector.broadcast %6 : vector<1x512xf32> to vector<8x512xf32>
    %121 = arith.mulf %119, %120 : vector<8x512xf32>
    %c104 = arith.constant 104 : index
    %c0_73 = arith.constant 0 : index
    %122 = vector.load %arg13[%c104, %c0_73] : memref<296x512xf32, #tpu.memory_space<vmem>>, vector<8x512xf32>
    tpu.vector_store %arg13[%c104, %c0_73], %121 {strides = array<i32>} : memref<296x512xf32, #tpu.memory_space<vmem>>, vector<8x512xf32>,
    %c112 = arith.constant 112 : index
    %c0_74 = arith.constant 0 : index
    %123 = vector.load %arg13[%c112, %c0_74] : memref<296x512xf32, #tpu.memory_space<vmem>>, vector<8x512xf32>
    tpu.vector_store %arg13[%c112, %c0_74], %106 {strides = array<i32>} : memref<296x512xf32, #tpu.memory_space<vmem>>, vector<8x512xf32>,
    %c511_i32_75 = arith.constant 511 : i32
    %124 = tpu.dynamic_rotate %106 by %c511_i32_75 dim 1 : vector<8x512xf32>, i32 -> vector<8x512xf32>
    %125 = vector.broadcast %7 : vector<1x512xf32> to vector<8x512xf32>
    %126 = arith.mulf %124, %125 : vector<8x512xf32>
    %c120 = arith.constant 120 : index
    %c0_76 = arith.constant 0 : index
    %127 = vector.load %arg13[%c120, %c0_76] : memref<296x512xf32, #tpu.memory_space<vmem>>, vector<8x512xf32>
    tpu.vector_store %arg13[%c120, %c0_76], %126 {strides = array<i32>} : memref<296x512xf32, #tpu.memory_space<vmem>>, vector<8x512xf32>,
    %c497_i32_77 = arith.constant 497 : i32
    %128 = tpu.dynamic_rotate %106 by %c497_i32_77 dim 1 : vector<8x512xf32>, i32 -> vector<8x512xf32>
    %129 = vector.broadcast %8 : vector<1x512xf32> to vector<8x512xf32>
    %130 = arith.mulf %128, %129 : vector<8x512xf32>
    %c128 = arith.constant 128 : index
    %c0_78 = arith.constant 0 : index
    %131 = vector.load %arg13[%c128, %c0_78] : memref<296x512xf32, #tpu.memory_space<vmem>>, vector<8x512xf32>
    tpu.vector_store %arg13[%c128, %c0_78], %130 {strides = array<i32>} : memref<296x512xf32, #tpu.memory_space<vmem>>, vector<8x512xf32>,
    %c496_i32_79 = arith.constant 496 : i32
    %132 = tpu.dynamic_rotate %106 by %c496_i32_79 dim 1 : vector<8x512xf32>, i32 -> vector<8x512xf32>
    %133 = vector.broadcast %9 : vector<1x512xf32> to vector<8x512xf32>
    %134 = arith.mulf %132, %133 : vector<8x512xf32>
    %c136 = arith.constant 136 : index
    %c0_80 = arith.constant 0 : index
    %135 = vector.load %arg13[%c136, %c0_80] : memref<296x512xf32, #tpu.memory_space<vmem>>, vector<8x512xf32>
    tpu.vector_store %arg13[%c136, %c0_80], %134 {strides = array<i32>} : memref<296x512xf32, #tpu.memory_space<vmem>>, vector<8x512xf32>,
    %c495_i32_81 = arith.constant 495 : i32
    %136 = tpu.dynamic_rotate %106 by %c495_i32_81 dim 1 : vector<8x512xf32>, i32 -> vector<8x512xf32>
    %137 = vector.broadcast %10 : vector<1x512xf32> to vector<8x512xf32>
    %138 = arith.mulf %136, %137 : vector<8x512xf32>
    %c144 = arith.constant 144 : index
    %c0_82 = arith.constant 0 : index
    %139 = vector.load %arg13[%c144, %c0_82] : memref<296x512xf32, #tpu.memory_space<vmem>>, vector<8x512xf32>
    tpu.vector_store %arg13[%c144, %c0_82], %138 {strides = array<i32>} : memref<296x512xf32, #tpu.memory_space<vmem>>, vector<8x512xf32>,
    %c0_83 = arith.constant 0 : index
    %c0_84 = arith.constant 0 : index
    %140 = vector.load %arg4[%c0_83, %c0_84] : memref<16x152xf32, #tpu.memory_space<vmem>>, vector<16x152xf32>
    %c0_85 = arith.constant 0 : index
    %c0_86 = arith.constant 0 : index
    %141 = vector.load %arg13[%c0_85, %c0_86] : memref<296x512xf32, #tpu.memory_space<vmem>>, vector<152x512xf32>
    %cst_87 = arith.constant dense<0.000000e+00> : vector<16x512xf32>
    %142 = tpu.matmul %140, %141, %cst_87 {dimension_numbers = #tpu.dot_dimension_numbers<[1], [0], [0], [1], [0, 0, 1, 1], [], []>} : vector<16x152xf32>, vector<152x512xf32>, vector<16x512xf32> -> vector<16x512xf32>
    %143 = vector.extract_strided_slice %142 {offsets = [0, 0], sizes = [8, 512], strides = [1, 1]} : vector<16x512xf32> to vector<8x512xf32>
    %144 = vector.extract_strided_slice %142 {offsets = [8, 0], sizes = [8, 512], strides = [1, 1]} : vector<16x512xf32> to vector<8x512xf32>
    %c2_88 = arith.constant 2 : index
    %c0_89 = arith.constant 0 : index
    %c0_90 = arith.constant 0 : index
    %145 = vector.load %arg12[%c2_88, %c0_89, %c0_90] : memref<4x8x512xf32, #tpu.memory_space<vmem>>, vector<1x8x512xf32>
    %146 = vector.shape_cast %145 : vector<1x8x512xf32> to vector<8x512xf32>
    %147 = vector.shape_cast %143 : vector<8x512xf32> to vector<1x8x512xf32>
    tpu.vector_store %arg12[%c2_88, %c0_89, %c0_90], %147 {strides = array<i32>} : memref<4x8x512xf32, #tpu.memory_space<vmem>>, vector<1x8x512xf32>,
    %c3_91 = arith.constant 3 : index
    %c0_92 = arith.constant 0 : index
    %c0_93 = arith.constant 0 : index
    %148 = vector.load %arg12[%c3_91, %c0_92, %c0_93] : memref<4x8x512xf32, #tpu.memory_space<vmem>>, vector<1x8x512xf32>
    %149 = vector.shape_cast %148 : vector<1x8x512xf32> to vector<8x512xf32>
    %150 = vector.shape_cast %144 : vector<8x512xf32> to vector<1x8x512xf32>
    tpu.vector_store %arg12[%c3_91, %c0_92, %c0_93], %150 {strides = array<i32>} : memref<4x8x512xf32, #tpu.memory_space<vmem>>, vector<1x8x512xf32>,
    %c2_94 = arith.constant 2 : index
    %c0_95 = arith.constant 0 : index
    %c0_96 = arith.constant 0 : index
    %151 = vector.load %arg12[%c2_94, %c0_95, %c0_96] : memref<4x8x512xf32, #tpu.memory_space<vmem>>, vector<1x8x512xf32>
    %152 = vector.shape_cast %151 : vector<1x8x512xf32> to vector<8x512xf32>
    %c3_97 = arith.constant 3 : index
    %c0_98 = arith.constant 0 : index
    %c0_99 = arith.constant 0 : index
    %153 = vector.load %arg12[%c3_97, %c0_98, %c0_99] : memref<4x8x512xf32, #tpu.memory_space<vmem>>, vector<1x8x512xf32>
    %154 = vector.shape_cast %153 : vector<1x8x512xf32> to vector<8x512xf32>
    %155 = arith.addf %152, %154 : vector<8x512xf32>
    %cst_100 = arith.constant 5.000000e-01 : f32
    %156 = vector.broadcast %cst_100 : f32 to vector<8x512xf32>
    %157 = arith.mulf %155, %156 : vector<8x512xf32>
    %c2_101 = arith.constant 2 : index
    %c0_102 = arith.constant 0 : index
    %c0_103 = arith.constant 0 : index
    %158 = vector.load %arg12[%c2_101, %c0_102, %c0_103] : memref<4x8x512xf32, #tpu.memory_space<vmem>>, vector<1x8x512xf32>
    %159 = vector.shape_cast %158 : vector<1x8x512xf32> to vector<8x512xf32>
    %160 = vector.shape_cast %157 : vector<8x512xf32> to vector<1x8x512xf32>
    tpu.vector_store %arg12[%c2_101, %c0_102, %c0_103], %160 {strides = array<i32>} : memref<4x8x512xf32, #tpu.memory_space<vmem>>, vector<1x8x512xf32>,
    %c3_104 = arith.constant 3 : index
    %c0_105 = arith.constant 0 : index
    %c0_106 = arith.constant 0 : index
    %161 = vector.load %arg12[%c3_104, %c0_105, %c0_106] : memref<4x8x512xf32, #tpu.memory_space<vmem>>, vector<1x8x512xf32>
    %162 = vector.shape_cast %161 : vector<1x8x512xf32> to vector<8x512xf32>
    %163 = vector.shape_cast %157 : vector<8x512xf32> to vector<1x8x512xf32>
    tpu.vector_store %arg12[%c3_104, %c0_105, %c0_106], %163 {strides = array<i32>} : memref<4x8x512xf32, #tpu.memory_space<vmem>>, vector<1x8x512xf32>,
    %c3_107 = arith.constant 3 : index
    %c0_108 = arith.constant 0 : index
    %c0_109 = arith.constant 0 : index
    %164 = vector.load %arg12[%c3_107, %c0_108, %c0_109] : memref<4x8x512xf32, #tpu.memory_space<vmem>>, vector<1x8x512xf32>
    %165 = vector.shape_cast %164 : vector<1x8x512xf32> to vector<8x512xf32>
    %c17_i32_110 = arith.constant 17 : i32
    %166 = tpu.dynamic_rotate %165 by %c17_i32_110 dim 1 : vector<8x512xf32>, i32 -> vector<8x512xf32>
    %167 = vector.broadcast %3 : vector<1x512xf32> to vector<8x512xf32>
    %168 = arith.mulf %166, %167 : vector<8x512xf32>
    %c8_111 = arith.constant 8 : index
    %c0_112 = arith.constant 0 : index
    %169 = vector.load %arg13[%c8_111, %c0_112] : memref<296x512xf32, #tpu.memory_space<vmem>>, vector<8x512xf32>
    tpu.vector_store %arg13[%c8_111, %c0_112], %168 {strides = array<i32>} : memref<296x512xf32, #tpu.memory_space<vmem>>, vector<8x512xf32>,
    %c16_i32_113 = arith.constant 16 : i32
    %170 = tpu.dynamic_rotate %165 by %c16_i32_113 dim 1 : vector<8x512xf32>, i32 -> vector<8x512xf32>
    %171 = vector.broadcast %4 : vector<1x512xf32> to vector<8x512xf32>
    %172 = arith.mulf %170, %171 : vector<8x512xf32>
    %c16_114 = arith.constant 16 : index
    %c0_115 = arith.constant 0 : index
    %173 = vector.load %arg13[%c16_114, %c0_115] : memref<296x512xf32, #tpu.memory_space<vmem>>, vector<8x512xf32>
    tpu.vector_store %arg13[%c16_114, %c0_115], %172 {strides = array<i32>} : memref<296x512xf32, #tpu.memory_space<vmem>>, vector<8x512xf32>,
    %c15_i32_116 = arith.constant 15 : i32
    %174 = tpu.dynamic_rotate %165 by %c15_i32_116 dim 1 : vector<8x512xf32>, i32 -> vector<8x512xf32>
    %175 = vector.broadcast %5 : vector<1x512xf32> to vector<8x512xf32>
    %176 = arith.mulf %174, %175 : vector<8x512xf32>
    %c24_117 = arith.constant 24 : index
    %c0_118 = arith.constant 0 : index
    %177 = vector.load %arg13[%c24_117, %c0_118] : memref<296x512xf32, #tpu.memory_space<vmem>>, vector<8x512xf32>
    tpu.vector_store %arg13[%c24_117, %c0_118], %176 {strides = array<i32>} : memref<296x512xf32, #tpu.memory_space<vmem>>, vector<8x512xf32>,
    %c1_i32_119 = arith.constant 1 : i32
    %178 = tpu.dynamic_rotate %165 by %c1_i32_119 dim 1 : vector<8x512xf32>, i32 -> vector<8x512xf32>
    %179 = vector.broadcast %6 : vector<1x512xf32> to vector<8x512xf32>
    %180 = arith.mulf %178, %179 : vector<8x512xf32>
    %c32_120 = arith.constant 32 : index
    %c0_121 = arith.constant 0 : index
    %181 = vector.load %arg13[%c32_120, %c0_121] : memref<296x512xf32, #tpu.memory_space<vmem>>, vector<8x512xf32>
    tpu.vector_store %arg13[%c32_120, %c0_121], %180 {strides = array<i32>} : memref<296x512xf32, #tpu.memory_space<vmem>>, vector<8x512xf32>,
    %c40_122 = arith.constant 40 : index
    %c0_123 = arith.constant 0 : index
    %182 = vector.load %arg13[%c40_122, %c0_123] : memref<296x512xf32, #tpu.memory_space<vmem>>, vector<8x512xf32>
    tpu.vector_store %arg13[%c40_122, %c0_123], %165 {strides = array<i32>} : memref<296x512xf32, #tpu.memory_space<vmem>>, vector<8x512xf32>,
    %c511_i32_124 = arith.constant 511 : i32
    %183 = tpu.dynamic_rotate %165 by %c511_i32_124 dim 1 : vector<8x512xf32>, i32 -> vector<8x512xf32>
    %184 = vector.broadcast %7 : vector<1x512xf32> to vector<8x512xf32>
    %185 = arith.mulf %183, %184 : vector<8x512xf32>
    %c48_125 = arith.constant 48 : index
    %c0_126 = arith.constant 0 : index
    %186 = vector.load %arg13[%c48_125, %c0_126] : memref<296x512xf32, #tpu.memory_space<vmem>>, vector<8x512xf32>
    tpu.vector_store %arg13[%c48_125, %c0_126], %185 {strides = array<i32>} : memref<296x512xf32, #tpu.memory_space<vmem>>, vector<8x512xf32>,
    %c497_i32_127 = arith.constant 497 : i32
    %187 = tpu.dynamic_rotate %165 by %c497_i32_127 dim 1 : vector<8x512xf32>, i32 -> vector<8x512xf32>
    %188 = vector.broadcast %8 : vector<1x512xf32> to vector<8x512xf32>
    %189 = arith.mulf %187, %188 : vector<8x512xf32>
    %c56_128 = arith.constant 56 : index
    %c0_129 = arith.constant 0 : index
    %190 = vector.load %arg13[%c56_128, %c0_129] : memref<296x512xf32, #tpu.memory_space<vmem>>, vector<8x512xf32>
    tpu.vector_store %arg13[%c56_128, %c0_129], %189 {strides = array<i32>} : memref<296x512xf32, #tpu.memory_space<vmem>>, vector<8x512xf32>,
    %c496_i32_130 = arith.constant 496 : i32
    %191 = tpu.dynamic_rotate %165 by %c496_i32_130 dim 1 : vector<8x512xf32>, i32 -> vector<8x512xf32>
    %192 = vector.broadcast %9 : vector<1x512xf32> to vector<8x512xf32>
    %193 = arith.mulf %191, %192 : vector<8x512xf32>
    %c64_131 = arith.constant 64 : index
    %c0_132 = arith.constant 0 : index
    %194 = vector.load %arg13[%c64_131, %c0_132] : memref<296x512xf32, #tpu.memory_space<vmem>>, vector<8x512xf32>
    tpu.vector_store %arg13[%c64_131, %c0_132], %193 {strides = array<i32>} : memref<296x512xf32, #tpu.memory_space<vmem>>, vector<8x512xf32>,
    %c495_i32_133 = arith.constant 495 : i32
    %195 = tpu.dynamic_rotate %165 by %c495_i32_133 dim 1 : vector<8x512xf32>, i32 -> vector<8x512xf32>
    %196 = vector.broadcast %10 : vector<1x512xf32> to vector<8x512xf32>
    %197 = arith.mulf %195, %196 : vector<8x512xf32>
    %c72_134 = arith.constant 72 : index
    %c0_135 = arith.constant 0 : index
    %198 = vector.load %arg13[%c72_134, %c0_135] : memref<296x512xf32, #tpu.memory_space<vmem>>, vector<8x512xf32>
    tpu.vector_store %arg13[%c72_134, %c0_135], %197 {strides = array<i32>} : memref<296x512xf32, #tpu.memory_space<vmem>>, vector<8x512xf32>,
    %c0_136 = arith.constant 0 : index
    %c0_137 = arith.constant 0 : index
    %199 = vector.load %arg5[%c0_136, %c0_137] : memref<8x80xf32, #tpu.memory_space<vmem>>, vector<8x80xf32>
    %c0_138 = arith.constant 0 : index
    %c0_139 = arith.constant 0 : index
    %200 = vector.load %arg13[%c0_138, %c0_139] : memref<296x512xf32, #tpu.memory_space<vmem>>, vector<80x512xf32>
    %cst_140 = arith.constant dense<0.000000e+00> : vector<8x512xf32>
    %201 = tpu.matmul %199, %200, %cst_140 {dimension_numbers = #tpu.dot_dimension_numbers<[1], [0], [0], [1], [0, 0, 1, 1], [], []>} : vector<8x80xf32>, vector<80x512xf32>, vector<8x512xf32> -> vector<8x512xf32>
    %c3_141 = arith.constant 3 : index
    %c0_142 = arith.constant 0 : index
    %c0_143 = arith.constant 0 : index
    %202 = vector.load %arg12[%c3_141, %c0_142, %c0_143] : memref<4x8x512xf32, #tpu.memory_space<vmem>>, vector<1x8x512xf32>
    %203 = vector.shape_cast %202 : vector<1x8x512xf32> to vector<8x512xf32>
    %204 = vector.shape_cast %201 : vector<8x512xf32> to vector<1x8x512xf32>
    tpu.vector_store %arg12[%c3_141, %c0_142, %c0_143], %204 {strides = array<i32>} : memref<4x8x512xf32, #tpu.memory_space<vmem>>, vector<1x8x512xf32>,
    %c1_144 = arith.constant 1 : index
    %c0_145 = arith.constant 0 : index
    %c0_146 = arith.constant 0 : index
    %205 = vector.load %arg12[%c1_144, %c0_145, %c0_146] : memref<4x8x512xf32, #tpu.memory_space<vmem>>, vector<1x8x512xf32>
    %206 = vector.shape_cast %205 : vector<1x8x512xf32> to vector<8x512xf32>
    %c17_i32_147 = arith.constant 17 : i32
    %207 = tpu.dynamic_rotate %206 by %c17_i32_147 dim 1 : vector<8x512xf32>, i32 -> vector<8x512xf32>
    %208 = vector.broadcast %3 : vector<1x512xf32> to vector<8x512xf32>
    %209 = arith.mulf %207, %208 : vector<8x512xf32>
    %c8_148 = arith.constant 8 : index
    %c0_149 = arith.constant 0 : index
    %210 = vector.load %arg13[%c8_148, %c0_149] : memref<296x512xf32, #tpu.memory_space<vmem>>, vector<8x512xf32>
    tpu.vector_store %arg13[%c8_148, %c0_149], %209 {strides = array<i32>} : memref<296x512xf32, #tpu.memory_space<vmem>>, vector<8x512xf32>,
    %c16_i32_150 = arith.constant 16 : i32
    %211 = tpu.dynamic_rotate %206 by %c16_i32_150 dim 1 : vector<8x512xf32>, i32 -> vector<8x512xf32>
    %212 = vector.broadcast %4 : vector<1x512xf32> to vector<8x512xf32>
    %213 = arith.mulf %211, %212 : vector<8x512xf32>
    %c16_151 = arith.constant 16 : index
    %c0_152 = arith.constant 0 : index
    %214 = vector.load %arg13[%c16_151, %c0_152] : memref<296x512xf32, #tpu.memory_space<vmem>>, vector<8x512xf32>
    tpu.vector_store %arg13[%c16_151, %c0_152], %213 {strides = array<i32>} : memref<296x512xf32, #tpu.memory_space<vmem>>, vector<8x512xf32>,
    %c15_i32_153 = arith.constant 15 : i32
    %215 = tpu.dynamic_rotate %206 by %c15_i32_153 dim 1 : vector<8x512xf32>, i32 -> vector<8x512xf32>
    %216 = vector.broadcast %5 : vector<1x512xf32> to vector<8x512xf32>
    %217 = arith.mulf %215, %216 : vector<8x512xf32>
    %c24_154 = arith.constant 24 : index
    %c0_155 = arith.constant 0 : index
    %218 = vector.load %arg13[%c24_154, %c0_155] : memref<296x512xf32, #tpu.memory_space<vmem>>, vector<8x512xf32>
    tpu.vector_store %arg13[%c24_154, %c0_155], %217 {strides = array<i32>} : memref<296x512xf32, #tpu.memory_space<vmem>>, vector<8x512xf32>,
    %c1_i32_156 = arith.constant 1 : i32
    %219 = tpu.dynamic_rotate %206 by %c1_i32_156 dim 1 : vector<8x512xf32>, i32 -> vector<8x512xf32>
    %220 = vector.broadcast %6 : vector<1x512xf32> to vector<8x512xf32>
    %221 = arith.mulf %219, %220 : vector<8x512xf32>
    %c32_157 = arith.constant 32 : index
    %c0_158 = arith.constant 0 : index
    %222 = vector.load %arg13[%c32_157, %c0_158] : memref<296x512xf32, #tpu.memory_space<vmem>>, vector<8x512xf32>
    tpu.vector_store %arg13[%c32_157, %c0_158], %221 {strides = array<i32>} : memref<296x512xf32, #tpu.memory_space<vmem>>, vector<8x512xf32>,
    %c40_159 = arith.constant 40 : index
    %c0_160 = arith.constant 0 : index
    %223 = vector.load %arg13[%c40_159, %c0_160] : memref<296x512xf32, #tpu.memory_space<vmem>>, vector<8x512xf32>
    tpu.vector_store %arg13[%c40_159, %c0_160], %206 {strides = array<i32>} : memref<296x512xf32, #tpu.memory_space<vmem>>, vector<8x512xf32>,
    %c511_i32_161 = arith.constant 511 : i32
    %224 = tpu.dynamic_rotate %206 by %c511_i32_161 dim 1 : vector<8x512xf32>, i32 -> vector<8x512xf32>
    %225 = vector.broadcast %7 : vector<1x512xf32> to vector<8x512xf32>
    %226 = arith.mulf %224, %225 : vector<8x512xf32>
    %c48_162 = arith.constant 48 : index
    %c0_163 = arith.constant 0 : index
    %227 = vector.load %arg13[%c48_162, %c0_163] : memref<296x512xf32, #tpu.memory_space<vmem>>, vector<8x512xf32>
    tpu.vector_store %arg13[%c48_162, %c0_163], %226 {strides = array<i32>} : memref<296x512xf32, #tpu.memory_space<vmem>>, vector<8x512xf32>,
    %c497_i32_164 = arith.constant 497 : i32
    %228 = tpu.dynamic_rotate %206 by %c497_i32_164 dim 1 : vector<8x512xf32>, i32 -> vector<8x512xf32>
    %229 = vector.broadcast %8 : vector<1x512xf32> to vector<8x512xf32>
    %230 = arith.mulf %228, %229 : vector<8x512xf32>
    %c56_165 = arith.constant 56 : index
    %c0_166 = arith.constant 0 : index
    %231 = vector.load %arg13[%c56_165, %c0_166] : memref<296x512xf32, #tpu.memory_space<vmem>>, vector<8x512xf32>
    tpu.vector_store %arg13[%c56_165, %c0_166], %230 {strides = array<i32>} : memref<296x512xf32, #tpu.memory_space<vmem>>, vector<8x512xf32>,
    %c496_i32_167 = arith.constant 496 : i32
    %232 = tpu.dynamic_rotate %206 by %c496_i32_167 dim 1 : vector<8x512xf32>, i32 -> vector<8x512xf32>
    %233 = vector.broadcast %9 : vector<1x512xf32> to vector<8x512xf32>
    %234 = arith.mulf %232, %233 : vector<8x512xf32>
    %c64_168 = arith.constant 64 : index
    %c0_169 = arith.constant 0 : index
    %235 = vector.load %arg13[%c64_168, %c0_169] : memref<296x512xf32, #tpu.memory_space<vmem>>, vector<8x512xf32>
    tpu.vector_store %arg13[%c64_168, %c0_169], %234 {strides = array<i32>} : memref<296x512xf32, #tpu.memory_space<vmem>>, vector<8x512xf32>,
    %c495_i32_170 = arith.constant 495 : i32
    %236 = tpu.dynamic_rotate %206 by %c495_i32_170 dim 1 : vector<8x512xf32>, i32 -> vector<8x512xf32>
    %237 = vector.broadcast %10 : vector<1x512xf32> to vector<8x512xf32>
    %238 = arith.mulf %236, %237 : vector<8x512xf32>
    %c72_171 = arith.constant 72 : index
    %c0_172 = arith.constant 0 : index
    %239 = vector.load %arg13[%c72_171, %c0_172] : memref<296x512xf32, #tpu.memory_space<vmem>>, vector<8x512xf32>
    tpu.vector_store %arg13[%c72_171, %c0_172], %238 {strides = array<i32>} : memref<296x512xf32, #tpu.memory_space<vmem>>, vector<8x512xf32>,
    %c2_173 = arith.constant 2 : index
    %c0_174 = arith.constant 0 : index
    %c0_175 = arith.constant 0 : index
    %240 = vector.load %arg12[%c2_173, %c0_174, %c0_175] : memref<4x8x512xf32, #tpu.memory_space<vmem>>, vector<1x8x512xf32>
    %241 = vector.shape_cast %240 : vector<1x8x512xf32> to vector<8x512xf32>
    %c17_i32_176 = arith.constant 17 : i32
    %242 = tpu.dynamic_rotate %241 by %c17_i32_176 dim 1 : vector<8x512xf32>, i32 -> vector<8x512xf32>
    %243 = vector.broadcast %3 : vector<1x512xf32> to vector<8x512xf32>
    %244 = arith.mulf %242, %243 : vector<8x512xf32>
    %c80_177 = arith.constant 80 : index
    %c0_178 = arith.constant 0 : index
    %245 = vector.load %arg13[%c80_177, %c0_178] : memref<296x512xf32, #tpu.memory_space<vmem>>, vector<8x512xf32>
    tpu.vector_store %arg13[%c80_177, %c0_178], %244 {strides = array<i32>} : memref<296x512xf32, #tpu.memory_space<vmem>>, vector<8x512xf32>,
    %c16_i32_179 = arith.constant 16 : i32
    %246 = tpu.dynamic_rotate %241 by %c16_i32_179 dim 1 : vector<8x512xf32>, i32 -> vector<8x512xf32>
    %247 = vector.broadcast %4 : vector<1x512xf32> to vector<8x512xf32>
    %248 = arith.mulf %246, %247 : vector<8x512xf32>
    %c88_180 = arith.constant 88 : index
    %c0_181 = arith.constant 0 : index
    %249 = vector.load %arg13[%c88_180, %c0_181] : memref<296x512xf32, #tpu.memory_space<vmem>>, vector<8x512xf32>
    tpu.vector_store %arg13[%c88_180, %c0_181], %248 {strides = array<i32>} : memref<296x512xf32, #tpu.memory_space<vmem>>, vector<8x512xf32>,
    %c15_i32_182 = arith.constant 15 : i32
    %250 = tpu.dynamic_rotate %241 by %c15_i32_182 dim 1 : vector<8x512xf32>, i32 -> vector<8x512xf32>
    %251 = vector.broadcast %5 : vector<1x512xf32> to vector<8x512xf32>
    %252 = arith.mulf %250, %251 : vector<8x512xf32>
    %c96_183 = arith.constant 96 : index
    %c0_184 = arith.constant 0 : index
    %253 = vector.load %arg13[%c96_183, %c0_184] : memref<296x512xf32, #tpu.memory_space<vmem>>, vector<8x512xf32>
    tpu.vector_store %arg13[%c96_183, %c0_184], %252 {strides = array<i32>} : memref<296x512xf32, #tpu.memory_space<vmem>>, vector<8x512xf32>,
    %c1_i32_185 = arith.constant 1 : i32
    %254 = tpu.dynamic_rotate %241 by %c1_i32_185 dim 1 : vector<8x512xf32>, i32 -> vector<8x512xf32>
    %255 = vector.broadcast %6 : vector<1x512xf32> to vector<8x512xf32>
    %256 = arith.mulf %254, %255 : vector<8x512xf32>
    %c104_186 = arith.constant 104 : index
    %c0_187 = arith.constant 0 : index
    %257 = vector.load %arg13[%c104_186, %c0_187] : memref<296x512xf32, #tpu.memory_space<vmem>>, vector<8x512xf32>
    tpu.vector_store %arg13[%c104_186, %c0_187], %256 {strides = array<i32>} : memref<296x512xf32, #tpu.memory_space<vmem>>, vector<8x512xf32>,
    %c112_188 = arith.constant 112 : index
    %c0_189 = arith.constant 0 : index
    %258 = vector.load %arg13[%c112_188, %c0_189] : memref<296x512xf32, #tpu.memory_space<vmem>>, vector<8x512xf32>
    tpu.vector_store %arg13[%c112_188, %c0_189], %241 {strides = array<i32>} : memref<296x512xf32, #tpu.memory_space<vmem>>, vector<8x512xf32>,
    %c511_i32_190 = arith.constant 511 : i32
    %259 = tpu.dynamic_rotate %241 by %c511_i32_190 dim 1 : vector<8x512xf32>, i32 -> vector<8x512xf32>
    %260 = vector.broadcast %7 : vector<1x512xf32> to vector<8x512xf32>
    %261 = arith.mulf %259, %260 : vector<8x512xf32>
    %c120_191 = arith.constant 120 : index
    %c0_192 = arith.constant 0 : index
    %262 = vector.load %arg13[%c120_191, %c0_192] : memref<296x512xf32, #tpu.memory_space<vmem>>, vector<8x512xf32>
    tpu.vector_store %arg13[%c120_191, %c0_192], %261 {strides = array<i32>} : memref<296x512xf32, #tpu.memory_space<vmem>>, vector<8x512xf32>,
    %c497_i32_193 = arith.constant 497 : i32
    %263 = tpu.dynamic_rotate %241 by %c497_i32_193 dim 1 : vector<8x512xf32>, i32 -> vector<8x512xf32>
    %264 = vector.broadcast %8 : vector<1x512xf32> to vector<8x512xf32>
    %265 = arith.mulf %263, %264 : vector<8x512xf32>
    %c128_194 = arith.constant 128 : index
    %c0_195 = arith.constant 0 : index
    %266 = vector.load %arg13[%c128_194, %c0_195] : memref<296x512xf32, #tpu.memory_space<vmem>>, vector<8x512xf32>
    tpu.vector_store %arg13[%c128_194, %c0_195], %265 {strides = array<i32>} : memref<296x512xf32, #tpu.memory_space<vmem>>, vector<8x512xf32>,
    %c496_i32_196 = arith.constant 496 : i32
    %267 = tpu.dynamic_rotate %241 by %c496_i32_196 dim 1 : vector<8x512xf32>, i32 -> vector<8x512xf32>
    %268 = vector.broadcast %9 : vector<1x512xf32> to vector<8x512xf32>
    %269 = arith.mulf %267, %268 : vector<8x512xf32>
    %c136_197 = arith.constant 136 : index
    %c0_198 = arith.constant 0 : index
    %270 = vector.load %arg13[%c136_197, %c0_198] : memref<296x512xf32, #tpu.memory_space<vmem>>, vector<8x512xf32>
    tpu.vector_store %arg13[%c136_197, %c0_198], %269 {strides = array<i32>} : memref<296x512xf32, #tpu.memory_space<vmem>>, vector<8x512xf32>,
    %c495_i32_199 = arith.constant 495 : i32
    %271 = tpu.dynamic_rotate %241 by %c495_i32_199 dim 1 : vector<8x512xf32>, i32 -> vector<8x512xf32>
    %272 = vector.broadcast %10 : vector<1x512xf32> to vector<8x512xf32>
    %273 = arith.mulf %271, %272 : vector<8x512xf32>
    %c144_200 = arith.constant 144 : index
    %c0_201 = arith.constant 0 : index
    %274 = vector.load %arg13[%c144_200, %c0_201] : memref<296x512xf32, #tpu.memory_space<vmem>>, vector<8x512xf32>
    tpu.vector_store %arg13[%c144_200, %c0_201], %273 {strides = array<i32>} : memref<296x512xf32, #tpu.memory_space<vmem>>, vector<8x512xf32>,
    %c3_202 = arith.constant 3 : index
    %c0_203 = arith.constant 0 : index
    %c0_204 = arith.constant 0 : index
    %275 = vector.load %arg12[%c3_202, %c0_203, %c0_204] : memref<4x8x512xf32, #tpu.memory_space<vmem>>, vector<1x8x512xf32>
    %276 = vector.shape_cast %275 : vector<1x8x512xf32> to vector<8x512xf32>
    %c17_i32_205 = arith.constant 17 : i32
    %277 = tpu.dynamic_rotate %276 by %c17_i32_205 dim 1 : vector<8x512xf32>, i32 -> vector<8x512xf32>
    %278 = vector.broadcast %3 : vector<1x512xf32> to vector<8x512xf32>
    %279 = arith.mulf %277, %278 : vector<8x512xf32>
    %c152 = arith.constant 152 : index
    %c0_206 = arith.constant 0 : index
    %280 = vector.load %arg13[%c152, %c0_206] : memref<296x512xf32, #tpu.memory_space<vmem>>, vector<8x512xf32>
    tpu.vector_store %arg13[%c152, %c0_206], %279 {strides = array<i32>} : memref<296x512xf32, #tpu.memory_space<vmem>>, vector<8x512xf32>,
    %c16_i32_207 = arith.constant 16 : i32
    %281 = tpu.dynamic_rotate %276 by %c16_i32_207 dim 1 : vector<8x512xf32>, i32 -> vector<8x512xf32>
    %282 = vector.broadcast %4 : vector<1x512xf32> to vector<8x512xf32>
    %283 = arith.mulf %281, %282 : vector<8x512xf32>
    %c160 = arith.constant 160 : index
    %c0_208 = arith.constant 0 : index
    %284 = vector.load %arg13[%c160, %c0_208] : memref<296x512xf32, #tpu.memory_space<vmem>>, vector<8x512xf32>
    tpu.vector_store %arg13[%c160, %c0_208], %283 {strides = array<i32>} : memref<296x512xf32, #tpu.memory_space<vmem>>, vector<8x512xf32>,
    %c15_i32_209 = arith.constant 15 : i32
    %285 = tpu.dynamic_rotate %276 by %c15_i32_209 dim 1 : vector<8x512xf32>, i32 -> vector<8x512xf32>
    %286 = vector.broadcast %5 : vector<1x512xf32> to vector<8x512xf32>
    %287 = arith.mulf %285, %286 : vector<8x512xf32>
    %c168 = arith.constant 168 : index
    %c0_210 = arith.constant 0 : index
    %288 = vector.load %arg13[%c168, %c0_210] : memref<296x512xf32, #tpu.memory_space<vmem>>, vector<8x512xf32>
    tpu.vector_store %arg13[%c168, %c0_210], %287 {strides = array<i32>} : memref<296x512xf32, #tpu.memory_space<vmem>>, vector<8x512xf32>,
    %c1_i32_211 = arith.constant 1 : i32
    %289 = tpu.dynamic_rotate %276 by %c1_i32_211 dim 1 : vector<8x512xf32>, i32 -> vector<8x512xf32>
    %290 = vector.broadcast %6 : vector<1x512xf32> to vector<8x512xf32>
    %291 = arith.mulf %289, %290 : vector<8x512xf32>
    %c176 = arith.constant 176 : index
    %c0_212 = arith.constant 0 : index
    %292 = vector.load %arg13[%c176, %c0_212] : memref<296x512xf32, #tpu.memory_space<vmem>>, vector<8x512xf32>
    tpu.vector_store %arg13[%c176, %c0_212], %291 {strides = array<i32>} : memref<296x512xf32, #tpu.memory_space<vmem>>, vector<8x512xf32>,
    %c184 = arith.constant 184 : index
    %c0_213 = arith.constant 0 : index
    %293 = vector.load %arg13[%c184, %c0_213] : memref<296x512xf32, #tpu.memory_space<vmem>>, vector<8x512xf32>
    tpu.vector_store %arg13[%c184, %c0_213], %276 {strides = array<i32>} : memref<296x512xf32, #tpu.memory_space<vmem>>, vector<8x512xf32>,
    %c511_i32_214 = arith.constant 511 : i32
    %294 = tpu.dynamic_rotate %276 by %c511_i32_214 dim 1 : vector<8x512xf32>, i32 -> vector<8x512xf32>
    %295 = vector.broadcast %7 : vector<1x512xf32> to vector<8x512xf32>
    %296 = arith.mulf %294, %295 : vector<8x512xf32>
    %c192 = arith.constant 192 : index
    %c0_215 = arith.constant 0 : index
    %297 = vector.load %arg13[%c192, %c0_215] : memref<296x512xf32, #tpu.memory_space<vmem>>, vector<8x512xf32>
    tpu.vector_store %arg13[%c192, %c0_215], %296 {strides = array<i32>} : memref<296x512xf32, #tpu.memory_space<vmem>>, vector<8x512xf32>,
    %c497_i32_216 = arith.constant 497 : i32
    %298 = tpu.dynamic_rotate %276 by %c497_i32_216 dim 1 : vector<8x512xf32>, i32 -> vector<8x512xf32>
    %299 = vector.broadcast %8 : vector<1x512xf32> to vector<8x512xf32>
    %300 = arith.mulf %298, %299 : vector<8x512xf32>
    %c200 = arith.constant 200 : index
    %c0_217 = arith.constant 0 : index
    %301 = vector.load %arg13[%c200, %c0_217] : memref<296x512xf32, #tpu.memory_space<vmem>>, vector<8x512xf32>
    tpu.vector_store %arg13[%c200, %c0_217], %300 {strides = array<i32>} : memref<296x512xf32, #tpu.memory_space<vmem>>, vector<8x512xf32>,
    %c496_i32_218 = arith.constant 496 : i32
    %302 = tpu.dynamic_rotate %276 by %c496_i32_218 dim 1 : vector<8x512xf32>, i32 -> vector<8x512xf32>
    %303 = vector.broadcast %9 : vector<1x512xf32> to vector<8x512xf32>
    %304 = arith.mulf %302, %303 : vector<8x512xf32>
    %c208 = arith.constant 208 : index
    %c0_219 = arith.constant 0 : index
    %305 = vector.load %arg13[%c208, %c0_219] : memref<296x512xf32, #tpu.memory_space<vmem>>, vector<8x512xf32>
    tpu.vector_store %arg13[%c208, %c0_219], %304 {strides = array<i32>} : memref<296x512xf32, #tpu.memory_space<vmem>>, vector<8x512xf32>,
    %c495_i32_220 = arith.constant 495 : i32
    %306 = tpu.dynamic_rotate %276 by %c495_i32_220 dim 1 : vector<8x512xf32>, i32 -> vector<8x512xf32>
    %307 = vector.broadcast %10 : vector<1x512xf32> to vector<8x512xf32>
    %308 = arith.mulf %306, %307 : vector<8x512xf32>
    %c216 = arith.constant 216 : index
    %c0_221 = arith.constant 0 : index
    %309 = vector.load %arg13[%c216, %c0_221] : memref<296x512xf32, #tpu.memory_space<vmem>>, vector<8x512xf32>
    tpu.vector_store %arg13[%c216, %c0_221], %308 {strides = array<i32>} : memref<296x512xf32, #tpu.memory_space<vmem>>, vector<8x512xf32>,
    %c0_222 = arith.constant 0 : index
    %c0_223 = arith.constant 0 : index
    %310 = vector.load %arg6[%c0_222, %c0_223] : memref<24x224xf32, #tpu.memory_space<vmem>>, vector<24x224xf32>
    %c0_224 = arith.constant 0 : index
    %c0_225 = arith.constant 0 : index
    %311 = vector.load %arg13[%c0_224, %c0_225] : memref<296x512xf32, #tpu.memory_space<vmem>>, vector<224x512xf32>
    %cst_226 = arith.constant dense<0.000000e+00> : vector<24x512xf32>
    %312 = tpu.matmul %310, %311, %cst_226 {dimension_numbers = #tpu.dot_dimension_numbers<[1], [0], [0], [1], [0, 0, 1, 1], [], []>} : vector<24x224xf32>, vector<224x512xf32>, vector<24x512xf32> -> vector<24x512xf32>
    %313 = vector.extract_strided_slice %312 {offsets = [0, 0], sizes = [8, 512], strides = [1, 1]} : vector<24x512xf32> to vector<8x512xf32>
    %314 = vector.extract_strided_slice %312 {offsets = [8, 0], sizes = [8, 512], strides = [1, 1]} : vector<24x512xf32> to vector<8x512xf32>
    %315 = vector.extract_strided_slice %312 {offsets = [16, 0], sizes = [8, 512], strides = [1, 1]} : vector<24x512xf32> to vector<8x512xf32>
    %c1_227 = arith.constant 1 : index
    %c0_228 = arith.constant 0 : index
    %c0_229 = arith.constant 0 : index
    %316 = vector.load %arg12[%c1_227, %c0_228, %c0_229] : memref<4x8x512xf32, #tpu.memory_space<vmem>>, vector<1x8x512xf32>
    %317 = vector.shape_cast %316 : vector<1x8x512xf32> to vector<8x512xf32>
    %318 = vector.shape_cast %313 : vector<8x512xf32> to vector<1x8x512xf32>
    tpu.vector_store %arg12[%c1_227, %c0_228, %c0_229], %318 {strides = array<i32>} : memref<4x8x512xf32, #tpu.memory_space<vmem>>, vector<1x8x512xf32>,
    %c2_230 = arith.constant 2 : index
    %c0_231 = arith.constant 0 : index
    %c0_232 = arith.constant 0 : index
    %319 = vector.load %arg12[%c2_230, %c0_231, %c0_232] : memref<4x8x512xf32, #tpu.memory_space<vmem>>, vector<1x8x512xf32>
    %320 = vector.shape_cast %319 : vector<1x8x512xf32> to vector<8x512xf32>
    %321 = vector.shape_cast %314 : vector<8x512xf32> to vector<1x8x512xf32>
    tpu.vector_store %arg12[%c2_230, %c0_231, %c0_232], %321 {strides = array<i32>} : memref<4x8x512xf32, #tpu.memory_space<vmem>>, vector<1x8x512xf32>,
    %c3_233 = arith.constant 3 : index
    %c0_234 = arith.constant 0 : index
    %c0_235 = arith.constant 0 : index
    %322 = vector.load %arg12[%c3_233, %c0_234, %c0_235] : memref<4x8x512xf32, #tpu.memory_space<vmem>>, vector<1x8x512xf32>
    %323 = vector.shape_cast %322 : vector<1x8x512xf32> to vector<8x512xf32>
    %324 = vector.shape_cast %315 : vector<8x512xf32> to vector<1x8x512xf32>
    tpu.vector_store %arg12[%c3_233, %c0_234, %c0_235], %324 {strides = array<i32>} : memref<4x8x512xf32, #tpu.memory_space<vmem>>, vector<1x8x512xf32>,
    %c1_236 = arith.constant 1 : index
    %c0_237 = arith.constant 0 : index
    %c0_238 = arith.constant 0 : index
    %325 = vector.load %arg12[%c1_236, %c0_237, %c0_238] : memref<4x8x512xf32, #tpu.memory_space<vmem>>, vector<1x8x512xf32>
    %326 = vector.shape_cast %325 : vector<1x8x512xf32> to vector<8x512xf32>
    %c2_239 = arith.constant 2 : index
    %c0_240 = arith.constant 0 : index
    %c0_241 = arith.constant 0 : index
    %327 = vector.load %arg12[%c2_239, %c0_240, %c0_241] : memref<4x8x512xf32, #tpu.memory_space<vmem>>, vector<1x8x512xf32>
    %328 = vector.shape_cast %327 : vector<1x8x512xf32> to vector<8x512xf32>
    %329 = arith.addf %326, %328 : vector<8x512xf32>
    %c3_242 = arith.constant 3 : index
    %c0_243 = arith.constant 0 : index
    %c0_244 = arith.constant 0 : index
    %330 = vector.load %arg12[%c3_242, %c0_243, %c0_244] : memref<4x8x512xf32, #tpu.memory_space<vmem>>, vector<1x8x512xf32>
    %331 = vector.shape_cast %330 : vector<1x8x512xf32> to vector<8x512xf32>
    %332 = arith.addf %329, %331 : vector<8x512xf32>
    %cst_245 = arith.constant 0.333333343 : f32
    %333 = vector.broadcast %cst_245 : f32 to vector<8x512xf32>
    %334 = arith.mulf %332, %333 : vector<8x512xf32>
    %c1_246 = arith.constant 1 : index
    %c0_247 = arith.constant 0 : index
    %c0_248 = arith.constant 0 : index
    %335 = vector.load %arg12[%c1_246, %c0_247, %c0_248] : memref<4x8x512xf32, #tpu.memory_space<vmem>>, vector<1x8x512xf32>
    %336 = vector.shape_cast %335 : vector<1x8x512xf32> to vector<8x512xf32>
    %337 = vector.shape_cast %334 : vector<8x512xf32> to vector<1x8x512xf32>
    tpu.vector_store %arg12[%c1_246, %c0_247, %c0_248], %337 {strides = array<i32>} : memref<4x8x512xf32, #tpu.memory_space<vmem>>, vector<1x8x512xf32>,
    %c2_249 = arith.constant 2 : index
    %c0_250 = arith.constant 0 : index
    %c0_251 = arith.constant 0 : index
    %338 = vector.load %arg12[%c2_249, %c0_250, %c0_251] : memref<4x8x512xf32, #tpu.memory_space<vmem>>, vector<1x8x512xf32>
    %339 = vector.shape_cast %338 : vector<1x8x512xf32> to vector<8x512xf32>
    %340 = vector.shape_cast %334 : vector<8x512xf32> to vector<1x8x512xf32>
    tpu.vector_store %arg12[%c2_249, %c0_250, %c0_251], %340 {strides = array<i32>} : memref<4x8x512xf32, #tpu.memory_space<vmem>>, vector<1x8x512xf32>,
    %c3_252 = arith.constant 3 : index
    %c0_253 = arith.constant 0 : index
    %c0_254 = arith.constant 0 : index
    %341 = vector.load %arg12[%c3_252, %c0_253, %c0_254] : memref<4x8x512xf32, #tpu.memory_space<vmem>>, vector<1x8x512xf32>
    %342 = vector.shape_cast %341 : vector<1x8x512xf32> to vector<8x512xf32>
    %343 = vector.shape_cast %334 : vector<8x512xf32> to vector<1x8x512xf32>
    tpu.vector_store %arg12[%c3_252, %c0_253, %c0_254], %343 {strides = array<i32>} : memref<4x8x512xf32, #tpu.memory_space<vmem>>, vector<1x8x512xf32>,
    %c3_255 = arith.constant 3 : index
    %c0_256 = arith.constant 0 : index
    %c0_257 = arith.constant 0 : index
    %344 = vector.load %arg12[%c3_255, %c0_256, %c0_257] : memref<4x8x512xf32, #tpu.memory_space<vmem>>, vector<1x8x512xf32>
    %345 = vector.shape_cast %344 : vector<1x8x512xf32> to vector<8x512xf32>
    %c17_i32_258 = arith.constant 17 : i32
    %346 = tpu.dynamic_rotate %345 by %c17_i32_258 dim 1 : vector<8x512xf32>, i32 -> vector<8x512xf32>
    %347 = vector.broadcast %3 : vector<1x512xf32> to vector<8x512xf32>
    %348 = arith.mulf %346, %347 : vector<8x512xf32>
    %c8_259 = arith.constant 8 : index
    %c0_260 = arith.constant 0 : index
    %349 = vector.load %arg13[%c8_259, %c0_260] : memref<296x512xf32, #tpu.memory_space<vmem>>, vector<8x512xf32>
    tpu.vector_store %arg13[%c8_259, %c0_260], %348 {strides = array<i32>} : memref<296x512xf32, #tpu.memory_space<vmem>>, vector<8x512xf32>,
    %c16_i32_261 = arith.constant 16 : i32
    %350 = tpu.dynamic_rotate %345 by %c16_i32_261 dim 1 : vector<8x512xf32>, i32 -> vector<8x512xf32>
    %351 = vector.broadcast %4 : vector<1x512xf32> to vector<8x512xf32>
    %352 = arith.mulf %350, %351 : vector<8x512xf32>
    %c16_262 = arith.constant 16 : index
    %c0_263 = arith.constant 0 : index
    %353 = vector.load %arg13[%c16_262, %c0_263] : memref<296x512xf32, #tpu.memory_space<vmem>>, vector<8x512xf32>
    tpu.vector_store %arg13[%c16_262, %c0_263], %352 {strides = array<i32>} : memref<296x512xf32, #tpu.memory_space<vmem>>, vector<8x512xf32>,
    %c15_i32_264 = arith.constant 15 : i32
    %354 = tpu.dynamic_rotate %345 by %c15_i32_264 dim 1 : vector<8x512xf32>, i32 -> vector<8x512xf32>
    %355 = vector.broadcast %5 : vector<1x512xf32> to vector<8x512xf32>
    %356 = arith.mulf %354, %355 : vector<8x512xf32>
    %c24_265 = arith.constant 24 : index
    %c0_266 = arith.constant 0 : index
    %357 = vector.load %arg13[%c24_265, %c0_266] : memref<296x512xf32, #tpu.memory_space<vmem>>, vector<8x512xf32>
    tpu.vector_store %arg13[%c24_265, %c0_266], %356 {strides = array<i32>} : memref<296x512xf32, #tpu.memory_space<vmem>>, vector<8x512xf32>,
    %c1_i32_267 = arith.constant 1 : i32
    %358 = tpu.dynamic_rotate %345 by %c1_i32_267 dim 1 : vector<8x512xf32>, i32 -> vector<8x512xf32>
    %359 = vector.broadcast %6 : vector<1x512xf32> to vector<8x512xf32>
    %360 = arith.mulf %358, %359 : vector<8x512xf32>
    %c32_268 = arith.constant 32 : index
    %c0_269 = arith.constant 0 : index
    %361 = vector.load %arg13[%c32_268, %c0_269] : memref<296x512xf32, #tpu.memory_space<vmem>>, vector<8x512xf32>
    tpu.vector_store %arg13[%c32_268, %c0_269], %360 {strides = array<i32>} : memref<296x512xf32, #tpu.memory_space<vmem>>, vector<8x512xf32>,
    %c40_270 = arith.constant 40 : index
    %c0_271 = arith.constant 0 : index
    %362 = vector.load %arg13[%c40_270, %c0_271] : memref<296x512xf32, #tpu.memory_space<vmem>>, vector<8x512xf32>
    tpu.vector_store %arg13[%c40_270, %c0_271], %345 {strides = array<i32>} : memref<296x512xf32, #tpu.memory_space<vmem>>, vector<8x512xf32>,
    %c511_i32_272 = arith.constant 511 : i32
    %363 = tpu.dynamic_rotate %345 by %c511_i32_272 dim 1 : vector<8x512xf32>, i32 -> vector<8x512xf32>
    %364 = vector.broadcast %7 : vector<1x512xf32> to vector<8x512xf32>
    %365 = arith.mulf %363, %364 : vector<8x512xf32>
    %c48_273 = arith.constant 48 : index
    %c0_274 = arith.constant 0 : index
    %366 = vector.load %arg13[%c48_273, %c0_274] : memref<296x512xf32, #tpu.memory_space<vmem>>, vector<8x512xf32>
    tpu.vector_store %arg13[%c48_273, %c0_274], %365 {strides = array<i32>} : memref<296x512xf32, #tpu.memory_space<vmem>>, vector<8x512xf32>,
    %c497_i32_275 = arith.constant 497 : i32
    %367 = tpu.dynamic_rotate %345 by %c497_i32_275 dim 1 : vector<8x512xf32>, i32 -> vector<8x512xf32>
    %368 = vector.broadcast %8 : vector<1x512xf32> to vector<8x512xf32>
    %369 = arith.mulf %367, %368 : vector<8x512xf32>
    %c56_276 = arith.constant 56 : index
    %c0_277 = arith.constant 0 : index
    %370 = vector.load %arg13[%c56_276, %c0_277] : memref<296x512xf32, #tpu.memory_space<vmem>>, vector<8x512xf32>
    tpu.vector_store %arg13[%c56_276, %c0_277], %369 {strides = array<i32>} : memref<296x512xf32, #tpu.memory_space<vmem>>, vector<8x512xf32>,
    %c496_i32_278 = arith.constant 496 : i32
    %371 = tpu.dynamic_rotate %345 by %c496_i32_278 dim 1 : vector<8x512xf32>, i32 -> vector<8x512xf32>
    %372 = vector.broadcast %9 : vector<1x512xf32> to vector<8x512xf32>
    %373 = arith.mulf %371, %372 : vector<8x512xf32>
    %c64_279 = arith.constant 64 : index
    %c0_280 = arith.constant 0 : index
    %374 = vector.load %arg13[%c64_279, %c0_280] : memref<296x512xf32, #tpu.memory_space<vmem>>, vector<8x512xf32>
    tpu.vector_store %arg13[%c64_279, %c0_280], %373 {strides = array<i32>} : memref<296x512xf32, #tpu.memory_space<vmem>>, vector<8x512xf32>,
    %c495_i32_281 = arith.constant 495 : i32
    %375 = tpu.dynamic_rotate %345 by %c495_i32_281 dim 1 : vector<8x512xf32>, i32 -> vector<8x512xf32>
    %376 = vector.broadcast %10 : vector<1x512xf32> to vector<8x512xf32>
    %377 = arith.mulf %375, %376 : vector<8x512xf32>
    %c72_282 = arith.constant 72 : index
    %c0_283 = arith.constant 0 : index
    %378 = vector.load %arg13[%c72_282, %c0_283] : memref<296x512xf32, #tpu.memory_space<vmem>>, vector<8x512xf32>
    tpu.vector_store %arg13[%c72_282, %c0_283], %377 {strides = array<i32>} : memref<296x512xf32, #tpu.memory_space<vmem>>, vector<8x512xf32>,
    %c0_284 = arith.constant 0 : index
    %c0_285 = arith.constant 0 : index
    %379 = vector.load %arg7[%c0_284, %c0_285] : memref<8x80xf32, #tpu.memory_space<vmem>>, vector<8x80xf32>
    %c0_286 = arith.constant 0 : index
    %c0_287 = arith.constant 0 : index
    %380 = vector.load %arg13[%c0_286, %c0_287] : memref<296x512xf32, #tpu.memory_space<vmem>>, vector<80x512xf32>
    %cst_288 = arith.constant dense<0.000000e+00> : vector<8x512xf32>
    %381 = tpu.matmul %379, %380, %cst_288 {dimension_numbers = #tpu.dot_dimension_numbers<[1], [0], [0], [1], [0, 0, 1, 1], [], []>} : vector<8x80xf32>, vector<80x512xf32>, vector<8x512xf32> -> vector<8x512xf32>
    %c3_289 = arith.constant 3 : index
    %c0_290 = arith.constant 0 : index
    %c0_291 = arith.constant 0 : index
    %382 = vector.load %arg12[%c3_289, %c0_290, %c0_291] : memref<4x8x512xf32, #tpu.memory_space<vmem>>, vector<1x8x512xf32>
    %383 = vector.shape_cast %382 : vector<1x8x512xf32> to vector<8x512xf32>
    %384 = vector.shape_cast %381 : vector<8x512xf32> to vector<1x8x512xf32>
    tpu.vector_store %arg12[%c3_289, %c0_290, %c0_291], %384 {strides = array<i32>} : memref<4x8x512xf32, #tpu.memory_space<vmem>>, vector<1x8x512xf32>,
    %c2_292 = arith.constant 2 : index
    %c0_293 = arith.constant 0 : index
    %c0_294 = arith.constant 0 : index
    %385 = vector.load %arg12[%c2_292, %c0_293, %c0_294] : memref<4x8x512xf32, #tpu.memory_space<vmem>>, vector<1x8x512xf32>
    %386 = vector.shape_cast %385 : vector<1x8x512xf32> to vector<8x512xf32>
    %c17_i32_295 = arith.constant 17 : i32
    %387 = tpu.dynamic_rotate %386 by %c17_i32_295 dim 1 : vector<8x512xf32>, i32 -> vector<8x512xf32>
    %388 = vector.broadcast %3 : vector<1x512xf32> to vector<8x512xf32>
    %389 = arith.mulf %387, %388 : vector<8x512xf32>
    %c8_296 = arith.constant 8 : index
    %c0_297 = arith.constant 0 : index
    %390 = vector.load %arg13[%c8_296, %c0_297] : memref<296x512xf32, #tpu.memory_space<vmem>>, vector<8x512xf32>
    tpu.vector_store %arg13[%c8_296, %c0_297], %389 {strides = array<i32>} : memref<296x512xf32, #tpu.memory_space<vmem>>, vector<8x512xf32>,
    %c16_i32_298 = arith.constant 16 : i32
    %391 = tpu.dynamic_rotate %386 by %c16_i32_298 dim 1 : vector<8x512xf32>, i32 -> vector<8x512xf32>
    %392 = vector.broadcast %4 : vector<1x512xf32> to vector<8x512xf32>
    %393 = arith.mulf %391, %392 : vector<8x512xf32>
    %c16_299 = arith.constant 16 : index
    %c0_300 = arith.constant 0 : index
    %394 = vector.load %arg13[%c16_299, %c0_300] : memref<296x512xf32, #tpu.memory_space<vmem>>, vector<8x512xf32>
    tpu.vector_store %arg13[%c16_299, %c0_300], %393 {strides = array<i32>} : memref<296x512xf32, #tpu.memory_space<vmem>>, vector<8x512xf32>,
    %c15_i32_301 = arith.constant 15 : i32
    %395 = tpu.dynamic_rotate %386 by %c15_i32_301 dim 1 : vector<8x512xf32>, i32 -> vector<8x512xf32>
    %396 = vector.broadcast %5 : vector<1x512xf32> to vector<8x512xf32>
    %397 = arith.mulf %395, %396 : vector<8x512xf32>
    %c24_302 = arith.constant 24 : index
    %c0_303 = arith.constant 0 : index
    %398 = vector.load %arg13[%c24_302, %c0_303] : memref<296x512xf32, #tpu.memory_space<vmem>>, vector<8x512xf32>
    tpu.vector_store %arg13[%c24_302, %c0_303], %397 {strides = array<i32>} : memref<296x512xf32, #tpu.memory_space<vmem>>, vector<8x512xf32>,
    %c1_i32_304 = arith.constant 1 : i32
    %399 = tpu.dynamic_rotate %386 by %c1_i32_304 dim 1 : vector<8x512xf32>, i32 -> vector<8x512xf32>
    %400 = vector.broadcast %6 : vector<1x512xf32> to vector<8x512xf32>
    %401 = arith.mulf %399, %400 : vector<8x512xf32>
    %c32_305 = arith.constant 32 : index
    %c0_306 = arith.constant 0 : index
    %402 = vector.load %arg13[%c32_305, %c0_306] : memref<296x512xf32, #tpu.memory_space<vmem>>, vector<8x512xf32>
    tpu.vector_store %arg13[%c32_305, %c0_306], %401 {strides = array<i32>} : memref<296x512xf32, #tpu.memory_space<vmem>>, vector<8x512xf32>,
    %c40_307 = arith.constant 40 : index
    %c0_308 = arith.constant 0 : index
    %403 = vector.load %arg13[%c40_307, %c0_308] : memref<296x512xf32, #tpu.memory_space<vmem>>, vector<8x512xf32>
    tpu.vector_store %arg13[%c40_307, %c0_308], %386 {strides = array<i32>} : memref<296x512xf32, #tpu.memory_space<vmem>>, vector<8x512xf32>,
    %c511_i32_309 = arith.constant 511 : i32
    %404 = tpu.dynamic_rotate %386 by %c511_i32_309 dim 1 : vector<8x512xf32>, i32 -> vector<8x512xf32>
    %405 = vector.broadcast %7 : vector<1x512xf32> to vector<8x512xf32>
    %406 = arith.mulf %404, %405 : vector<8x512xf32>
    %c48_310 = arith.constant 48 : index
    %c0_311 = arith.constant 0 : index
    %407 = vector.load %arg13[%c48_310, %c0_311] : memref<296x512xf32, #tpu.memory_space<vmem>>, vector<8x512xf32>
    tpu.vector_store %arg13[%c48_310, %c0_311], %406 {strides = array<i32>} : memref<296x512xf32, #tpu.memory_space<vmem>>, vector<8x512xf32>,
    %c497_i32_312 = arith.constant 497 : i32
    %408 = tpu.dynamic_rotate %386 by %c497_i32_312 dim 1 : vector<8x512xf32>, i32 -> vector<8x512xf32>
    %409 = vector.broadcast %8 : vector<1x512xf32> to vector<8x512xf32>
    %410 = arith.mulf %408, %409 : vector<8x512xf32>
    %c56_313 = arith.constant 56 : index
    %c0_314 = arith.constant 0 : index
    %411 = vector.load %arg13[%c56_313, %c0_314] : memref<296x512xf32, #tpu.memory_space<vmem>>, vector<8x512xf32>
    tpu.vector_store %arg13[%c56_313, %c0_314], %410 {strides = array<i32>} : memref<296x512xf32, #tpu.memory_space<vmem>>, vector<8x512xf32>,
    %c496_i32_315 = arith.constant 496 : i32
    %412 = tpu.dynamic_rotate %386 by %c496_i32_315 dim 1 : vector<8x512xf32>, i32 -> vector<8x512xf32>
    %413 = vector.broadcast %9 : vector<1x512xf32> to vector<8x512xf32>
    %414 = arith.mulf %412, %413 : vector<8x512xf32>
    %c64_316 = arith.constant 64 : index
    %c0_317 = arith.constant 0 : index
    %415 = vector.load %arg13[%c64_316, %c0_317] : memref<296x512xf32, #tpu.memory_space<vmem>>, vector<8x512xf32>
    tpu.vector_store %arg13[%c64_316, %c0_317], %414 {strides = array<i32>} : memref<296x512xf32, #tpu.memory_space<vmem>>, vector<8x512xf32>,
    %c495_i32_318 = arith.constant 495 : i32
    %416 = tpu.dynamic_rotate %386 by %c495_i32_318 dim 1 : vector<8x512xf32>, i32 -> vector<8x512xf32>
    %417 = vector.broadcast %10 : vector<1x512xf32> to vector<8x512xf32>
    %418 = arith.mulf %416, %417 : vector<8x512xf32>
    %c72_319 = arith.constant 72 : index
    %c0_320 = arith.constant 0 : index
    %419 = vector.load %arg13[%c72_319, %c0_320] : memref<296x512xf32, #tpu.memory_space<vmem>>, vector<8x512xf32>
    tpu.vector_store %arg13[%c72_319, %c0_320], %418 {strides = array<i32>} : memref<296x512xf32, #tpu.memory_space<vmem>>, vector<8x512xf32>,
    %c3_321 = arith.constant 3 : index
    %c0_322 = arith.constant 0 : index
    %c0_323 = arith.constant 0 : index
    %420 = vector.load %arg12[%c3_321, %c0_322, %c0_323] : memref<4x8x512xf32, #tpu.memory_space<vmem>>, vector<1x8x512xf32>
    %421 = vector.shape_cast %420 : vector<1x8x512xf32> to vector<8x512xf32>
    %c17_i32_324 = arith.constant 17 : i32
    %422 = tpu.dynamic_rotate %421 by %c17_i32_324 dim 1 : vector<8x512xf32>, i32 -> vector<8x512xf32>
    %423 = vector.broadcast %3 : vector<1x512xf32> to vector<8x512xf32>
    %424 = arith.mulf %422, %423 : vector<8x512xf32>
    %c80_325 = arith.constant 80 : index
    %c0_326 = arith.constant 0 : index
    %425 = vector.load %arg13[%c80_325, %c0_326] : memref<296x512xf32, #tpu.memory_space<vmem>>, vector<8x512xf32>
    tpu.vector_store %arg13[%c80_325, %c0_326], %424 {strides = array<i32>} : memref<296x512xf32, #tpu.memory_space<vmem>>, vector<8x512xf32>,
    %c16_i32_327 = arith.constant 16 : i32
    %426 = tpu.dynamic_rotate %421 by %c16_i32_327 dim 1 : vector<8x512xf32>, i32 -> vector<8x512xf32>
    %427 = vector.broadcast %4 : vector<1x512xf32> to vector<8x512xf32>
    %428 = arith.mulf %426, %427 : vector<8x512xf32>
    %c88_328 = arith.constant 88 : index
    %c0_329 = arith.constant 0 : index
    %429 = vector.load %arg13[%c88_328, %c0_329] : memref<296x512xf32, #tpu.memory_space<vmem>>, vector<8x512xf32>
    tpu.vector_store %arg13[%c88_328, %c0_329], %428 {strides = array<i32>} : memref<296x512xf32, #tpu.memory_space<vmem>>, vector<8x512xf32>,
    %c15_i32_330 = arith.constant 15 : i32
    %430 = tpu.dynamic_rotate %421 by %c15_i32_330 dim 1 : vector<8x512xf32>, i32 -> vector<8x512xf32>
    %431 = vector.broadcast %5 : vector<1x512xf32> to vector<8x512xf32>
    %432 = arith.mulf %430, %431 : vector<8x512xf32>
    %c96_331 = arith.constant 96 : index
    %c0_332 = arith.constant 0 : index
    %433 = vector.load %arg13[%c96_331, %c0_332] : memref<296x512xf32, #tpu.memory_space<vmem>>, vector<8x512xf32>
    tpu.vector_store %arg13[%c96_331, %c0_332], %432 {strides = array<i32>} : memref<296x512xf32, #tpu.memory_space<vmem>>, vector<8x512xf32>,
    %c1_i32_333 = arith.constant 1 : i32
    %434 = tpu.dynamic_rotate %421 by %c1_i32_333 dim 1 : vector<8x512xf32>, i32 -> vector<8x512xf32>
    %435 = vector.broadcast %6 : vector<1x512xf32> to vector<8x512xf32>
    %436 = arith.mulf %434, %435 : vector<8x512xf32>
    %c104_334 = arith.constant 104 : index
    %c0_335 = arith.constant 0 : index
    %437 = vector.load %arg13[%c104_334, %c0_335] : memref<296x512xf32, #tpu.memory_space<vmem>>, vector<8x512xf32>
    tpu.vector_store %arg13[%c104_334, %c0_335], %436 {strides = array<i32>} : memref<296x512xf32, #tpu.memory_space<vmem>>, vector<8x512xf32>,
    %c112_336 = arith.constant 112 : index
    %c0_337 = arith.constant 0 : index
    %438 = vector.load %arg13[%c112_336, %c0_337] : memref<296x512xf32, #tpu.memory_space<vmem>>, vector<8x512xf32>
    tpu.vector_store %arg13[%c112_336, %c0_337], %421 {strides = array<i32>} : memref<296x512xf32, #tpu.memory_space<vmem>>, vector<8x512xf32>,
    %c511_i32_338 = arith.constant 511 : i32
    %439 = tpu.dynamic_rotate %421 by %c511_i32_338 dim 1 : vector<8x512xf32>, i32 -> vector<8x512xf32>
    %440 = vector.broadcast %7 : vector<1x512xf32> to vector<8x512xf32>
    %441 = arith.mulf %439, %440 : vector<8x512xf32>
    %c120_339 = arith.constant 120 : index
    %c0_340 = arith.constant 0 : index
    %442 = vector.load %arg13[%c120_339, %c0_340] : memref<296x512xf32, #tpu.memory_space<vmem>>, vector<8x512xf32>
    tpu.vector_store %arg13[%c120_339, %c0_340], %441 {strides = array<i32>} : memref<296x512xf32, #tpu.memory_space<vmem>>, vector<8x512xf32>,
    %c497_i32_341 = arith.constant 497 : i32
    %443 = tpu.dynamic_rotate %421 by %c497_i32_341 dim 1 : vector<8x512xf32>, i32 -> vector<8x512xf32>
    %444 = vector.broadcast %8 : vector<1x512xf32> to vector<8x512xf32>
    %445 = arith.mulf %443, %444 : vector<8x512xf32>
    %c128_342 = arith.constant 128 : index
    %c0_343 = arith.constant 0 : index
    %446 = vector.load %arg13[%c128_342, %c0_343] : memref<296x512xf32, #tpu.memory_space<vmem>>, vector<8x512xf32>
    tpu.vector_store %arg13[%c128_342, %c0_343], %445 {strides = array<i32>} : memref<296x512xf32, #tpu.memory_space<vmem>>, vector<8x512xf32>,
    %c496_i32_344 = arith.constant 496 : i32
    %447 = tpu.dynamic_rotate %421 by %c496_i32_344 dim 1 : vector<8x512xf32>, i32 -> vector<8x512xf32>
    %448 = vector.broadcast %9 : vector<1x512xf32> to vector<8x512xf32>
    %449 = arith.mulf %447, %448 : vector<8x512xf32>
    %c136_345 = arith.constant 136 : index
    %c0_346 = arith.constant 0 : index
    %450 = vector.load %arg13[%c136_345, %c0_346] : memref<296x512xf32, #tpu.memory_space<vmem>>, vector<8x512xf32>
    tpu.vector_store %arg13[%c136_345, %c0_346], %449 {strides = array<i32>} : memref<296x512xf32, #tpu.memory_space<vmem>>, vector<8x512xf32>,
    %c495_i32_347 = arith.constant 495 : i32
    %451 = tpu.dynamic_rotate %421 by %c495_i32_347 dim 1 : vector<8x512xf32>, i32 -> vector<8x512xf32>
    %452 = vector.broadcast %10 : vector<1x512xf32> to vector<8x512xf32>
    %453 = arith.mulf %451, %452 : vector<8x512xf32>
    %c144_348 = arith.constant 144 : index
    %c0_349 = arith.constant 0 : index
    %454 = vector.load %arg13[%c144_348, %c0_349] : memref<296x512xf32, #tpu.memory_space<vmem>>, vector<8x512xf32>
    tpu.vector_store %arg13[%c144_348, %c0_349], %453 {strides = array<i32>} : memref<296x512xf32, #tpu.memory_space<vmem>>, vector<8x512xf32>,
    %c0_350 = arith.constant 0 : index
    %c0_351 = arith.constant 0 : index
    %455 = vector.load %arg8[%c0_350, %c0_351] : memref<16x152xf32, #tpu.memory_space<vmem>>, vector<16x152xf32>
    %c0_352 = arith.constant 0 : index
    %c0_353 = arith.constant 0 : index
    %456 = vector.load %arg13[%c0_352, %c0_353] : memref<296x512xf32, #tpu.memory_space<vmem>>, vector<152x512xf32>
    %cst_354 = arith.constant dense<0.000000e+00> : vector<16x512xf32>
    %457 = tpu.matmul %455, %456, %cst_354 {dimension_numbers = #tpu.dot_dimension_numbers<[1], [0], [0], [1], [0, 0, 1, 1], [], []>} : vector<16x152xf32>, vector<152x512xf32>, vector<16x512xf32> -> vector<16x512xf32>
    %458 = vector.extract_strided_slice %457 {offsets = [0, 0], sizes = [8, 512], strides = [1, 1]} : vector<16x512xf32> to vector<8x512xf32>
    %459 = vector.extract_strided_slice %457 {offsets = [8, 0], sizes = [8, 512], strides = [1, 1]} : vector<16x512xf32> to vector<8x512xf32>
    %c2_355 = arith.constant 2 : index
    %c0_356 = arith.constant 0 : index
    %c0_357 = arith.constant 0 : index
    %460 = vector.load %arg12[%c2_355, %c0_356, %c0_357] : memref<4x8x512xf32, #tpu.memory_space<vmem>>, vector<1x8x512xf32>
    %461 = vector.shape_cast %460 : vector<1x8x512xf32> to vector<8x512xf32>
    %462 = vector.shape_cast %458 : vector<8x512xf32> to vector<1x8x512xf32>
    tpu.vector_store %arg12[%c2_355, %c0_356, %c0_357], %462 {strides = array<i32>} : memref<4x8x512xf32, #tpu.memory_space<vmem>>, vector<1x8x512xf32>,
    %c3_358 = arith.constant 3 : index
    %c0_359 = arith.constant 0 : index
    %c0_360 = arith.constant 0 : index
    %463 = vector.load %arg12[%c3_358, %c0_359, %c0_360] : memref<4x8x512xf32, #tpu.memory_space<vmem>>, vector<1x8x512xf32>
    %464 = vector.shape_cast %463 : vector<1x8x512xf32> to vector<8x512xf32>
    %465 = vector.shape_cast %459 : vector<8x512xf32> to vector<1x8x512xf32>
    tpu.vector_store %arg12[%c3_358, %c0_359, %c0_360], %465 {strides = array<i32>} : memref<4x8x512xf32, #tpu.memory_space<vmem>>, vector<1x8x512xf32>,
    %c2_361 = arith.constant 2 : index
    %c0_362 = arith.constant 0 : index
    %c0_363 = arith.constant 0 : index
    %466 = vector.load %arg12[%c2_361, %c0_362, %c0_363] : memref<4x8x512xf32, #tpu.memory_space<vmem>>, vector<1x8x512xf32>
    %467 = vector.shape_cast %466 : vector<1x8x512xf32> to vector<8x512xf32>
    %c3_364 = arith.constant 3 : index
    %c0_365 = arith.constant 0 : index
    %c0_366 = arith.constant 0 : index
    %468 = vector.load %arg12[%c3_364, %c0_365, %c0_366] : memref<4x8x512xf32, #tpu.memory_space<vmem>>, vector<1x8x512xf32>
    %469 = vector.shape_cast %468 : vector<1x8x512xf32> to vector<8x512xf32>
    %470 = arith.addf %467, %469 : vector<8x512xf32>
    %cst_367 = arith.constant 5.000000e-01 : f32
    %471 = vector.broadcast %cst_367 : f32 to vector<8x512xf32>
    %472 = arith.mulf %470, %471 : vector<8x512xf32>
    %c2_368 = arith.constant 2 : index
    %c0_369 = arith.constant 0 : index
    %c0_370 = arith.constant 0 : index
    %473 = vector.load %arg12[%c2_368, %c0_369, %c0_370] : memref<4x8x512xf32, #tpu.memory_space<vmem>>, vector<1x8x512xf32>
    %474 = vector.shape_cast %473 : vector<1x8x512xf32> to vector<8x512xf32>
    %475 = vector.shape_cast %472 : vector<8x512xf32> to vector<1x8x512xf32>
    tpu.vector_store %arg12[%c2_368, %c0_369, %c0_370], %475 {strides = array<i32>} : memref<4x8x512xf32, #tpu.memory_space<vmem>>, vector<1x8x512xf32>,
    %c3_371 = arith.constant 3 : index
    %c0_372 = arith.constant 0 : index
    %c0_373 = arith.constant 0 : index
    %476 = vector.load %arg12[%c3_371, %c0_372, %c0_373] : memref<4x8x512xf32, #tpu.memory_space<vmem>>, vector<1x8x512xf32>
    %477 = vector.shape_cast %476 : vector<1x8x512xf32> to vector<8x512xf32>
    %478 = vector.shape_cast %472 : vector<8x512xf32> to vector<1x8x512xf32>
    tpu.vector_store %arg12[%c3_371, %c0_372, %c0_373], %478 {strides = array<i32>} : memref<4x8x512xf32, #tpu.memory_space<vmem>>, vector<1x8x512xf32>,
    %c3_374 = arith.constant 3 : index
    %c0_375 = arith.constant 0 : index
    %c0_376 = arith.constant 0 : index
    %479 = vector.load %arg12[%c3_374, %c0_375, %c0_376] : memref<4x8x512xf32, #tpu.memory_space<vmem>>, vector<1x8x512xf32>
    %480 = vector.shape_cast %479 : vector<1x8x512xf32> to vector<8x512xf32>
    %c17_i32_377 = arith.constant 17 : i32
    %481 = tpu.dynamic_rotate %480 by %c17_i32_377 dim 1 : vector<8x512xf32>, i32 -> vector<8x512xf32>
    %482 = vector.broadcast %3 : vector<1x512xf32> to vector<8x512xf32>
    %483 = arith.mulf %481, %482 : vector<8x512xf32>
    %c8_378 = arith.constant 8 : index
    %c0_379 = arith.constant 0 : index
    %484 = vector.load %arg13[%c8_378, %c0_379] : memref<296x512xf32, #tpu.memory_space<vmem>>, vector<8x512xf32>
    tpu.vector_store %arg13[%c8_378, %c0_379], %483 {strides = array<i32>} : memref<296x512xf32, #tpu.memory_space<vmem>>, vector<8x512xf32>,
    %c16_i32_380 = arith.constant 16 : i32
    %485 = tpu.dynamic_rotate %480 by %c16_i32_380 dim 1 : vector<8x512xf32>, i32 -> vector<8x512xf32>
    %486 = vector.broadcast %4 : vector<1x512xf32> to vector<8x512xf32>
    %487 = arith.mulf %485, %486 : vector<8x512xf32>
    %c16_381 = arith.constant 16 : index
    %c0_382 = arith.constant 0 : index
    %488 = vector.load %arg13[%c16_381, %c0_382] : memref<296x512xf32, #tpu.memory_space<vmem>>, vector<8x512xf32>
    tpu.vector_store %arg13[%c16_381, %c0_382], %487 {strides = array<i32>} : memref<296x512xf32, #tpu.memory_space<vmem>>, vector<8x512xf32>,
    %c15_i32_383 = arith.constant 15 : i32
    %489 = tpu.dynamic_rotate %480 by %c15_i32_383 dim 1 : vector<8x512xf32>, i32 -> vector<8x512xf32>
    %490 = vector.broadcast %5 : vector<1x512xf32> to vector<8x512xf32>
    %491 = arith.mulf %489, %490 : vector<8x512xf32>
    %c24_384 = arith.constant 24 : index
    %c0_385 = arith.constant 0 : index
    %492 = vector.load %arg13[%c24_384, %c0_385] : memref<296x512xf32, #tpu.memory_space<vmem>>, vector<8x512xf32>
    tpu.vector_store %arg13[%c24_384, %c0_385], %491 {strides = array<i32>} : memref<296x512xf32, #tpu.memory_space<vmem>>, vector<8x512xf32>,
    %c1_i32_386 = arith.constant 1 : i32
    %493 = tpu.dynamic_rotate %480 by %c1_i32_386 dim 1 : vector<8x512xf32>, i32 -> vector<8x512xf32>
    %494 = vector.broadcast %6 : vector<1x512xf32> to vector<8x512xf32>
    %495 = arith.mulf %493, %494 : vector<8x512xf32>
    %c32_387 = arith.constant 32 : index
    %c0_388 = arith.constant 0 : index
    %496 = vector.load %arg13[%c32_387, %c0_388] : memref<296x512xf32, #tpu.memory_space<vmem>>, vector<8x512xf32>
    tpu.vector_store %arg13[%c32_387, %c0_388], %495 {strides = array<i32>} : memref<296x512xf32, #tpu.memory_space<vmem>>, vector<8x512xf32>,
    %c40_389 = arith.constant 40 : index
    %c0_390 = arith.constant 0 : index
    %497 = vector.load %arg13[%c40_389, %c0_390] : memref<296x512xf32, #tpu.memory_space<vmem>>, vector<8x512xf32>
    tpu.vector_store %arg13[%c40_389, %c0_390], %480 {strides = array<i32>} : memref<296x512xf32, #tpu.memory_space<vmem>>, vector<8x512xf32>,
    %c511_i32_391 = arith.constant 511 : i32
    %498 = tpu.dynamic_rotate %480 by %c511_i32_391 dim 1 : vector<8x512xf32>, i32 -> vector<8x512xf32>
    %499 = vector.broadcast %7 : vector<1x512xf32> to vector<8x512xf32>
    %500 = arith.mulf %498, %499 : vector<8x512xf32>
    %c48_392 = arith.constant 48 : index
    %c0_393 = arith.constant 0 : index
    %501 = vector.load %arg13[%c48_392, %c0_393] : memref<296x512xf32, #tpu.memory_space<vmem>>, vector<8x512xf32>
    tpu.vector_store %arg13[%c48_392, %c0_393], %500 {strides = array<i32>} : memref<296x512xf32, #tpu.memory_space<vmem>>, vector<8x512xf32>,
    %c497_i32_394 = arith.constant 497 : i32
    %502 = tpu.dynamic_rotate %480 by %c497_i32_394 dim 1 : vector<8x512xf32>, i32 -> vector<8x512xf32>
    %503 = vector.broadcast %8 : vector<1x512xf32> to vector<8x512xf32>
    %504 = arith.mulf %502, %503 : vector<8x512xf32>
    %c56_395 = arith.constant 56 : index
    %c0_396 = arith.constant 0 : index
    %505 = vector.load %arg13[%c56_395, %c0_396] : memref<296x512xf32, #tpu.memory_space<vmem>>, vector<8x512xf32>
    tpu.vector_store %arg13[%c56_395, %c0_396], %504 {strides = array<i32>} : memref<296x512xf32, #tpu.memory_space<vmem>>, vector<8x512xf32>,
    %c496_i32_397 = arith.constant 496 : i32
    %506 = tpu.dynamic_rotate %480 by %c496_i32_397 dim 1 : vector<8x512xf32>, i32 -> vector<8x512xf32>
    %507 = vector.broadcast %9 : vector<1x512xf32> to vector<8x512xf32>
    %508 = arith.mulf %506, %507 : vector<8x512xf32>
    %c64_398 = arith.constant 64 : index
    %c0_399 = arith.constant 0 : index
    %509 = vector.load %arg13[%c64_398, %c0_399] : memref<296x512xf32, #tpu.memory_space<vmem>>, vector<8x512xf32>
    tpu.vector_store %arg13[%c64_398, %c0_399], %508 {strides = array<i32>} : memref<296x512xf32, #tpu.memory_space<vmem>>, vector<8x512xf32>,
    %c495_i32_400 = arith.constant 495 : i32
    %510 = tpu.dynamic_rotate %480 by %c495_i32_400 dim 1 : vector<8x512xf32>, i32 -> vector<8x512xf32>
    %511 = vector.broadcast %10 : vector<1x512xf32> to vector<8x512xf32>
    %512 = arith.mulf %510, %511 : vector<8x512xf32>
    %c72_401 = arith.constant 72 : index
    %c0_402 = arith.constant 0 : index
    %513 = vector.load %arg13[%c72_401, %c0_402] : memref<296x512xf32, #tpu.memory_space<vmem>>, vector<8x512xf32>
    tpu.vector_store %arg13[%c72_401, %c0_402], %512 {strides = array<i32>} : memref<296x512xf32, #tpu.memory_space<vmem>>, vector<8x512xf32>,
    %c0_403 = arith.constant 0 : index
    %c0_404 = arith.constant 0 : index
    %514 = vector.load %arg9[%c0_403, %c0_404] : memref<8x80xf32, #tpu.memory_space<vmem>>, vector<8x80xf32>
    %c0_405 = arith.constant 0 : index
    %c0_406 = arith.constant 0 : index
    %515 = vector.load %arg13[%c0_405, %c0_406] : memref<296x512xf32, #tpu.memory_space<vmem>>, vector<80x512xf32>
    %cst_407 = arith.constant dense<0.000000e+00> : vector<8x512xf32>
    %516 = tpu.matmul %514, %515, %cst_407 {dimension_numbers = #tpu.dot_dimension_numbers<[1], [0], [0], [1], [0, 0, 1, 1], [], []>} : vector<8x80xf32>, vector<80x512xf32>, vector<8x512xf32> -> vector<8x512xf32>
    %c3_408 = arith.constant 3 : index
    %c0_409 = arith.constant 0 : index
    %c0_410 = arith.constant 0 : index
    %517 = vector.load %arg12[%c3_408, %c0_409, %c0_410] : memref<4x8x512xf32, #tpu.memory_space<vmem>>, vector<1x8x512xf32>
    %518 = vector.shape_cast %517 : vector<1x8x512xf32> to vector<8x512xf32>
    %519 = vector.shape_cast %516 : vector<8x512xf32> to vector<1x8x512xf32>
    tpu.vector_store %arg12[%c3_408, %c0_409, %c0_410], %519 {strides = array<i32>} : memref<4x8x512xf32, #tpu.memory_space<vmem>>, vector<1x8x512xf32>,
    %c0_411 = arith.constant 0 : index
    %c0_412 = arith.constant 0 : index
    %c0_413 = arith.constant 0 : index
    %520 = vector.load %arg12[%c0_411, %c0_412, %c0_413] : memref<4x8x512xf32, #tpu.memory_space<vmem>>, vector<1x8x512xf32>
    %521 = vector.shape_cast %520 : vector<1x8x512xf32> to vector<8x512xf32>
    %c17_i32_414 = arith.constant 17 : i32
    %522 = tpu.dynamic_rotate %521 by %c17_i32_414 dim 1 : vector<8x512xf32>, i32 -> vector<8x512xf32>
    %523 = vector.broadcast %3 : vector<1x512xf32> to vector<8x512xf32>
    %524 = arith.mulf %522, %523 : vector<8x512xf32>
    %c8_415 = arith.constant 8 : index
    %c0_416 = arith.constant 0 : index
    %525 = vector.load %arg13[%c8_415, %c0_416] : memref<296x512xf32, #tpu.memory_space<vmem>>, vector<8x512xf32>
    tpu.vector_store %arg13[%c8_415, %c0_416], %524 {strides = array<i32>} : memref<296x512xf32, #tpu.memory_space<vmem>>, vector<8x512xf32>,
    %c16_i32_417 = arith.constant 16 : i32
    %526 = tpu.dynamic_rotate %521 by %c16_i32_417 dim 1 : vector<8x512xf32>, i32 -> vector<8x512xf32>
    %527 = vector.broadcast %4 : vector<1x512xf32> to vector<8x512xf32>
    %528 = arith.mulf %526, %527 : vector<8x512xf32>
    %c16_418 = arith.constant 16 : index
    %c0_419 = arith.constant 0 : index
    %529 = vector.load %arg13[%c16_418, %c0_419] : memref<296x512xf32, #tpu.memory_space<vmem>>, vector<8x512xf32>
    tpu.vector_store %arg13[%c16_418, %c0_419], %528 {strides = array<i32>} : memref<296x512xf32, #tpu.memory_space<vmem>>, vector<8x512xf32>,
    %c15_i32_420 = arith.constant 15 : i32
    %530 = tpu.dynamic_rotate %521 by %c15_i32_420 dim 1 : vector<8x512xf32>, i32 -> vector<8x512xf32>
    %531 = vector.broadcast %5 : vector<1x512xf32> to vector<8x512xf32>
    %532 = arith.mulf %530, %531 : vector<8x512xf32>
    %c24_421 = arith.constant 24 : index
    %c0_422 = arith.constant 0 : index
    %533 = vector.load %arg13[%c24_421, %c0_422] : memref<296x512xf32, #tpu.memory_space<vmem>>, vector<8x512xf32>
    tpu.vector_store %arg13[%c24_421, %c0_422], %532 {strides = array<i32>} : memref<296x512xf32, #tpu.memory_space<vmem>>, vector<8x512xf32>,
    %c1_i32_423 = arith.constant 1 : i32
    %534 = tpu.dynamic_rotate %521 by %c1_i32_423 dim 1 : vector<8x512xf32>, i32 -> vector<8x512xf32>
    %535 = vector.broadcast %6 : vector<1x512xf32> to vector<8x512xf32>
    %536 = arith.mulf %534, %535 : vector<8x512xf32>
    %c32_424 = arith.constant 32 : index
    %c0_425 = arith.constant 0 : index
    %537 = vector.load %arg13[%c32_424, %c0_425] : memref<296x512xf32, #tpu.memory_space<vmem>>, vector<8x512xf32>
    tpu.vector_store %arg13[%c32_424, %c0_425], %536 {strides = array<i32>} : memref<296x512xf32, #tpu.memory_space<vmem>>, vector<8x512xf32>,
    %c40_426 = arith.constant 40 : index
    %c0_427 = arith.constant 0 : index
    %538 = vector.load %arg13[%c40_426, %c0_427] : memref<296x512xf32, #tpu.memory_space<vmem>>, vector<8x512xf32>
    tpu.vector_store %arg13[%c40_426, %c0_427], %521 {strides = array<i32>} : memref<296x512xf32, #tpu.memory_space<vmem>>, vector<8x512xf32>,
    %c511_i32_428 = arith.constant 511 : i32
    %539 = tpu.dynamic_rotate %521 by %c511_i32_428 dim 1 : vector<8x512xf32>, i32 -> vector<8x512xf32>
    %540 = vector.broadcast %7 : vector<1x512xf32> to vector<8x512xf32>
    %541 = arith.mulf %539, %540 : vector<8x512xf32>
    %c48_429 = arith.constant 48 : index
    %c0_430 = arith.constant 0 : index
    %542 = vector.load %arg13[%c48_429, %c0_430] : memref<296x512xf32, #tpu.memory_space<vmem>>, vector<8x512xf32>
    tpu.vector_store %arg13[%c48_429, %c0_430], %541 {strides = array<i32>} : memref<296x512xf32, #tpu.memory_space<vmem>>, vector<8x512xf32>,
    %c497_i32_431 = arith.constant 497 : i32
    %543 = tpu.dynamic_rotate %521 by %c497_i32_431 dim 1 : vector<8x512xf32>, i32 -> vector<8x512xf32>
    %544 = vector.broadcast %8 : vector<1x512xf32> to vector<8x512xf32>
    %545 = arith.mulf %543, %544 : vector<8x512xf32>
    %c56_432 = arith.constant 56 : index
    %c0_433 = arith.constant 0 : index
    %546 = vector.load %arg13[%c56_432, %c0_433] : memref<296x512xf32, #tpu.memory_space<vmem>>, vector<8x512xf32>
    tpu.vector_store %arg13[%c56_432, %c0_433], %545 {strides = array<i32>} : memref<296x512xf32, #tpu.memory_space<vmem>>, vector<8x512xf32>,
    %c496_i32_434 = arith.constant 496 : i32
    %547 = tpu.dynamic_rotate %521 by %c496_i32_434 dim 1 : vector<8x512xf32>, i32 -> vector<8x512xf32>
    %548 = vector.broadcast %9 : vector<1x512xf32> to vector<8x512xf32>
    %549 = arith.mulf %547, %548 : vector<8x512xf32>
    %c64_435 = arith.constant 64 : index
    %c0_436 = arith.constant 0 : index
    %550 = vector.load %arg13[%c64_435, %c0_436] : memref<296x512xf32, #tpu.memory_space<vmem>>, vector<8x512xf32>
    tpu.vector_store %arg13[%c64_435, %c0_436], %549 {strides = array<i32>} : memref<296x512xf32, #tpu.memory_space<vmem>>, vector<8x512xf32>,
    %c495_i32_437 = arith.constant 495 : i32
    %551 = tpu.dynamic_rotate %521 by %c495_i32_437 dim 1 : vector<8x512xf32>, i32 -> vector<8x512xf32>
    %552 = vector.broadcast %10 : vector<1x512xf32> to vector<8x512xf32>
    %553 = arith.mulf %551, %552 : vector<8x512xf32>
    %c72_438 = arith.constant 72 : index
    %c0_439 = arith.constant 0 : index
    %554 = vector.load %arg13[%c72_438, %c0_439] : memref<296x512xf32, #tpu.memory_space<vmem>>, vector<8x512xf32>
    tpu.vector_store %arg13[%c72_438, %c0_439], %553 {strides = array<i32>} : memref<296x512xf32, #tpu.memory_space<vmem>>, vector<8x512xf32>,
    %c1_440 = arith.constant 1 : index
    %c0_441 = arith.constant 0 : index
    %c0_442 = arith.constant 0 : index
    %555 = vector.load %arg12[%c1_440, %c0_441, %c0_442] : memref<4x8x512xf32, #tpu.memory_space<vmem>>, vector<1x8x512xf32>
    %556 = vector.shape_cast %555 : vector<1x8x512xf32> to vector<8x512xf32>
    %c17_i32_443 = arith.constant 17 : i32
    %557 = tpu.dynamic_rotate %556 by %c17_i32_443 dim 1 : vector<8x512xf32>, i32 -> vector<8x512xf32>
    %558 = vector.broadcast %3 : vector<1x512xf32> to vector<8x512xf32>
    %559 = arith.mulf %557, %558 : vector<8x512xf32>
    %c80_444 = arith.constant 80 : index
    %c0_445 = arith.constant 0 : index
    %560 = vector.load %arg13[%c80_444, %c0_445] : memref<296x512xf32, #tpu.memory_space<vmem>>, vector<8x512xf32>
    tpu.vector_store %arg13[%c80_444, %c0_445], %559 {strides = array<i32>} : memref<296x512xf32, #tpu.memory_space<vmem>>, vector<8x512xf32>,
    %c16_i32_446 = arith.constant 16 : i32
    %561 = tpu.dynamic_rotate %556 by %c16_i32_446 dim 1 : vector<8x512xf32>, i32 -> vector<8x512xf32>
    %562 = vector.broadcast %4 : vector<1x512xf32> to vector<8x512xf32>
    %563 = arith.mulf %561, %562 : vector<8x512xf32>
    %c88_447 = arith.constant 88 : index
    %c0_448 = arith.constant 0 : index
    %564 = vector.load %arg13[%c88_447, %c0_448] : memref<296x512xf32, #tpu.memory_space<vmem>>, vector<8x512xf32>
    tpu.vector_store %arg13[%c88_447, %c0_448], %563 {strides = array<i32>} : memref<296x512xf32, #tpu.memory_space<vmem>>, vector<8x512xf32>,
    %c15_i32_449 = arith.constant 15 : i32
    %565 = tpu.dynamic_rotate %556 by %c15_i32_449 dim 1 : vector<8x512xf32>, i32 -> vector<8x512xf32>
    %566 = vector.broadcast %5 : vector<1x512xf32> to vector<8x512xf32>
    %567 = arith.mulf %565, %566 : vector<8x512xf32>
    %c96_450 = arith.constant 96 : index
    %c0_451 = arith.constant 0 : index
    %568 = vector.load %arg13[%c96_450, %c0_451] : memref<296x512xf32, #tpu.memory_space<vmem>>, vector<8x512xf32>
    tpu.vector_store %arg13[%c96_450, %c0_451], %567 {strides = array<i32>} : memref<296x512xf32, #tpu.memory_space<vmem>>, vector<8x512xf32>,
    %c1_i32_452 = arith.constant 1 : i32
    %569 = tpu.dynamic_rotate %556 by %c1_i32_452 dim 1 : vector<8x512xf32>, i32 -> vector<8x512xf32>
    %570 = vector.broadcast %6 : vector<1x512xf32> to vector<8x512xf32>
    %571 = arith.mulf %569, %570 : vector<8x512xf32>
    %c104_453 = arith.constant 104 : index
    %c0_454 = arith.constant 0 : index
    %572 = vector.load %arg13[%c104_453, %c0_454] : memref<296x512xf32, #tpu.memory_space<vmem>>, vector<8x512xf32>
    tpu.vector_store %arg13[%c104_453, %c0_454], %571 {strides = array<i32>} : memref<296x512xf32, #tpu.memory_space<vmem>>, vector<8x512xf32>,
    %c112_455 = arith.constant 112 : index
    %c0_456 = arith.constant 0 : index
    %573 = vector.load %arg13[%c112_455, %c0_456] : memref<296x512xf32, #tpu.memory_space<vmem>>, vector<8x512xf32>
    tpu.vector_store %arg13[%c112_455, %c0_456], %556 {strides = array<i32>} : memref<296x512xf32, #tpu.memory_space<vmem>>, vector<8x512xf32>,
    %c511_i32_457 = arith.constant 511 : i32
    %574 = tpu.dynamic_rotate %556 by %c511_i32_457 dim 1 : vector<8x512xf32>, i32 -> vector<8x512xf32>
    %575 = vector.broadcast %7 : vector<1x512xf32> to vector<8x512xf32>
    %576 = arith.mulf %574, %575 : vector<8x512xf32>
    %c120_458 = arith.constant 120 : index
    %c0_459 = arith.constant 0 : index
    %577 = vector.load %arg13[%c120_458, %c0_459] : memref<296x512xf32, #tpu.memory_space<vmem>>, vector<8x512xf32>
    tpu.vector_store %arg13[%c120_458, %c0_459], %576 {strides = array<i32>} : memref<296x512xf32, #tpu.memory_space<vmem>>, vector<8x512xf32>,
    %c497_i32_460 = arith.constant 497 : i32
    %578 = tpu.dynamic_rotate %556 by %c497_i32_460 dim 1 : vector<8x512xf32>, i32 -> vector<8x512xf32>
    %579 = vector.broadcast %8 : vector<1x512xf32> to vector<8x512xf32>
    %580 = arith.mulf %578, %579 : vector<8x512xf32>
    %c128_461 = arith.constant 128 : index
    %c0_462 = arith.constant 0 : index
    %581 = vector.load %arg13[%c128_461, %c0_462] : memref<296x512xf32, #tpu.memory_space<vmem>>, vector<8x512xf32>
    tpu.vector_store %arg13[%c128_461, %c0_462], %580 {strides = array<i32>} : memref<296x512xf32, #tpu.memory_space<vmem>>, vector<8x512xf32>,
    %c496_i32_463 = arith.constant 496 : i32
    %582 = tpu.dynamic_rotate %556 by %c496_i32_463 dim 1 : vector<8x512xf32>, i32 -> vector<8x512xf32>
    %583 = vector.broadcast %9 : vector<1x512xf32> to vector<8x512xf32>
    %584 = arith.mulf %582, %583 : vector<8x512xf32>
    %c136_464 = arith.constant 136 : index
    %c0_465 = arith.constant 0 : index
    %585 = vector.load %arg13[%c136_464, %c0_465] : memref<296x512xf32, #tpu.memory_space<vmem>>, vector<8x512xf32>
    tpu.vector_store %arg13[%c136_464, %c0_465], %584 {strides = array<i32>} : memref<296x512xf32, #tpu.memory_space<vmem>>, vector<8x512xf32>,
    %c495_i32_466 = arith.constant 495 : i32
    %586 = tpu.dynamic_rotate %556 by %c495_i32_466 dim 1 : vector<8x512xf32>, i32 -> vector<8x512xf32>
    %587 = vector.broadcast %10 : vector<1x512xf32> to vector<8x512xf32>
    %588 = arith.mulf %586, %587 : vector<8x512xf32>
    %c144_467 = arith.constant 144 : index
    %c0_468 = arith.constant 0 : index
    %589 = vector.load %arg13[%c144_467, %c0_468] : memref<296x512xf32, #tpu.memory_space<vmem>>, vector<8x512xf32>
    tpu.vector_store %arg13[%c144_467, %c0_468], %588 {strides = array<i32>} : memref<296x512xf32, #tpu.memory_space<vmem>>, vector<8x512xf32>,
    %c2_469 = arith.constant 2 : index
    %c0_470 = arith.constant 0 : index
    %c0_471 = arith.constant 0 : index
    %590 = vector.load %arg12[%c2_469, %c0_470, %c0_471] : memref<4x8x512xf32, #tpu.memory_space<vmem>>, vector<1x8x512xf32>
    %591 = vector.shape_cast %590 : vector<1x8x512xf32> to vector<8x512xf32>
    %c17_i32_472 = arith.constant 17 : i32
    %592 = tpu.dynamic_rotate %591 by %c17_i32_472 dim 1 : vector<8x512xf32>, i32 -> vector<8x512xf32>
    %593 = vector.broadcast %3 : vector<1x512xf32> to vector<8x512xf32>
    %594 = arith.mulf %592, %593 : vector<8x512xf32>
    %c152_473 = arith.constant 152 : index
    %c0_474 = arith.constant 0 : index
    %595 = vector.load %arg13[%c152_473, %c0_474] : memref<296x512xf32, #tpu.memory_space<vmem>>, vector<8x512xf32>
    tpu.vector_store %arg13[%c152_473, %c0_474], %594 {strides = array<i32>} : memref<296x512xf32, #tpu.memory_space<vmem>>, vector<8x512xf32>,
    %c16_i32_475 = arith.constant 16 : i32
    %596 = tpu.dynamic_rotate %591 by %c16_i32_475 dim 1 : vector<8x512xf32>, i32 -> vector<8x512xf32>
    %597 = vector.broadcast %4 : vector<1x512xf32> to vector<8x512xf32>
    %598 = arith.mulf %596, %597 : vector<8x512xf32>
    %c160_476 = arith.constant 160 : index
    %c0_477 = arith.constant 0 : index
    %599 = vector.load %arg13[%c160_476, %c0_477] : memref<296x512xf32, #tpu.memory_space<vmem>>, vector<8x512xf32>
    tpu.vector_store %arg13[%c160_476, %c0_477], %598 {strides = array<i32>} : memref<296x512xf32, #tpu.memory_space<vmem>>, vector<8x512xf32>,
    %c15_i32_478 = arith.constant 15 : i32
    %600 = tpu.dynamic_rotate %591 by %c15_i32_478 dim 1 : vector<8x512xf32>, i32 -> vector<8x512xf32>
    %601 = vector.broadcast %5 : vector<1x512xf32> to vector<8x512xf32>
    %602 = arith.mulf %600, %601 : vector<8x512xf32>
    %c168_479 = arith.constant 168 : index
    %c0_480 = arith.constant 0 : index
    %603 = vector.load %arg13[%c168_479, %c0_480] : memref<296x512xf32, #tpu.memory_space<vmem>>, vector<8x512xf32>
    tpu.vector_store %arg13[%c168_479, %c0_480], %602 {strides = array<i32>} : memref<296x512xf32, #tpu.memory_space<vmem>>, vector<8x512xf32>,
    %c1_i32_481 = arith.constant 1 : i32
    %604 = tpu.dynamic_rotate %591 by %c1_i32_481 dim 1 : vector<8x512xf32>, i32 -> vector<8x512xf32>
    %605 = vector.broadcast %6 : vector<1x512xf32> to vector<8x512xf32>
    %606 = arith.mulf %604, %605 : vector<8x512xf32>
    %c176_482 = arith.constant 176 : index
    %c0_483 = arith.constant 0 : index
    %607 = vector.load %arg13[%c176_482, %c0_483] : memref<296x512xf32, #tpu.memory_space<vmem>>, vector<8x512xf32>
    tpu.vector_store %arg13[%c176_482, %c0_483], %606 {strides = array<i32>} : memref<296x512xf32, #tpu.memory_space<vmem>>, vector<8x512xf32>,
    %c184_484 = arith.constant 184 : index
    %c0_485 = arith.constant 0 : index
    %608 = vector.load %arg13[%c184_484, %c0_485] : memref<296x512xf32, #tpu.memory_space<vmem>>, vector<8x512xf32>
    tpu.vector_store %arg13[%c184_484, %c0_485], %591 {strides = array<i32>} : memref<296x512xf32, #tpu.memory_space<vmem>>, vector<8x512xf32>,
    %c511_i32_486 = arith.constant 511 : i32
    %609 = tpu.dynamic_rotate %591 by %c511_i32_486 dim 1 : vector<8x512xf32>, i32 -> vector<8x512xf32>
    %610 = vector.broadcast %7 : vector<1x512xf32> to vector<8x512xf32>
    %611 = arith.mulf %609, %610 : vector<8x512xf32>
    %c192_487 = arith.constant 192 : index
    %c0_488 = arith.constant 0 : index
    %612 = vector.load %arg13[%c192_487, %c0_488] : memref<296x512xf32, #tpu.memory_space<vmem>>, vector<8x512xf32>
    tpu.vector_store %arg13[%c192_487, %c0_488], %611 {strides = array<i32>} : memref<296x512xf32, #tpu.memory_space<vmem>>, vector<8x512xf32>,
    %c497_i32_489 = arith.constant 497 : i32
    %613 = tpu.dynamic_rotate %591 by %c497_i32_489 dim 1 : vector<8x512xf32>, i32 -> vector<8x512xf32>
    %614 = vector.broadcast %8 : vector<1x512xf32> to vector<8x512xf32>
    %615 = arith.mulf %613, %614 : vector<8x512xf32>
    %c200_490 = arith.constant 200 : index
    %c0_491 = arith.constant 0 : index
    %616 = vector.load %arg13[%c200_490, %c0_491] : memref<296x512xf32, #tpu.memory_space<vmem>>, vector<8x512xf32>
    tpu.vector_store %arg13[%c200_490, %c0_491], %615 {strides = array<i32>} : memref<296x512xf32, #tpu.memory_space<vmem>>, vector<8x512xf32>,
    %c496_i32_492 = arith.constant 496 : i32
    %617 = tpu.dynamic_rotate %591 by %c496_i32_492 dim 1 : vector<8x512xf32>, i32 -> vector<8x512xf32>
    %618 = vector.broadcast %9 : vector<1x512xf32> to vector<8x512xf32>
    %619 = arith.mulf %617, %618 : vector<8x512xf32>
    %c208_493 = arith.constant 208 : index
    %c0_494 = arith.constant 0 : index
    %620 = vector.load %arg13[%c208_493, %c0_494] : memref<296x512xf32, #tpu.memory_space<vmem>>, vector<8x512xf32>
    tpu.vector_store %arg13[%c208_493, %c0_494], %619 {strides = array<i32>} : memref<296x512xf32, #tpu.memory_space<vmem>>, vector<8x512xf32>,
    %c495_i32_495 = arith.constant 495 : i32
    %621 = tpu.dynamic_rotate %591 by %c495_i32_495 dim 1 : vector<8x512xf32>, i32 -> vector<8x512xf32>
    %622 = vector.broadcast %10 : vector<1x512xf32> to vector<8x512xf32>
    %623 = arith.mulf %621, %622 : vector<8x512xf32>
    %c216_496 = arith.constant 216 : index
    %c0_497 = arith.constant 0 : index
    %624 = vector.load %arg13[%c216_496, %c0_497] : memref<296x512xf32, #tpu.memory_space<vmem>>, vector<8x512xf32>
    tpu.vector_store %arg13[%c216_496, %c0_497], %623 {strides = array<i32>} : memref<296x512xf32, #tpu.memory_space<vmem>>, vector<8x512xf32>,
    %c3_498 = arith.constant 3 : index
    %c0_499 = arith.constant 0 : index
    %c0_500 = arith.constant 0 : index
    %625 = vector.load %arg12[%c3_498, %c0_499, %c0_500] : memref<4x8x512xf32, #tpu.memory_space<vmem>>, vector<1x8x512xf32>
    %626 = vector.shape_cast %625 : vector<1x8x512xf32> to vector<8x512xf32>
    %c17_i32_501 = arith.constant 17 : i32
    %627 = tpu.dynamic_rotate %626 by %c17_i32_501 dim 1 : vector<8x512xf32>, i32 -> vector<8x512xf32>
    %628 = vector.broadcast %3 : vector<1x512xf32> to vector<8x512xf32>
    %629 = arith.mulf %627, %628 : vector<8x512xf32>
    %c224 = arith.constant 224 : index
    %c0_502 = arith.constant 0 : index
    %630 = vector.load %arg13[%c224, %c0_502] : memref<296x512xf32, #tpu.memory_space<vmem>>, vector<8x512xf32>
    tpu.vector_store %arg13[%c224, %c0_502], %629 {strides = array<i32>} : memref<296x512xf32, #tpu.memory_space<vmem>>, vector<8x512xf32>,
    %c16_i32_503 = arith.constant 16 : i32
    %631 = tpu.dynamic_rotate %626 by %c16_i32_503 dim 1 : vector<8x512xf32>, i32 -> vector<8x512xf32>
    %632 = vector.broadcast %4 : vector<1x512xf32> to vector<8x512xf32>
    %633 = arith.mulf %631, %632 : vector<8x512xf32>
    %c232 = arith.constant 232 : index
    %c0_504 = arith.constant 0 : index
    %634 = vector.load %arg13[%c232, %c0_504] : memref<296x512xf32, #tpu.memory_space<vmem>>, vector<8x512xf32>
    tpu.vector_store %arg13[%c232, %c0_504], %633 {strides = array<i32>} : memref<296x512xf32, #tpu.memory_space<vmem>>, vector<8x512xf32>,
    %c15_i32_505 = arith.constant 15 : i32
    %635 = tpu.dynamic_rotate %626 by %c15_i32_505 dim 1 : vector<8x512xf32>, i32 -> vector<8x512xf32>
    %636 = vector.broadcast %5 : vector<1x512xf32> to vector<8x512xf32>
    %637 = arith.mulf %635, %636 : vector<8x512xf32>
    %c240 = arith.constant 240 : index
    %c0_506 = arith.constant 0 : index
    %638 = vector.load %arg13[%c240, %c0_506] : memref<296x512xf32, #tpu.memory_space<vmem>>, vector<8x512xf32>
    tpu.vector_store %arg13[%c240, %c0_506], %637 {strides = array<i32>} : memref<296x512xf32, #tpu.memory_space<vmem>>, vector<8x512xf32>,
    %c1_i32_507 = arith.constant 1 : i32
    %639 = tpu.dynamic_rotate %626 by %c1_i32_507 dim 1 : vector<8x512xf32>, i32 -> vector<8x512xf32>
    %640 = vector.broadcast %6 : vector<1x512xf32> to vector<8x512xf32>
    %641 = arith.mulf %639, %640 : vector<8x512xf32>
    %c248 = arith.constant 248 : index
    %c0_508 = arith.constant 0 : index
    %642 = vector.load %arg13[%c248, %c0_508] : memref<296x512xf32, #tpu.memory_space<vmem>>, vector<8x512xf32>
    tpu.vector_store %arg13[%c248, %c0_508], %641 {strides = array<i32>} : memref<296x512xf32, #tpu.memory_space<vmem>>, vector<8x512xf32>,
    %c256 = arith.constant 256 : index
    %c0_509 = arith.constant 0 : index
    %643 = vector.load %arg13[%c256, %c0_509] : memref<296x512xf32, #tpu.memory_space<vmem>>, vector<8x512xf32>
    tpu.vector_store %arg13[%c256, %c0_509], %626 {strides = array<i32>} : memref<296x512xf32, #tpu.memory_space<vmem>>, vector<8x512xf32>,
    %c511_i32_510 = arith.constant 511 : i32
    %644 = tpu.dynamic_rotate %626 by %c511_i32_510 dim 1 : vector<8x512xf32>, i32 -> vector<8x512xf32>
    %645 = vector.broadcast %7 : vector<1x512xf32> to vector<8x512xf32>
    %646 = arith.mulf %644, %645 : vector<8x512xf32>
    %c264 = arith.constant 264 : index
    %c0_511 = arith.constant 0 : index
    %647 = vector.load %arg13[%c264, %c0_511] : memref<296x512xf32, #tpu.memory_space<vmem>>, vector<8x512xf32>
    tpu.vector_store %arg13[%c264, %c0_511], %646 {strides = array<i32>} : memref<296x512xf32, #tpu.memory_space<vmem>>, vector<8x512xf32>,
    %c497_i32_512 = arith.constant 497 : i32
    %648 = tpu.dynamic_rotate %626 by %c497_i32_512 dim 1 : vector<8x512xf32>, i32 -> vector<8x512xf32>
    %649 = vector.broadcast %8 : vector<1x512xf32> to vector<8x512xf32>
    %650 = arith.mulf %648, %649 : vector<8x512xf32>
    %c272 = arith.constant 272 : index
    %c0_513 = arith.constant 0 : index
    %651 = vector.load %arg13[%c272, %c0_513] : memref<296x512xf32, #tpu.memory_space<vmem>>, vector<8x512xf32>
    tpu.vector_store %arg13[%c272, %c0_513], %650 {strides = array<i32>} : memref<296x512xf32, #tpu.memory_space<vmem>>, vector<8x512xf32>,
    %c496_i32_514 = arith.constant 496 : i32
    %652 = tpu.dynamic_rotate %626 by %c496_i32_514 dim 1 : vector<8x512xf32>, i32 -> vector<8x512xf32>
    %653 = vector.broadcast %9 : vector<1x512xf32> to vector<8x512xf32>
    %654 = arith.mulf %652, %653 : vector<8x512xf32>
    %c280 = arith.constant 280 : index
    %c0_515 = arith.constant 0 : index
    %655 = vector.load %arg13[%c280, %c0_515] : memref<296x512xf32, #tpu.memory_space<vmem>>, vector<8x512xf32>
    tpu.vector_store %arg13[%c280, %c0_515], %654 {strides = array<i32>} : memref<296x512xf32, #tpu.memory_space<vmem>>, vector<8x512xf32>,
    %c495_i32_516 = arith.constant 495 : i32
    %656 = tpu.dynamic_rotate %626 by %c495_i32_516 dim 1 : vector<8x512xf32>, i32 -> vector<8x512xf32>
    %657 = vector.broadcast %10 : vector<1x512xf32> to vector<8x512xf32>
    %658 = arith.mulf %656, %657 : vector<8x512xf32>
    %c288 = arith.constant 288 : index
    %c0_517 = arith.constant 0 : index
    %659 = vector.load %arg13[%c288, %c0_517] : memref<296x512xf32, #tpu.memory_space<vmem>>, vector<8x512xf32>
    tpu.vector_store %arg13[%c288, %c0_517], %658 {strides = array<i32>} : memref<296x512xf32, #tpu.memory_space<vmem>>, vector<8x512xf32>,
    %c0_518 = arith.constant 0 : index
    %c0_519 = arith.constant 0 : index
    %660 = vector.load %arg10[%c0_518, %c0_519] : memref<32x296xf32, #tpu.memory_space<vmem>>, vector<32x296xf32>
    %c0_520 = arith.constant 0 : index
    %c0_521 = arith.constant 0 : index
    %661 = vector.load %arg13[%c0_520, %c0_521] : memref<296x512xf32, #tpu.memory_space<vmem>>, vector<296x512xf32>
    %cst_522 = arith.constant dense<0.000000e+00> : vector<32x512xf32>
    %662 = tpu.matmul %660, %661, %cst_522 {dimension_numbers = #tpu.dot_dimension_numbers<[1], [0], [0], [1], [0, 0, 1, 1], [], []>} : vector<32x296xf32>, vector<296x512xf32>, vector<32x512xf32> -> vector<32x512xf32>
    %663 = vector.extract_strided_slice %662 {offsets = [0, 0], sizes = [8, 512], strides = [1, 1]} : vector<32x512xf32> to vector<8x512xf32>
    %664 = vector.extract_strided_slice %662 {offsets = [8, 0], sizes = [8, 512], strides = [1, 1]} : vector<32x512xf32> to vector<8x512xf32>
    %665 = vector.extract_strided_slice %662 {offsets = [16, 0], sizes = [8, 512], strides = [1, 1]} : vector<32x512xf32> to vector<8x512xf32>
    %666 = vector.extract_strided_slice %662 {offsets = [24, 0], sizes = [8, 512], strides = [1, 1]} : vector<32x512xf32> to vector<8x512xf32>
    %667 = arith.addf %663, %664 : vector<8x512xf32>
    %668 = arith.addf %667, %665 : vector<8x512xf32>
    %669 = arith.addf %668, %666 : vector<8x512xf32>
    %cst_523 = arith.constant 2.500000e-01 : f32
    %670 = vector.broadcast %cst_523 : f32 to vector<8x512xf32>
    %671 = arith.mulf %669, %670 : vector<8x512xf32>
    %c0_524 = arith.constant 0 : index
    %c0_525 = arith.constant 0 : index
    %c0_526 = arith.constant 0 : index
    %672 = vector.load %arg11[%c0_524, %c0_525, %c0_526] : memref<1x8x512xf32, #tpu.memory_space<vmem>>, vector<1x8x512xf32>
    %673 = vector.shape_cast %672 : vector<1x8x512xf32> to vector<8x512xf32>
    %674 = vector.shape_cast %671 : vector<8x512xf32> to vector<1x8x512xf32>
    tpu.vector_store %arg11[%c0_524, %c0_525, %c0_526], %674 {strides = array<i32>} : memref<1x8x512xf32, #tpu.memory_space<vmem>>, vector<1x8x512xf32>,
    return
  }
  func.func @transform_0(%arg0: i32) -> (i32, i32, i32) {
    %c0_i32 = arith.constant 0 : i32
    %c0_i32_0 = arith.constant 0 : i32
    %c0_i32_1 = arith.constant 0 : i32
    return %arg0, %c0_i32, %c0_i32_0 : i32, i32, i32
  }
  func.func @transform_1(%arg0: i32) -> (i32, i32) {
    %c0_i32 = arith.constant 0 : i32
    %c0_i32_0 = arith.constant 0 : i32
    %c0_i32_1 = arith.constant 0 : i32
    return %c0_i32, %c0_i32_0 : i32, i32
  }
  func.func @transform_2(%arg0: i32) -> (i32, i32) {
    %c0_i32 = arith.constant 0 : i32
    %c0_i32_0 = arith.constant 0 : i32
    %c0_i32_1 = arith.constant 0 : i32
    return %c0_i32, %c0_i32_0 : i32, i32
  }
  func.func @transform_3(%arg0: i32) -> (i32, i32) {
    %c0_i32 = arith.constant 0 : i32
    %c0_i32_0 = arith.constant 0 : i32
    %c0_i32_1 = arith.constant 0 : i32
    return %c0_i32, %c0_i32_0 : i32, i32
  }
  func.func @transform_4(%arg0: i32) -> (i32, i32) {
    %c0_i32 = arith.constant 0 : i32
    %c0_i32_0 = arith.constant 0 : i32
    %c0_i32_1 = arith.constant 0 : i32
    return %c0_i32, %c0_i32_0 : i32, i32
  }
  func.func @transform_5(%arg0: i32) -> (i32, i32) {
    %c0_i32 = arith.constant 0 : i32
    %c0_i32_0 = arith.constant 0 : i32
    %c0_i32_1 = arith.constant 0 : i32
    return %c0_i32, %c0_i32_0 : i32, i32
  }
  func.func @transform_6(%arg0: i32) -> (i32, i32) {
    %c0_i32 = arith.constant 0 : i32
    %c0_i32_0 = arith.constant 0 : i32
    %c0_i32_1 = arith.constant 0 : i32
    return %c0_i32, %c0_i32_0 : i32, i32
  }
  func.func @transform_7(%arg0: i32) -> (i32, i32) {
    %c0_i32 = arith.constant 0 : i32
    %c0_i32_0 = arith.constant 0 : i32
    %c0_i32_1 = arith.constant 0 : i32
    return %c0_i32, %c0_i32_0 : i32, i32
  }
  func.func @transform_8(%arg0: i32) -> (i32, i32) {
    %c0_i32 = arith.constant 0 : i32
    %c0_i32_0 = arith.constant 0 : i32
    %c0_i32_1 = arith.constant 0 : i32
    return %c0_i32, %c0_i32_0 : i32, i32
  }
  func.func @transform_9(%arg0: i32) -> (i32, i32) {
    %c0_i32 = arith.constant 0 : i32
    %c0_i32_0 = arith.constant 0 : i32
    %c0_i32_1 = arith.constant 0 : i32
    return %c0_i32, %c0_i32_0 : i32, i32
  }
  func.func @transform_10(%arg0: i32) -> (i32, i32, i32) {
    %c0_i32 = arith.constant 0 : i32
    %c0_i32_0 = arith.constant 0 : i32
    %c0_i32_1 = arith.constant 0 : i32
    return %arg0, %c0_i32, %c0_i32_0 : i32, i32, i32
  }
}

</mosaic_0001>

<bundles_post_ra>
// kernel: tpu_custom_call.1
= control target key start
LH: loop header
LB: loop body
LE: loop exit
PB: predicated region body
PF: predicated region fallthrough
CT: control target
= control target key end

     0   :  { %15 = vsyncpa [#allocation5], 0  ;;  %s9383_s0 = inlined_call_operand.hbm [shape: f32[1,8,512], index: 0, kind: input, shape index: {}]   ;;  %s9384_s1 = inlined_call_operand.hbm [shape: f32[9,512], index: 1, kind: input, shape index: {}]   ;;  %s9385_s2 = inlined_call_operand.hbm [shape: f32[8,80], index: 2, kind: input, shape index: {}]   ;;  %s9386_s3 = inlined_call_operand.hbm [shape: f32[16,152], index: 3, kind: input, shape index: {}]   ;;  %s9387_s4 = inlined_call_operand.hbm [shape: f32[8,80], index: 4, kind: input, shape index: {}]   ;;  %s9388_s5 = inlined_call_operand.hbm [shape: f32[24,224], index: 5, kind: input, shape index: {}]   ;;  %s9389_s6 = inlined_call_operand.vmem [shape: f32[8,80], index: 6, kind: input, shape index: {}]   ;;  %s9390_s7 = inlined_call_operand.hbm [shape: f32[16,152], index: 7, kind: input, shape index: {}]   ;;  %s9391_s8 = inlined_call_operand.hbm [shape: f32[8,80], index: 8, kind: input, shape index: {}]   ;;  %s9392_s9 = inlined_call_operand.hbm [shape: f32[32,296], index: 9, kind: input, shape index: {}]   ;;  %s9393_s10 = inlined_call_operand.hbm [shape: f32[1,8,512], index: 10, kind: output, shape index: {}]  }
   0x1   :  { %16 = vsyncpa [#allocation8], 0 }
   0x2   :  { %17 = vsyncpa [#allocation11], 0 }
   0x3   :  { %18 = vsyncpa [#allocation14], 0 }
   0x4   :  { %19 = vsyncpa [#allocation17], 0 }
   0x5   :  { %20 = vsyncpa [#allocation6], 0  ;;  %s5394_s13 = smov [#allocation7]  }
   0x6   :  { %s36_s14 = sshll.u32 %s5394_s13, 4  ;;  %s37_s14 = int_to_ptr.vmem [resolvable:$true] %s36_s14 }
   0x7   :  { %s5190_s15 = scalar_lea.vmem %s37_s14, 1024  ;;  %p5195_p1 = scmp.lt.s32.totalorder %s37_s14, %s37_s14 }
   0x8   :  { %p5191_p0 = scmp.ne.s32.totalorder %s37_s14, %s5190_s15  ;;  %p5196_p2 = scmp.lt.s32.totalorder %s5190_s15, %s5190_s15 }
   0xa   :  { %p5197_p3 = por %p5196_p2, %p5195_p1 }
   0xc   :  { %p5198_p4 = pnand %p5197_p3, %p5191_p0 }
   0xe   :  { %5201 = shalt.err (!%p5198_p4)
}
   0xf   :  { %s5395_s16 = smov 512   ;;  %s5396_s17 = smov 32  }
  0x10   :  { %42 = dma.hbm_to_vmem [thread:$0]  %s9384_s1, 1024, %s37_s14, [#allocation8], %s5395_s16, %s5395_s16, %s5396_s17  }
  0x11   :  { %s5397_s20 = smov [#allocation10]  }
  0x12   :  { %s58_s21 = sshll.u32 %s5397_s20, 4  ;;  %s59_s21 = int_to_ptr.vmem [resolvable:$true] %s58_s21 }
  0x13   :  { %s5210_s22 = scalar_lea.vmem %s59_s21, 512  ;;  %p5215_p6 = scmp.lt.s32.totalorder %s59_s21, %s59_s21 }
  0x14   :  { %p5211_p5 = scmp.ne.s32.totalorder %s59_s21, %s5210_s22  ;;  %p5216_p7 = scmp.lt.s32.totalorder %s5210_s22, %s5210_s22 }
  0x16   :  { %p5217_p8 = por %p5216_p7, %p5215_p6 }
  0x18   :  { %p5218_p9 = pnand %p5217_p8, %p5211_p5 }
  0x1a   :  { %5221 = shalt.err (!%p5218_p9)
}
  0x1b   :  { %s5398_s23 = smov 256   ;;  %s5399_s24 = smov 16  }
  0x1c   :  { %64 = dma.hbm_to_vmem [thread:$0]  %s9386_s3, 512, %s59_s21, [#allocation11], %s5398_s23, %s5398_s23, %s5399_s24  }
  0x1d   :  { %s5400_s1 = smov [#allocation13]   ;;  %s5401_s28 = smov [#allocation16]  }
  0x1e   :  { %s80_s27 = sshll.u32 %s5400_s1, 4  ;;  %s107_s29 = sshll.u32 %s5401_s28, 4  ;;  %s81_s27 = int_to_ptr.vmem [resolvable:$true] %s80_s27  ;;  %s108_s29 = int_to_ptr.vmem [resolvable:$true] %s107_s29 }
  0x1f   :  { %s5230_s30 = scalar_lea.vmem %s81_s27, 768  ;;  %p5235_p11 = scmp.lt.s32.totalorder %s81_s27, %s81_s27 }
  0x20   :  { %p5231_p10 = scmp.ne.s32.totalorder %s81_s27, %s5230_s30  ;;  %p5236_p12 = scmp.lt.s32.totalorder %s5230_s30, %s5230_s30 }
  0x22   :  { %p5237_p13 = por %p5236_p12, %p5235_p11 }
  0x24   :  { %p5238_p0 = pnand %p5237_p13, %p5231_p10 }
  0x26   :  { %5241 = shalt.err (!%p5238_p0)
}
  0x27   :  { %86 = dma.hbm_to_vmem [thread:$0]  %s9388_s5, 768, %s81_s27, [#allocation14], %s5398_s23, %s5398_s23, %s5399_s24  }
  0x28   :  { %s5250_s3 = scalar_lea.vmem %s108_s29, 128  ;;  %p5255_p2 = scmp.lt.s32.totalorder %s108_s29, %s108_s29 }
  0x29   :  { %p5251_p1 = scmp.ne.s32.totalorder %s108_s29, %s5250_s3  ;;  %p5256_p3 = scmp.lt.s32.totalorder %s5250_s3, %s5250_s3 }
  0x2b   :  { %p5257_p4 = por %p5256_p3, %p5255_p2 }
  0x2d   :  { %p5258_p5 = pnand %p5257_p4, %p5251_p1 }
  0x2f   :  { %5261 = shalt.err (!%p5258_p5)
}
  0x30   :  { %110 = dma.hbm_to_vmem [thread:$0]  %s9391_s8, 128, %s108_s29, [#allocation17]  }
  0x31   :  { %s5402_s15 = smov [#allocation4]   ;;  %s5403_s17 = smov [#allocation9]  }
  0x32   :  { %s27_s16 = sshll.u32 %s5402_s15, 4  ;;  %s49_s18 = sshll.u32 %s5403_s17, 4  ;;  %s28_s16 = int_to_ptr.vmem [resolvable:$true] %s27_s16  ;;  %s50_s18 = int_to_ptr.vmem [resolvable:$true] %s49_s18 }
  0x33   :  { %s5270_s19 = scalar_lea.vmem %s28_s16, 512  ;;  %p5275_p7 = scmp.lt.s32.totalorder %s28_s16, %s28_s16 }
  0x34   :  { %p5271_p6 = scmp.ne.s32.totalorder %s28_s16, %s5270_s19  ;;  %p5276_p8 = scmp.lt.s32.totalorder %s5270_s19, %s5270_s19 }
  0x36   :  { %p5277_p9 = por %p5276_p8, %p5275_p7 }
  0x38   :  { %p5278_p10 = pnand %p5277_p9, %p5271_p6 }
  0x3a   :  { %5281 = shalt.err (!%p5278_p10)
}
  0x3b   :  { %30 = dma.hbm_to_vmem [thread:$0]  %s9383_s0, 512, %s28_s16, [#allocation5]  }
  0x3c   :  { %s5290_s21 = scalar_lea.vmem %s50_s18, 128  ;;  %p5295_p12 = scmp.lt.s32.totalorder %s50_s18, %s50_s18 }
  0x3d   :  { %p5291_p11 = scmp.ne.s32.totalorder %s50_s18, %s5290_s21  ;;  %p5296_p13 = scmp.lt.s32.totalorder %s5290_s21, %s5290_s21 }
  0x3f   :  { %p5297_p0 = por %p5296_p13, %p5295_p12 }
  0x41   :  { %p5298_p1 = pnand %p5297_p0, %p5291_p11 }
  0x43   :  { %5301 = shalt.err (!%p5298_p1)
}
  0x44   :  { %52 = dma.hbm_to_vmem [thread:$0]  %s9385_s2, 128, %s50_s18, [#allocation8]  }
  0x45   :  { %s5404_s25 = smov [#allocation12]   ;;  %s5405_s1 = smov [#allocation15]  }
  0x46   :  { %s71_s26 = sshll.u32 %s5404_s25, 4  ;;  %s94_s27 = sshll.u32 %s5405_s1, 4  ;;  %s72_s26 = int_to_ptr.vmem [resolvable:$true] %s71_s26  ;;  %s95_s27 = int_to_ptr.vmem [resolvable:$true] %s94_s27 }
  0x47   :  { %s5310_s28 = scalar_lea.vmem %s72_s26, 128  ;;  %p5315_p3 = scmp.lt.s32.totalorder %s72_s26, %s72_s26 }
  0x48   :  { %p5311_p2 = scmp.ne.s32.totalorder %s72_s26, %s5310_s28  ;;  %p5316_p4 = scmp.lt.s32.totalorder %s5310_s28, %s5310_s28 }
  0x4a   :  { %p5317_p5 = por %p5316_p4, %p5315_p3 }
  0x4c   :  { %p5318_p6 = pnand %p5317_p5, %p5311_p2 }
  0x4e   :  { %5321 = shalt.err (!%p5318_p6)
}
  0x4f   :  { %74 = dma.hbm_to_vmem [thread:$0]  %s9387_s4, 128, %s72_s26, [#allocation11]  }
  0x50   :  { %s5330_s30 = scalar_lea.vmem %s95_s27, 512  ;;  %p5335_p8 = scmp.lt.s32.totalorder %s95_s27, %s95_s27 }
  0x51   :  { %p5331_p7 = scmp.ne.s32.totalorder %s95_s27, %s5330_s30  ;;  %p5336_p9 = scmp.lt.s32.totalorder %s5330_s30, %s5330_s30 }
  0x53   :  { %p5337_p10 = por %p5336_p9, %p5335_p8 }
  0x55   :  { %p5338_p11 = pnand %p5337_p10, %p5331_p7 }
  0x57   :  { %5341 = shalt.err (!%p5338_p11)
}
  0x58   :  { %100 = dma.hbm_to_vmem [thread:$0]  %s9390_s7, 512, %s95_s27, [#allocation14], %s5398_s23, %s5398_s23, %s5399_s24  }
  0x59   :  { %s5406_s12 = smov [#allocation18]  }
  0x5a   :  { %s116_s3 = sshll.u32 %s5406_s12, 4  ;;  %s117_s3 = int_to_ptr.vmem [resolvable:$true] %s116_s3 }
  0x5b   :  { %s5350_s13 = scalar_lea.vmem %s117_s3, 1536  ;;  %p5355_p13 = scmp.lt.s32.totalorder %s117_s3, %s117_s3 }
  0x5c   :  { %p5351_p12 = scmp.ne.s32.totalorder %s117_s3, %s5350_s13  ;;  %p5356_p0 = scmp.lt.s32.totalorder %s5350_s13, %s5350_s13 }
  0x5e   :  { %p5357_p1 = por %p5356_p0, %p5355_p13 }
  0x60   :  { %p5358_p2 = pnand %p5357_p1, %p5351_p12 }
  0x62   :  { %5361 = shalt.err (!%p5358_p2)
}
  0x63   :  { %s5407_s4 = smov 384   ;;  %s5408_s14 = smov 24  }
  0x64   :  { %122 = dma.hbm_to_vmem [thread:$0]  %s9392_s9, 1536, %s117_s3, [#allocation17], %s5407_s4, %s5407_s4, %s5408_s14  }
  0x65   :  { %5382 = dma.done.wait [#allocation5], 512  }
  0x66   :  { %5383 = vsyncadd [#allocation5], 4294966784 }
  0x67   :  { %5384 = dma.done.wait [#allocation8], 1152  }
  0x68   :  { %5385 = vsyncadd [#allocation8], 4294966144 }
  0x69   :  { %5386 = dma.done.wait [#allocation11], 640  }
  0x6a   :  { %5387 = vsyncadd [#allocation11], 4294966656 }
  0x6b   :  { %5388 = dma.done.wait [#allocation14], 1280  }
  0x6c   :  { %5389 = vsyncadd [#allocation14], 4294966016 }
  0x6d   :  { %5390 = dma.done.wait [#allocation17], 1664  }
  0x6e   :  { %5391 = vsyncadd [#allocation17], 4294965632  ;;  %v5510_v0 = vld [vmem:[#allocation4 + $0x8] sm:$0xff]  ;;  %v5512_v1 = vld [vmem:[#allocation4] sm:$0xff]  ;;  %s5409_s7 = smov 111   ;;  %s5410_s9 = smov 112   ;;  %v162_v5 = vlaneseq }
  0x6f   :  { %9614 = vst [vmem:[#allocation26_spill] sm:$0xff] %v5510_v0  ;;  %9615 = vst [vmem:[#allocation27_spill] sm:$0xff] %v5512_v1  ;;  %461 = vrot.lane.b32.xlu0 %v5510_v0, %s5409_s7  ;;  %459 = vrot.lane.b32.xlu1 %v5512_v1, %s5409_s7  ;;  %v5518_v2 = vld [vmem:[#allocation4 + $0x10] sm:$0xff]  ;;  %v5524_v3 = vld [vmem:[#allocation4 + $0x18] sm:$0xff]  ;;  %s5411_s23 = smov 113   ;;  %s5412_s17 = smov 127  }
  0x70   :  { %9616 = vst [vmem:[#allocation28_spill] sm:$0xff] %v5518_v2  ;;  %9617 = vst [vmem:[#allocation29_spill] sm:$0xff] %v5524_v3  ;;  %s5413_s18 = smov 1   ;;  %s5414_s19 = smov 15   ;;  %v9394_v4 = vmov 0.0   ;;  %v5632_v6 = vand.u32 127, %v162_v5 }
  0x71   :  { %s5415_s5 = smov 17   ;;  %605 = vmatprep.mubr.f32.mxu0 %v9394_v4  ;;  %676 = vmatprep.mubr.f32.mxu1 %v9394_v4  ;;  %v5634_v7 = vshrl.u32 %v162_v5, 7  ;;  %v5644_v11 = vld [vmem:[#allocation7 + $0x28] ss:$0 sm:$0xff]  ;;  %v5648_v15 = vld [vmem:[#allocation7 + $0x20] ss:$0 sm:$0xff] }
  0x72   :  { %vm467_vm0 = vcmp.lt.s32.totalorder %v5632_v6, 111  ;;  %v5646_v12 = vld [vmem:[#allocation7 + $0x8] sm:$0xff]  ;;  %9619 = vst [vmem:[#allocation31_spill] sm:$0xff] %v5648_v15  ;;  %vm430_vm1 = vcmp.lt.s32.totalorder %v5632_v6, 112  ;;  %v5660_v21 = vld [vmem:[#allocation7 + $0x38] ss:$0 sm:$0xff] }
  0x73   :  { %463 = vrot.lane.b32.xlu0 %v5518_v2, %s5409_s7  ;;  %424 = vrot.lane.b32.xlu1 %v5510_v0, %s5410_s9  ;;  %9618 = vst [vmem:[#allocation30_spill] sm:$0xff] %v5634_v7  ;;  %v437_v10 = vsub.s32 7, %v5634_v7  ;;  %v5662_v22 = vld [vmem:[#allocation7 + $0x30] ss:$0 sm:$0xff]  ;;  %v5664_v23 = vld [vmem:[#allocation7] sm:$0xff]  ;;  %v400_v29 = vsub.s32 6, %v5634_v7 }
  0x74   :  { %9620 = vst [vmem:[#allocation32_spill] sm:$0xff] %v5662_v22  ;;  %v5679_v34 = vld [vmem:[#allocation7 + $0x18] sm:$0xff]  ;;  %v5681_v35 = vld [vmem:[#allocation7 + $0x10] sm:$0xff]  ;;  %vm393_vm2 = vcmp.lt.s32.totalorder %v5632_v6, 113  ;;  %v363_v52 = vsub.s32 5, %v5634_v7  ;;  %vm356_vm3 = vcmp.lt.s32.totalorder %v5632_v6, 127 }
  0x75   :  { %v5657_v19 = vrot.slane %v5646_v12, %v437_v10  ;;  %v5677_v33 = vrot.slane %v5664_v23, %v437_v10  ;;  %v5688_v40 = vrot.slane %v5646_v12, %v400_v29  ;;  %v5691_v41 = vrot.slane %v5679_v34, %v437_v10 }
  0x76   :  { %v5694_v42 = vrot.slane %v5681_v35, %v437_v10  ;;  %v5703_v48 = vrot.slane %v5664_v23, %v400_v29  ;;  %v5714_v57 = vrot.slane %v5646_v12, %v363_v52  ;;  %v5717_v58 = vrot.slane %v5679_v34, %v400_v29 }
  0x77   :  { %426 = vrot.lane.b32.xlu0 %v5518_v2, %s5410_s9  ;;  %465 = vrot.lane.b32.xlu1 %v5524_v3, %s5409_s7  ;;  %9621 = vst [vmem:[#allocation33_spill] sm:$0xff] %v5677_v33  ;;  %9622 = vst [vmem:[#allocation34_spill] sm:$0xff] %v5688_v40  ;;  %v5720_v59 = vrot.slane %v5681_v35, %v400_v29  ;;  %v5723_v62 = vrot.slane %v5664_v23, %v363_v52  ;;  %vm315_vm4 = vcmp.lt.s32.totalorder %v5632_v6, 1  ;;  %vm537_vm9 = vcmask 654336  }
  0x78   :  { %9623 = vst [vmem:[#allocation35_spill] sm:$0xff] %v5691_v41  ;;  %9624 = vst [vmem:[#allocation36_spill] sm:$0xff] %v5694_v42  ;;  %v5726_v63 = vrot.slane %v5679_v34, %v363_v52  ;;  %v5735_v10 = vrot.slane %v5681_v35, %v363_v52  ;;  %vm278_vm5 = vcmp.lt.s32.totalorder %v5632_v6, 15  ;;  %vm241_vm6 = vcmp.lt.s32.totalorder %v5632_v6, 16 }
  0x79   :  { %9625 = vst [vmem:[#allocation37_spill] sm:$0xff] %v5703_v48  ;;  %9626 = vst [vmem:[#allocation38_spill] sm:$0xff] %v5714_v57  ;;  %vm204_vm7 = vcmp.lt.s32.totalorder %v5632_v6, 17  ;;  %vm164_vm8 = vcmp.eq.s32.totalorder %v5634_v7, 0  ;;  %vm1103_vm10 = vcmask 195584   ;;  %vm2276_vm11 = vcmask 785408  }
  0x7a   :  { %9627 = vst [vmem:[#allocation39_spill] sm:$0xff] %v5717_v58  ;;  %9628 = vst [vmem:[#allocation40_spill] sm:$0xff] %v5720_v59  ;;  %vm4656_vm12 = vcmask 326656  }
  0x7b   :  { %422 = vrot.lane.b32.xlu0 %v5512_v1, %s5410_s9  ;;  %387 = vrot.lane.b32.xlu1 %v5510_v0, %s5411_s23  ;;  %9629 = vst [vmem:[#allocation41_spill] sm:$0xff] %v5723_v62 }
  0x7f   :  { %389 = vrot.lane.b32.xlu0 %v5518_v2, %s5411_s23  ;;  %428 = vrot.lane.b32.xlu1 %v5524_v3, %s5410_s9 }
  0x83   :  { %385 = vrot.lane.b32.xlu0 %v5512_v1, %s5411_s23  ;;  %350 = vrot.lane.b32.xlu1 %v5510_v0, %s5412_s17 }
  0x87   :  { %352 = vrot.lane.b32.xlu0 %v5518_v2, %s5412_s17  ;;  %391 = vrot.lane.b32.xlu1 %v5524_v3, %s5411_s23 }
  0x8b   :  { %348 = vrot.lane.b32.xlu0 %v5512_v1, %s5412_s17  ;;  %354 = vrot.lane.b32.xlu1 %v5524_v3, %s5412_s17 }
  0x8f   :  { %307 = vrot.lane.b32.xlu0 %v5512_v1, %s5413_s18  ;;  %309 = vrot.lane.b32.xlu1 %v5510_v0, %s5413_s18 }
  0x93   :  { %313 = vrot.lane.b32.xlu0 %v5524_v3, %s5413_s18  ;;  %270 = vrot.lane.b32.xlu1 %v5512_v1, %s5414_s19 }
  0x97   :  { %272 = vrot.lane.b32.xlu0 %v5510_v0, %s5414_s19  ;;  %311 = vrot.lane.b32.xlu1 %v5518_v2, %s5413_s18 }
  0x9b   :  { %276 = vrot.lane.b32.xlu0 %v5524_v3, %s5414_s19  ;;  %233 = vrot.lane.b32.xlu1 %v5512_v1, %s5399_s24 }
  0x9f   :  { %235 = vrot.lane.b32.xlu0 %v5510_v0, %s5399_s24  ;;  %274 = vrot.lane.b32.xlu1 %v5518_v2, %s5414_s19 }
  0xa3   :  { %239 = vrot.lane.b32.xlu0 %v5524_v3, %s5399_s24  ;;  %194 = vrot.lane.b32.xlu1 %v5512_v1, %s5415_s5 }
  0xa7   :  { %196 = vrot.lane.b32.xlu0 %v5510_v0, %s5415_s5  ;;  %237 = vrot.lane.b32.xlu1 %v5518_v2, %s5399_s24 }
  0xab   :  { %200 = vrot.lane.b32.xlu0 %v5524_v3, %s5415_s5  ;;  %198 = vrot.lane.b32.xlu1 %v5518_v2, %s5415_s5 }
  0xaf   :  { %839 = vrot.lane.b32.xlu0 %v5518_v2, %s5409_s7  ;;  %837 = vrot.lane.b32.xlu1 %v5510_v0, %s5409_s7 }
  0xb3   :  { %835 = vrot.lane.b32.xlu0 %v5512_v1, %s5409_s7  ;;  %817 = vrot.lane.b32.xlu1 %v5510_v0, %s5410_s9 }
  0xb7   :  { %819 = vrot.lane.b32.xlu0 %v5518_v2, %s5410_s9  ;;  %841 = vrot.lane.b32.xlu1 %v5524_v3, %s5409_s7 }
  0xbb   :  { %815 = vrot.lane.b32.xlu0 %v5512_v1, %s5410_s9  ;;  %797 = vrot.lane.b32.xlu1 %v5510_v0, %s5411_s23 }
  0xbf   :  { %799 = vrot.lane.b32.xlu0 %v5518_v2, %s5411_s23  ;;  %821 = vrot.lane.b32.xlu1 %v5524_v3, %s5410_s9 }
  0xc3   :  { %795 = vrot.lane.b32.xlu0 %v5512_v1, %s5411_s23  ;;  %777 = vrot.lane.b32.xlu1 %v5510_v0, %s5412_s17 }
  0xc7   :  { %779 = vrot.lane.b32.xlu0 %v5518_v2, %s5412_s17  ;;  %801 = vrot.lane.b32.xlu1 %v5524_v3, %s5411_s23 }
  0xcb   :  { %775 = vrot.lane.b32.xlu0 %v5512_v1, %s5412_s17  ;;  %781 = vrot.lane.b32.xlu1 %v5524_v3, %s5412_s17 }
  0xcf   :  { %751 = vrot.lane.b32.xlu0 %v5512_v1, %s5413_s18  ;;  %753 = vrot.lane.b32.xlu1 %v5510_v0, %s5413_s18 }
  0xd3   :  { %757 = vrot.lane.b32.xlu0 %v5524_v3, %s5413_s18  ;;  %731 = vrot.lane.b32.xlu1 %v5512_v1, %s5414_s19 }
  0xd7   :  { %733 = vrot.lane.b32.xlu0 %v5510_v0, %s5414_s19  ;;  %755 = vrot.lane.b32.xlu1 %v5518_v2, %s5413_s18 }
  0xdb   :  { %737 = vrot.lane.b32.xlu0 %v5524_v3, %s5414_s19  ;;  %711 = vrot.lane.b32.xlu1 %v5512_v1, %s5399_s24 }
  0xdf   :  { %713 = vrot.lane.b32.xlu0 %v5510_v0, %s5399_s24  ;;  %735 = vrot.lane.b32.xlu1 %v5518_v2, %s5414_s19 }
  0xe1   :  { %v462_v8 = vpop.permute.xlu0 %461  ;;  %v460_v9 = vpop.permute.xlu1 %459 }
  0xe2   :  { %v470_v16 = vsel %vm467_vm0, %v460_v9, %v462_v8 }
  0xe3   :  { %717 = vrot.lane.b32.xlu0 %v5524_v3, %s5399_s24  ;;  %v488_v20 = vmul.f32 %v5648_v15, %v470_v16 }
  0xe5   :  { %v464_v13 = vpop.permute.xlu0 %463  ;;  %v425_v14 = vpop.permute.xlu1 %424 }
  0xe6   :  { %v469_v17 = vsel %vm467_vm0, %v462_v8, %v464_v13 }
  0xe7   :  { %v489_v18 = vmul.f32 %v5644_v11, %v469_v17  ;;  %v322_v17 = vsub.s32 3, %v5634_v7 }
  0xe9   :  { %553 = vmatprep.subr.mxu0 %v489_v18  ;;  %v427_v24 = vpop.permute.xlu0 %426  ;;  %v466_v25 = vpop.permute.xlu1 %465 }
  0xea   :  { %v432_v26 = vsel %vm430_vm1, %v425_v14, %v427_v24  ;;  %554 = vmatpush1.msra.mxu0 %v488_v20  ;;  %v471_v27 = vsel %vm467_vm0, %v466_v25, %v460_v9  ;;  %v468_v28 = vsel %vm467_vm0, %v464_v13, %v466_v25 }
  0xeb   :  { %v452_v30 = vmul.f32 %v5657_v19, %v432_v26  ;;  %v491_v31 = vmul.f32 %v5660_v21, %v471_v27  ;;  %v490_v32 = vmul.f32 %v5662_v22, %v468_v28 }
  0xed   :  { %v423_v36 = vpop.permute.xlu0 %422  ;;  %555 = vmatprep.subr.mxu0 %v452_v30  ;;  %624 = vmatprep.subr.mxu1 %v491_v31  ;;  %v388_v37 = vpop.permute.xlu1 %387  ;;  %v5752_v30 = vrot.slane %v5646_v12, %v322_v17 }
  0xee   :  { %v433_v38 = vsel %vm430_vm1, %v423_v36, %v425_v14  ;;  %625 = vmatpush1.msra.mxu1 %v490_v32 }
  0xef   :  { %v451_v39 = vmul.f32 %v5677_v33, %v433_v38  ;;  %9630 = vst [vmem:[#allocation42_spill] sm:$0xff] %v5752_v30  ;;  %v5760_v38 = vrot.slane %v5664_v23, %v322_v17 }
  0xf1   :  { %v390_v43 = vpop.permute.xlu0 %389  ;;  %556 = vmatpush1.msra.mxu0 %v451_v39  ;;  %v429_v44 = vpop.permute.xlu1 %428  ;;  %v285_v39 = vsub.s32 2, %v5634_v7 }
  0xf2   :  { %v395_v45 = vsel %vm393_vm2, %v388_v37, %v390_v43  ;;  %v431_v46 = vsel %vm430_vm1, %v427_v24, %v429_v44  ;;  %v434_v47 = vsel %vm430_vm1, %v429_v44, %v423_v36 }
  0xf3   :  { %v415_v49 = vmul.f32 %v5688_v40, %v395_v45  ;;  %v454_v50 = vmul.f32 %v5691_v41, %v434_v47  ;;  %v453_v51 = vmul.f32 %v5694_v42, %v431_v46  ;;  %v5770_v47 = vrot.slane %v5646_v12, %v285_v39 }
  0xf5   :  { %v386_v53 = vpop.permute.xlu0 %385  ;;  %557 = vmatprep.subr.mxu0 %v415_v49  ;;  %626 = vmatprep.subr.mxu1 %v454_v50  ;;  %v351_v54 = vpop.permute.xlu1 %350  ;;  %v5773_v49 = vrot.slane %v5679_v34, %v322_v17  ;;  %v5776_v50 = vrot.slane %v5681_v35, %v322_v17 }
  0xf6   :  { %v396_v55 = vsel %vm393_vm2, %v386_v53, %v388_v37  ;;  %627 = vmatpush1.msra.mxu1 %v453_v51 }
  0xf7   :  { %v414_v56 = vmul.f32 %v5703_v48, %v396_v55 }
  0xf9   :  { %v353_v60 = vpop.permute.xlu0 %352  ;;  %558 = vmatpush1.msra.mxu0 %v414_v56  ;;  %v392_v61 = vpop.permute.xlu1 %391  ;;  %v5785_v56 = vrot.slane %v5664_v23, %v285_v39 }
  0xfa   :  { %v358_v5 = vsel %vm356_vm3, %v351_v54, %v353_v60  ;;  %v394_v8 = vsel %vm393_vm2, %v390_v43, %v392_v61  ;;  %v397_v9 = vsel %vm393_vm2, %v392_v61, %v386_v53 }
  0xfb   :  { %v378_v13 = vmul.f32 %v5714_v57, %v358_v5  ;;  %v417_v14 = vmul.f32 %v5717_v58, %v397_v9  ;;  %v416_v16 = vmul.f32 %v5720_v59, %v394_v8  ;;  %v248_v8 = vsub.s32 1, %v5634_v7 }
  0xfd   :  { %v349_v18 = vpop.permute.xlu0 %348  ;;  %559 = vmatprep.subr.mxu0 %v378_v13  ;;  %628 = vmatprep.subr.mxu1 %v417_v14  ;;  %v355_v20 = vpop.permute.xlu1 %354  ;;  %v5796_v17 = vrot.slane %v5646_v12, %v248_v8 }
  0xfe   :  { %v359_v24 = vsel %vm356_vm3, %v349_v18, %v351_v54  ;;  %v357_v25 = vsel %vm356_vm3, %v353_v60, %v355_v20  ;;  %v360_v26 = vsel %vm356_vm3, %v355_v20, %v349_v18  ;;  %629 = vmatpush1.msra.mxu1 %v416_v16  ;;  %v5799_v18 = vrot.slane %v5679_v34, %v285_v39 }
  0xff   :  { %v377_v27 = vmul.f32 %v5723_v62, %v359_v24  ;;  %v380_v28 = vmul.f32 %v5726_v63, %v360_v26  ;;  %v379_v29 = vmul.f32 %v5735_v10, %v357_v25  ;;  %v5802_v20 = vrot.slane %v5681_v35, %v285_v39 }
 0x100   :  { %9631 = vst [vmem:[#allocation43_spill] sm:$0xff] %v5799_v18 }
 0x101   :  { %v308_v31 = vpop.permute.xlu0 %307  ;;  %560 = vmatpush1.msra.mxu0 %v377_v27  ;;  %630 = vmatprep.subr.mxu1 %v380_v28  ;;  %v310_v32 = vpop.permute.xlu1 %309  ;;  %9632 = vst [vmem:[#allocation44_spill] sm:$0xff] %v5802_v20 }
 0x102   :  { %v318_v36 = vsel %vm315_vm4, %v308_v31, %v310_v32  ;;  %631 = vmatpush1.msra.mxu1 %v379_v29  ;;  %561 = vmatprep.subr.mxu0 %v5510_v0  ;;  %v5811_v29 = vrot.slane %v5664_v23, %v248_v8 }
 0x103   :  { %562 = vmatpush1.msra.mxu0 %v5512_v1  ;;  %v337_v37 = vmul.f32 %v5752_v30, %v318_v36  ;;  %632 = vmatprep.subr.mxu1 %v5524_v3 }
 0x104   :  { %633 = vmatpush1.msra.mxu1 %v5518_v2 }
 0x105   :  { %v314_v43 = vpop.permute.xlu0 %313  ;;  %563 = vmatprep.subr.mxu0 %v337_v37  ;;  %v271_v44 = vpop.permute.xlu1 %270  ;;  %v211_v37 = vsub.s32 0, %v5634_v7 }
 0x106   :  { %v319_v45 = vsel %vm315_vm4, %v314_v43, %v308_v31 }
 0x107   :  { %v336_v46 = vmul.f32 %v5760_v38, %v319_v45 }
 0x109   :  { %v273_v51 = vpop.permute.xlu0 %272  ;;  %564 = vmatpush1.msra.mxu0 %v336_v46  ;;  %v312_v52 = vpop.permute.xlu1 %311  ;;  %v5822_v46 = vrot.slane %v5646_v12, %v211_v37 }
 0x10a   :  { %v281_v53 = vsel %vm278_vm5, %v271_v44, %v273_v51  ;;  %v316_v54 = vsel %vm315_vm4, %v312_v52, %v314_v43  ;;  %v317_v55 = vsel %vm315_vm4, %v310_v32, %v312_v52  ;;  %v5828_v52 = vrot.slane %v5681_v35, %v248_v8 }
 0x10b   :  { %v300_v60 = vmul.f32 %v5770_v47, %v281_v53  ;;  %v339_v61 = vmul.f32 %v5773_v49, %v316_v54  ;;  %v338_v5 = vmul.f32 %v5776_v50, %v317_v55  ;;  %9633 = vst [vmem:[#allocation45_spill] sm:$0xff] %v5822_v46  ;;  %v5831_v55 = vrot.slane %v5664_v23, %v211_v37 }
 0x10c   :  { %9635 = vst [vmem:[#allocation47_spill] sm:$0xff] %v5828_v52  ;;  %v5846_v23 = vrot.slane %v5681_v35, %v211_v37 }
 0x10d   :  { %v277_v9 = vpop.permute.xlu0 %276  ;;  %565 = vmatprep.subr.mxu0 %v300_v60  ;;  %634 = vmatprep.subr.mxu1 %v339_v61  ;;  %v234_v13 = vpop.permute.xlu1 %233  ;;  %9636 = vst [vmem:[#allocation48_spill] sm:$0xff] %v5831_v55 }
 0x10e   :  { %v282_v14 = vsel %vm278_vm5, %v277_v9, %v271_v44  ;;  %635 = vmatpush1.msra.mxu1 %v338_v5  ;;  %v5840_v5 = vrot.slane %v5679_v34, %v211_v37  ;;  %9638 = vst [vmem:[#allocation50_spill] sm:$0xff] %v5846_v23 }
 0x10f   :  { %v299_v16 = vmul.f32 %v5785_v56, %v282_v14 }
 0x110   :  { %9637 = vst [vmem:[#allocation49_spill] sm:$0xff] %v5840_v5 }
 0x111   :  { %v236_v24 = vpop.permute.xlu0 %235  ;;  %566 = vmatpush1.msra.mxu0 %v299_v16  ;;  %v275_v25 = vpop.permute.xlu1 %274 }
 0x112   :  { %v244_v26 = vsel %vm241_vm6, %v234_v13, %v236_v24  ;;  %v279_v27 = vsel %vm278_vm5, %v275_v25, %v277_v9  ;;  %v280_v28 = vsel %vm278_vm5, %v273_v51, %v275_v25  ;;  %v5825_v51 = vrot.slane %v5679_v34, %v248_v8 }
 0x113   :  { %v263_v31 = vmul.f32 %v5796_v17, %v244_v26  ;;  %v302_v32 = vmul.f32 %v5799_v18, %v279_v27  ;;  %v301_v36 = vmul.f32 %v5802_v20, %v280_v28  ;;  %v496_v28 = vld [vmem:[#allocation9] sm:$0xff] }
 0x114   :  { %9634 = vst [vmem:[#allocation46_spill] sm:$0xff] %v5825_v51 }
 0x115   :  { %v240_v39 = vpop.permute.xlu0 %239  ;;  %567 = vmatprep.subr.mxu0 %v263_v31  ;;  %636 = vmatprep.subr.mxu1 %v302_v32  ;;  %v195_v43 = vpop.permute.xlu1 %194  ;;  %v9396_v31 = vmov 1.0  }
 0x116   :  { %v245_v44 = vsel %vm241_vm6, %v240_v39, %v234_v13  ;;  %637 = vmatpush1.msra.mxu1 %v301_v36 }
 0x117   :  { %v262_v45 = vmul.f32 %v5811_v29, %v245_v44 }
 0x119   :  { %v197_v53 = vpop.permute.xlu0 %196  ;;  %568 = vmatpush1.msra.mxu0 %v262_v45  ;;  %v238_v54 = vpop.permute.xlu1 %237 }
 0x11a   :  { %v207_v60 = vsel %vm204_vm7, %v195_v43, %v197_v53  ;;  %v242_v61 = vsel %vm241_vm6, %v238_v54, %v240_v39  ;;  %v243_v12 = vsel %vm241_vm6, %v236_v24, %v238_v54 }
 0x11b   :  { %v226_v8 = vmul.f32 %v5822_v46, %v207_v60  ;;  %v265_v9 = vmul.f32 %v5825_v51, %v242_v61  ;;  %v264_v13 = vmul.f32 %v5828_v52, %v243_v12 }
 0x11d   :  { %v201_v14 = vpop.permute.xlu0 %200  ;;  %569 = vmatprep.subr.mxu0 %v226_v8  ;;  %638 = vmatprep.subr.mxu1 %v265_v9  ;;  %v199_v16 = vpop.permute.xlu1 %198  ;;  %v1024_v9 = vld [vmem:[#allocation10 + $0x8] sm:$0xff] }
 0x11e   :  { %v208_v24 = vsel %vm204_vm7, %v201_v14, %v195_v43  ;;  %v205_v34 = vsel %vm204_vm7, %v199_v16, %v201_v14  ;;  %v206_v25 = vsel %vm204_vm7, %v197_v53, %v199_v16  ;;  %639 = vmatpush1.msra.mxu1 %v264_v13 }
 0x11f   :  { %v225_v26 = vmul.f32 %v5831_v55, %v208_v24  ;;  %v228_v35 = vmul.f32 %v5840_v5, %v205_v34  ;;  %v227_v27 = vmul.f32 %v5846_v23, %v206_v25 }
 0x121   :  { %570 = vmatpush1.msra.mxu0 %v225_v26  ;;  %640 = vmatprep.subr.mxu1 %v228_v35  ;;  %v5914_v43 = vpop.permute.xlu0 %839  ;;  %v5924_v45 = vpop.permute.xlu1 %837 }
 0x122   :  { %5099 = vmatprep.subr.msk.mxu0 %vm164_vm8, %v9396_v31  ;;  %641 = vmatpush1.msra.mxu1 %v227_v27 }
 0x123   :  { %5100 = vmatpush1.msk.msra.mxu0 %vm164_vm8, %v9396_v31  ;;  %5101 = vmatprep.subr.msk.mxu1 %vm164_vm8, %v9396_v31 }
 0x124   :  { %5069 = vmatmul.mubr.msk.f32.vlgmr.msra.gmra.mxu0 %vm537_vm9, %v496_v28  ;;  %5102 = vmatpush1.msk.msra.mxu1 %vm164_vm8, %v9396_v31 }
 0x125   :  { %5070 = vmatmul.mubr.msk.f32.vlgmr.msra.gmra.mxu1 %vm537_vm9, %v496_v28  ;;  %v5922_v44 = vpop.permute.xlu0 %835  ;;  %v5936_v54 = vpop.permute.xlu1 %817  ;;  %5071 = vmatprep.mubr.msk.f32.mxu0 %vm1103_vm10, %v1024_v9 }
 0x126   :  { %5073 = vmatprep.mubr.msk.f32.mxu1 %vm1103_vm10, %v1024_v9 }
 0x129   :  { %v5932_v53 = vpop.permute.xlu0 %819  ;;  %v5944_v61 = vpop.permute.xlu1 %841 }
 0x12d   :  { %v5942_v60 = vpop.permute.xlu0 %815  ;;  %v5956_v8 = vpop.permute.xlu1 %797 }
 0x131   :  { %v5952_v12 = vpop.permute.xlu0 %799  ;;  %v5966_v14 = vpop.permute.xlu1 %821 }
 0x135   :  { %v5963_v13 = vpop.permute.xlu0 %795  ;;  %v5978_v24 = vpop.permute.xlu1 %777 }
 0x139   :  { %v5974_v16 = vpop.permute.xlu0 %779  ;;  %v5984_v25 = vpop.permute.xlu1 %801 }
 0x13a   :  { %9639 = vst [vmem:[#allocation51_spill] sm:$0xff] %v5974_v16 }
 0x13d   :  { %v5982_v34 = vpop.permute.xlu0 %775  ;;  %v5988_v35 = vpop.permute.xlu1 %781 }
 0x13e   :  { %9640 = vst [vmem:[#allocation52_spill] sm:$0xff] %v5982_v34  ;;  %9642 = vst [vmem:[#allocation54_spill] sm:$0xff] %v5988_v35 }
 0x141   :  { %v5986_v26 = vpop.permute.xlu0 %751  ;;  %v5992_v28 = vpop.permute.xlu1 %753 }
 0x142   :  { %9641 = vst [vmem:[#allocation53_spill] sm:$0xff] %v5986_v26  ;;  %9644 = vst [vmem:[#allocation56_spill] sm:$0xff] %v5992_v28 }
 0x145   :  { %v5990_v27 = vpop.permute.xlu0 %757  ;;  %v5996_v4 = vpop.permute.xlu1 %731 }
 0x146   :  { %9643 = vst [vmem:[#allocation55_spill] sm:$0xff] %v5990_v27  ;;  %9646 = vst [vmem:[#allocation58_spill] sm:$0xff] %v5996_v4 }
 0x149   :  { %v5994_v9 = vpop.permute.xlu0 %733  ;;  %v6000_v7 = vpop.permute.xlu1 %755 }
 0x14a   :  { %9645 = vst [vmem:[#allocation57_spill] sm:$0xff] %v5994_v9  ;;  %9648 = vst [vmem:[#allocation60_spill] sm:$0xff] %v6000_v7 }
 0x14d   :  { %v5998_v31 = vpop.permute.xlu0 %737 }
 0x14e   :  { %9647 = vst [vmem:[#allocation59_spill] sm:$0xff] %v5998_v31 }
 0x1e4   :  { %v5872_v32 = vpop.f32.mrf.mxu0 }
 0x1e5   :  { %943 = vrot.lane.b32.xlu0 %v5872_v32, %s5412_s17  ;;  %v5876_v36 = vpop.f32.mrf.mxu1 }
 0x1e6   :  { %947 = vrot.lane.b32.xlu1 %v5876_v36, %s5412_s17  ;;  %v5884_v37 = vpop.f32.mrf.mxu0 }
 0x1e7   :  { %v5894_v39 = vpop.f32.mrf.mxu1 }
 0x1e9   :  { %919 = vrot.lane.b32.xlu0 %v5872_v32, %s5413_s18 }
 0x1ea   :  { %899 = vrot.lane.b32.xlu1 %v5872_v32, %s5414_s19 }
 0x1ed   :  { %945 = vrot.lane.b32.xlu0 %v5884_v37, %s5412_s17 }
 0x1ee   :  { %923 = vrot.lane.b32.xlu1 %v5876_v36, %s5413_s18 }
 0x1f1   :  { %693 = vrot.lane.b32.xlu0 %v5510_v0, %s5415_s5 }
 0x1f2   :  { %879 = vrot.lane.b32.xlu1 %v5872_v32, %s5399_s24 }
 0x1f5   :  { %925 = vrot.lane.b32.xlu0 %v5894_v39, %s5413_s18 }
 0x1f6   :  { %903 = vrot.lane.b32.xlu1 %v5876_v36, %s5414_s19 }
 0x1f9   :  { %901 = vrot.lane.b32.xlu0 %v5884_v37, %s5414_s19 }
 0x1fa   :  { %859 = vrot.lane.b32.xlu1 %v5872_v32, %s5415_s5 }
 0x1fd   :  { %905 = vrot.lane.b32.xlu0 %v5894_v39, %s5414_s19 }
 0x1fe   :  { %883 = vrot.lane.b32.xlu1 %v5876_v36, %s5399_s24 }
 0x201   :  { %881 = vrot.lane.b32.xlu0 %v5884_v37, %s5399_s24 }
 0x202   :  { %863 = vrot.lane.b32.xlu1 %v5876_v36, %s5415_s5 }
 0x205   :  { %885 = vrot.lane.b32.xlu0 %v5894_v39, %s5399_s24 }
 0x206   :  { %949 = vrot.lane.b32.xlu1 %v5894_v39, %s5412_s17 }
 0x209   :  { %861 = vrot.lane.b32.xlu0 %v5884_v37, %s5415_s5 }
 0x20a   :  { %921 = vrot.lane.b32.xlu1 %v5884_v37, %s5413_s18 }
 0x20d   :  { %865 = vrot.lane.b32.xlu0 %v5894_v39, %s5415_s5 }
 0x20e   :  { %691 = vrot.lane.b32.xlu1 %v5512_v1, %s5415_s5  ;;  %v6004_v1 = vpop.permute.xlu1 %711 }
 0x20f   :  { %9650 = vst [vmem:[#allocation62_spill] sm:$0xff] %v6004_v1 }
 0x211   :  { %697 = vrot.lane.b32.xlu0 %v5524_v3, %s5415_s5 }
 0x212   :  { %715 = vrot.lane.b32.xlu1 %v5518_v2, %s5399_s24  ;;  %v6008_v0 = vpop.permute.xlu1 %735 }
 0x213   :  { %9652 = vst [vmem:[#allocation64_spill] sm:$0xff] %v6008_v0 }
 0x215   :  { %1003 = vrot.lane.b32.xlu0 %v5872_v32, %s5409_s7 }
 0x216   :  { %695 = vrot.lane.b32.xlu1 %v5518_v2, %s5415_s5  ;;  %v6002_v2 = vpop.permute.xlu0 %713 }
 0x217   :  { %9649 = vst [vmem:[#allocation61_spill] sm:$0xff] %v6002_v2 }
 0x219   :  { %987 = vrot.lane.b32.xlu0 %v5876_v36, %s5410_s9 }
 0x21a   :  { %1007 = vrot.lane.b32.xlu1 %v5876_v36, %s5409_s7  ;;  %v6006_v3 = vpop.permute.xlu0 %717 }
 0x21b   :  { %9651 = vst [vmem:[#allocation63_spill] sm:$0xff] %v6006_v3 }
 0x21d   :  { %983 = vrot.lane.b32.xlu0 %v5872_v32, %s5410_s9 }
 0x21e   :  { %985 = vrot.lane.b32.xlu1 %v5884_v37, %s5410_s9 }
 0x221   :  { %1005 = vrot.lane.b32.xlu0 %v5884_v37, %s5409_s7 }
 0x222   :  { %1009 = vrot.lane.b32.xlu1 %v5894_v39, %s5409_s7 }
 0x225   :  { %967 = vrot.lane.b32.xlu0 %v5876_v36, %s5411_s23 }
 0x226   :  { %965 = vrot.lane.b32.xlu1 %v5884_v37, %s5411_s23 }
 0x229   :  { %963 = vrot.lane.b32.xlu0 %v5872_v32, %s5411_s23 }
 0x22a   :  { %989 = vrot.lane.b32.xlu1 %v5894_v39, %s5410_s9 }
 0x22e   :  { %969 = vrot.lane.b32.xlu1 %v5894_v39, %s5411_s23 }
 0x257   :  { %v944_v26 = vpop.permute.xlu0 %943 }
 0x258   :  { %v948_v27 = vpop.permute.xlu1 %947 }
 0x25b   :  { %v920_v58 = vpop.permute.xlu0 %919 }
 0x25c   :  { %v900_v28 = vpop.permute.xlu1 %899 }
 0x25f   :  { %v946_v59 = vpop.permute.xlu0 %945 }
 0x260   :  { %v952_v4 = vsel %vm356_vm3, %v946_v59, %v948_v27  ;;  %v953_v31 = vsel %vm356_vm3, %v944_v26, %v946_v59  ;;  %v924_v9 = vpop.permute.xlu1 %923 }
 0x261   :  { %v955_v2 = vmul.f32 %v953_v31, %v5723_v62  ;;  %v956_v1 = vmul.f32 %v952_v4, %v5714_v57  ;;  %v845_v4 = vsel %vm467_vm0, %v5922_v44, %v5924_v45  ;;  %v843_v31 = vsel %vm467_vm0, %v5914_v43, %v5944_v61 }
 0x262   :  { %v846_v57 = vsel %vm467_vm0, %v5944_v61, %v5922_v44  ;;  %v824_v62 = vsel %vm430_vm1, %v5936_v54, %v5932_v53  ;;  %v6056_v44 = vmul.f32 %v5662_v22, %v843_v31 }
 0x263   :  { %v6016_v7 = vpop.permute.xlu0 %693  ;;  %1110 = vmatprep.subr.mxu0 %v956_v1 }
 0x264   :  { %9653 = vst [vmem:[#allocation65_spill] sm:$0xff] %v6016_v7  ;;  %1111 = vmatpush1.msra.mxu0 %v955_v2  ;;  %v880_v3 = vpop.permute.xlu1 %879  ;;  %v844_v2 = vsel %vm467_vm0, %v5924_v45, %v5914_v43  ;;  %v6037_v7 = vmul.f32 %v5648_v15, %v845_v4 }
 0x265   :  { %1112 = vmatprep.subr.mxu0 %v5884_v37 }
 0x266   :  { %1113 = vmatpush1.msra.mxu0 %v5872_v32  ;;  %v825_v32 = vsel %vm430_vm1, %v5942_v60, %v5936_v54  ;;  %9654 = vst [vmem:[#allocation66_spill] sm:$0xff] %v6037_v7 }
 0x267   :  { %v926_v0 = vpop.permute.xlu0 %925  ;;  %v6059_v61 = vmul.f32 %v825_v32, %v5677_v33  ;;  %v6073_v32 = vmul.f32 %v5660_v21, %v846_v57 }
 0x268   :  { %v904_v40 = vpop.permute.xlu1 %903  ;;  %v930_v4 = vsel %vm315_vm4, %v926_v0, %v920_v58 }
 0x26b   :  { %v902_v48 = vpop.permute.xlu0 %901 }
 0x26c   :  { %v860_v41 = vpop.permute.xlu1 %859  ;;  %v908_v54 = vsel %vm278_vm5, %v902_v48, %v904_v40 }
 0x26f   :  { %v906_v35 = vpop.permute.xlu0 %905 }
 0x270   :  { %v884_v59 = vpop.permute.xlu1 %883  ;;  %v910_v31 = vsel %vm278_vm5, %v906_v35, %v900_v28 }
 0x273   :  { %v882_v16 = vpop.permute.xlu0 %881 }
 0x274   :  { %v864_v34 = vpop.permute.xlu1 %863 }
 0x277   :  { %v886_v1 = vpop.permute.xlu0 %885 }
 0x278   :  { %v950_v37 = vpop.permute.xlu1 %949 }
 0x279   :  { %v951_v45 = vsel %vm356_vm3, %v948_v27, %v950_v37  ;;  %v954_v43 = vsel %vm356_vm3, %v950_v37, %v944_v26  ;;  %v927_v26 = vsel %vm315_vm4, %v924_v9, %v926_v0  ;;  %v6064_v37 = vmul.f32 %v5644_v11, %v844_v2 }
 0x27a   :  { %v957_v15 = vmul.f32 %v951_v45, %v5735_v10  ;;  %v958_v7 = vmul.f32 %v954_v43, %v5726_v63  ;;  %v909_v45 = vsel %vm278_vm5, %v900_v28, %v902_v48  ;;  %v931_v0 = vmul.f32 %v930_v4, %v5760_v38 }
 0x27b   :  { %v862_v27 = vpop.permute.xlu0 %861  ;;  %v907_v2 = vsel %vm278_vm5, %v904_v40, %v906_v35  ;;  %v889_v48 = vsel %vm241_vm6, %v880_v3, %v882_v16  ;;  %v934_v28 = vmul.f32 %v927_v26, %v5773_v49  ;;  %v913_v40 = vmul.f32 %v908_v54, %v5802_v20 }
 0x27c   :  { %1187 = vmatprep.subr.mxu1 %v958_v7  ;;  %v922_v43 = vpop.permute.xlu1 %921  ;;  %v911_v35 = vmul.f32 %v910_v31, %v5785_v56  ;;  %v914_v4 = vmul.f32 %v907_v2, %v5799_v18  ;;  %v869_v26 = vsel %vm204_vm7, %v860_v41, %v862_v27  ;;  %v892_v54 = vmul.f32 %v889_v48, %v5796_v17 }
 0x27d   :  { %v928_v33 = vsel %vm315_vm4, %v922_v43, %v924_v9  ;;  %v929_v22 = vsel %vm315_vm4, %v920_v58, %v922_v43  ;;  %1188 = vmatpush1.msra.mxu1 %v957_v15  ;;  %v887_v9 = vsel %vm241_vm6, %v884_v59, %v886_v1  ;;  %v912_v15 = vmul.f32 %v909_v45, %v5770_v47 }
 0x27e   :  { %v933_v7 = vmul.f32 %v928_v33, %v5776_v50  ;;  %1189 = vmatprep.subr.mxu1 %v5894_v39  ;;  %v932_v57 = vmul.f32 %v929_v22, %v5752_v30  ;;  %v888_v33 = vsel %vm241_vm6, %v882_v16, %v884_v59  ;;  %v890_v22 = vsel %vm241_vm6, %v886_v1, %v880_v3 }
 0x27f   :  { %v866_v58 = vpop.permute.xlu0 %865  ;;  %1190 = vmatpush1.msra.mxu1 %v5876_v36  ;;  %v868_v16 = vsel %vm204_vm7, %v862_v27, %v864_v34  ;;  %v894_v59 = vmul.f32 %v887_v9, %v5825_v51  ;;  %v823_v1 = vsel %vm430_vm1, %v5932_v53, %v5966_v14  ;;  %v893_v45 = vmul.f32 %v888_v33, %v5828_v52  ;;  %v9659_v33 = vld [vmem:[#allocation37_spill] sm:$0xff] }
 0x280   :  { %1114 = vmatprep.subr.mxu0 %v932_v57  ;;  %1191 = vmatprep.subr.mxu1 %v934_v28  ;;  %v6098_v39 = vpop.permute.xlu1 %691  ;;  %v867_v36 = vsel %vm204_vm7, %v864_v34, %v866_v58  ;;  %v870_v3 = vsel %vm204_vm7, %v866_v58, %v860_v41  ;;  %v891_v31 = vmul.f32 %v890_v22, %v5811_v29  ;;  %v9655_v28 = vld [vmem:[#allocation52_spill] sm:$0xff] }
 0x281   :  { %1115 = vmatpush1.msra.mxu0 %v931_v0  ;;  %1192 = vmatpush1.msra.mxu1 %v933_v7  ;;  %v872_v34 = vmul.f32 %v869_v26, %v5822_v46  ;;  %v874_v27 = vmul.f32 %v867_v36, %v5840_v5  ;;  %v828_v0 = vmul.f32 %v824_v62, %v5657_v19  ;;  %v9661_v26 = vld [vmem:[#allocation34_spill] sm:$0xff] }
 0x282   :  { %1116 = vmatprep.subr.mxu0 %v912_v15  ;;  %1193 = vmatprep.subr.mxu1 %v914_v4  ;;  %v826_v53 = vsel %vm430_vm1, %v5966_v14, %v5942_v60  ;;  %v873_v2 = vmul.f32 %v868_v16, %v5846_v23  ;;  %v871_v48 = vmul.f32 %v870_v3, %v5831_v55  ;;  %v9663_v16 = vld [vmem:[#allocation41_spill] sm:$0xff]  ;;  %v9664_v3 = vld [vmem:[#allocation39_spill] sm:$0xff] }
 0x283   :  { %v6117_v43 = vpop.permute.xlu0 %697  ;;  %1117 = vmatpush1.msra.mxu0 %v911_v35  ;;  %1194 = vmatpush1.msra.mxu1 %v913_v40  ;;  %v804_v7 = vsel %vm393_vm2, %v5956_v8, %v5952_v12  ;;  %v829_v57 = vmul.f32 %v823_v1, %v5694_v42  ;;  %v805_v62 = vsel %vm393_vm2, %v5963_v13, %v5956_v8  ;;  %v9656_v8 = vld [vmem:[#allocation51_spill] sm:$0xff] }
 0x284   :  { %1118 = vmatprep.subr.mxu0 %v892_v54  ;;  %1195 = vmatprep.subr.mxu1 %v894_v59  ;;  %v6119_v41 = vpop.permute.xlu1 %715  ;;  %v803_v60 = vsel %vm393_vm2, %v5952_v12, %v5984_v25  ;;  %v806_v14 = vsel %vm393_vm2, %v5984_v25, %v5963_v13  ;;  %v785_v40 = vsel %vm356_vm3, %v9655_v28, %v5978_v24  ;;  %v9657_v12 = vld [vmem:[#allocation54_spill] sm:$0xff]  ;;  %v9658_v25 = vld [vmem:[#allocation35_spill] sm:$0xff]  ;;  %v9662_v54 = vld [vmem:[#allocation40_spill] sm:$0xff] }
 0x285   :  { %1119 = vmatpush1.msra.mxu0 %v891_v31  ;;  %1196 = vmatpush1.msra.mxu1 %v893_v45  ;;  %v784_v9 = vsel %vm356_vm3, %v5978_v24, %v9656_v8  ;;  %v783_v58 = vsel %vm356_vm3, %v9656_v8, %v9657_v12  ;;  %v830_v15 = vmul.f32 %v826_v53, %v9658_v25  ;;  %v9660_v24 = vld [vmem:[#allocation66_spill] sm:$0xff]  ;;  %v9665_v45 = vld [vmem:[#allocation53_spill] sm:$0xff]  ;;  %v9666_v31 = vld [vmem:[#allocation55_spill] sm:$0xff] }
 0x286   :  { %1120 = vmatprep.subr.mxu0 %v872_v34  ;;  %1197 = vmatprep.subr.mxu1 %v874_v27  ;;  %v807_v22 = vmul.f32 %v805_v62, %v9659_v33  ;;  %v786_v4 = vsel %vm356_vm3, %v9657_v12, %v9655_v28  ;;  %v808_v36 = vmul.f32 %v804_v7, %v9661_v26  ;;  %v9673_v12 = vld [vmem:[#allocation64_spill] sm:$0xff] }
 0x287   :  { %v6151_v35 = vpop.permute.xlu0 %1003  ;;  %1121 = vmatpush1.msra.mxu0 %v871_v48  ;;  %1198 = vmatpush1.msra.mxu1 %v873_v2  ;;  %v810_v59 = vmul.f32 %v806_v14, %v9664_v3  ;;  %v789_v1 = vmul.f32 %v783_v58, %v5735_v10  ;;  %v762_v34 = vsel %vm315_vm4, %v9666_v31, %v9665_v45  ;;  %v9668_v2 = vld [vmem:[#allocation56_spill] sm:$0xff]  ;;  %v9670_v14 = vld [vmem:[#allocation57_spill] sm:$0xff] }
 0x288   :  { %1122 = vmatprep.subr.mxu0 %v6064_v37  ;;  %1199 = vmatprep.subr.mxu1 %v6073_v32  ;;  %v696_v13 = vpop.permute.xlu1 %695  ;;  %v809_v37 = vmul.f32 %v803_v60, %v9662_v54  ;;  %v787_v32 = vmul.f32 %v785_v40, %v9663_v16  ;;  %v9669_v48 = vld [vmem:[#allocation60_spill] sm:$0xff]  ;;  %v790_v60 = vmul.f32 %v786_v4, %v5726_v63  ;;  %v9672_v40 = vld [vmem:[#allocation59_spill] sm:$0xff] }
 0x289   :  { %1123 = vmatpush1.msra.mxu0 %v9660_v24  ;;  %1200 = vmatpush1.msra.mxu1 %v6056_v44  ;;  %v9667_v44 = vld [vmem:[#allocation38_spill] sm:$0xff]  ;;  %v760_v7 = vsel %vm315_vm4, %v9668_v2, %v9669_v48  ;;  %v759_v28 = vsel %vm315_vm4, %v9669_v48, %v9666_v31  ;;  %v740_v58 = vsel %vm278_vm5, %v9670_v14, %v9673_v12 }
 0x28a   :  { %1124 = vmatprep.subr.mxu0 %v828_v0  ;;  %1201 = vmatprep.subr.mxu1 %v830_v15  ;;  %v788_v53 = vmul.f32 %v784_v9, %v9667_v44  ;;  %v761_v0 = vsel %vm315_vm4, %v9665_v45, %v9668_v2  ;;  %v763_v9 = vmul.f32 %v762_v34, %v5760_v38  ;;  %v9677_v2 = vld [vmem:[#allocation62_spill] sm:$0xff] }
 0x28b   :  { %v6180_v27 = vpop.permute.xlu0 %987  ;;  %1125 = vmatpush1.msra.mxu0 %v6059_v61  ;;  %1202 = vmatpush1.msra.mxu1 %v829_v57  ;;  %v9671_v61 = vld [vmem:[#allocation58_spill] sm:$0xff]  ;;  %v765_v15 = vmul.f32 %v760_v7, %v5776_v50  ;;  %v739_v4 = vsel %vm278_vm5, %v9673_v12, %v9672_v40  ;;  %v766_v31 = vmul.f32 %v759_v28, %v5773_v49  ;;  %v9679_v7 = vld [vmem:[#allocation27_spill] sm:$0xff]  ;;  %v9681_v28 = vld [vmem:[#allocation65_spill] sm:$0xff] }
 0x28c   :  { %1126 = vmatprep.subr.mxu0 %v808_v36  ;;  %1203 = vmatprep.subr.mxu1 %v810_v59  ;;  %v1008_v62 = vpop.permute.xlu1 %1007  ;;  %v741_v57 = vsel %vm278_vm5, %v9671_v61, %v9670_v14  ;;  %v742_v8 = vsel %vm278_vm5, %v9672_v40, %v9671_v61  ;;  %v9675_v59 = vld [vmem:[#allocation29_spill] sm:$0xff]  ;;  %v701_v40 = vsel %vm204_vm7, %v6098_v39, %v9681_v28 }
 0x28d   :  { %1127 = vmatpush1.msra.mxu0 %v807_v22  ;;  %1204 = vmatpush1.msra.mxu1 %v809_v37  ;;  %v764_v22 = vmul.f32 %v761_v0, %v5752_v30  ;;  %v743_v36 = vmul.f32 %v742_v8, %v5785_v56  ;;  %v9674_v37 = vld [vmem:[#allocation26_spill] sm:$0xff]  ;;  %v744_v34 = vmul.f32 %v741_v57, %v5770_v47 }
 0x28e   :  { %1128 = vmatprep.subr.mxu0 %v788_v53  ;;  %1205 = vmatprep.subr.mxu1 %v790_v60  ;;  %v9676_v53 = vld [vmem:[#allocation61_spill] sm:$0xff]  ;;  %v9680_v60 = vld [vmem:[#allocation28_spill] sm:$0xff]  ;;  %v746_v57 = vmul.f32 %v739_v4, %v5799_v18  ;;  %v702_v8 = vsel %vm204_vm7, %v6117_v43, %v6098_v39  ;;  %v699_v12 = vsel %vm204_vm7, %v696_v13, %v6117_v43 }
 0x28f   :  { %v6215_v24 = vpop.permute.xlu0 %983  ;;  %1129 = vmatpush1.msra.mxu0 %v787_v32  ;;  %1206 = vmatpush1.msra.mxu1 %v789_v1  ;;  %v721_v48 = vsel %vm241_vm6, %v9677_v2, %v9676_v53  ;;  %v745_v32 = vmul.f32 %v740_v58, %v5802_v20  ;;  %v9678_v1 = vld [vmem:[#allocation63_spill] sm:$0xff]  ;;  %v720_v61 = vsel %vm241_vm6, %v9676_v53, %v6119_v41 }
 0x290   :  { %1130 = vmatprep.subr.mxu0 %v9674_v37  ;;  %1207 = vmatprep.subr.mxu1 %v9675_v59  ;;  %v986_v45 = vpop.permute.xlu1 %985  ;;  %v719_v0 = vsel %vm241_vm6, %v6119_v41, %v9678_v1  ;;  %v722_v14 = vsel %vm241_vm6, %v9678_v1, %v9677_v2  ;;  %v700_v41 = vsel %vm204_vm7, %v9681_v28, %v696_v13 }
 0x291   :  { %1131 = vmatpush1.msra.mxu0 %v9679_v7  ;;  %1208 = vmatpush1.msra.mxu1 %v9680_v60  ;;  %v726_v37 = vmul.f32 %v719_v0, %v5825_v51  ;;  %v723_v39 = vmul.f32 %v722_v14, %v5811_v29  ;;  %v725_v59 = vmul.f32 %v720_v61, %v5828_v52  ;;  %v9682_v0 = vmov 1.0   ;;  %v9684_v60 = vld [vmem:[#allocation31_spill] sm:$0xff]  ;;  %v9685_v61 = vld [vmem:[#allocation32_spill] sm:$0xff] }
 0x292   :  { %1132 = vmatprep.subr.mxu0 %v764_v22  ;;  %1209 = vmatprep.subr.mxu1 %v766_v31  ;;  %v724_v22 = vmul.f32 %v721_v48, %v5796_v17  ;;  %v703_v43 = vmul.f32 %v702_v8, %v5831_v55  ;;  %v706_v13 = vmul.f32 %v699_v12, %v5840_v5  ;;  %v9686_v8 = vld [vmem:[#allocation33_spill] sm:$0xff] }
 0x293   :  { %v1006_v58 = vpop.permute.xlu0 %1005  ;;  %1133 = vmatpush1.msra.mxu0 %v763_v9  ;;  %1210 = vmatpush1.msra.mxu1 %v765_v15  ;;  %v704_v9 = vmul.f32 %v701_v40, %v5822_v46  ;;  %v705_v15 = vmul.f32 %v700_v41, %v5846_v23  ;;  %v993_v1 = vsel %vm430_vm1, %v6215_v24, %v986_v45 }
 0x294   :  { %1134 = vmatprep.subr.mxu0 %v744_v34  ;;  %1211 = vmatprep.subr.mxu1 %v746_v57  ;;  %v1010_v4 = vpop.permute.xlu1 %1009  ;;  %v1012_v31 = vsel %vm467_vm0, %v1006_v58, %v1008_v62  ;;  %v995_v12 = vmul.f32 %v993_v1, %v9686_v8 }
 0x295   :  { %1135 = vmatpush1.msra.mxu0 %v743_v36  ;;  %1212 = vmatpush1.msra.mxu1 %v745_v32  ;;  %v1014_v34 = vsel %vm467_vm0, %v1010_v4, %v6151_v35  ;;  %v1013_v36 = vsel %vm467_vm0, %v6151_v35, %v1006_v58  ;;  %v1011_v2 = vsel %vm467_vm0, %v1008_v62, %v1010_v4 }
 0x296   :  { %1136 = vmatprep.subr.mxu0 %v724_v22  ;;  %1213 = vmatprep.subr.mxu1 %v726_v37  ;;  %v992_v32 = vsel %vm430_vm1, %v986_v45, %v6180_v27  ;;  %v1016_v35 = vmul.f32 %v5644_v11, %v1012_v31  ;;  %v1018_v62 = vmul.f32 %v5660_v21, %v1014_v34  ;;  %v1025_v31 = vld [vmem:[#allocation10 + $0x10] sm:$0xff]  ;;  %v9687_v34 = vmov 0.0  }
 0x297   :  { %v968_v53 = vpop.permute.xlu0 %967  ;;  %1137 = vmatpush1.msra.mxu0 %v723_v39  ;;  %1214 = vmatpush1.msra.mxu1 %v725_v59  ;;  %v1015_v14 = vmul.f32 %v9684_v60, %v1013_v36  ;;  %v1017_v57 = vmul.f32 %v9685_v61, %v1011_v2  ;;  %v996_v40 = vmul.f32 %v992_v32, %v5657_v19  ;;  %v1023_v59 = vld [vmem:[#allocation10] sm:$0xff] }
 0x298   :  { %1138 = vmatprep.subr.mxu0 %v704_v9  ;;  %1215 = vmatprep.subr.mxu1 %v706_v13  ;;  %v966_v48 = vpop.permute.xlu1 %965 }
 0x299   :  { %1139 = vmatpush1.msra.mxu0 %v703_v43  ;;  %1216 = vmatpush1.msra.mxu1 %v705_v15  ;;  %v972_v28 = vsel %vm393_vm2, %v966_v48, %v968_v53  ;;  %v1026_v43 = vld [vmem:[#allocation10 + $0x18] sm:$0xff] }
 0x29a   :  { %5103 = vmatprep.subr.msk.mxu0 %vm164_vm8, %v9682_v0  ;;  %5105 = vmatprep.subr.msk.mxu1 %vm164_vm8, %v9682_v0  ;;  %v976_v22 = vmul.f32 %v972_v28, %v9661_v26 }
 0x29b   :  { %v964_v45 = vpop.permute.xlu0 %963  ;;  %5104 = vmatpush1.msk.msra.mxu0 %vm164_vm8, %v9682_v0  ;;  %5106 = vmatpush1.msk.msra.mxu1 %vm164_vm8, %v9682_v0 }
 0x29c   :  { %v973_v11 = vsel %vm393_vm2, %v964_v45, %v966_v48  ;;  %1168 = vmatprep.subr.mxu0 %v1016_v35  ;;  %1245 = vmatprep.subr.mxu1 %v1018_v62  ;;  %v990_v21 = vpop.permute.xlu1 %989 }
 0x29d   :  { %v991_v58 = vsel %vm430_vm1, %v6180_v27, %v990_v21  ;;  %v994_v41 = vsel %vm430_vm1, %v990_v21, %v6215_v24  ;;  %1169 = vmatpush2.msra.mxu0 %v1015_v14  ;;  %1246 = vmatpush2.msra.mxu1 %v1017_v57  ;;  %v975_v39 = vmul.f32 %v973_v11, %v9659_v33 }
 0x29e   :  { %v997_v4 = vmul.f32 %v991_v58, %v5694_v42  ;;  %1170 = vmatprep.subr.mxu0 %v996_v40  ;;  %v998_v37 = vmul.f32 %v994_v41, %v9658_v25  ;;  %v6401_v40 = vld [vmem:[#allocation4 + $0x10] sm:$0xff]  ;;  %v6431_v58 = vld [vmem:[#allocation4 + $0x8] sm:$0xff]  ;;  %v6443_v41 = vld [vmem:[#allocation4 + $0x18] sm:$0xff] }
 0x29f   :  { %1171 = vmatpush2.msra.mxu0 %v995_v12  ;;  %9690 = vst [vmem:[#allocation54_spill] sm:$0xff] %v6401_v40  ;;  %v6407_v12 = vld [vmem:[#allocation4] sm:$0xff]  ;;  %9692 = vst [vmem:[#allocation53_spill] sm:$0xff] %v6431_v58 }
 0x2a0   :  { %1172 = vmatprep.subr.mxu0 %v976_v22  ;;  %1247 = vmatprep.subr.mxu1 %v998_v37  ;;  %v970_v27 = vpop.permute.xlu1 %969  ;;  %9691 = vst [vmem:[#allocation66_spill] sm:$0xff] %v6407_v12  ;;  %9693 = vst [vmem:[#allocation55_spill] sm:$0xff] %v6443_v41 }
 0x2a1   :  { %v971_v24 = vsel %vm393_vm2, %v968_v53, %v970_v27  ;;  %v974_v9 = vsel %vm393_vm2, %v970_v27, %v964_v45  ;;  %1173 = vmatpush2.msra.mxu0 %v975_v39  ;;  %1248 = vmatpush2.msra.mxu1 %v997_v4 }
 0x2a2   :  { %v977_v13 = vmul.f32 %v971_v24, %v9662_v54  ;;  %1175 = vmatmul.mubr.f32.vlgmr.msra.gmra.mxu0 %v1023_v59  ;;  %v978_v15 = vmul.f32 %v974_v9, %v9664_v3 }
 0x2a3   :  { %5072 = vmatprep.mubr.msk.f32.mxu0 %vm1103_vm10, %v1026_v43 }
 0x2a4   :  { %1249 = vmatprep.subr.mxu1 %v978_v15 }
 0x2a5   :  { %1250 = vmatpush2.msra.mxu1 %v977_v13 }
 0x2a6   :  { %1181 = vmatmul.mubr.f32.gmra.mxu0 %v1025_v31  ;;  %1252 = vmatmul.mubr.f32.vlgmr.msra.gmra.mxu1 %v1023_v59 }
 0x2a7   :  { %5074 = vmatprep.mubr.msk.f32.mxu1 %vm1103_vm10, %v1026_v43  ;;  %1572 = vmatprep.mubr.f32.mxu0 %v9687_v34 }
 0x2aa   :  { %1258 = vmatmul.mubr.f32.gmra.mxu1 %v1025_v31 }
 0x2ab   :  { %1643 = vmatprep.mubr.f32.mxu1 %v9687_v34  ;;  %v6523_v34 = vld [vmem:[#allocation7 + $0x30] ss:$0 sm:$0xff] }
 0x2ac   :  { %9695 = vst [vmem:[#allocation60_spill] sm:$0xff] %v6523_v34 }
 0x362   :  { %v1176_v53 = vpop.f32.mrf.mxu0 }
 0x364   :  { %v1178_v36 = vpop.f32.mrf.mxu0 }
 0x366   :  { %v1182_v2 = vpop.f32.mrf.mxu0  ;;  %v1253_v48 = vpop.f32.mrf.mxu1 }
 0x367   :  { %v1280_v32 = vadd.f32 %v1182_v2, %v1176_v53 }
 0x368   :  { %v1255_v1 = vpop.f32.mrf.mxu1  ;;  %v1184_v61 = vpop.f32.mrf.mxu0 }
 0x369   :  { %v6323_v35 = vmul.f32 0.5, %v1280_v32  ;;  %v1281_v57 = vadd.f32 %v1184_v61, %v1178_v36 }
 0x36a   :  { %v1259_v62 = vpop.f32.mrf.mxu1 }
 0x36b   :  { %9688 = vst [vmem:[#allocation52_spill] sm:$0xff] %v6323_v35  ;;  %v1282_v60 = vadd.f32 %v1259_v62, %v1253_v48  ;;  %1444 = vrot.lane.b32.xlu0 %v6323_v35, %s5409_s7  ;;  %v6353_v45 = vmul.f32 0.5, %v1281_v57 }
 0x36c   :  { %v1261_v28 = vpop.f32.mrf.mxu1 }
 0x36d   :  { %v6327_v14 = vmul.f32 0.5, %v1282_v60  ;;  %9689 = vst [vmem:[#allocation51_spill] sm:$0xff] %v6353_v45  ;;  %v1283_v11 = vadd.f32 %v1261_v28, %v1255_v1  ;;  %v6520_v28 = vld [vmem:[#allocation7 + $0x20] ss:$0 sm:$0xff] }
 0x36e   :  { %9694 = vst [vmem:[#allocation56_spill] sm:$0xff] %v6520_v28 }
 0x36f   :  { %1428 = vrot.lane.b32.xlu0 %v6327_v14, %s5410_s9  ;;  %1448 = vrot.lane.b32.xlu1 %v6327_v14, %s5409_s7  ;;  %v6359_v21 = vmul.f32 0.5, %v1283_v11 }
 0x373   :  { %1424 = vrot.lane.b32.xlu0 %v6323_v35, %s5410_s9  ;;  %1340 = vrot.lane.b32.xlu1 %v6323_v35, %s5414_s19 }
 0x377   :  { %1408 = vrot.lane.b32.xlu0 %v6327_v14, %s5411_s23  ;;  %1364 = vrot.lane.b32.xlu1 %v6327_v14, %s5413_s18 }
 0x37b   :  { %1404 = vrot.lane.b32.xlu0 %v6323_v35, %s5411_s23  ;;  %1320 = vrot.lane.b32.xlu1 %v6323_v35, %s5399_s24 }
 0x37f   :  { %1388 = vrot.lane.b32.xlu0 %v6327_v14, %s5412_s17  ;;  %1344 = vrot.lane.b32.xlu1 %v6327_v14, %s5414_s19 }
 0x383   :  { %1384 = vrot.lane.b32.xlu0 %v6323_v35, %s5412_s17  ;;  %1300 = vrot.lane.b32.xlu1 %v6323_v35, %s5415_s5 }
 0x387   :  { %1360 = vrot.lane.b32.xlu0 %v6323_v35, %s5413_s18  ;;  %1426 = vrot.lane.b32.xlu1 %v6353_v45, %s5410_s9 }
 0x38b   :  { %1446 = vrot.lane.b32.xlu0 %v6353_v45, %s5409_s7  ;;  %1450 = vrot.lane.b32.xlu1 %v6359_v21, %s5409_s7 }
 0x38f   :  { %1366 = vrot.lane.b32.xlu0 %v6359_v21, %s5413_s18  ;;  %1406 = vrot.lane.b32.xlu1 %v6353_v45, %s5411_s23 }
 0x393   :  { %1342 = vrot.lane.b32.xlu0 %v6353_v45, %s5414_s19  ;;  %1430 = vrot.lane.b32.xlu1 %v6359_v21, %s5410_s9 }
 0x397   :  { %1346 = vrot.lane.b32.xlu0 %v6359_v21, %s5414_s19  ;;  %1386 = vrot.lane.b32.xlu1 %v6353_v45, %s5412_s17 }
 0x39b   :  { %1322 = vrot.lane.b32.xlu0 %v6353_v45, %s5399_s24  ;;  %1410 = vrot.lane.b32.xlu1 %v6359_v21, %s5411_s23 }
 0x39f   :  { %1326 = vrot.lane.b32.xlu0 %v6359_v21, %s5399_s24  ;;  %1390 = vrot.lane.b32.xlu1 %v6359_v21, %s5412_s17 }
 0x3a3   :  { %1302 = vrot.lane.b32.xlu0 %v6353_v45, %s5415_s5  ;;  %1362 = vrot.lane.b32.xlu1 %v6353_v45, %s5413_s18 }
 0x3a7   :  { %1306 = vrot.lane.b32.xlu0 %v6359_v21, %s5415_s5  ;;  %1324 = vrot.lane.b32.xlu1 %v6327_v14, %s5399_s24 }
 0x3ab   :  { %1910 = vrot.lane.b32.xlu0 %v6323_v35, %s5412_s17  ;;  %1304 = vrot.lane.b32.xlu1 %v6327_v14, %s5415_s5 }
 0x3af   :  { %1886 = vrot.lane.b32.xlu0 %v6323_v35, %s5413_s18  ;;  %1914 = vrot.lane.b32.xlu1 %v6327_v14, %s5412_s17 }
 0x3b3   :  { %1806 = vrot.lane.b32.xlu0 %v6401_v40, %s5409_s7  ;;  %1866 = vrot.lane.b32.xlu1 %v6323_v35, %s5414_s19 }
 0x3b7   :  { %1802 = vrot.lane.b32.xlu0 %v6407_v12, %s5409_s7  ;;  %1890 = vrot.lane.b32.xlu1 %v6327_v14, %s5413_s18 }
 0x3bb   :  { %1786 = vrot.lane.b32.xlu0 %v6401_v40, %s5410_s9  ;;  %1846 = vrot.lane.b32.xlu1 %v6323_v35, %s5399_s24 }
 0x3bf   :  { %1782 = vrot.lane.b32.xlu0 %v6407_v12, %s5410_s9  ;;  %1870 = vrot.lane.b32.xlu1 %v6327_v14, %s5414_s19 }
 0x3c3   :  { %1766 = vrot.lane.b32.xlu0 %v6401_v40, %s5411_s23  ;;  %1826 = vrot.lane.b32.xlu1 %v6323_v35, %s5415_s5 }
 0x3c7   :  { %1762 = vrot.lane.b32.xlu0 %v6407_v12, %s5411_s23  ;;  %1850 = vrot.lane.b32.xlu1 %v6327_v14, %s5399_s24 }
 0x3cb   :  { %1746 = vrot.lane.b32.xlu0 %v6401_v40, %s5412_s17  ;;  %1804 = vrot.lane.b32.xlu1 %v6431_v58, %s5409_s7 }
 0x3cf   :  { %1742 = vrot.lane.b32.xlu0 %v6407_v12, %s5412_s17  ;;  %1830 = vrot.lane.b32.xlu1 %v6327_v14, %s5415_s5 }
 0x3d3   :  { %1718 = vrot.lane.b32.xlu0 %v6407_v12, %s5413_s18  ;;  %1784 = vrot.lane.b32.xlu1 %v6431_v58, %s5410_s9 }
 0x3d7   :  { %1724 = vrot.lane.b32.xlu0 %v6443_v41, %s5413_s18  ;;  %1808 = vrot.lane.b32.xlu1 %v6443_v41, %s5409_s7 }
 0x3db   :  { %1700 = vrot.lane.b32.xlu0 %v6431_v58, %s5414_s19  ;;  %1764 = vrot.lane.b32.xlu1 %v6431_v58, %s5411_s23 }
 0x3dd   :  { %v1445_v4 = vpop.permute.xlu0 %1444 }
 0x3df   :  { %1704 = vrot.lane.b32.xlu0 %v6443_v41, %s5414_s19  ;;  %1788 = vrot.lane.b32.xlu1 %v6443_v41, %s5410_s9 }
 0x3e1   :  { %v6457_v22 = vpop.permute.xlu0 %1428  ;;  %v1449_v37 = vpop.permute.xlu1 %1448 }
 0x3e3   :  { %1680 = vrot.lane.b32.xlu0 %v6431_v58, %s5399_s24  ;;  %1744 = vrot.lane.b32.xlu1 %v6431_v58, %s5412_s17 }
 0x3e5   :  { %v6463_v39 = vpop.permute.xlu0 %1424  ;;  %v6465_v59 = vpop.permute.xlu1 %1340 }
 0x3e7   :  { %1684 = vrot.lane.b32.xlu0 %v6443_v41, %s5399_s24  ;;  %1768 = vrot.lane.b32.xlu1 %v6443_v41, %s5411_s23 }
 0x3e9   :  { %v6471_v27 = vpop.permute.xlu0 %1408  ;;  %v6473_v43 = vpop.permute.xlu1 %1364 }
 0x3eb   :  { %1660 = vrot.lane.b32.xlu0 %v6431_v58, %s5415_s5  ;;  %1748 = vrot.lane.b32.xlu1 %v6443_v41, %s5412_s17 }
 0x3ed   :  { %v6479_v24 = vpop.permute.xlu0 %1404  ;;  %v6481_v9 = vpop.permute.xlu1 %1320 }
 0x3ef   :  { %1664 = vrot.lane.b32.xlu0 %v6443_v41, %s5415_s5  ;;  %1720 = vrot.lane.b32.xlu1 %v6431_v58, %s5413_s18 }
 0x3f1   :  { %v6487_v13 = vpop.permute.xlu0 %1388  ;;  %v6489_v15 = vpop.permute.xlu1 %1344 }
 0x3f3   :  { %1974 = vrot.lane.b32.xlu0 %v6327_v14, %s5409_s7  ;;  %1698 = vrot.lane.b32.xlu1 %v6407_v12, %s5414_s19 }
 0x3f5   :  { %v6495_v31 = vpop.permute.xlu0 %1384  ;;  %v6497_v53 = vpop.permute.xlu1 %1300 }
 0x3f7   :  { %1970 = vrot.lane.b32.xlu0 %v6323_v35, %s5409_s7  ;;  %1722 = vrot.lane.b32.xlu1 %v6401_v40, %s5413_s18 }
 0x3f9   :  { %v6503_v36 = vpop.permute.xlu0 %1360  ;;  %v1427_v2 = vpop.permute.xlu1 %1426 }
 0x3fa   :  { %v1433_v48 = vsel %vm430_vm1, %v1427_v2, %v6457_v22 }
 0x3fb   :  { %1954 = vrot.lane.b32.xlu0 %v6327_v14, %s5410_s9  ;;  %1678 = vrot.lane.b32.xlu1 %v6407_v12, %s5399_s24 }
 0x3fd   :  { %v1447_v32 = vpop.permute.xlu0 %1446  ;;  %v1451_v1 = vpop.permute.xlu1 %1450 }
 0x3fe   :  { %v1453_v62 = vsel %vm467_vm0, %v1447_v32, %v1449_v37  ;;  %v1454_v60 = vsel %vm467_vm0, %v1445_v4, %v1447_v32  ;;  %v1452_v61 = vsel %vm467_vm0, %v1449_v37, %v1451_v1  ;;  %v1455_v57 = vsel %vm467_vm0, %v1451_v1, %v1445_v4  ;;  %v6530_v32 = vld [vmem:[#allocation7 + $0x28] ss:$0 sm:$0xff]  ;;  %v6536_v1 = vld [vmem:[#allocation7 + $0x38] ss:$0 sm:$0xff] }
 0x3ff   :  { %v1456_v11 = vmul.f32 %v6520_v28, %v1454_v60  ;;  %v1458_v41 = vmul.f32 %v6523_v34, %v1452_v61  ;;  %1912 = vrot.lane.b32.xlu0 %v6353_v45, %s5412_s17  ;;  %1702 = vrot.lane.b32.xlu1 %v6401_v40, %s5414_s19  ;;  %9696 = vst [vmem:[#allocation57_spill] sm:$0xff] %v6530_v32 }
 0x400   :  { %v1457_v37 = vmul.f32 %v6530_v32, %v1453_v62  ;;  %v1434_v4 = vsel %vm430_vm1, %v6463_v39, %v1427_v2  ;;  %v1459_v60 = vmul.f32 %v6536_v1, %v1455_v57  ;;  %v1437_v32 = vmul.f32 %v1433_v48, %v5657_v19 }
 0x401   :  { %v1367_v61 = vpop.permute.xlu0 %1366  ;;  %v1407_v58 = vpop.permute.xlu1 %1406  ;;  %v1436_v2 = vmul.f32 %v1434_v4, %v9686_v8 }
 0x402   :  { %1520 = vmatprep.subr.mxu0 %v1457_v37  ;;  %1591 = vmatprep.subr.mxu1 %v1459_v60  ;;  %v1413_v34 = vsel %vm393_vm2, %v1407_v58, %v6471_v27  ;;  %v1414_v62 = vsel %vm393_vm2, %v6479_v24, %v1407_v58 }
 0x403   :  { %v1416_v28 = vmul.f32 %v1414_v62, %v9659_v33  ;;  %1521 = vmatpush1.msra.mxu0 %v1456_v11  ;;  %1592 = vmatpush1.msra.mxu1 %v1458_v41  ;;  %v1417_v57 = vmul.f32 %v1413_v34, %v9661_v26 }
 0x404   :  { %1522 = vmatprep.subr.mxu0 %v1437_v32  ;;  %1892 = vrot.lane.b32.xlu0 %v6359_v21, %s5413_s18 }
 0x405   :  { %1658 = vrot.lane.b32.xlu1 %v6407_v12, %s5415_s5  ;;  %1523 = vmatpush1.msra.mxu0 %v1436_v2  ;;  %v1343_v37 = vpop.permute.xlu0 %1342  ;;  %v1431_v58 = vpop.permute.xlu1 %1430 }
 0x406   :  { %1524 = vmatprep.subr.mxu0 %v1417_v57  ;;  %v1432_v48 = vsel %vm430_vm1, %v6457_v22, %v1431_v58  ;;  %v1435_v41 = vsel %vm430_vm1, %v1431_v58, %v6463_v39 }
 0x407   :  { %v1438_v34 = vmul.f32 %v1432_v48, %v5694_v42  ;;  %1525 = vmatpush1.msra.mxu0 %v1416_v28  ;;  %v1439_v11 = vmul.f32 %v1435_v41, %v9658_v25 }
 0x408   :  { %1868 = vrot.lane.b32.xlu0 %v6353_v45, %s5414_s19 }
 0x409   :  { %1682 = vrot.lane.b32.xlu1 %v6401_v40, %s5399_s24  ;;  %v1347_v32 = vpop.permute.xlu0 %1346  ;;  %1593 = vmatprep.subr.mxu1 %v1439_v11  ;;  %v1387_v4 = vpop.permute.xlu1 %1386 }
 0x40a   :  { %v1393_v22 = vsel %vm356_vm3, %v1387_v4, %v6487_v13  ;;  %v1394_v39 = vsel %vm356_vm3, %v6495_v31, %v1387_v4  ;;  %1594 = vmatpush1.msra.mxu1 %v1438_v34 }
 0x40b   :  { %v1396_v28 = vmul.f32 %v1394_v39, %v9663_v16  ;;  %v1397_v60 = vmul.f32 %v1393_v22, %v9667_v44  ;;  %v1371_v39 = vsel %vm315_vm4, %v1367_v61, %v6503_v36 }
 0x40c   :  { %1872 = vrot.lane.b32.xlu0 %v6359_v21, %s5414_s19 }
 0x40d   :  { %1662 = vrot.lane.b32.xlu1 %v6401_v40, %s5415_s5  ;;  %v1323_v62 = vpop.permute.xlu0 %1322  ;;  %1526 = vmatprep.subr.mxu0 %v1397_v60  ;;  %v1411_v2 = vpop.permute.xlu1 %1410 }
 0x40e   :  { %v1412_v57 = vsel %vm393_vm2, %v6471_v27, %v1411_v2  ;;  %v1415_v58 = vsel %vm393_vm2, %v1411_v2, %v6479_v24  ;;  %1527 = vmatpush1.msra.mxu0 %v1396_v28  ;;  %v1350_v2 = vsel %vm278_vm5, %v6465_v59, %v1343_v37 }
 0x40f   :  { %v1418_v48 = vmul.f32 %v1412_v57, %v9662_v54  ;;  %1528 = vmatprep.subr.mxu0 %v6353_v45  ;;  %v1419_v41 = vmul.f32 %v1415_v58, %v9664_v3  ;;  %v1348_v57 = vsel %vm278_vm5, %v6489_v15, %v1347_v32 }
 0x410   :  { %1848 = vrot.lane.b32.xlu0 %v6353_v45, %s5399_s24  ;;  %1529 = vmatpush1.msra.mxu0 %v6323_v35 }
 0x411   :  { %1916 = vrot.lane.b32.xlu1 %v6359_v21, %s5412_s17  ;;  %v1327_v27 = vpop.permute.xlu0 %1326  ;;  %1595 = vmatprep.subr.mxu1 %v1419_v41  ;;  %v1391_v34 = vpop.permute.xlu1 %1390 }
 0x412   :  { %v1392_v24 = vsel %vm356_vm3, %v6487_v13, %v1391_v34  ;;  %v1395_v11 = vsel %vm356_vm3, %v1391_v34, %v6495_v31  ;;  %1596 = vmatpush1.msra.mxu1 %v1418_v48  ;;  %v1368_v13 = vsel %vm315_vm4, %v6473_v43, %v1367_v61  ;;  %v1349_v31 = vsel %vm278_vm5, %v1343_v37, %v6489_v15 }
 0x413   :  { %v1398_v4 = vmul.f32 %v1392_v24, %v5735_v10  ;;  %v1399_v22 = vmul.f32 %v1395_v11, %v5726_v63  ;;  %v1372_v48 = vmul.f32 %v1371_v39, %v5760_v38  ;;  %v1354_v34 = vmul.f32 %v1349_v31, %v5802_v20 }
 0x414   :  { %1852 = vrot.lane.b32.xlu0 %v6359_v21, %s5399_s24  ;;  %v1351_v15 = vsel %vm278_vm5, %v1347_v32, %v6465_v59  ;;  %v1355_v59 = vmul.f32 %v1348_v57, %v5799_v18  ;;  %v1331_v32 = vsel %vm241_vm6, %v1327_v27, %v6481_v9 }
 0x415   :  { %1888 = vrot.lane.b32.xlu1 %v6353_v45, %s5413_s18  ;;  %v1303_v28 = vpop.permute.xlu0 %1302  ;;  %1597 = vmatprep.subr.mxu1 %v1399_v22  ;;  %v1363_v60 = vpop.permute.xlu1 %1362 }
 0x416   :  { %v1369_v61 = vsel %vm315_vm4, %v1363_v60, %v6473_v43  ;;  %v1370_v58 = vsel %vm315_vm4, %v6503_v36, %v1363_v60  ;;  %1598 = vmatpush1.msra.mxu1 %v1398_v4  ;;  %v1375_v43 = vmul.f32 %v1368_v13, %v5773_v49  ;;  %v1330_v36 = vsel %vm241_vm6, %v6481_v9, %v1323_v62 }
 0x417   :  { %v1374_v41 = vmul.f32 %v1369_v61, %v5776_v50  ;;  %1599 = vmatprep.subr.mxu1 %v6359_v21  ;;  %v1373_v37 = vmul.f32 %v1370_v58, %v5752_v30  ;;  %v1353_v4 = vmul.f32 %v1350_v2, %v5770_v47  ;;  %v1352_v13 = vmul.f32 %v1351_v15, %v5785_v56 }
 0x418   :  { %1828 = vrot.lane.b32.xlu0 %v6353_v45, %s5415_s5  ;;  %1600 = vmatpush1.msra.mxu1 %v6327_v14  ;;  %v1310_v31 = vsel %vm204_vm7, %v6497_v53, %v1303_v28  ;;  %v1332_v2 = vmul.f32 %v1331_v32, %v5811_v29 }
 0x419   :  { %1972 = vrot.lane.b32.xlu1 %v6353_v45, %s5409_s7  ;;  %v1307_v24 = vpop.permute.xlu0 %1306  ;;  %1530 = vmatprep.subr.mxu0 %v1373_v37  ;;  %v1325_v11 = vpop.permute.xlu1 %1324 }
 0x41a   :  { %1601 = vmatprep.subr.mxu1 %v1375_v43  ;;  %v1328_v22 = vsel %vm241_vm6, %v1325_v11, %v1327_v27  ;;  %v1329_v39 = vsel %vm241_vm6, %v1323_v62, %v1325_v11  ;;  %1531 = vmatpush1.msra.mxu0 %v1372_v48  ;;  %v1311_v9 = vsel %vm204_vm7, %v1307_v24, %v6497_v53 }
 0x41b   :  { %1602 = vmatpush1.msra.mxu1 %v1374_v41  ;;  %1532 = vmatprep.subr.mxu0 %v1353_v4  ;;  %v1335_v60 = vmul.f32 %v1328_v22, %v5825_v51  ;;  %v1334_v27 = vmul.f32 %v1329_v39, %v5828_v52  ;;  %v1333_v62 = vmul.f32 %v1330_v36, %v5796_v17  ;;  %v1464_v36 = vld [vmem:[#allocation12] sm:$0xff] }
 0x41c   :  { %1832 = vrot.lane.b32.xlu0 %v6359_v21, %s5415_s5  ;;  %1603 = vmatprep.subr.mxu1 %v1355_v59  ;;  %v1313_v48 = vmul.f32 %v1310_v31, %v5822_v46  ;;  %v1312_v41 = vmul.f32 %v1311_v9, %v5831_v55 }
 0x41d   :  { %1952 = vrot.lane.b32.xlu1 %v6353_v45, %s5410_s9  ;;  %1533 = vmatpush1.msra.mxu0 %v1352_v13  ;;  %v6665_v57 = vpop.permute.xlu0 %1910  ;;  %v1305_v61 = vpop.permute.xlu1 %1304 }
 0x41e   :  { %1604 = vmatpush1.msra.mxu1 %v1354_v34  ;;  %1534 = vmatprep.subr.mxu0 %v1333_v62  ;;  %v1308_v53 = vsel %vm204_vm7, %v1305_v61, %v1307_v24  ;;  %v1309_v58 = vsel %vm204_vm7, %v1303_v28, %v1305_v61 }
 0x41f   :  { %1605 = vmatprep.subr.mxu1 %v1335_v60  ;;  %v1314_v37 = vmul.f32 %v1309_v58, %v5846_v23  ;;  %1535 = vmatpush1.msra.mxu0 %v1332_v2  ;;  %v1315_v15 = vmul.f32 %v1308_v53, %v5840_v5 }
 0x420   :  { %1606 = vmatpush1.msra.mxu1 %v1334_v27  ;;  %1536 = vmatprep.subr.mxu0 %v1313_v48 }
 0x421   :  { %1537 = vmatpush1.msra.mxu0 %v1312_v41  ;;  %v6675_v34 = vpop.permute.xlu0 %1886  ;;  %1607 = vmatprep.subr.mxu1 %v1315_v15  ;;  %v6677_v43 = vpop.permute.xlu1 %1914 }
 0x422   :  { %5107 = vmatprep.subr.msk.mxu0 %vm164_vm8, %v9682_v0  ;;  %1608 = vmatpush1.msra.mxu1 %v1314_v37 }
 0x423   :  { %5108 = vmatpush1.msk.msra.mxu0 %vm164_vm8, %v9682_v0  ;;  %5109 = vmatprep.subr.msk.mxu1 %vm164_vm8, %v9682_v0 }
 0x424   :  { %5075 = vmatmul.mubr.msk.f32.vlgmr.msra.gmra.mxu0 %vm537_vm9, %v1464_v36  ;;  %5110 = vmatpush1.msk.msra.mxu1 %vm164_vm8, %v9682_v0 }
 0x425   :  { %v1807_v28 = vpop.permute.xlu0 %1806  ;;  %5076 = vmatmul.mubr.msk.f32.vlgmr.msra.gmra.mxu1 %vm537_vm9, %v1464_v36  ;;  %v6693_v24 = vpop.permute.xlu1 %1866 }
 0x429   :  { %v6695_v11 = vpop.permute.xlu0 %1802  ;;  %v6697_v4 = vpop.permute.xlu1 %1890 }
 0x42d   :  { %v6699_v59 = vpop.permute.xlu0 %1786  ;;  %v6701_v32 = vpop.permute.xlu1 %1846 }
 0x431   :  { %v6703_v22 = vpop.permute.xlu0 %1782  ;;  %v6705_v39 = vpop.permute.xlu1 %1870 }
 0x435   :  { %v6707_v13 = vpop.permute.xlu0 %1766  ;;  %v6709_v31 = vpop.permute.xlu1 %1826 }
 0x439   :  { %v6711_v60 = vpop.permute.xlu0 %1762  ;;  %v6713_v9 = vpop.permute.xlu1 %1850 }
 0x43d   :  { %v6715_v27 = vpop.permute.xlu0 %1746  ;;  %v1805_v62 = vpop.permute.xlu1 %1804 }
 0x441   :  { %v6717_v2 = vpop.permute.xlu0 %1742  ;;  %v6719_v61 = vpop.permute.xlu1 %1830 }
 0x442   :  { %9697 = vst [vmem:[#allocation58_spill] sm:$0xff] %v6717_v2 }
 0x445   :  { %v6721_v53 = vpop.permute.xlu0 %1718  ;;  %v1785_v58 = vpop.permute.xlu1 %1784 }
 0x446   :  { %9698 = vst [vmem:[#allocation59_spill] sm:$0xff] %v6721_v53 }
 0x449   :  { %v6723_v48 = vpop.permute.xlu0 %1724  ;;  %v1809_v41 = vpop.permute.xlu1 %1808 }
 0x44a   :  { %9699 = vst [vmem:[#allocation64_spill] sm:$0xff] %v6723_v48 }
 0x44d   :  { %v6725_v37 = vpop.permute.xlu0 %1700  ;;  %v1765_v15 = vpop.permute.xlu1 %1764 }
 0x44e   :  { %9700 = vst [vmem:[#allocation26_spill] sm:$0xff] %v6725_v37 }
 0x451   :  { %v6727_v36 = vpop.permute.xlu0 %1704  ;;  %v1789_v7 = vpop.permute.xlu1 %1788 }
 0x452   :  { %9701 = vst [vmem:[#allocation29_spill] sm:$0xff] %v6727_v36 }
 0x455   :  { %v6729_v0 = vpop.permute.xlu0 %1680  ;;  %v6731_v40 = vpop.permute.xlu1 %1744 }
 0x456   :  { %9702 = vst [vmem:[#allocation61_spill] sm:$0xff] %v6729_v0 }
 0x459   :  { %v6733_v12 = vpop.permute.xlu0 %1684  ;;  %v6735_v54 = vpop.permute.xlu1 %1768 }
 0x45a   :  { %9703 = vst [vmem:[#allocation62_spill] sm:$0xff] %v6733_v12 }
 0x45d   :  { %v6737_v3 = vpop.permute.xlu0 %1660  ;;  %v6739_v53 = vpop.permute.xlu1 %1748 }
 0x45e   :  { %9704 = vst [vmem:[#allocation63_spill] sm:$0xff] %v6737_v3  ;;  %9705 = vst [vmem:[#allocation27_spill] sm:$0xff] %v6739_v53 }
 0x461   :  { %v6741_v48 = vpop.permute.xlu0 %1664  ;;  %v6743_v33 = vpop.permute.xlu1 %1720 }
 0x462   :  { %9706 = vst [vmem:[#allocation28_spill] sm:$0xff] %v6741_v48  ;;  %9707 = vst [vmem:[#allocation65_spill] sm:$0xff] %v6743_v33 }
 0x465   :  { %v6745_v37 = vpop.permute.xlu0 %1974  ;;  %v6747_v36 = vpop.permute.xlu1 %1698 }
 0x466   :  { %9708 = vst [vmem:[#allocation31_spill] sm:$0xff] %v6745_v37  ;;  %9709 = vst [vmem:[#allocation32_spill] sm:$0xff] %v6747_v36 }
 0x469   :  { %v6749_v26 = vpop.permute.xlu0 %1970  ;;  %v6751_v0 = vpop.permute.xlu1 %1722 }
 0x46a   :  { %9710 = vst [vmem:[#allocation67_spill] sm:$0xff] %v6749_v26  ;;  %9711 = vst [vmem:[#allocation68_spill] sm:$0xff] %v6751_v0 }
 0x46d   :  { %v6753_v2 = vpop.permute.xlu0 %1954  ;;  %v6755_v12 = vpop.permute.xlu1 %1678 }
 0x46e   :  { %9712 = vst [vmem:[#allocation69_spill] sm:$0xff] %v6753_v2  ;;  %9713 = vst [vmem:[#allocation70_spill] sm:$0xff] %v6755_v12 }
 0x471   :  { %v1913_v25 = vpop.permute.xlu0 %1912  ;;  %v6757_v3 = vpop.permute.xlu1 %1702 }
 0x472   :  { %9714 = vst [vmem:[#allocation71_spill] sm:$0xff] %v6757_v3  ;;  %v1919_v48 = vsel %vm356_vm3, %v1913_v25, %v6677_v43  ;;  %v1920_v37 = vsel %vm356_vm3, %v6665_v57, %v1913_v25  ;;  %v1812_v25 = vsel %vm467_vm0, %v6695_v11, %v1805_v62 }
 0x473   :  { %v1922_v36 = vmul.f32 %v1920_v37, %v9663_v16  ;;  %v1923_v26 = vmul.f32 %v1919_v48, %v9667_v44  ;;  %v1811_v37 = vsel %vm467_vm0, %v1805_v62, %v1807_v28 }
 0x475   :  { %2286 = vmatprep.subr.mxu0 %v1923_v26  ;;  %v1792_v26 = vsel %vm430_vm1, %v6703_v22, %v1785_v58 }
 0x476   :  { %v1893_v0 = vpop.permute.xlu0 %1892  ;;  %2287 = vmatpush1.msra.mxu0 %v1922_v36  ;;  %v1810_v36 = vsel %vm467_vm0, %v1807_v28, %v1809_v41  ;;  %v6800_v16 = vmul.f32 %v1792_v26, %v9686_v8  ;;  %v1790_v26 = vsel %vm430_vm1, %v6699_v59, %v1789_v7 }
 0x477   :  { %v6767_v2 = vpop.permute.xlu1 %1658  ;;  %2288 = vmatprep.subr.mxu0 %v6353_v45  ;;  %v1894_v28 = vsel %vm315_vm4, %v6697_v4, %v1893_v0 }
 0x478   :  { %9715 = vst [vmem:[#allocation72_spill] sm:$0xff] %v6767_v2  ;;  %2289 = vmatpush1.msra.mxu0 %v6323_v35  ;;  %v9718_v35 = vld [vmem:[#allocation56_spill] sm:$0xff] }
 0x479   :  { %v6786_v2 = vmul.f32 %v9718_v35, %v1812_v25  ;;  %v1813_v35 = vsel %vm467_vm0, %v1809_v41, %v6695_v11  ;;  %v1793_v11 = vsel %vm430_vm1, %v1789_v7, %v6703_v22  ;;  %v1897_v41 = vsel %vm315_vm4, %v1893_v0, %v6675_v34 }
 0x47a   :  { %v1869_v12 = vpop.permute.xlu0 %1868  ;;  %v1901_v0 = vmul.f32 %v1894_v28, %v5773_v49  ;;  %v1898_v8 = vmul.f32 %v1897_v41, %v5760_v38 }
 0x47b   :  { %v6771_v3 = vpop.permute.xlu1 %1682  ;;  %v1875_v22 = vsel %vm278_vm5, %v1869_v12, %v6705_v39 }
 0x47c   :  { %9716 = vst [vmem:[#allocation73_spill] sm:$0xff] %v6771_v3  ;;  %v1880_v41 = vmul.f32 %v1875_v22, %v5802_v20 }
 0x47e   :  { %v1873_v33 = vpop.permute.xlu0 %1872 }
 0x47f   :  { %v6773_v53 = vpop.permute.xlu1 %1662 }
 0x480   :  { %9717 = vst [vmem:[#allocation74_spill] sm:$0xff] %v6773_v53  ;;  %v6791_v53 = vsel %vm430_vm1, %v1785_v58, %v6699_v59 }
 0x482   :  { %v1849_v48 = vpop.permute.xlu0 %1848 }
 0x483   :  { %v1917_v45 = vpop.permute.xlu1 %1916 }
 0x484   :  { %v1918_v3 = vsel %vm356_vm3, %v6677_v43, %v1917_v45  ;;  %v1921_v62 = vsel %vm356_vm3, %v1917_v45, %v6665_v57  ;;  %v9719_v43 = vld [vmem:[#allocation60_spill] sm:$0xff]  ;;  %v6816_v45 = vsel %vm393_vm2, %v1765_v15, %v6707_v13  ;;  %v6821_v57 = vsel %vm393_vm2, %v6711_v60, %v1765_v15 }
 0x485   :  { %v1924_v25 = vmul.f32 %v1918_v3, %v5735_v10  ;;  %v1925_v58 = vmul.f32 %v1921_v62, %v5726_v63  ;;  %v6811_v44 = vmul.f32 %v9719_v43, %v1810_v36  ;;  %v1876_v36 = vsel %vm278_vm5, %v6693_v24, %v1869_v12 }
 0x486   :  { %v1853_v3 = vpop.permute.xlu0 %1852  ;;  %v1874_v62 = vsel %vm278_vm5, %v6705_v39, %v1873_v33 }
 0x487   :  { %2369 = vmatprep.subr.mxu1 %v1925_v58  ;;  %v1889_v15 = vpop.permute.xlu1 %1888  ;;  %v1877_v58 = vsel %vm278_vm5, %v1873_v33, %v6693_v24  ;;  %v1854_v12 = vsel %vm241_vm6, %v6713_v9, %v1853_v3  ;;  %v1879_v33 = vmul.f32 %v1876_v36, %v5770_v47  ;;  %v1855_v24 = vsel %vm241_vm6, %v1849_v48, %v6713_v9 }
 0x488   :  { %v1895_v59 = vsel %vm315_vm4, %v1889_v15, %v6697_v4  ;;  %v1896_v7 = vsel %vm315_vm4, %v6675_v34, %v1889_v15  ;;  %2370 = vmatpush1.msra.mxu1 %v1924_v25  ;;  %v1856_v34 = vsel %vm241_vm6, %v6701_v32, %v1849_v48  ;;  %v1857_v28 = vsel %vm241_vm6, %v1853_v3, %v6701_v32  ;;  %v9720_v48 = vld [vmem:[#allocation57_spill] sm:$0xff] }
 0x489   :  { %v1900_v43 = vmul.f32 %v1895_v59, %v5776_v50  ;;  %2371 = vmatprep.subr.mxu1 %v6359_v21  ;;  %v1899_v4 = vmul.f32 %v1896_v7, %v5752_v30  ;;  %v1881_v25 = vmul.f32 %v1874_v62, %v5799_v18  ;;  %v1878_v15 = vmul.f32 %v1877_v58, %v5785_v56 }
 0x48a   :  { %2372 = vmatpush1.msra.mxu1 %v6327_v14  ;;  %v1829_v39 = vpop.permute.xlu0 %1828  ;;  %v1859_v9 = vmul.f32 %v1856_v34, %v5796_v17  ;;  %v1861_v32 = vmul.f32 %v1854_v12, %v5825_v51  ;;  %v1815_v3 = vmul.f32 %v9720_v48, %v1811_v37  ;;  %v1860_v62 = vmul.f32 %v1855_v24, %v5828_v52 }
 0x48b   :  { %2290 = vmatprep.subr.mxu0 %v1899_v4  ;;  %2373 = vmatprep.subr.mxu1 %v1901_v0  ;;  %v1836_v36 = vsel %vm204_vm7, %v6709_v31, %v1829_v39  ;;  %v1858_v59 = vmul.f32 %v1857_v28, %v5811_v29  ;;  %v1835_v7 = vsel %vm204_vm7, %v1829_v39, %v6719_v61 }
 0x48c   :  { %2291 = vmatpush1.msra.mxu0 %v1898_v8  ;;  %2374 = vmatpush1.msra.mxu1 %v1900_v43  ;;  %v1839_v37 = vmul.f32 %v1836_v36, %v5822_v46  ;;  %v1817_v4 = vmul.f32 %v6536_v1, %v1813_v35  ;;  %v1796_v34 = vmul.f32 %v1790_v26, %v5694_v42  ;;  %v9721_v26 = vld [vmem:[#allocation35_spill] sm:$0xff]  ;;  %v9727_v36 = vld [vmem:[#allocation40_spill] sm:$0xff] }
 0x48d   :  { %2292 = vmatprep.subr.mxu0 %v1879_v33  ;;  %2375 = vmatprep.subr.mxu1 %v1881_v25  ;;  %v1795_v12 = vmul.f32 %v6791_v53, %v5657_v19  ;;  %v1751_v39 = vsel %vm356_vm3, %v6731_v40, %v6715_v27  ;;  %v1770_v35 = vsel %vm393_vm2, %v6707_v13, %v6735_v54  ;;  %v9722_v33 = vld [vmem:[#allocation58_spill] sm:$0xff]  ;;  %v9723_v53 = vld [vmem:[#allocation27_spill] sm:$0xff] }
 0x48e   :  { %2293 = vmatpush1.msra.mxu0 %v1878_v15  ;;  %2376 = vmatpush1.msra.mxu1 %v1880_v41  ;;  %v1833_v8 = vpop.permute.xlu0 %1832  ;;  %v1752_v24 = vsel %vm356_vm3, %v9722_v33, %v6731_v40  ;;  %v1753_v28 = vsel %vm356_vm3, %v9723_v53, %v9722_v33  ;;  %v9724_v25 = vld [vmem:[#allocation34_spill] sm:$0xff]  ;;  %v9726_v40 = vld [vmem:[#allocation39_spill] sm:$0xff] }
 0x48f   :  { %v1834_v43 = vsel %vm204_vm7, %v6719_v61, %v1833_v8  ;;  %v1837_v0 = vsel %vm204_vm7, %v1833_v8, %v6709_v31  ;;  %2294 = vmatprep.subr.mxu0 %v1859_v9  ;;  %2377 = vmatprep.subr.mxu1 %v1861_v32  ;;  %v1773_v61 = vsel %vm393_vm2, %v6735_v54, %v6711_v60  ;;  %v9725_v54 = vld [vmem:[#allocation37_spill] sm:$0xff]  ;;  %v9728_v32 = vld [vmem:[#allocation38_spill] sm:$0xff] }
 0x490   :  { %v1838_v22 = vmul.f32 %v1837_v0, %v5831_v55  ;;  %2295 = vmatpush1.msra.mxu0 %v1858_v59  ;;  %2378 = vmatpush1.msra.mxu1 %v1860_v62  ;;  %v1841_v58 = vmul.f32 %v1834_v43, %v5840_v5  ;;  %v1840_v31 = vmul.f32 %v1835_v7, %v5846_v23  ;;  %v9731_v59 = vld [vmem:[#allocation59_spill] sm:$0xff]  ;;  %v9733_v43 = vld [vmem:[#allocation68_spill] sm:$0xff] }
 0x491   :  { %2296 = vmatprep.subr.mxu0 %v1839_v37  ;;  %v1797_v60 = vmul.f32 %v1793_v11, %v9721_v26  ;;  %v1775_v41 = vmul.f32 %v6816_v45, %v9724_v25  ;;  %v1774_v13 = vmul.f32 %v6821_v57, %v9725_v54  ;;  %v1750_v11 = vsel %vm356_vm3, %v6715_v27, %v9723_v53  ;;  %v9730_v57 = vld [vmem:[#allocation65_spill] sm:$0xff]  ;;  %v9734_v37 = vld [vmem:[#allocation26_spill] sm:$0xff] }
 0x492   :  { %2297 = vmatpush1.msra.mxu0 %v1838_v22  ;;  %2379 = vmatprep.subr.mxu1 %v1841_v58  ;;  %v1777_v15 = vmul.f32 %v1773_v61, %v9726_v40  ;;  %v1776_v9 = vmul.f32 %v1770_v35, %v9727_v36  ;;  %v1755_v45 = vmul.f32 %v1751_v39, %v9728_v32  ;;  %v9735_v22 = vld [vmem:[#allocation32_spill] sm:$0xff] }
 0x493   :  { %2380 = vmatpush1.msra.mxu1 %v1840_v31  ;;  %2298 = vmatprep.subr.mxu0 %v1815_v3  ;;  %v9729_v3 = vld [vmem:[#allocation41_spill] sm:$0xff]  ;;  %v1728_v7 = vsel %vm315_vm4, %v9731_v59, %v9730_v57  ;;  %v1757_v27 = vmul.f32 %v1753_v28, %v5726_v63  ;;  %v1756_v8 = vmul.f32 %v1750_v11, %v5735_v10  ;;  %v9739_v28 = vld [vmem:[#allocation66_spill] sm:$0xff] }
 0x494   :  { %2381 = vmatprep.subr.mxu1 %v1817_v4  ;;  %2299 = vmatpush1.msra.mxu0 %v6786_v2  ;;  %v1754_v62 = vmul.f32 %v1752_v24, %v9729_v3  ;;  %v9732_v2 = vld [vmem:[#allocation64_spill] sm:$0xff]  ;;  %v1727_v58 = vsel %vm315_vm4, %v9730_v57, %v9733_v43  ;;  %v9736_v4 = vld [vmem:[#allocation29_spill] sm:$0xff] }
 0x495   :  { %2382 = vmatpush1.msra.mxu1 %v6811_v44  ;;  %2300 = vmatprep.subr.mxu0 %v1795_v12  ;;  %v1729_v44 = vsel %vm315_vm4, %v9732_v2, %v9731_v59  ;;  %v1726_v0 = vsel %vm315_vm4, %v9733_v43, %v9732_v2  ;;  %v1709_v61 = vsel %vm278_vm5, %v9736_v4, %v9735_v22  ;;  %v9738_v24 = vld [vmem:[#allocation53_spill] sm:$0xff]  ;;  %v9744_v59 = vld [vmem:[#allocation62_spill] sm:$0xff] }
 0x496   :  { %2383 = vmatprep.subr.mxu1 %v1797_v60  ;;  %2301 = vmatpush1.msra.mxu0 %v6800_v16  ;;  %v1708_v16 = vsel %vm278_vm5, %v9735_v22, %v9734_v37  ;;  %v1731_v12 = vmul.f32 %v1728_v7, %v5752_v30  ;;  %v1730_v39 = vmul.f32 %v1729_v44, %v5760_v38  ;;  %v9746_v22 = vld [vmem:[#allocation74_spill] sm:$0xff] }
 0x497   :  { %2384 = vmatpush1.msra.mxu1 %v1796_v34  ;;  %2302 = vmatprep.subr.mxu0 %v1775_v41  ;;  %v9737_v34 = vld [vmem:[#allocation71_spill] sm:$0xff]  ;;  %v1733_v60 = vmul.f32 %v1726_v0, %v5773_v49  ;;  %v1732_v33 = vmul.f32 %v1727_v58, %v5776_v50  ;;  %v1710_v53 = vmul.f32 %v1709_v61, %v5785_v56 }
 0x498   :  { %2385 = vmatprep.subr.mxu1 %v1777_v15  ;;  %2303 = vmatpush1.msra.mxu0 %v1774_v13  ;;  %v1706_v31 = vsel %vm278_vm5, %v9737_v34, %v9736_v4  ;;  %v1707_v35 = vsel %vm278_vm5, %v9734_v37, %v9737_v34  ;;  %v9740_v41 = vld [vmem:[#allocation55_spill] sm:$0xff]  ;;  %v1711_v11 = vmul.f32 %v1708_v16, %v5770_v47  ;;  %v9748_v4 = vld [vmem:[#allocation28_spill] sm:$0xff] }
 0x499   :  { %2386 = vmatpush1.msra.mxu1 %v1776_v9  ;;  %2304 = vmatprep.subr.mxu0 %v1755_v45  ;;  %v1713_v13 = vmul.f32 %v1706_v31, %v5799_v18  ;;  %v1712_v15 = vmul.f32 %v1707_v35, %v5802_v20  ;;  %v9741_v9 = vld [vmem:[#allocation54_spill] sm:$0xff]  ;;  %v9742_v45 = vld [vmem:[#allocation73_spill] sm:$0xff]  ;;  %v9747_v16 = vld [vmem:[#allocation63_spill] sm:$0xff]  ;;  %v1666_v61 = vsel %vm204_vm7, %v9746_v22, %v9748_v4 }
 0x49a   :  { %2387 = vmatprep.subr.mxu1 %v1757_v27  ;;  %2305 = vmatpush1.msra.mxu0 %v1754_v62  ;;  %v9743_v62 = vld [vmem:[#allocation61_spill] sm:$0xff]  ;;  %v1686_v7 = vsel %vm241_vm6, %v9742_v45, %v9744_v59  ;;  %v9745_v27 = vld [vmem:[#allocation70_spill] sm:$0xff]  ;;  %v1667_v58 = vsel %vm204_vm7, %v9747_v16, %v9746_v22  ;;  %v9749_v34 = vld [vmem:[#allocation72_spill] sm:$0xff]  ;;  %v1673_v35 = vmul.f32 %v1666_v61, %v5840_v5 }
 0x49b   :  { %2388 = vmatpush1.msra.mxu1 %v1756_v8  ;;  %2306 = vmatprep.subr.mxu0 %v9738_v24  ;;  %v1687_v57 = vsel %vm241_vm6, %v9743_v62, %v9742_v45  ;;  %v1689_v2 = vsel %vm241_vm6, %v9744_v59, %v9745_v27  ;;  %v1688_v44 = vsel %vm241_vm6, %v9745_v27, %v9743_v62  ;;  %v9750_v24 = vmov 1.0   ;;  %v9753_v45 = vld [vmem:[#allocation51_spill] sm:$0xff]  ;;  %v7119_v62 = vpop.permute.xlu1 %1972 }
 0x49c   :  { %2307 = vmatpush1.msra.mxu0 %v9739_v28  ;;  %2389 = vmatprep.subr.mxu1 %v9740_v41  ;;  %v1692_v8 = vmul.f32 %v1687_v57, %v5828_v52  ;;  %v1693_v43 = vmul.f32 %v1686_v7, %v5825_v51  ;;  %v1690_v0 = vmul.f32 %v1689_v2, %v5811_v29 }
 0x49d   :  { %2308 = vmatprep.subr.mxu0 %v1731_v12  ;;  %2390 = vmatpush1.msra.mxu1 %v9741_v9  ;;  %v1691_v37 = vmul.f32 %v1688_v44, %v5796_v17  ;;  %v1669_v31 = vsel %vm204_vm7, %v9748_v4, %v9749_v34  ;;  %v1668_v12 = vsel %vm204_vm7, %v9749_v34, %v9747_v16  ;;  %v2159_v9 = vld [vmem:[#allocation13 + $0x8] sm:$0xff] }
 0x49e   :  { %2309 = vmatpush1.msra.mxu0 %v1730_v39  ;;  %2391 = vmatprep.subr.mxu1 %v1733_v60  ;;  %v1672_v39 = vmul.f32 %v1667_v58, %v5846_v23  ;;  %v1670_v60 = vmul.f32 %v1669_v31, %v5831_v55  ;;  %v9756_v23 = vld [vmem:[#allocation60_spill] sm:$0xff] }
 0x49f   :  { %2392 = vmatpush1.msra.mxu1 %v1732_v33  ;;  %2310 = vmatprep.subr.mxu0 %v1711_v11  ;;  %v1671_v33 = vmul.f32 %v1668_v12, %v5822_v46  ;;  %v7121_v57 = vpop.permute.xlu1 %1952 }
 0x4a0   :  { %2393 = vmatprep.subr.mxu1 %v1713_v13  ;;  %2311 = vmatpush1.msra.mxu0 %v1710_v53 }
 0x4a1   :  { %2394 = vmatpush1.msra.mxu1 %v1712_v15  ;;  %2312 = vmatprep.subr.mxu0 %v1691_v37  ;;  %v9752_v15 = vld [vmem:[#allocation52_spill] sm:$0xff] }
 0x4a2   :  { %2395 = vmatprep.subr.mxu1 %v1693_v43  ;;  %2313 = vmatpush1.msra.mxu0 %v1690_v0 }
 0x4a3   :  { %2396 = vmatpush1.msra.mxu1 %v1692_v8  ;;  %2314 = vmatprep.subr.mxu0 %v1671_v33 }
 0x4a4   :  { %2397 = vmatprep.subr.mxu1 %v1673_v35  ;;  %2315 = vmatpush1.msra.mxu0 %v1670_v60  ;;  %v9754_v35 = vld [vmem:[#allocation56_spill] sm:$0xff] }
 0x4a5   :  { %2398 = vmatpush1.msra.mxu1 %v1672_v39  ;;  %5111 = vmatprep.subr.msk.mxu0 %vm164_vm8, %v9750_v24 }
 0x4a6   :  { %5113 = vmatprep.subr.msk.mxu1 %vm164_vm8, %v9750_v24  ;;  %5112 = vmatpush1.msk.msra.mxu0 %vm164_vm8, %v9750_v24 }
 0x4a7   :  { %5114 = vmatpush1.msk.msra.mxu1 %vm164_vm8, %v9750_v24  ;;  %5077 = vmatprep.mubr.msk.f32.mxu0 %vm2276_vm11, %v2159_v9 }
 0x4a8   :  { %5080 = vmatprep.mubr.msk.f32.mxu1 %vm2276_vm11, %v2159_v9 }
 0x4e4   :  { %v7031_v28 = vpop.f32.mrf.mxu0 }
 0x4e5   :  { %2138 = vrot.lane.b32.xlu0 %v7031_v28, %s5409_s7  ;;  %v7035_v41 = vpop.f32.mrf.mxu1 }
 0x4e6   :  { %2142 = vrot.lane.b32.xlu1 %v7035_v41, %s5409_s7  ;;  %v7067_v13 = vpop.f32.mrf.mxu0 }
 0x4e7   :  { %v7073_v11 = vpop.f32.mrf.mxu1 }
 0x4e9   :  { %2122 = vrot.lane.b32.xlu0 %v7035_v41, %s5410_s9 }
 0x4ea   :  { %2034 = vrot.lane.b32.xlu1 %v7031_v28, %s5414_s19 }
 0x4ed   :  { %2118 = vrot.lane.b32.xlu0 %v7031_v28, %s5410_s9 }
 0x4ee   :  { %2058 = vrot.lane.b32.xlu1 %v7035_v41, %s5413_s18 }
 0x4f1   :  { %2102 = vrot.lane.b32.xlu0 %v7035_v41, %s5411_s23 }
 0x4f2   :  { %2014 = vrot.lane.b32.xlu1 %v7031_v28, %s5399_s24 }
 0x4f5   :  { %2098 = vrot.lane.b32.xlu0 %v7031_v28, %s5411_s23 }
 0x4f6   :  { %2038 = vrot.lane.b32.xlu1 %v7035_v41, %s5414_s19 }
 0x4f9   :  { %2082 = vrot.lane.b32.xlu0 %v7035_v41, %s5412_s17 }
 0x4fa   :  { %1994 = vrot.lane.b32.xlu1 %v7031_v28, %s5415_s5 }
 0x4fd   :  { %2078 = vrot.lane.b32.xlu0 %v7031_v28, %s5412_s17 }
 0x4fe   :  { %2018 = vrot.lane.b32.xlu1 %v7035_v41, %s5399_s24 }
 0x501   :  { %2054 = vrot.lane.b32.xlu0 %v7031_v28, %s5413_s18 }
 0x502   :  { %1998 = vrot.lane.b32.xlu1 %v7035_v41, %s5415_s5 }
 0x505   :  { %2140 = vrot.lane.b32.xlu0 %v7067_v13, %s5409_s7 }
 0x506   :  { %2120 = vrot.lane.b32.xlu1 %v7067_v13, %s5410_s9 }
 0x509   :  { %1950 = vrot.lane.b32.xlu0 %v9752_v15, %s5410_s9 }
 0x50a   :  { %2144 = vrot.lane.b32.xlu1 %v7073_v11, %s5409_s7 }
 0x50d   :  { %2060 = vrot.lane.b32.xlu0 %v7073_v11, %s5413_s18 }
 0x50e   :  { %2100 = vrot.lane.b32.xlu1 %v7067_v13, %s5411_s23 }
 0x511   :  { %2036 = vrot.lane.b32.xlu0 %v7067_v13, %s5414_s19 }
 0x512   :  { %2124 = vrot.lane.b32.xlu1 %v7073_v11, %s5410_s9 }
 0x515   :  { %2040 = vrot.lane.b32.xlu0 %v7073_v11, %s5414_s19 }
 0x516   :  { %2080 = vrot.lane.b32.xlu1 %v7067_v13, %s5412_s17 }
 0x519   :  { %2016 = vrot.lane.b32.xlu0 %v7067_v13, %s5399_s24 }
 0x51a   :  { %2104 = vrot.lane.b32.xlu1 %v7073_v11, %s5411_s23 }
 0x51d   :  { %2020 = vrot.lane.b32.xlu0 %v7073_v11, %s5399_s24 }
 0x51e   :  { %2084 = vrot.lane.b32.xlu1 %v7073_v11, %s5412_s17 }
 0x521   :  { %1996 = vrot.lane.b32.xlu0 %v7067_v13, %s5415_s5 }
 0x522   :  { %2056 = vrot.lane.b32.xlu1 %v7067_v13, %s5413_s18 }
 0x525   :  { %2000 = vrot.lane.b32.xlu0 %v7073_v11, %s5415_s5 }
 0x526   :  { %1976 = vrot.lane.b32.xlu1 %v6359_v21, %s5409_s7 }
 0x529   :  { %1934 = vrot.lane.b32.xlu0 %v6327_v14, %s5411_s23 }
 0x52a   :  { %1932 = vrot.lane.b32.xlu1 %v9753_v45, %s5411_s23  ;;  %v9755_v45 = vld [vmem:[#allocation33_spill] sm:$0xff] }
 0x52d   :  { %1930 = vrot.lane.b32.xlu0 %v9752_v15, %s5411_s23 }
 0x52e   :  { %1956 = vrot.lane.b32.xlu1 %v6359_v21, %s5410_s9 }
 0x532   :  { %1936 = vrot.lane.b32.xlu1 %v6359_v21, %s5411_s23 }
 0x557   :  { %v2139_v59 = vpop.permute.xlu0 %2138 }
 0x558   :  { %v2143_v7 = vpop.permute.xlu1 %2142 }
 0x55b   :  { %v2123_v27 = vpop.permute.xlu0 %2122 }
 0x55c   :  { %v7123_v14 = vpop.permute.xlu1 %2034 }
 0x55f   :  { %v2119_v2 = vpop.permute.xlu0 %2118 }
 0x560   :  { %v7125_v44 = vpop.permute.xlu1 %2058 }
 0x563   :  { %v2103_v8 = vpop.permute.xlu0 %2102 }
 0x564   :  { %v7127_v43 = vpop.permute.xlu1 %2014 }
 0x567   :  { %v2099_v0 = vpop.permute.xlu0 %2098 }
 0x568   :  { %v7129_v37 = vpop.permute.xlu1 %2038 }
 0x56b   :  { %v7131_v22 = vpop.permute.xlu0 %2082 }
 0x56c   :  { %v7133_v21 = vpop.permute.xlu1 %1994 }
 0x56f   :  { %v7135_v16 = vpop.permute.xlu0 %2078 }
 0x570   :  { %v7137_v58 = vpop.permute.xlu1 %2018 }
 0x573   :  { %v7139_v4 = vpop.permute.xlu0 %2054 }
 0x574   :  { %v7141_v61 = vpop.permute.xlu1 %1998 }
 0x577   :  { %v2141_v34 = vpop.permute.xlu0 %2140 }
 0x578   :  { %v2147_v31 = vsel %vm467_vm0, %v2141_v34, %v2143_v7  ;;  %v2148_v12 = vsel %vm467_vm0, %v2139_v59, %v2141_v34  ;;  %v2121_v39 = vpop.permute.xlu1 %2120 }
 0x579   :  { %v2150_v60 = vmul.f32 %v9754_v35, %v2148_v12  ;;  %v2127_v33 = vsel %vm430_vm1, %v2121_v39, %v2123_v27  ;;  %v2128_v15 = vsel %vm430_vm1, %v2119_v2, %v2121_v39  ;;  %v2151_v9 = vmul.f32 %v9720_v48, %v2147_v31 }
 0x57a   :  { %v2130_v53 = vmul.f32 %v2128_v15, %v9755_v45  ;;  %v2131_v24 = vmul.f32 %v2127_v33, %v5657_v19 }
 0x57b   :  { %v7155_v55 = vpop.permute.xlu0 %1950  ;;  %2326 = vmatprep.subr.mxu0 %v2151_v9 }
 0x57c   :  { %2327 = vmatpush2.msra.mxu0 %v2150_v60  ;;  %v2145_v34 = vpop.permute.xlu1 %2144 }
 0x57d   :  { %2328 = vmatprep.subr.mxu0 %v2131_v24  ;;  %v2146_v12 = vsel %vm467_vm0, %v2143_v7, %v2145_v34  ;;  %v2149_v35 = vsel %vm467_vm0, %v2145_v34, %v2139_v59 }
 0x57e   :  { %v2152_v39 = vmul.f32 %v9756_v23, %v2146_v12  ;;  %2329 = vmatpush2.msra.mxu0 %v2130_v53  ;;  %v2153_v48 = vmul.f32 %v6536_v1, %v2149_v35 }
 0x57f   :  { %v2061_v31 = vpop.permute.xlu0 %2060 }
 0x580   :  { %2409 = vmatprep.subr.mxu1 %v2153_v48  ;;  %v2101_v33 = vpop.permute.xlu1 %2100 }
 0x581   :  { %v2107_v15 = vsel %vm393_vm2, %v2101_v33, %v2103_v8  ;;  %v2108_v24 = vsel %vm393_vm2, %v2099_v0, %v2101_v33  ;;  %2410 = vmatpush2.msra.mxu1 %v2152_v39 }
 0x582   :  { %v2110_v7 = vmul.f32 %v2108_v24, %v9725_v54  ;;  %v2111_v60 = vmul.f32 %v2107_v15, %v9724_v25 }
 0x583   :  { %v2037_v59 = vpop.permute.xlu0 %2036 }
 0x584   :  { %2330 = vmatprep.subr.mxu0 %v2111_v60  ;;  %v2125_v23 = vpop.permute.xlu1 %2124 }
 0x585   :  { %v2126_v1 = vsel %vm430_vm1, %v2123_v27, %v2125_v23  ;;  %v2129_v53 = vsel %vm430_vm1, %v2125_v23, %v2119_v2  ;;  %2331 = vmatpush2.msra.mxu0 %v2110_v7 }
 0x586   :  { %v2132_v9 = vmul.f32 %v2126_v1, %v5694_v42  ;;  %v2133_v34 = vmul.f32 %v2129_v53, %v9721_v26 }
 0x587   :  { %v2041_v12 = vpop.permute.xlu0 %2040 }
 0x588   :  { %2411 = vmatprep.subr.mxu1 %v2133_v34  ;;  %v2081_v35 = vpop.permute.xlu1 %2080 }
 0x589   :  { %v2087_v39 = vsel %vm356_vm3, %v2081_v35, %v7131_v22  ;;  %v2088_v48 = vsel %vm356_vm3, %v7135_v16, %v2081_v35  ;;  %2412 = vmatpush2.msra.mxu1 %v2132_v9 }
 0x58a   :  { %v2090_v27 = vmul.f32 %v2088_v48, %v9729_v3  ;;  %v2091_v2 = vmul.f32 %v2087_v39, %v9728_v32 }
 0x58b   :  { %v2017_v33 = vpop.permute.xlu0 %2016 }
 0x58c   :  { %2332 = vmatprep.subr.mxu0 %v2091_v2  ;;  %v2105_v15 = vpop.permute.xlu1 %2104  ;;  %v2044_v2 = vsel %vm278_vm5, %v7123_v14, %v2037_v59 }
 0x58d   :  { %v2106_v24 = vsel %vm393_vm2, %v2103_v8, %v2105_v15  ;;  %v2109_v7 = vsel %vm393_vm2, %v2105_v15, %v2099_v0  ;;  %2333 = vmatpush2.msra.mxu0 %v2090_v27  ;;  %v2043_v27 = vsel %vm278_vm5, %v2037_v59, %v7129_v37  ;;  %v2045_v15 = vsel %vm278_vm5, %v2041_v12, %v7123_v14 }
 0x58e   :  { %v2112_v60 = vmul.f32 %v2106_v24, %v9727_v36  ;;  %2334 = vmatprep.subr.mxu0 %v7067_v13  ;;  %v2113_v23 = vmul.f32 %v2109_v7, %v9726_v40  ;;  %v2065_v13 = vsel %vm315_vm4, %v2061_v31, %v7139_v4  ;;  %v2024_v14 = vsel %vm241_vm6, %v7127_v43, %v2017_v33 }
 0x58f   :  { %v2021_v1 = vpop.permute.xlu0 %2020  ;;  %2335 = vmatpush2.msra.mxu0 %v7031_v28  ;;  %v9757_v28 = vld [vmem:[#allocation31_spill] sm:$0xff]  ;;  %v2066_v24 = vmul.f32 %v2065_v13, %v5760_v38 }
 0x590   :  { %2413 = vmatprep.subr.mxu1 %v2113_v23  ;;  %v2085_v53 = vpop.permute.xlu1 %2084  ;;  %v1979_v35 = vsel %vm467_vm0, %v7119_v62, %v9757_v28 }
 0x591   :  { %v2086_v9 = vsel %vm356_vm3, %v7131_v22, %v2085_v53  ;;  %v2089_v8 = vsel %vm356_vm3, %v2085_v53, %v7135_v16  ;;  %2414 = vmatpush2.msra.mxu1 %v2112_v60  ;;  %v2062_v22 = vsel %vm315_vm4, %v7125_v44, %v2061_v31  ;;  %v9758_v16 = vld [vmem:[#allocation67_spill] sm:$0xff] }
 0x592   :  { %v2092_v0 = vmul.f32 %v2086_v9, %v5735_v10  ;;  %v2093_v34 = vmul.f32 %v2089_v8, %v5726_v63  ;;  %v7213_v48 = vsel %vm467_vm0, %v9758_v16, %v7119_v62  ;;  %v2042_v62 = vsel %vm278_vm5, %v7129_v37, %v2041_v12 }
 0x593   :  { %v1997_v39 = vpop.permute.xlu0 %1996  ;;  %v2069_v37 = vmul.f32 %v2062_v22, %v5773_v49  ;;  %v2048_v12 = vmul.f32 %v2043_v27, %v5802_v20  ;;  %v2047_v9 = vmul.f32 %v2044_v2, %v5770_v47  ;;  %v2025_v8 = vsel %vm241_vm6, %v2021_v1, %v7127_v43 }
 0x594   :  { %2415 = vmatprep.subr.mxu1 %v2093_v34  ;;  %v2057_v31 = vpop.permute.xlu1 %2056  ;;  %v2004_v34 = vsel %vm204_vm7, %v7133_v21, %v1997_v39  ;;  %v2003_v43 = vsel %vm204_vm7, %v1997_v39, %v7141_v61  ;;  %v2026_v27 = vmul.f32 %v2025_v8, %v5811_v29 }
 0x595   :  { %v2063_v7 = vsel %vm315_vm4, %v2057_v31, %v7125_v44  ;;  %v2064_v59 = vsel %vm315_vm4, %v7139_v4, %v2057_v31  ;;  %2416 = vmatpush2.msra.mxu1 %v2092_v0  ;;  %v2046_v44 = vmul.f32 %v2045_v15, %v5785_v56  ;;  %v2022_v4 = vsel %vm241_vm6, %v7137_v58, %v2021_v1 }
 0x596   :  { %v2068_v60 = vmul.f32 %v2063_v7, %v5776_v50  ;;  %2417 = vmatprep.subr.mxu1 %v7073_v11  ;;  %v2067_v23 = vmul.f32 %v2064_v59, %v5752_v30  ;;  %v2023_v11 = vsel %vm241_vm6, %v2017_v33, %v7137_v58  ;;  %v2049_v0 = vmul.f32 %v2042_v62, %v5799_v18  ;;  %v9761_v59 = vld [vmem:[#allocation48_spill] sm:$0xff] }
 0x597   :  { %v2001_v53 = vpop.permute.xlu0 %2000  ;;  %2418 = vmatpush2.msra.mxu1 %v7035_v41  ;;  %v2027_v58 = vmul.f32 %v2024_v14, %v5796_v17  ;;  %v2029_v1 = vmul.f32 %v2022_v4, %v5825_v51  ;;  %v2028_v22 = vmul.f32 %v2023_v11, %v5828_v52  ;;  %v2007_v39 = vmul.f32 %v2004_v34, %v5822_v46 }
 0x598   :  { %2336 = vmatprep.subr.mxu0 %v2067_v23  ;;  %2419 = vmatprep.subr.mxu1 %v2069_v37  ;;  %v1977_v13 = vpop.permute.xlu1 %1976  ;;  %v2002_v41 = vsel %vm204_vm7, %v7141_v61, %v2001_v53  ;;  %v2005_v33 = vsel %vm204_vm7, %v2001_v53, %v7133_v21  ;;  %v7292_v37 = vld [vmem:[#allocation7 + $0x38] ss:$0 sm:$0xff]  ;;  %v7299_v53 = vld [vmem:[#allocation7 + $0x30] ss:$0 sm:$0xff] }
 0x599   :  { %2337 = vmatpush2.msra.mxu0 %v2066_v24  ;;  %2420 = vmatpush2.msra.mxu1 %v2068_v60  ;;  %v1981_v2 = vsel %vm467_vm0, %v1977_v13, %v9758_v16  ;;  %v1978_v61 = vsel %vm467_vm0, %v9757_v28, %v1977_v13  ;;  %v2009_v31 = vmul.f32 %v2002_v41, %v5840_v5  ;;  %v9759_v24 = vld [vmem:[#allocation69_spill] sm:$0xff]  ;;  %v9760_v16 = vld [vmem:[#allocation50_spill] sm:$0xff] }
 0x59a   :  { %2338 = vmatprep.subr.mxu0 %v2047_v9  ;;  %2421 = vmatprep.subr.mxu1 %v2049_v0  ;;  %v1959_v62 = vsel %vm430_vm1, %v7121_v57, %v9759_v24  ;;  %v2008_v7 = vmul.f32 %v2003_v43, %v9760_v16  ;;  %v2006_v14 = vmul.f32 %v2005_v33, %v9761_v59  ;;  %v7289_v60 = vld [vmem:[#allocation7 + $0x28] ss:$0 sm:$0xff] }
 0x59b   :  { %v1935_v15 = vpop.permute.xlu0 %1934  ;;  %2339 = vmatpush2.msra.mxu0 %v2046_v44  ;;  %2422 = vmatpush2.msra.mxu1 %v2048_v12  ;;  %v1960_v28 = vsel %vm430_vm1, %v7155_v55, %v7121_v57  ;;  %v1983_v23 = vmul.f32 %v7289_v60, %v1979_v35  ;;  %9762 = vst [vmem:[#allocation57_spill] sm:$0xff] %v7292_v37  ;;  %v7295_v44 = vld [vmem:[#allocation7 + $0x20] ss:$0 sm:$0xff] }
 0x59c   :  { %2340 = vmatprep.subr.mxu0 %v2027_v58  ;;  %2423 = vmatprep.subr.mxu1 %v2029_v1  ;;  %v1933_v21 = vpop.permute.xlu1 %1932  ;;  %v1985_v12 = vmul.f32 %v7292_v37, %v1981_v2  ;;  %v1982_v4 = vmul.f32 %v7295_v44, %v7213_v48  ;;  %v1984_v9 = vmul.f32 %v7299_v53, %v1978_v61  ;;  %v2158_v1 = vld [vmem:[#allocation13] sm:$0xff] }
 0x59d   :  { %2341 = vmatpush2.msra.mxu0 %v2026_v27  ;;  %2424 = vmatpush2.msra.mxu1 %v2028_v22  ;;  %v1939_v57 = vsel %vm393_vm2, %v1933_v21, %v1935_v15  ;;  %v1963_v13 = vmul.f32 %v1959_v62, %v5657_v19  ;;  %v1962_v48 = vmul.f32 %v1960_v28, %v9755_v45  ;;  %v2161_v27 = vld [vmem:[#allocation13 + $0x18] sm:$0xff] }
 0x59e   :  { %2342 = vmatprep.subr.mxu0 %v2007_v39  ;;  %2425 = vmatprep.subr.mxu1 %v2009_v31  ;;  %v1943_v58 = vmul.f32 %v1939_v57, %v9724_v25  ;;  %v2160_v39 = vld [vmem:[#allocation13 + $0x10] sm:$0xff]  ;;  %v2163_v31 = vld [vmem:[#allocation13 + $0x28] sm:$0xff] }
 0x59f   :  { %v1931_v11 = vpop.permute.xlu0 %1930  ;;  %2343 = vmatpush2.msra.mxu0 %v2006_v14  ;;  %2426 = vmatpush2.msra.mxu1 %v2008_v7 }
 0x5a0   :  { %v1940_v35 = vsel %vm393_vm2, %v1931_v11, %v1933_v21  ;;  %2344 = vmatprep.subr.mxu0 %v1983_v23  ;;  %2427 = vmatprep.subr.mxu1 %v1985_v12  ;;  %v1957_v8 = vpop.permute.xlu1 %1956 }
 0x5a1   :  { %v1958_v0 = vsel %vm430_vm1, %v9759_v24, %v1957_v8  ;;  %v1961_v34 = vsel %vm430_vm1, %v1957_v8, %v7155_v55  ;;  %2345 = vmatpush2.msra.mxu0 %v1982_v4  ;;  %2428 = vmatpush2.msra.mxu1 %v1984_v9  ;;  %v1942_v33 = vmul.f32 %v1940_v35, %v9725_v54  ;;  %v9763_v24 = vmov 0.0  }
 0x5a2   :  { %v1964_v41 = vmul.f32 %v1958_v0, %v5694_v42  ;;  %2346 = vmatprep.subr.mxu0 %v1963_v13  ;;  %v1965_v43 = vmul.f32 %v1961_v34, %v9721_v26 }
 0x5a3   :  { %2347 = vmatpush2.msra.mxu0 %v1962_v48 }
 0x5a4   :  { %2348 = vmatprep.subr.mxu0 %v1943_v58  ;;  %2429 = vmatprep.subr.mxu1 %v1965_v43  ;;  %v1937_v22 = vpop.permute.xlu1 %1936 }
 0x5a5   :  { %v1938_v55 = vsel %vm393_vm2, %v1935_v15, %v1937_v22  ;;  %v1941_v2 = vsel %vm393_vm2, %v1937_v22, %v1931_v11  ;;  %2349 = vmatpush2.msra.mxu0 %v1942_v33  ;;  %2430 = vmatpush2.msra.mxu1 %v1964_v41  ;;  %v2162_v15 = vld [vmem:[#allocation13 + $0x20] sm:$0xff] }
 0x5a6   :  { %v1944_v61 = vmul.f32 %v1938_v55, %v9727_v36  ;;  %2351 = vmatmul.mubr.f32.vlgmr.msra.gmra.mxu0 %v2158_v1  ;;  %v1945_v21 = vmul.f32 %v1941_v2, %v9726_v40 }
 0x5a7   :  { %5078 = vmatprep.mubr.msk.f32.mxu0 %vm2276_vm11, %v2161_v27 }
 0x5a8   :  { %2431 = vmatprep.subr.mxu1 %v1945_v21 }
 0x5a9   :  { %2432 = vmatpush2.msra.mxu1 %v1944_v61 }
 0x5aa   :  { %2357 = vmatmul.mubr.f32.gmra.mxu0 %v2160_v39  ;;  %2434 = vmatmul.mubr.f32.vlgmr.msra.gmra.mxu1 %v2158_v1 }
 0x5ab   :  { %5079 = vmatprep.mubr.msk.f32.mxu0 %vm2276_vm11, %v2163_v31  ;;  %5081 = vmatprep.mubr.msk.f32.mxu1 %vm2276_vm11, %v2161_v27 }
 0x5ae   :  { %2363 = vmatmul.mubr.f32.gmra.mxu0 %v2162_v15  ;;  %2440 = vmatmul.mubr.f32.gmra.mxu1 %v2160_v39 }
 0x5af   :  { %5082 = vmatprep.mubr.msk.f32.mxu1 %vm2276_vm11, %v2163_v31  ;;  %2776 = vmatprep.mubr.f32.mxu0 %v9763_v24 }
 0x5b2   :  { %2446 = vmatmul.mubr.f32.gmra.mxu1 %v2162_v15 }
 0x5b3   :  { %2847 = vmatprep.mubr.f32.mxu1 %v9763_v24 }
 0x666   :  { %v2352_v62 = vpop.f32.mrf.mxu0 }
 0x668   :  { %v2354_v7 = vpop.f32.mrf.mxu0 }
 0x66a   :  { %v2358_v14 = vpop.f32.mrf.mxu0  ;;  %v2435_v28 = vpop.f32.mrf.mxu1 }
 0x66b   :  { %v2472_v4 = vadd.f32 %v2358_v14, %v2352_v62 }
 0x66c   :  { %v2360_v23 = vpop.f32.mrf.mxu0  ;;  %v2437_v12 = vpop.f32.mrf.mxu1 }
 0x66d   :  { %v2473_v58 = vadd.f32 %v2360_v23, %v2354_v7 }
 0x66e   :  { %v2364_v9 = vpop.f32.mrf.mxu0  ;;  %v2441_v57 = vpop.f32.mrf.mxu1 }
 0x66f   :  { %v2480_v11 = vadd.f32 %v2472_v4, %v2364_v9  ;;  %v2474_v13 = vadd.f32 %v2441_v57, %v2435_v28 }
 0x670   :  { %v2443_v35 = vpop.f32.mrf.mxu1  ;;  %v2366_v41 = vpop.f32.mrf.mxu0 }
 0x671   :  { %v7330_v8 = vmul.f32 0.33333334, %v2480_v11  ;;  %v2481_v43 = vadd.f32 %v2473_v58, %v2366_v41  ;;  %v2475_v1 = vadd.f32 %v2443_v35, %v2437_v12 }
 0x672   :  { %v2447_v48 = vpop.f32.mrf.mxu1 }
 0x673   :  { %9764 = vst [vmem:[#allocation58_spill] sm:$0xff] %v7330_v8  ;;  %v2482_v0 = vadd.f32 %v2474_v13, %v2447_v48  ;;  %2648 = vrot.lane.b32.xlu0 %v7330_v8, %s5409_s7  ;;  %v7360_v22 = vmul.f32 0.33333334, %v2481_v43 }
 0x674   :  { %v2449_v33 = vpop.f32.mrf.mxu1 }
 0x675   :  { %v7334_v34 = vmul.f32 0.33333334, %v2482_v0  ;;  %9766 = vst [vmem:[#allocation37_spill] sm:$0xff] %v7360_v22  ;;  %v2483_v27 = vadd.f32 %v2475_v1, %v2449_v33 }
 0x677   :  { %9765 = vst [vmem:[#allocation27_spill] sm:$0xff] %v7334_v34  ;;  %2632 = vrot.lane.b32.xlu0 %v7334_v34, %s5410_s9  ;;  %2652 = vrot.lane.b32.xlu1 %v7334_v34, %s5409_s7  ;;  %v7366_v55 = vmul.f32 0.33333334, %v2483_v27 }
 0x679   :  { %9767 = vst [vmem:[#allocation65_spill] sm:$0xff] %v7366_v55 }
 0x67b   :  { %2628 = vrot.lane.b32.xlu0 %v7330_v8, %s5410_s9  ;;  %2544 = vrot.lane.b32.xlu1 %v7330_v8, %s5414_s19 }
 0x67f   :  { %2612 = vrot.lane.b32.xlu0 %v7334_v34, %s5411_s23  ;;  %2568 = vrot.lane.b32.xlu1 %v7334_v34, %s5413_s18 }
 0x683   :  { %2608 = vrot.lane.b32.xlu0 %v7330_v8, %s5411_s23  ;;  %2524 = vrot.lane.b32.xlu1 %v7330_v8, %s5399_s24 }
 0x687   :  { %2592 = vrot.lane.b32.xlu0 %v7334_v34, %s5412_s17  ;;  %2548 = vrot.lane.b32.xlu1 %v7334_v34, %s5414_s19 }
 0x68b   :  { %2588 = vrot.lane.b32.xlu0 %v7330_v8, %s5412_s17  ;;  %2504 = vrot.lane.b32.xlu1 %v7330_v8, %s5415_s5 }
 0x68f   :  { %2564 = vrot.lane.b32.xlu0 %v7330_v8, %s5413_s18  ;;  %2630 = vrot.lane.b32.xlu1 %v7360_v22, %s5410_s9 }
 0x693   :  { %2650 = vrot.lane.b32.xlu0 %v7360_v22, %s5409_s7  ;;  %2654 = vrot.lane.b32.xlu1 %v7366_v55, %s5409_s7 }
 0x697   :  { %2570 = vrot.lane.b32.xlu0 %v7366_v55, %s5413_s18  ;;  %2610 = vrot.lane.b32.xlu1 %v7360_v22, %s5411_s23 }
 0x69b   :  { %2546 = vrot.lane.b32.xlu0 %v7360_v22, %s5414_s19  ;;  %2634 = vrot.lane.b32.xlu1 %v7366_v55, %s5410_s9 }
 0x69f   :  { %2550 = vrot.lane.b32.xlu0 %v7366_v55, %s5414_s19  ;;  %2590 = vrot.lane.b32.xlu1 %v7360_v22, %s5412_s17 }
 0x6a3   :  { %2526 = vrot.lane.b32.xlu0 %v7360_v22, %s5399_s24  ;;  %2614 = vrot.lane.b32.xlu1 %v7366_v55, %s5411_s23 }
 0x6a7   :  { %2530 = vrot.lane.b32.xlu0 %v7366_v55, %s5399_s24  ;;  %2594 = vrot.lane.b32.xlu1 %v7366_v55, %s5412_s17 }
 0x6ab   :  { %2506 = vrot.lane.b32.xlu0 %v7360_v22, %s5415_s5  ;;  %2566 = vrot.lane.b32.xlu1 %v7360_v22, %s5413_s18 }
 0x6af   :  { %2510 = vrot.lane.b32.xlu0 %v7366_v55, %s5415_s5  ;;  %2528 = vrot.lane.b32.xlu1 %v7334_v34, %s5399_s24 }
 0x6b3   :  { %3010 = vrot.lane.b32.xlu0 %v7334_v34, %s5409_s7  ;;  %2508 = vrot.lane.b32.xlu1 %v7334_v34, %s5415_s5 }
 0x6b7   :  { %3006 = vrot.lane.b32.xlu0 %v7330_v8, %s5409_s7  ;;  %2902 = vrot.lane.b32.xlu1 %v7330_v8, %s5414_s19 }
 0x6bb   :  { %2990 = vrot.lane.b32.xlu0 %v7334_v34, %s5410_s9  ;;  %2926 = vrot.lane.b32.xlu1 %v7334_v34, %s5413_s18 }
 0x6bf   :  { %2986 = vrot.lane.b32.xlu0 %v7330_v8, %s5410_s9  ;;  %2882 = vrot.lane.b32.xlu1 %v7330_v8, %s5399_s24 }
 0x6c3   :  { %2970 = vrot.lane.b32.xlu0 %v7334_v34, %s5411_s23  ;;  %2906 = vrot.lane.b32.xlu1 %v7334_v34, %s5414_s19 }
 0x6c7   :  { %2966 = vrot.lane.b32.xlu0 %v7330_v8, %s5411_s23  ;;  %3008 = vrot.lane.b32.xlu1 %v7360_v22, %s5409_s7 }
 0x6cb   :  { %2950 = vrot.lane.b32.xlu0 %v7334_v34, %s5412_s17  ;;  %2988 = vrot.lane.b32.xlu1 %v7360_v22, %s5410_s9 }
 0x6cf   :  { %2946 = vrot.lane.b32.xlu0 %v7330_v8, %s5412_s17  ;;  %3012 = vrot.lane.b32.xlu1 %v7366_v55, %s5409_s7 }
 0x6d3   :  { %2922 = vrot.lane.b32.xlu0 %v7330_v8, %s5413_s18  ;;  %2968 = vrot.lane.b32.xlu1 %v7360_v22, %s5411_s23 }
 0x6d7   :  { %2928 = vrot.lane.b32.xlu0 %v7366_v55, %s5413_s18  ;;  %2992 = vrot.lane.b32.xlu1 %v7366_v55, %s5410_s9 }
 0x6db   :  { %2904 = vrot.lane.b32.xlu0 %v7360_v22, %s5414_s19  ;;  %2948 = vrot.lane.b32.xlu1 %v7360_v22, %s5412_s17 }
 0x6df   :  { %2908 = vrot.lane.b32.xlu0 %v7366_v55, %s5414_s19  ;;  %2972 = vrot.lane.b32.xlu1 %v7366_v55, %s5411_s23 }
 0x6e3   :  { %2884 = vrot.lane.b32.xlu0 %v7360_v22, %s5399_s24  ;;  %2952 = vrot.lane.b32.xlu1 %v7366_v55, %s5412_s17 }
 0x6e5   :  { %v2649_v2 = vpop.permute.xlu0 %2648 }
 0x6e7   :  { %2888 = vrot.lane.b32.xlu0 %v7366_v55, %s5399_s24  ;;  %2924 = vrot.lane.b32.xlu1 %v7360_v22, %s5413_s18 }
 0x6e9   :  { %v2633_v61 = vpop.permute.xlu0 %2632  ;;  %v2653_v21 = vpop.permute.xlu1 %2652 }
 0x6ed   :  { %v2629_v39 = vpop.permute.xlu0 %2628  ;;  %v7456_v31 = vpop.permute.xlu1 %2544 }
 0x6f1   :  { %v2613_v15 = vpop.permute.xlu0 %2612  ;;  %v7458_v62 = vpop.permute.xlu1 %2568 }
 0x6f5   :  { %v2609_v7 = vpop.permute.xlu0 %2608  ;;  %v7460_v14 = vpop.permute.xlu1 %2524 }
 0x6f9   :  { %v2593_v28 = vpop.permute.xlu0 %2592  ;;  %v7462_v23 = vpop.permute.xlu1 %2548 }
 0x6fd   :  { %v2589_v12 = vpop.permute.xlu0 %2588  ;;  %v7464_v4 = vpop.permute.xlu1 %2504 }
 0x701   :  { %v7466_v9 = vpop.permute.xlu0 %2564  ;;  %v2631_v57 = vpop.permute.xlu1 %2630 }
 0x702   :  { %v2637_v11 = vsel %vm430_vm1, %v2631_v57, %v2633_v61  ;;  %v2638_v35 = vsel %vm430_vm1, %v2629_v39, %v2631_v57 }
 0x703   :  { %v2640_v16 = vmul.f32 %v2638_v35, %v9755_v45 }
 0x705   :  { %v2651_v13 = vpop.permute.xlu0 %2650  ;;  %v2655_v48 = vpop.permute.xlu1 %2654 }
 0x706   :  { %v2657_v0 = vsel %vm467_vm0, %v2651_v13, %v2653_v21  ;;  %v2658_v41 = vsel %vm467_vm0, %v2649_v2, %v2651_v13  ;;  %v2656_v58 = vsel %vm467_vm0, %v2653_v21, %v2655_v48  ;;  %v2659_v43 = vsel %vm467_vm0, %v2655_v48, %v2649_v2 }
 0x707   :  { %v2660_v33 = vmul.f32 %v7295_v44, %v2658_v41  ;;  %v2662_v1 = vmul.f32 %v7299_v53, %v2656_v58  ;;  %v2661_v27 = vmul.f32 %v7289_v60, %v2657_v0  ;;  %v2663_v57 = vmul.f32 %v7292_v37, %v2659_v43 }
 0x708   :  { %v2641_v13 = vmul.f32 %v2637_v11, %v5657_v19 }
 0x709   :  { %2724 = vmatprep.subr.mxu0 %v2661_v27  ;;  %v2571_v24 = vpop.permute.xlu0 %2570  ;;  %2795 = vmatprep.subr.mxu1 %v2663_v57  ;;  %v2611_v5 = vpop.permute.xlu1 %2610 }
 0x70a   :  { %v2617_v21 = vsel %vm393_vm2, %v2611_v5, %v2613_v15  ;;  %v2618_v2 = vsel %vm393_vm2, %v2609_v7, %v2611_v5  ;;  %2725 = vmatpush1.msra.mxu0 %v2660_v33  ;;  %2796 = vmatpush1.msra.mxu1 %v2662_v1 }
 0x70b   :  { %v2620_v48 = vmul.f32 %v2618_v2, %v9725_v54  ;;  %2726 = vmatprep.subr.mxu0 %v2641_v13  ;;  %v2621_v0 = vmul.f32 %v2617_v21, %v9724_v25 }
 0x70c   :  { %2727 = vmatpush1.msra.mxu0 %v2640_v16 }
 0x70d   :  { %v2547_v41 = vpop.permute.xlu0 %2546  ;;  %2728 = vmatprep.subr.mxu0 %v2621_v0  ;;  %v2635_v58 = vpop.permute.xlu1 %2634 }
 0x70e   :  { %v2636_v11 = vsel %vm430_vm1, %v2633_v61, %v2635_v58  ;;  %v2639_v35 = vsel %vm430_vm1, %v2635_v58, %v2629_v39  ;;  %2729 = vmatpush1.msra.mxu0 %v2620_v48 }
 0x70f   :  { %v2642_v5 = vmul.f32 %v2636_v11, %v5694_v42  ;;  %v2643_v43 = vmul.f32 %v2639_v35, %v9721_v26 }
 0x711   :  { %v2551_v33 = vpop.permute.xlu0 %2550  ;;  %2797 = vmatprep.subr.mxu1 %v2643_v43  ;;  %v2591_v1 = vpop.permute.xlu1 %2590  ;;  %v2572_v43 = vsel %vm315_vm4, %v7458_v62, %v2571_v24 }
 0x712   :  { %v2597_v16 = vsel %vm356_vm3, %v2591_v1, %v2593_v28  ;;  %v2598_v27 = vsel %vm356_vm3, %v2589_v12, %v2591_v1  ;;  %2798 = vmatpush1.msra.mxu1 %v2642_v5  ;;  %v2575_v1 = vsel %vm315_vm4, %v2571_v24, %v7466_v9 }
 0x713   :  { %v2600_v61 = vmul.f32 %v2598_v27, %v9729_v3  ;;  %v2601_v57 = vmul.f32 %v2597_v16, %v9728_v32  ;;  %v2555_v16 = vsel %vm278_vm5, %v2551_v33, %v7456_v31 }
 0x715   :  { %v2527_v39 = vpop.permute.xlu0 %2526  ;;  %2730 = vmatprep.subr.mxu0 %v2601_v57  ;;  %v2615_v13 = vpop.permute.xlu1 %2614  ;;  %v2552_v57 = vsel %vm278_vm5, %v7462_v23, %v2551_v33  ;;  %v2576_v33 = vmul.f32 %v2575_v1, %v5760_v38 }
 0x716   :  { %v2616_v21 = vsel %vm393_vm2, %v2613_v15, %v2615_v13  ;;  %v2619_v2 = vsel %vm393_vm2, %v2615_v13, %v2609_v7  ;;  %2731 = vmatpush1.msra.mxu0 %v2600_v61  ;;  %v2534_v24 = vsel %vm241_vm6, %v7460_v14, %v2527_v39 }
 0x717   :  { %v2622_v48 = vmul.f32 %v2616_v21, %v9727_v36  ;;  %2732 = vmatprep.subr.mxu0 %v7360_v22  ;;  %v2623_v0 = vmul.f32 %v2619_v2, %v9726_v40 }
 0x718   :  { %2733 = vmatpush1.msra.mxu0 %v7330_v8 }
 0x719   :  { %v2531_v58 = vpop.permute.xlu0 %2530  ;;  %2799 = vmatprep.subr.mxu1 %v2623_v0  ;;  %v2595_v11 = vpop.permute.xlu1 %2594 }
 0x71a   :  { %v2596_v35 = vsel %vm356_vm3, %v2593_v28, %v2595_v11  ;;  %v2599_v15 = vsel %vm356_vm3, %v2595_v11, %v2589_v12  ;;  %2800 = vmatpush1.msra.mxu1 %v2622_v48  ;;  %v2553_v28 = vsel %vm278_vm5, %v2547_v41, %v7462_v23  ;;  %v2554_v12 = vsel %vm278_vm5, %v7456_v31, %v2547_v41 }
 0x71b   :  { %v2602_v7 = vmul.f32 %v2596_v35, %v5735_v10  ;;  %v2603_v5 = vmul.f32 %v2599_v15, %v5726_v63  ;;  %v2579_v23 = vmul.f32 %v2572_v43, %v5773_v49  ;;  %v2558_v2 = vmul.f32 %v2553_v28, %v5802_v20 }
 0x71c   :  { %v2556_v48 = vmul.f32 %v2555_v16, %v5785_v56  ;;  %v2559_v35 = vmul.f32 %v2552_v57, %v5799_v18  ;;  %v2537_v15 = vmul.f32 %v2534_v24, %v5796_v17  ;;  %v9768_v57 = vld [vmem:[#allocation50_spill] sm:$0xff] }
 0x71d   :  { %v2507_v27 = vpop.permute.xlu0 %2506  ;;  %2801 = vmatprep.subr.mxu1 %v2603_v5  ;;  %v2567_v61 = vpop.permute.xlu1 %2566 }
 0x71e   :  { %v2573_v13 = vsel %vm315_vm4, %v2567_v61, %v7458_v62  ;;  %v2574_v41 = vsel %vm315_vm4, %v7466_v9, %v2567_v61  ;;  %2802 = vmatpush1.msra.mxu1 %v2602_v7  ;;  %v2557_v62 = vmul.f32 %v2554_v12, %v5770_v47  ;;  %v2535_v9 = vsel %vm241_vm6, %v2531_v58, %v7460_v14 }
 0x71f   :  { %v2578_v31 = vmul.f32 %v2573_v13, %v5776_v50  ;;  %2803 = vmatprep.subr.mxu1 %v7366_v55  ;;  %v2577_v21 = vmul.f32 %v2574_v41, %v5752_v30  ;;  %v2514_v7 = vsel %vm204_vm7, %v7464_v4, %v2507_v27  ;;  %v2536_v12 = vmul.f32 %v2535_v9, %v5811_v29  ;;  %v9769_v13 = vld [vmem:[#allocation49_spill] sm:$0xff] }
 0x720   :  { %2804 = vmatpush1.msra.mxu1 %v7334_v34 }
 0x721   :  { %v2511_v0 = vpop.permute.xlu0 %2510  ;;  %2734 = vmatprep.subr.mxu0 %v2577_v21  ;;  %2805 = vmatprep.subr.mxu1 %v2579_v23  ;;  %v2529_v11 = vpop.permute.xlu1 %2528  ;;  %v9770_v21 = vmov 1.0  }
 0x722   :  { %v2532_v5 = vsel %vm241_vm6, %v2529_v11, %v2531_v58  ;;  %v2533_v43 = vsel %vm241_vm6, %v2527_v39, %v2529_v11  ;;  %2735 = vmatpush1.msra.mxu0 %v2576_v33  ;;  %2806 = vmatpush1.msra.mxu1 %v2578_v31  ;;  %v2515_v14 = vsel %vm204_vm7, %v2511_v0, %v7464_v4  ;;  %v2668_v31 = vld [vmem:[%s9389_s6] sm:$0xff]  ;;  %s5418_s6 = smov [#allocation19]  }
 0x723   :  { %v2538_v1 = vmul.f32 %v2533_v43, %v5828_v52  ;;  %2736 = vmatprep.subr.mxu0 %v2557_v62  ;;  %2807 = vmatprep.subr.mxu1 %v2559_v35  ;;  %v2539_v28 = vmul.f32 %v2532_v5, %v5825_v51  ;;  %v2517_v39 = vmul.f32 %v2514_v7, %v5822_v46 }
 0x724   :  { %2737 = vmatpush1.msra.mxu0 %v2556_v48  ;;  %2808 = vmatpush1.msra.mxu1 %v2558_v2  ;;  %v2516_v16 = vmul.f32 %v2515_v14, %v9761_v59 }
 0x725   :  { %2738 = vmatprep.subr.mxu0 %v2537_v15  ;;  %2809 = vmatprep.subr.mxu1 %v2539_v28  ;;  %v2509_v58 = vpop.permute.xlu1 %2508  ;;  %v7637_v62 = vpop.permute.xlu0 %3010 }
 0x726   :  { %v2512_v4 = vsel %vm204_vm7, %v2509_v58, %v2511_v0  ;;  %v2513_v61 = vsel %vm204_vm7, %v2507_v27, %v2509_v58  ;;  %2739 = vmatpush1.msra.mxu0 %v2536_v12  ;;  %2810 = vmatpush1.msra.mxu1 %v2538_v1  ;;  %v3195_v1 = vld [vmem:[#allocation15 + $0x8] sm:$0xff] }
 0x727   :  { %v2518_v24 = vmul.f32 %v2513_v61, %v9768_v57  ;;  %2740 = vmatprep.subr.mxu0 %v2517_v39  ;;  %v2519_v41 = vmul.f32 %v2512_v4, %v9769_v13 }
 0x728   :  { %2741 = vmatpush1.msra.mxu0 %v2516_v16 }
 0x729   :  { %5115 = vmatprep.subr.msk.mxu0 %vm164_vm8, %v9770_v21  ;;  %2811 = vmatprep.subr.mxu1 %v2519_v41  ;;  %v7645_v9 = vpop.permute.xlu0 %3006  ;;  %v7649_v0 = vpop.permute.xlu1 %2902 }
 0x72a   :  { %5116 = vmatpush1.msk.msra.mxu0 %vm164_vm8, %v9770_v21  ;;  %2812 = vmatpush1.msra.mxu1 %v2518_v24  ;;  %9772 = vst [vmem:[#allocation59_spill] sm:$0xff] %v7649_v0 }
 0x72b   :  { %5083 = vmatmul.mubr.msk.f32.vlgmr.msra.gmra.mxu0 %vm537_vm9, %v2668_v31  ;;  %5117 = vmatprep.subr.msk.mxu1 %vm164_vm8, %v9770_v21 }
 0x72c   :  { %5118 = vmatpush1.msk.msra.mxu1 %vm164_vm8, %v9770_v21  ;;  %5085 = vmatprep.mubr.msk.f32.mxu0 %vm1103_vm10, %v3195_v1 }
 0x72d   :  { %5084 = vmatmul.mubr.msk.f32.vlgmr.msra.gmra.mxu1 %vm537_vm9, %v2668_v31  ;;  %v7655_v11 = vpop.permute.xlu0 %2990  ;;  %v7659_v35 = vpop.permute.xlu1 %2926 }
 0x72e   :  { %9773 = vst [vmem:[#allocation64_spill] sm:$0xff] %v7659_v35  ;;  %5087 = vmatprep.mubr.msk.f32.mxu1 %vm1103_vm10, %v3195_v1 }
 0x731   :  { %v7665_v15 = vpop.permute.xlu0 %2986  ;;  %v7669_v7 = vpop.permute.xlu1 %2882 }
 0x732   :  { %9774 = vst [vmem:[#allocation68_spill] sm:$0xff] %v7669_v7 }
 0x735   :  { %v7675_v5 = vpop.permute.xlu0 %2970  ;;  %v7679_v43 = vpop.permute.xlu1 %2906 }
 0x736   :  { %9775 = vst [vmem:[#allocation26_spill] sm:$0xff] %v7679_v43 }
 0x739   :  { %v7685_v14 = vpop.permute.xlu0 %2966  ;;  %v3009_v28 = vpop.permute.xlu1 %3008 }
 0x73d   :  { %v7695_v12 = vpop.permute.xlu0 %2950  ;;  %v2989_v58 = vpop.permute.xlu1 %2988 }
 0x73e   :  { %9776 = vst [vmem:[#allocation32_spill] sm:$0xff] %v7695_v12 }
 0x741   :  { %v7701_v39 = vpop.permute.xlu0 %2946  ;;  %v3013_v16 = vpop.permute.xlu1 %3012 }
 0x742   :  { %9777 = vst [vmem:[#allocation29_spill] sm:$0xff] %v7701_v39 }
 0x745   :  { %v7705_v4 = vpop.permute.xlu0 %2922  ;;  %v7707_v61 = vpop.permute.xlu1 %2968 }
 0x746   :  { %9778 = vst [vmem:[#allocation71_spill] sm:$0xff] %v7705_v4 }
 0x749   :  { %v7709_v24 = vpop.permute.xlu0 %2928  ;;  %v7711_v41 = vpop.permute.xlu1 %2992 }
 0x74a   :  { %9779 = vst [vmem:[#allocation53_spill] sm:$0xff] %v7709_v24 }
 0x74d   :  { %v7713_v31 = vpop.permute.xlu0 %2904  ;;  %v7715_v1 = vpop.permute.xlu1 %2948 }
 0x74e   :  { %9780 = vst [vmem:[#allocation66_spill] sm:$0xff] %v7713_v31  ;;  %9781 = vst [vmem:[#allocation55_spill] sm:$0xff] %v7715_v1 }
 0x751   :  { %v7717_v23 = vpop.permute.xlu0 %2908  ;;  %v7719_v21 = vpop.permute.xlu1 %2972 }
 0x752   :  { %9782 = vst [vmem:[#allocation54_spill] sm:$0xff] %v7717_v23  ;;  %9783 = vst [vmem:[#allocation73_spill] sm:$0xff] %v7719_v21 }
 0x7eb   :  { %v7597_v27 = vpop.f32.mrf.mxu0 }
 0x7ec   :  { %3114 = vrot.lane.b32.xlu0 %v7597_v27, %s5412_s17 }
 0x7ed   :  { %v7601_v33 = vpop.f32.mrf.mxu1  ;;  %v7609_v2 = vpop.f32.mrf.mxu0 }
 0x7ee   :  { %3118 = vrot.lane.b32.xlu1 %v7601_v33, %s5412_s17 }
 0x7ef   :  { %v7619_v48 = vpop.f32.mrf.mxu1 }
 0x7f0   :  { %3090 = vrot.lane.b32.xlu0 %v7597_v27, %s5413_s18 }
 0x7f2   :  { %3070 = vrot.lane.b32.xlu1 %v7597_v27, %s5414_s19 }
 0x7f4   :  { %3116 = vrot.lane.b32.xlu0 %v7609_v2, %s5412_s17 }
 0x7f6   :  { %3094 = vrot.lane.b32.xlu1 %v7601_v33, %s5413_s18 }
 0x7f8   :  { %2864 = vrot.lane.b32.xlu0 %v7360_v22, %s5415_s5 }
 0x7fa   :  { %3050 = vrot.lane.b32.xlu1 %v7597_v27, %s5399_s24 }
 0x7fc   :  { %3096 = vrot.lane.b32.xlu0 %v7619_v48, %s5413_s18 }
 0x7fe   :  { %3074 = vrot.lane.b32.xlu1 %v7601_v33, %s5414_s19 }
 0x800   :  { %3072 = vrot.lane.b32.xlu0 %v7609_v2, %s5414_s19 }
 0x802   :  { %3030 = vrot.lane.b32.xlu1 %v7597_v27, %s5415_s5 }
 0x804   :  { %3076 = vrot.lane.b32.xlu0 %v7619_v48, %s5414_s19 }
 0x806   :  { %3054 = vrot.lane.b32.xlu1 %v7601_v33, %s5399_s24 }
 0x808   :  { %3052 = vrot.lane.b32.xlu0 %v7609_v2, %s5399_s24 }
 0x80a   :  { %3034 = vrot.lane.b32.xlu1 %v7601_v33, %s5415_s5 }
 0x80c   :  { %3056 = vrot.lane.b32.xlu0 %v7619_v48, %s5399_s24 }
 0x80e   :  { %3120 = vrot.lane.b32.xlu1 %v7619_v48, %s5412_s17 }
 0x810   :  { %3032 = vrot.lane.b32.xlu0 %v7609_v2, %s5415_s5 }
 0x812   :  { %3092 = vrot.lane.b32.xlu1 %v7609_v2, %s5413_s18 }
 0x814   :  { %3036 = vrot.lane.b32.xlu0 %v7619_v48, %s5415_s5 }
 0x816   :  { %2862 = vrot.lane.b32.xlu1 %v7330_v8, %s5415_s5  ;;  %v7723_v8 = vpop.permute.xlu1 %2952 }
 0x817   :  { %9785 = vst [vmem:[#allocation62_spill] sm:$0xff] %v7723_v8 }
 0x818   :  { %2868 = vrot.lane.b32.xlu0 %v7366_v55, %s5415_s5 }
 0x81a   :  { %2886 = vrot.lane.b32.xlu1 %v7334_v34, %s5399_s24  ;;  %v7727_v55 = vpop.permute.xlu1 %2924 }
 0x81b   :  { %9787 = vst [vmem:[#allocation74_spill] sm:$0xff] %v7727_v55 }
 0x81c   :  { %3174 = vrot.lane.b32.xlu0 %v7597_v27, %s5409_s7 }
 0x81e   :  { %2866 = vrot.lane.b32.xlu1 %v7334_v34, %s5415_s5  ;;  %v7721_v34 = vpop.permute.xlu0 %2884 }
 0x81f   :  { %9784 = vst [vmem:[#allocation61_spill] sm:$0xff] %v7721_v34 }
 0x820   :  { %3158 = vrot.lane.b32.xlu0 %v7601_v33, %s5410_s9 }
 0x822   :  { %3178 = vrot.lane.b32.xlu1 %v7601_v33, %s5409_s7  ;;  %v7725_v7 = vpop.permute.xlu0 %2888 }
 0x823   :  { %9786 = vst [vmem:[#allocation70_spill] sm:$0xff] %v7725_v7 }
 0x824   :  { %3154 = vrot.lane.b32.xlu0 %v7597_v27, %s5410_s9 }
 0x826   :  { %3156 = vrot.lane.b32.xlu1 %v7609_v2, %s5410_s9 }
 0x828   :  { %3176 = vrot.lane.b32.xlu0 %v7609_v2, %s5409_s7 }
 0x82a   :  { %3180 = vrot.lane.b32.xlu1 %v7619_v48, %s5409_s7 }
 0x82c   :  { %3138 = vrot.lane.b32.xlu0 %v7601_v33, %s5411_s23 }
 0x82e   :  { %3136 = vrot.lane.b32.xlu1 %v7609_v2, %s5411_s23 }
 0x830   :  { %3134 = vrot.lane.b32.xlu0 %v7597_v27, %s5411_s23 }
 0x832   :  { %3160 = vrot.lane.b32.xlu1 %v7619_v48, %s5410_s9 }
 0x836   :  { %3140 = vrot.lane.b32.xlu1 %v7619_v48, %s5411_s23 }
 0x85e   :  { %v3115_v22 = vpop.permute.xlu0 %3114 }
 0x860   :  { %v3119_v36 = vpop.permute.xlu1 %3118 }
 0x862   :  { %v3091_v0 = vpop.permute.xlu0 %3090 }
 0x864   :  { %v3071_v43 = vpop.permute.xlu1 %3070 }
 0x866   :  { %v3117_v40 = vpop.permute.xlu0 %3116 }
 0x867   :  { %v3123_v31 = vsel %vm356_vm3, %v3117_v40, %v3119_v36  ;;  %v3124_v23 = vsel %vm356_vm3, %v3115_v22, %v3117_v40 }
 0x868   :  { %v3126_v4 = vmul.f32 %v3124_v23, %v9729_v3  ;;  %v3095_v34 = vpop.permute.xlu1 %3094  ;;  %v3127_v8 = vmul.f32 %v3123_v31, %v9728_v32  ;;  %v3015_v31 = vsel %vm467_vm0, %v3009_v28, %v7637_v62 }
 0x86a   :  { %v7735_v39 = vpop.permute.xlu0 %2864  ;;  %3280 = vmatprep.subr.mxu0 %v3127_v8  ;;  %v3016_v8 = vsel %vm467_vm0, %v7645_v9, %v3009_v28  ;;  %v7759_v28 = vmul.f32 %v7289_v60, %v3015_v31  ;;  %v7774_v60 = vsel %vm467_vm0, %v3013_v16, %v7645_v9 }
 0x86b   :  { %9788 = vst [vmem:[#allocation63_spill] sm:$0xff] %v7735_v39  ;;  %3281 = vmatpush1.msra.mxu0 %v3126_v4  ;;  %v2995_v4 = vsel %vm430_vm1, %v2989_v58, %v7655_v11  ;;  %v7752_v32 = vmul.f32 %v7295_v44, %v3016_v8 }
 0x86c   :  { %3282 = vmatprep.subr.mxu0 %v7609_v2  ;;  %v3051_v7 = vpop.permute.xlu1 %3050 }
 0x86d   :  { %3283 = vmatpush1.msra.mxu0 %v7597_v27  ;;  %v2996_v27 = vsel %vm430_vm1, %v7665_v15, %v2989_v58 }
 0x86e   :  { %v3097_v55 = vpop.permute.xlu0 %3096  ;;  %v7762_v35 = vmul.f32 %v2996_v27, %v9755_v45 }
 0x86f   :  { %v3101_v24 = vsel %vm315_vm4, %v3097_v55, %v3091_v0 }
 0x870   :  { %v3075_v1 = vpop.permute.xlu1 %3074 }
 0x872   :  { %v3073_v12 = vpop.permute.xlu0 %3072 }
 0x874   :  { %v3031_v26 = vpop.permute.xlu1 %3030 }
 0x876   :  { %v3077_v42 = vpop.permute.xlu0 %3076 }
 0x877   :  { %v3081_v9 = vsel %vm278_vm5, %v3077_v42, %v3071_v43  ;;  %v3078_v31 = vsel %vm278_vm5, %v3075_v1, %v3077_v42 }
 0x878   :  { %v3055_v40 = vpop.permute.xlu1 %3054 }
 0x87a   :  { %v3053_v25 = vpop.permute.xlu0 %3052 }
 0x87c   :  { %v3035_v23 = vpop.permute.xlu1 %3034 }
 0x87e   :  { %v3057_v2 = vpop.permute.xlu0 %3056 }
 0x880   :  { %v3121_v39 = vpop.permute.xlu1 %3120 }
 0x881   :  { %v3122_v3 = vsel %vm356_vm3, %v3119_v36, %v3121_v39  ;;  %v3125_v21 = vsel %vm356_vm3, %v3121_v39, %v3115_v22  ;;  %v3014_v36 = vsel %vm467_vm0, %v7637_v62, %v3013_v16  ;;  %v3098_v22 = vsel %vm315_vm4, %v3095_v34, %v3097_v55 }
 0x882   :  { %v3128_v58 = vmul.f32 %v3122_v3, %v5735_v10  ;;  %v3033_v37 = vpop.permute.xlu0 %3032  ;;  %v3129_v44 = vmul.f32 %v3125_v21, %v5726_v63  ;;  %v7779_v39 = vmul.f32 %v2995_v4, %v5657_v19  ;;  %v7785_v3 = vsel %vm393_vm2, %v7707_v61, %v7675_v5 }
 0x883   :  { %v3079_v21 = vsel %vm278_vm5, %v3073_v12, %v3075_v1  ;;  %v3080_v62 = vsel %vm278_vm5, %v3071_v43, %v3073_v12  ;;  %v3102_v16 = vmul.f32 %v3101_v24, %v5760_v38  ;;  %v3060_v12 = vsel %vm241_vm6, %v3051_v7, %v3053_v25 }
 0x884   :  { %3357 = vmatprep.subr.mxu1 %v3129_v44  ;;  %v3093_v55 = vpop.permute.xlu1 %3092  ;;  %v3105_v44 = vmul.f32 %v3098_v22, %v5773_v49  ;;  %v3084_v42 = vmul.f32 %v3079_v21, %v5802_v20  ;;  %v3083_v1 = vmul.f32 %v3080_v62, %v5770_v47  ;;  %v3085_v21 = vmul.f32 %v3078_v31, %v5799_v18 }
 0x885   :  { %v3099_v8 = vsel %vm315_vm4, %v3093_v55, %v3095_v34  ;;  %v3100_v27 = vsel %vm315_vm4, %v3091_v0, %v3093_v55  ;;  %3358 = vmatpush1.msra.mxu1 %v3128_v58  ;;  %v3082_v34 = vmul.f32 %v3081_v9, %v5785_v56  ;;  %v3058_v0 = vsel %vm241_vm6, %v3055_v40, %v3057_v2 }
 0x886   :  { %v3104_v4 = vmul.f32 %v3099_v8, %v5776_v50  ;;  %v3037_v43 = vpop.permute.xlu0 %3036  ;;  %3359 = vmatprep.subr.mxu1 %v7619_v48  ;;  %v3103_v24 = vmul.f32 %v3100_v27, %v5752_v30  ;;  %v3059_v58 = vsel %vm241_vm6, %v3053_v25, %v3055_v40  ;;  %v3061_v48 = vsel %vm241_vm6, %v3057_v2, %v3051_v7 }
 0x887   :  { %3360 = vmatpush1.msra.mxu1 %v7601_v33  ;;  %v3040_v9 = vsel %vm204_vm7, %v3031_v26, %v3033_v37  ;;  %v3038_v33 = vsel %vm204_vm7, %v3035_v23, %v3037_v43  ;;  %v3063_v62 = vmul.f32 %v3060_v12, %v5796_v17  ;;  %v3039_v25 = vsel %vm204_vm7, %v3033_v37, %v3035_v23 }
 0x888   :  { %3284 = vmatprep.subr.mxu0 %v3103_v24  ;;  %3361 = vmatprep.subr.mxu1 %v3105_v44  ;;  %v7816_v22 = vpop.permute.xlu1 %2862  ;;  %v3041_v7 = vsel %vm204_vm7, %v3037_v43, %v3031_v26  ;;  %v3065_v2 = vmul.f32 %v3058_v0, %v5825_v51  ;;  %v2976_v55 = vsel %vm393_vm2, %v7685_v14, %v7707_v61  ;;  %v9789_v24 = vld [vmem:[#allocation57_spill] sm:$0xff] }
 0x889   :  { %3285 = vmatpush1.msra.mxu0 %v3102_v16  ;;  %3362 = vmatpush1.msra.mxu1 %v3104_v4  ;;  %v3064_v16 = vmul.f32 %v3059_v58, %v5828_v52  ;;  %v3062_v31 = vmul.f32 %v3061_v48, %v5811_v29  ;;  %v2994_v26 = vsel %vm430_vm1, %v7655_v11, %v7711_v41 }
 0x88a   :  { %v7828_v40 = vpop.permute.xlu0 %2868  ;;  %3286 = vmatprep.subr.mxu0 %v3083_v1  ;;  %3363 = vmatprep.subr.mxu1 %v3085_v21  ;;  %v3043_v23 = vmul.f32 %v3040_v9, %v5822_v46  ;;  %v3045_v8 = vmul.f32 %v3038_v33, %v9769_v13  ;;  %v2997_v61 = vsel %vm430_vm1, %v7711_v41, %v7665_v15  ;;  %v9792_v41 = vld [vmem:[#allocation73_spill] sm:$0xff]  ;;  %v9794_v1 = vld [vmem:[#allocation36_spill] sm:$0xff]  ;;  %v9795_v21 = vld [vmem:[#allocation35_spill] sm:$0xff] }
 0x88b   :  { %3287 = vmatpush1.msra.mxu0 %v3082_v34  ;;  %3364 = vmatpush1.msra.mxu1 %v3084_v42  ;;  %v3044_v27 = vmul.f32 %v3039_v25, %v9768_v57  ;;  %v3042_v12 = vmul.f32 %v3041_v7, %v9761_v59  ;;  %v3020_v11 = vmul.f32 %v7299_v53, %v3014_v36  ;;  %v9790_v42 = vld [vmem:[#allocation53_spill] sm:$0xff]  ;;  %v9791_v34 = vld [vmem:[#allocation64_spill] sm:$0xff]  ;;  %v9793_v53 = vld [vmem:[#allocation34_spill] sm:$0xff] }
 0x88c   :  { %3288 = vmatprep.subr.mxu0 %v3063_v62  ;;  %3365 = vmatprep.subr.mxu1 %v3065_v2  ;;  %v7841_v37 = vpop.permute.xlu1 %2886  ;;  %v2978_v4 = vmul.f32 %v2976_v55, %v9725_v54  ;;  %v3021_v44 = vmul.f32 %v9789_v24, %v7774_v60  ;;  %v2930_v15 = vsel %vm315_vm4, %v9791_v34, %v9790_v42  ;;  %v9796_v33 = vld [vmem:[#allocation32_spill] sm:$0xff]  ;;  %v9799_v7 = vld [vmem:[#allocation62_spill] sm:$0xff]  ;;  %v9806_v24 = vld [vmem:[#allocation41_spill] sm:$0xff] }
 0x88d   :  { %3289 = vmatpush1.msra.mxu0 %v3062_v31  ;;  %3366 = vmatpush1.msra.mxu1 %v3064_v16  ;;  %v2977_v0 = vsel %vm393_vm2, %v9792_v41, %v7685_v14  ;;  %v2979_v36 = vmul.f32 %v7785_v3, %v9793_v53  ;;  %v3000_v58 = vmul.f32 %v2994_v26, %v9794_v1  ;;  %v9797_v14 = vld [vmem:[#allocation55_spill] sm:$0xff]  ;;  %v9798_v3 = vld [vmem:[#allocation29_spill] sm:$0xff] }
 0x88e   :  { %v7853_v43 = vpop.permute.xlu0 %3174  ;;  %3290 = vmatprep.subr.mxu0 %v3043_v23  ;;  %3367 = vmatprep.subr.mxu1 %v3045_v8  ;;  %v2974_v60 = vsel %vm393_vm2, %v7675_v5, %v9792_v41  ;;  %v3001_v9 = vmul.f32 %v2997_v61, %v9795_v21  ;;  %v2955_v62 = vsel %vm356_vm3, %v9797_v14, %v9796_v33  ;;  %v9801_v31 = vld [vmem:[#allocation39_spill] sm:$0xff]  ;;  %v9802_v23 = vld [vmem:[#allocation26_spill] sm:$0xff] }
 0x88f   :  { %3291 = vmatpush1.msra.mxu0 %v3042_v12  ;;  %3368 = vmatpush1.msra.mxu1 %v3044_v27  ;;  %v2956_v25 = vsel %vm356_vm3, %v9798_v3, %v9797_v14  ;;  %v2957_v5 = vsel %vm356_vm3, %v9799_v7, %v9798_v3  ;;  %v2954_v55 = vsel %vm356_vm3, %v9796_v33, %v9799_v7  ;;  %v9804_v61 = vld [vmem:[#allocation59_spill] sm:$0xff]  ;;  %v9805_v12 = vld [vmem:[#allocation40_spill] sm:$0xff]  ;;  %v9809_v14 = vld [vmem:[#allocation74_spill] sm:$0xff] }
 0x890   :  { %3292 = vmatprep.subr.mxu0 %v7759_v28  ;;  %3369 = vmatprep.subr.mxu1 %v3021_v44  ;;  %v2867_v48 = vpop.permute.xlu1 %2866  ;;  %v9800_v28 = vld [vmem:[#allocation71_spill] sm:$0xff]  ;;  %v2981_v26 = vmul.f32 %v2977_v0, %v9801_v31  ;;  %v2961_v0 = vmul.f32 %v2957_v5, %v5726_v63  ;;  %v9810_v5 = vld [vmem:[#allocation37_spill] sm:$0xff] }
 0x891   :  { %3293 = vmatpush1.msra.mxu0 %v7752_v32  ;;  %3370 = vmatpush1.msra.mxu1 %v3020_v11  ;;  %v2933_v2 = vsel %vm315_vm4, %v9790_v42, %v9800_v28  ;;  %v9803_v32 = vld [vmem:[#allocation66_spill] sm:$0xff]  ;;  %v2980_v11 = vmul.f32 %v2974_v60, %v9805_v12  ;;  %v2960_v60 = vmul.f32 %v2954_v55, %v5735_v10 }
 0x892   :  { %v7895_v16 = vpop.permute.xlu0 %3158  ;;  %3294 = vmatprep.subr.mxu0 %v7779_v39  ;;  %3371 = vmatprep.subr.mxu1 %v3001_v9  ;;  %v2911_v8 = vsel %vm278_vm5, %v9803_v32, %v9802_v23  ;;  %v2912_v27 = vsel %vm278_vm5, %v9804_v61, %v9803_v32  ;;  %v2958_v39 = vmul.f32 %v2956_v25, %v9806_v24  ;;  %v9807_v42 = vld [vmem:[#allocation38_spill] sm:$0xff]  ;;  %v9813_v32 = vld [vmem:[#allocation68_spill] sm:$0xff] }
 0x893   :  { %3295 = vmatpush1.msra.mxu0 %v7762_v35  ;;  %3372 = vmatpush1.msra.mxu1 %v3000_v58  ;;  %v2959_v41 = vmul.f32 %v2955_v62, %v9807_v42  ;;  %v9808_v9 = vld [vmem:[#allocation54_spill] sm:$0xff]  ;;  %v2932_v35 = vsel %vm315_vm4, %v9800_v28, %v9809_v14  ;;  %v2931_v58 = vsel %vm315_vm4, %v9809_v14, %v9791_v34  ;;  %v9811_v34 = vld [vmem:[#allocation65_spill] sm:$0xff] }
 0x894   :  { %3296 = vmatprep.subr.mxu0 %v2979_v36  ;;  %3373 = vmatprep.subr.mxu1 %v2981_v26  ;;  %v7910_v44 = vpop.permute.xlu1 %3178  ;;  %v2913_v33 = vsel %vm278_vm5, %v9808_v9, %v9804_v61  ;;  %v2934_v36 = vmul.f32 %v2933_v2, %v5760_v38  ;;  %v2916_v3 = vmul.f32 %v2911_v8, %v5802_v20  ;;  %v9812_v26 = vld [vmem:[#allocation61_spill] sm:$0xff]  ;;  %v9814_v61 = vld [vmem:[#allocation70_spill] sm:$0xff] }
 0x895   :  { %3297 = vmatpush1.msra.mxu0 %v2978_v4  ;;  %3374 = vmatpush1.msra.mxu1 %v2980_v11  ;;  %v2910_v25 = vsel %vm278_vm5, %v9802_v23, %v9808_v9  ;;  %v2937_v4 = vmul.f32 %v2930_v15, %v5773_v49  ;;  %v2914_v7 = vmul.f32 %v2913_v33, %v5785_v56  ;;  %v9815_v11 = vld [vmem:[#allocation58_spill] sm:$0xff]  ;;  %v9817_v33 = vld [vmem:[#allocation63_spill] sm:$0xff] }
 0x896   :  { %v7928_v62 = vpop.permute.xlu0 %3154  ;;  %3298 = vmatprep.subr.mxu0 %v2959_v41  ;;  %3375 = vmatprep.subr.mxu1 %v2961_v0  ;;  %v2935_v2 = vmul.f32 %v2932_v35, %v5752_v30  ;;  %v2915_v55 = vmul.f32 %v2912_v27, %v5770_v47  ;;  %v2892_v23 = vsel %vm241_vm6, %v9813_v32, %v9812_v26 }
 0x897   :  { %3299 = vmatpush1.msra.mxu0 %v2958_v39  ;;  %3376 = vmatpush1.msra.mxu1 %v2960_v60  ;;  %v2936_v8 = vmul.f32 %v2931_v58, %v5776_v50  ;;  %v2890_v15 = vsel %vm241_vm6, %v7841_v37, %v9814_v61  ;;  %v9816_v39 = vld [vmem:[#allocation27_spill] sm:$0xff]  ;;  %v2893_v27 = vsel %vm241_vm6, %v9814_v61, %v9813_v32 }
 0x898   :  { %3300 = vmatprep.subr.mxu0 %v9810_v5  ;;  %3377 = vmatprep.subr.mxu1 %v9811_v34  ;;  %v3157_v28 = vpop.permute.xlu1 %3156  ;;  %v2891_v41 = vsel %vm241_vm6, %v9812_v26, %v7841_v37  ;;  %v2917_v9 = vmul.f32 %v2910_v25, %v5799_v18  ;;  %v2872_v60 = vsel %vm204_vm7, %v7816_v22, %v9817_v33 }
 0x899   :  { %3301 = vmatpush1.msra.mxu0 %v9815_v11  ;;  %3378 = vmatpush1.msra.mxu1 %v9816_v39  ;;  %v2873_v14 = vsel %vm204_vm7, %v7828_v40, %v7816_v22  ;;  %v2870_v35 = vsel %vm204_vm7, %v2867_v48, %v7828_v40  ;;  %v2871_v37 = vsel %vm204_vm7, %v9817_v33, %v2867_v48 }
 0x89a   :  { %v3177_v0 = vpop.permute.xlu0 %3176  ;;  %3302 = vmatprep.subr.mxu0 %v2935_v2  ;;  %3379 = vmatprep.subr.mxu1 %v2937_v4  ;;  %v2895_v25 = vmul.f32 %v2892_v23, %v5796_v17  ;;  %v2897_v4 = vmul.f32 %v2890_v15, %v5825_v51  ;;  %v2894_v2 = vmul.f32 %v2893_v27, %v5811_v29 }
 0x89b   :  { %3303 = vmatpush1.msra.mxu0 %v2934_v36  ;;  %3380 = vmatpush1.msra.mxu1 %v2936_v8  ;;  %v2896_v22 = vmul.f32 %v2891_v41, %v5828_v52  ;;  %v2874_v40 = vmul.f32 %v2873_v14, %v9761_v59  ;;  %v2875_v48 = vmul.f32 %v2872_v60, %v5822_v46  ;;  %v9818_v41 = vmov 1.0   ;;  %v8013_v60 = vld [vmem:[#allocation7 + $0x20] ss:$0 sm:$0xff]  ;;  %v8016_v14 = vld [vmem:[#allocation7 + $0x30] ss:$0 sm:$0xff] }
 0x89c   :  { %3304 = vmatprep.subr.mxu0 %v2915_v55  ;;  %3381 = vmatprep.subr.mxu1 %v2917_v9  ;;  %v3181_v58 = vpop.permute.xlu1 %3180  ;;  %v2877_v55 = vmul.f32 %v2870_v35, %v9769_v13  ;;  %v2876_v26 = vmul.f32 %v2871_v37, %v9768_v57  ;;  %v3183_v32 = vsel %vm467_vm0, %v3177_v0, %v7910_v44  ;;  %v8010_v9 = vld [vmem:[#allocation7 + $0x38] ss:$0 sm:$0xff] }
 0x89d   :  { %3305 = vmatpush1.msra.mxu0 %v2914_v7  ;;  %3382 = vmatpush1.msra.mxu1 %v2916_v3  ;;  %v3185_v7 = vsel %vm467_vm0, %v3181_v58, %v7853_v43  ;;  %v3184_v3 = vsel %vm467_vm0, %v7853_v43, %v3177_v0  ;;  %v3182_v23 = vsel %vm467_vm0, %v7910_v44, %v3181_v58  ;;  %v8007_v44 = vld [vmem:[#allocation7 + $0x28] ss:$0 sm:$0xff] }
 0x89e   :  { %v3139_v36 = vpop.permute.xlu0 %3138  ;;  %3306 = vmatprep.subr.mxu0 %v2895_v25  ;;  %3383 = vmatprep.subr.mxu1 %v2897_v4  ;;  %v3163_v61 = vsel %vm430_vm1, %v3157_v28, %v7895_v16  ;;  %v3164_v15 = vsel %vm430_vm1, %v7928_v62, %v3157_v28  ;;  %v3187_v0 = vmul.f32 %v8007_v44, %v3183_v32 }
 0x89f   :  { %3307 = vmatpush1.msra.mxu0 %v2894_v2  ;;  %3384 = vmatpush1.msra.mxu1 %v2896_v22  ;;  %v3189_v33 = vmul.f32 %v8010_v9, %v3185_v7  ;;  %v3186_v28 = vmul.f32 %v8013_v60, %v3184_v3  ;;  %v3188_v35 = vmul.f32 %v8016_v14, %v3182_v23  ;;  %v3194_v7 = vld [vmem:[#allocation15] sm:$0xff]  ;;  %v3197_v3 = vld [vmem:[#allocation15 + $0x18] sm:$0xff] }
 0x8a0   :  { %3308 = vmatprep.subr.mxu0 %v2875_v48  ;;  %3385 = vmatprep.subr.mxu1 %v2877_v55  ;;  %v3137_v8 = vpop.permute.xlu1 %3136  ;;  %v3167_v4 = vmul.f32 %v3163_v61, %v5657_v19  ;;  %v3166_v2 = vmul.f32 %v3164_v15, %v9755_v45  ;;  %v3196_v15 = vld [vmem:[#allocation15 + $0x10] sm:$0xff] }
 0x8a1   :  { %3309 = vmatpush1.msra.mxu0 %v2874_v40  ;;  %3386 = vmatpush1.msra.mxu1 %v2876_v26  ;;  %v3143_v37 = vsel %vm393_vm2, %v3137_v8, %v3139_v36 }
 0x8a2   :  { %v3135_v27 = vpop.permute.xlu0 %3134  ;;  %5119 = vmatprep.subr.msk.mxu0 %vm164_vm8, %v9818_v41  ;;  %5121 = vmatprep.subr.msk.mxu1 %vm164_vm8, %v9818_v41  ;;  %v3147_v55 = vmul.f32 %v3143_v37, %v9793_v53 }
 0x8a3   :  { %5120 = vmatpush1.msk.msra.mxu0 %vm164_vm8, %v9818_v41  ;;  %5122 = vmatpush1.msk.msra.mxu1 %vm164_vm8, %v9818_v41  ;;  %v3144_v58 = vsel %vm393_vm2, %v3135_v27, %v3137_v8 }
 0x8a4   :  { %3338 = vmatprep.subr.mxu0 %v3187_v0  ;;  %3415 = vmatprep.subr.mxu1 %v3189_v33  ;;  %v3161_v25 = vpop.permute.xlu1 %3160  ;;  %v3146_v32 = vmul.f32 %v3144_v58, %v9725_v54 }
 0x8a5   :  { %v3162_v22 = vsel %vm430_vm1, %v7895_v16, %v3161_v25  ;;  %v3165_v40 = vsel %vm430_vm1, %v3161_v25, %v7928_v62  ;;  %3339 = vmatpush2.msra.mxu0 %v3186_v28  ;;  %3416 = vmatpush2.msra.mxu1 %v3188_v35 }
 0x8a6   :  { %v3168_v48 = vmul.f32 %v3162_v22, %v9794_v1  ;;  %3340 = vmatprep.subr.mxu0 %v3167_v4  ;;  %v3169_v26 = vmul.f32 %v3165_v40, %v9795_v21 }
 0x8a7   :  { %3341 = vmatpush2.msra.mxu0 %v3166_v2 }
 0x8a8   :  { %3342 = vmatprep.subr.mxu0 %v3147_v55  ;;  %3417 = vmatprep.subr.mxu1 %v3169_v26  ;;  %v3141_v16 = vpop.permute.xlu1 %3140 }
 0x8a9   :  { %v3142_v62 = vsel %vm393_vm2, %v3139_v36, %v3141_v16  ;;  %v3145_v23 = vsel %vm393_vm2, %v3141_v16, %v3135_v27  ;;  %3343 = vmatpush2.msra.mxu0 %v3146_v32  ;;  %3418 = vmatpush2.msra.mxu1 %v3168_v48  ;;  %v9820_v36 = vmov 0.0   ;;  %v8159_v16 = vld [vmem:[#allocation4 + $0x8] sm:$0xff] }
 0x8aa   :  { %v3148_v8 = vmul.f32 %v3142_v62, %v9805_v12  ;;  %3345 = vmatmul.mubr.f32.vlgmr.msra.gmra.mxu0 %v3194_v7  ;;  %v3149_v61 = vmul.f32 %v3145_v23, %v9801_v31 }
 0x8ab   :  { %5086 = vmatprep.mubr.msk.f32.mxu0 %vm1103_vm10, %v3197_v3 }
 0x8ac   :  { %3419 = vmatprep.subr.mxu1 %v3149_v61 }
 0x8ad   :  { %3420 = vmatpush2.msra.mxu1 %v3148_v8 }
 0x8ae   :  { %3351 = vmatmul.mubr.f32.gmra.mxu0 %v3196_v15  ;;  %3422 = vmatmul.mubr.f32.vlgmr.msra.gmra.mxu1 %v3194_v7  ;;  %v8151_v7 = vld [vmem:[#allocation4 + $0x10] sm:$0xff] }
 0x8af   :  { %5088 = vmatprep.mubr.msk.f32.mxu1 %vm1103_vm10, %v3197_v3  ;;  %3742 = vmatprep.mubr.f32.mxu0 %v9820_v36  ;;  %v8165_v3 = vld [vmem:[#allocation4] sm:$0xff] }
 0x8b0   :  { %9825 = vst [vmem:[#allocation56_spill] sm:$0xff] %v8165_v3 }
 0x8b2   :  { %3428 = vmatmul.mubr.f32.gmra.mxu1 %v3196_v15 }
 0x8b3   :  { %3813 = vmatprep.mubr.f32.mxu1 %v9820_v36 }
 0x96a   :  { %v3346_v27 = vpop.f32.mrf.mxu0 }
 0x96c   :  { %v3348_v0 = vpop.f32.mrf.mxu0 }
 0x96e   :  { %v3352_v33 = vpop.f32.mrf.mxu0  ;;  %v3423_v28 = vpop.f32.mrf.mxu1 }
 0x96f   :  { %v3450_v35 = vadd.f32 %v3352_v33, %v3346_v27 }
 0x970   :  { %v3425_v37 = vpop.f32.mrf.mxu1  ;;  %v3354_v22 = vpop.f32.mrf.mxu0 }
 0x971   :  { %v8051_v58 = vmul.f32 0.5, %v3450_v35  ;;  %v3451_v40 = vadd.f32 %v3354_v22, %v3348_v0 }
 0x972   :  { %v3429_v25 = vpop.f32.mrf.mxu1 }
 0x973   :  { %9821 = vst [vmem:[#allocation28_spill] sm:$0xff] %v8051_v58  ;;  %v3452_v4 = vadd.f32 %v3429_v25, %v3423_v28  ;;  %3614 = vrot.lane.b32.xlu0 %v8051_v58, %s5409_s7  ;;  %v8081_v55 = vmul.f32 0.5, %v3451_v40  ;;  %v8215_v25 = vld [vmem:[#allocation4 + $0x18] sm:$0xff] }
 0x974   :  { %v3431_v48 = vpop.f32.mrf.mxu1 }
 0x975   :  { %v8055_v2 = vmul.f32 0.5, %v3452_v4  ;;  %9823 = vst [vmem:[#allocation52_spill] sm:$0xff] %v8081_v55  ;;  %v3453_v26 = vadd.f32 %v3431_v48, %v3425_v37 }
 0x977   :  { %9822 = vst [vmem:[#allocation72_spill] sm:$0xff] %v8055_v2  ;;  %3598 = vrot.lane.b32.xlu0 %v8055_v2, %s5410_s9  ;;  %3618 = vrot.lane.b32.xlu1 %v8055_v2, %s5409_s7  ;;  %v8087_v32 = vmul.f32 0.5, %v3453_v26 }
 0x979   :  { %9824 = vst [vmem:[#allocation51_spill] sm:$0xff] %v8087_v32 }
 0x97b   :  { %3594 = vrot.lane.b32.xlu0 %v8051_v58, %s5410_s9  ;;  %3510 = vrot.lane.b32.xlu1 %v8051_v58, %s5414_s19 }
 0x97f   :  { %3578 = vrot.lane.b32.xlu0 %v8055_v2, %s5411_s23  ;;  %3534 = vrot.lane.b32.xlu1 %v8055_v2, %s5413_s18 }
 0x983   :  { %3574 = vrot.lane.b32.xlu0 %v8051_v58, %s5411_s23  ;;  %3490 = vrot.lane.b32.xlu1 %v8051_v58, %s5399_s24 }
 0x987   :  { %3558 = vrot.lane.b32.xlu0 %v8055_v2, %s5412_s17  ;;  %3514 = vrot.lane.b32.xlu1 %v8055_v2, %s5414_s19 }
 0x98b   :  { %3554 = vrot.lane.b32.xlu0 %v8051_v58, %s5412_s17  ;;  %3470 = vrot.lane.b32.xlu1 %v8051_v58, %s5415_s5 }
 0x98f   :  { %3530 = vrot.lane.b32.xlu0 %v8051_v58, %s5413_s18  ;;  %3596 = vrot.lane.b32.xlu1 %v8081_v55, %s5410_s9 }
 0x993   :  { %3616 = vrot.lane.b32.xlu0 %v8081_v55, %s5409_s7  ;;  %3620 = vrot.lane.b32.xlu1 %v8087_v32, %s5409_s7 }
 0x997   :  { %3536 = vrot.lane.b32.xlu0 %v8087_v32, %s5413_s18  ;;  %3576 = vrot.lane.b32.xlu1 %v8081_v55, %s5411_s23 }
 0x99b   :  { %3512 = vrot.lane.b32.xlu0 %v8081_v55, %s5414_s19  ;;  %3600 = vrot.lane.b32.xlu1 %v8087_v32, %s5410_s9 }
 0x99f   :  { %3516 = vrot.lane.b32.xlu0 %v8087_v32, %s5414_s19  ;;  %3556 = vrot.lane.b32.xlu1 %v8081_v55, %s5412_s17 }
 0x9a3   :  { %3492 = vrot.lane.b32.xlu0 %v8081_v55, %s5399_s24  ;;  %3580 = vrot.lane.b32.xlu1 %v8087_v32, %s5411_s23 }
 0x9a7   :  { %3496 = vrot.lane.b32.xlu0 %v8087_v32, %s5399_s24  ;;  %3560 = vrot.lane.b32.xlu1 %v8087_v32, %s5412_s17 }
 0x9ab   :  { %3472 = vrot.lane.b32.xlu0 %v8081_v55, %s5415_s5  ;;  %3532 = vrot.lane.b32.xlu1 %v8081_v55, %s5413_s18 }
 0x9af   :  { %3476 = vrot.lane.b32.xlu0 %v8087_v32, %s5415_s5  ;;  %3494 = vrot.lane.b32.xlu1 %v8055_v2, %s5399_s24 }
 0x9b3   :  { %4082 = vrot.lane.b32.xlu0 %v9810_v5, %s5412_s17  ;;  %3474 = vrot.lane.b32.xlu1 %v8055_v2, %s5415_s5 }
 0x9b7   :  { %4080 = vrot.lane.b32.xlu0 %v9815_v11, %s5412_s17  ;;  %4084 = vrot.lane.b32.xlu1 %v9816_v39, %s5412_s17 }
 0x9bb   :  { %4058 = vrot.lane.b32.xlu0 %v9810_v5, %s5413_s18  ;;  %4056 = vrot.lane.b32.xlu1 %v9815_v11, %s5413_s18 }
 0x9bf   :  { %4036 = vrot.lane.b32.xlu0 %v9815_v11, %s5414_s19  ;;  %4062 = vrot.lane.b32.xlu1 %v9811_v34, %s5413_s18 }
 0x9c3   :  { %4042 = vrot.lane.b32.xlu0 %v9811_v34, %s5414_s19  ;;  %4038 = vrot.lane.b32.xlu1 %v9810_v5, %s5414_s19 }
 0x9c7   :  { %4016 = vrot.lane.b32.xlu0 %v9815_v11, %s5399_s24  ;;  %4018 = vrot.lane.b32.xlu1 %v9810_v5, %s5399_s24 }
 0x9cb   :  { %4022 = vrot.lane.b32.xlu0 %v9811_v34, %s5399_s24  ;;  %3998 = vrot.lane.b32.xlu1 %v9810_v5, %s5415_s5 }
 0x9cf   :  { %3996 = vrot.lane.b32.xlu0 %v9815_v11, %s5415_s5  ;;  %3976 = vrot.lane.b32.xlu1 %v8151_v7, %s5409_s7 }
 0x9d3   :  { %4002 = vrot.lane.b32.xlu0 %v9811_v34, %s5415_s5  ;;  %3956 = vrot.lane.b32.xlu1 %v8151_v7, %s5410_s9 }
 0x9d7   :  { %3974 = vrot.lane.b32.xlu0 %v8159_v16, %s5409_s7  ;;  %3934 = vrot.lane.b32.xlu1 %v8159_v16, %s5411_s23 }
 0x9db   :  { %3972 = vrot.lane.b32.xlu0 %v8165_v3, %s5409_s7  ;;  %4086 = vrot.lane.b32.xlu1 %v9811_v34, %s5412_s17 }
 0x9df   :  { %3954 = vrot.lane.b32.xlu0 %v8159_v16, %s5410_s9  ;;  %3914 = vrot.lane.b32.xlu1 %v8159_v16, %s5412_s17 }
 0x9e3   :  { %3952 = vrot.lane.b32.xlu0 %v8165_v3, %s5410_s9  ;;  %3912 = vrot.lane.b32.xlu1 %v8165_v3, %s5412_s17 }
 0x9e5   :  { %v3615_v62 = vpop.permute.xlu0 %3614 }
 0x9e7   :  { %3936 = vrot.lane.b32.xlu0 %v8151_v7, %s5411_s23  ;;  %3888 = vrot.lane.b32.xlu1 %v8165_v3, %s5413_s18 }
 0x9e9   :  { %v8183_v23 = vpop.permute.xlu0 %3598  ;;  %v3619_v8 = vpop.permute.xlu1 %3618 }
 0x9eb   :  { %3932 = vrot.lane.b32.xlu0 %v8165_v3, %s5411_s23  ;;  %4040 = vrot.lane.b32.xlu1 %v9816_v39, %s5414_s19 }
 0x9ed   :  { %v3595_v61 = vpop.permute.xlu0 %3594  ;;  %v8189_v15 = vpop.permute.xlu1 %3510 }
 0x9ef   :  { %3916 = vrot.lane.b32.xlu0 %v8151_v7, %s5412_s17  ;;  %3868 = vrot.lane.b32.xlu1 %v8165_v3, %s5414_s19 }
 0x9f1   :  { %v8195_v27 = vpop.permute.xlu0 %3578  ;;  %v8197_v0 = vpop.permute.xlu1 %3534 }
 0x9f3   :  { %4060 = vrot.lane.b32.xlu0 %v9816_v39, %s5413_s18  ;;  %4020 = vrot.lane.b32.xlu1 %v9816_v39, %s5399_s24 }
 0x9f5   :  { %v8203_v33 = vpop.permute.xlu0 %3574  ;;  %v8205_v28 = vpop.permute.xlu1 %3490 }
 0x9f7   :  { %3890 = vrot.lane.b32.xlu0 %v8159_v16, %s5413_s18  ;;  %3848 = vrot.lane.b32.xlu1 %v8165_v3, %s5399_s24 }
 0x9f9   :  { %v8211_v35 = vpop.permute.xlu0 %3558  ;;  %v8213_v37 = vpop.permute.xlu1 %3514 }
 0x9fb   :  { %3894 = vrot.lane.b32.xlu0 %v8215_v25, %s5413_s18  ;;  %4000 = vrot.lane.b32.xlu1 %v9816_v39, %s5415_s5 }
 0x9fd   :  { %v8221_v4 = vpop.permute.xlu0 %3554  ;;  %v8223_v22 = vpop.permute.xlu1 %3470 }
 0x9ff   :  { %3870 = vrot.lane.b32.xlu0 %v8159_v16, %s5414_s19  ;;  %3828 = vrot.lane.b32.xlu1 %v8165_v3, %s5415_s5 }
 0xa01   :  { %v8229_v40 = vpop.permute.xlu0 %3530  ;;  %v3597_v48 = vpop.permute.xlu1 %3596 }
 0xa02   :  { %v3603_v26 = vsel %vm430_vm1, %v3597_v48, %v8183_v23 }
 0xa03   :  { %3874 = vrot.lane.b32.xlu0 %v8215_v25, %s5414_s19  ;;  %3978 = vrot.lane.b32.xlu1 %v8215_v25, %s5409_s7 }
 0xa05   :  { %v3617_v34 = vpop.permute.xlu0 %3616  ;;  %v3621_v39 = vpop.permute.xlu1 %3620 }
 0xa06   :  { %v3623_v36 = vsel %vm467_vm0, %v3617_v34, %v3619_v8  ;;  %v3624_v3 = vsel %vm467_vm0, %v3615_v62, %v3617_v34  ;;  %v3622_v11 = vsel %vm467_vm0, %v3619_v8, %v3621_v39  ;;  %v3625_v5 = vsel %vm467_vm0, %v3621_v39, %v3615_v62 }
 0xa07   :  { %v3626_v43 = vmul.f32 %v8013_v60, %v3624_v3  ;;  %v3628_v41 = vmul.f32 %v8016_v14, %v3622_v11  ;;  %3850 = vrot.lane.b32.xlu0 %v8159_v16, %s5399_s24  ;;  %3958 = vrot.lane.b32.xlu1 %v8215_v25, %s5410_s9  ;;  %v3627_v59 = vmul.f32 %v8007_v44, %v3623_v36 }
 0xa08   :  { %v3604_v34 = vsel %vm430_vm1, %v3595_v61, %v3597_v48  ;;  %v3629_v8 = vmul.f32 %v8010_v9, %v3625_v5  ;;  %v3607_v3 = vmul.f32 %v3603_v26, %v5657_v19 }
 0xa09   :  { %3690 = vmatprep.subr.mxu0 %v3627_v59  ;;  %v3537_v13 = vpop.permute.xlu0 %3536  ;;  %v3577_v39 = vpop.permute.xlu1 %3576  ;;  %v3606_v36 = vmul.f32 %v3604_v34, %v9755_v45 }
 0xa0a   :  { %3761 = vmatprep.subr.mxu1 %v3629_v8  ;;  %v3583_v11 = vsel %vm393_vm2, %v3577_v39, %v8195_v27  ;;  %v3584_v14 = vsel %vm393_vm2, %v8203_v33, %v3577_v39  ;;  %3691 = vmatpush1.msra.mxu0 %v3626_v43 }
 0xa0b   :  { %v3586_v62 = vmul.f32 %v3584_v14, %v9725_v54  ;;  %3762 = vmatpush1.msra.mxu1 %v3628_v41  ;;  %v3587_v59 = vmul.f32 %v3583_v11, %v9793_v53  ;;  %3692 = vmatprep.subr.mxu0 %v3607_v3 }
 0xa0c   :  { %3854 = vrot.lane.b32.xlu0 %v8215_v25, %s5399_s24  ;;  %3892 = vrot.lane.b32.xlu1 %v8151_v7, %s5413_s18 }
 0xa0d   :  { %3693 = vmatpush1.msra.mxu0 %v3606_v36  ;;  %v3513_v5 = vpop.permute.xlu0 %3512  ;;  %v3601_v9 = vpop.permute.xlu1 %3600 }
 0xa0e   :  { %3694 = vmatprep.subr.mxu0 %v3587_v59  ;;  %v3602_v48 = vsel %vm430_vm1, %v8183_v23, %v3601_v9  ;;  %v3605_v41 = vsel %vm430_vm1, %v3601_v9, %v3595_v61 }
 0xa0f   :  { %v3608_v43 = vmul.f32 %v3602_v48, %v9794_v1  ;;  %3695 = vmatpush1.msra.mxu0 %v3586_v62  ;;  %v3609_v26 = vmul.f32 %v3605_v41, %v9795_v21 }
 0xa10   :  { %3830 = vrot.lane.b32.xlu0 %v8159_v16, %s5415_s5  ;;  %3872 = vrot.lane.b32.xlu1 %v8151_v7, %s5414_s19 }
 0xa11   :  { %v3517_v34 = vpop.permute.xlu0 %3516  ;;  %3763 = vmatprep.subr.mxu1 %v3609_v26  ;;  %v3557_v8 = vpop.permute.xlu1 %3556 }
 0xa12   :  { %v3563_v23 = vsel %vm356_vm3, %v3557_v8, %v8211_v35  ;;  %v3564_v61 = vsel %vm356_vm3, %v8221_v4, %v3557_v8  ;;  %3764 = vmatpush1.msra.mxu1 %v3608_v43  ;;  %v3541_v8 = vsel %vm315_vm4, %v3537_v13, %v8229_v40 }
 0xa13   :  { %v3566_v39 = vmul.f32 %v3564_v61, %v9806_v24  ;;  %v3567_v11 = vmul.f32 %v3563_v23, %v9807_v42  ;;  %v3520_v61 = vsel %vm278_vm5, %v8189_v15, %v3513_v5 }
 0xa14   :  { %3834 = vrot.lane.b32.xlu0 %v8215_v25, %s5415_s5  ;;  %4312 = vrot.lane.b32.xlu1 %v8055_v2, %s5409_s7 }
 0xa15   :  { %v3493_v14 = vpop.permute.xlu0 %3492  ;;  %3696 = vmatprep.subr.mxu0 %v3567_v11  ;;  %v3581_v3 = vpop.permute.xlu1 %3580  ;;  %v3542_v11 = vmul.f32 %v3541_v8, %v5760_v38 }
 0xa16   :  { %v3582_v36 = vsel %vm393_vm2, %v8195_v27, %v3581_v3  ;;  %v3585_v62 = vsel %vm393_vm2, %v3581_v3, %v8203_v33  ;;  %3697 = vmatpush1.msra.mxu0 %v3566_v39  ;;  %v3518_v39 = vsel %vm278_vm5, %v8213_v37, %v3517_v34 }
 0xa17   :  { %v3588_v59 = vmul.f32 %v3582_v36, %v9805_v12  ;;  %3698 = vmatprep.subr.mxu0 %v8081_v55  ;;  %v3589_v9 = vmul.f32 %v3585_v62, %v9801_v31  ;;  %v3519_v62 = vsel %vm278_vm5, %v3513_v5, %v8213_v37  ;;  %v3523_v5 = vmul.f32 %v3520_v61, %v5770_v47 }
 0xa18   :  { %3938 = vrot.lane.b32.xlu0 %v8215_v25, %s5411_s23  ;;  %3699 = vmatpush1.msra.mxu0 %v8051_v58 }
 0xa19   :  { %3852 = vrot.lane.b32.xlu1 %v8151_v7, %s5399_s24  ;;  %v3497_v27 = vpop.permute.xlu0 %3496  ;;  %3765 = vmatprep.subr.mxu1 %v3589_v9  ;;  %v3561_v48 = vpop.permute.xlu1 %3560 }
 0xa1a   :  { %v3562_v33 = vsel %vm356_vm3, %v8211_v35, %v3561_v48  ;;  %v3565_v41 = vsel %vm356_vm3, %v3561_v48, %v8221_v4  ;;  %3766 = vmatpush1.msra.mxu1 %v3588_v59  ;;  %v3538_v35 = vsel %vm315_vm4, %v8197_v0, %v3537_v13  ;;  %v3500_v59 = vsel %vm241_vm6, %v8205_v28, %v3493_v14 }
 0xa1b   :  { %v3568_v43 = vmul.f32 %v3562_v33, %v5735_v10  ;;  %v3569_v26 = vmul.f32 %v3565_v41, %v5726_v63 }
 0xa1c   :  { %3918 = vrot.lane.b32.xlu0 %v8215_v25, %s5412_s17 }
 0xa1d   :  { %4292 = vrot.lane.b32.xlu1 %v8055_v2, %s5410_s9  ;;  %v3473_v4 = vpop.permute.xlu0 %3472  ;;  %3767 = vmatprep.subr.mxu1 %v3569_v26  ;;  %v3533_v23 = vpop.permute.xlu1 %3532 }
 0xa1e   :  { %v3539_v25 = vsel %vm315_vm4, %v3533_v23, %v8197_v0  ;;  %v3540_v13 = vsel %vm315_vm4, %v8229_v40, %v3533_v23  ;;  %3768 = vmatpush1.msra.mxu1 %v3568_v43  ;;  %v3521_v0 = vsel %vm278_vm5, %v3517_v34, %v8189_v15  ;;  %v3545_v40 = vmul.f32 %v3538_v35, %v5773_v49 }
 0xa1f   :  { %v3544_v3 = vmul.f32 %v3539_v25, %v5776_v50  ;;  %3769 = vmatprep.subr.mxu1 %v8087_v32  ;;  %v3543_v36 = vmul.f32 %v3540_v13, %v5752_v30  ;;  %v3525_v15 = vmul.f32 %v3518_v39, %v5799_v18  ;;  %v3501_v34 = vsel %vm241_vm6, %v3497_v27, %v8205_v28  ;;  %v9826_v13 = vld [vmem:[#allocation49_spill] sm:$0xff] }
 0xa20   :  { %4308 = vrot.lane.b32.xlu0 %v8051_v58, %s5409_s7  ;;  %3770 = vmatpush1.msra.mxu1 %v8055_v2  ;;  %v3522_v41 = vmul.f32 %v3521_v0, %v5785_v56  ;;  %v3480_v28 = vsel %vm204_vm7, %v8223_v22, %v3473_v4 }
 0xa21   :  { %3832 = vrot.lane.b32.xlu1 %v8151_v7, %s5415_s5  ;;  %v3477_v9 = vpop.permute.xlu0 %3476  ;;  %3700 = vmatprep.subr.mxu0 %v3543_v36  ;;  %v3495_v37 = vpop.permute.xlu1 %3494  ;;  %v3524_v7 = vmul.f32 %v3519_v62, %v5802_v20 }
 0xa22   :  { %3771 = vmatprep.subr.mxu1 %v3545_v40  ;;  %v3498_v48 = vsel %vm241_vm6, %v3495_v37, %v3497_v27  ;;  %v3499_v33 = vsel %vm241_vm6, %v3493_v14, %v3495_v37  ;;  %3701 = vmatpush1.msra.mxu0 %v3542_v11  ;;  %v3503_v14 = vmul.f32 %v3500_v59, %v5796_v17  ;;  %v3634_v59 = vld [vmem:[#allocation16] sm:$0xff]  ;;  %v9828_v37 = vmov 1.0  }
 0xa23   :  { %3772 = vmatpush1.msra.mxu1 %v3544_v3  ;;  %3702 = vmatprep.subr.mxu0 %v3523_v5  ;;  %v3505_v43 = vmul.f32 %v3498_v48, %v5825_v51  ;;  %v3504_v26 = vmul.f32 %v3499_v33, %v5828_v52  ;;  %v3502_v27 = vmul.f32 %v3501_v34, %v5811_v29  ;;  %v9827_v3 = vld [vmem:[#allocation48_spill] sm:$0xff] }
 0xa24   :  { %4288 = vrot.lane.b32.xlu0 %v8051_v58, %s5410_s9  ;;  %3773 = vmatprep.subr.mxu1 %v3525_v15  ;;  %v3481_v8 = vsel %vm204_vm7, %v3477_v9, %v8223_v22  ;;  %v3483_v22 = vmul.f32 %v3480_v28, %v5822_v46 }
 0xa25   :  { %4272 = vrot.lane.b32.xlu1 %v8055_v2, %s5411_s23  ;;  %3703 = vmatpush1.msra.mxu0 %v3522_v41  ;;  %v4083_v35 = vpop.permute.xlu0 %4082  ;;  %v3475_v23 = vpop.permute.xlu1 %3474  ;;  %v3482_v36 = vmul.f32 %v3481_v8, %v9827_v3  ;;  %v9830_v41 = vld [vmem:[#allocation37_spill] sm:$0xff] }
 0xa26   :  { %3774 = vmatpush1.msra.mxu1 %v3524_v7  ;;  %3704 = vmatprep.subr.mxu0 %v3503_v14  ;;  %v3478_v61 = vsel %vm204_vm7, %v3475_v23, %v3477_v9  ;;  %v3479_v39 = vsel %vm204_vm7, %v3473_v4, %v3475_v23 }
 0xa27   :  { %3775 = vmatprep.subr.mxu1 %v3505_v43  ;;  %v3484_v25 = vmul.f32 %v3479_v39, %v9768_v57  ;;  %3705 = vmatpush1.msra.mxu0 %v3502_v27  ;;  %v3485_v11 = vmul.f32 %v3478_v61, %v9826_v13  ;;  %v9832_v27 = vmov 0.0  }
 0xa28   :  { %3776 = vmatpush1.msra.mxu1 %v3504_v26  ;;  %4268 = vrot.lane.b32.xlu0 %v8051_v58, %s5411_s23  ;;  %v9831_v26 = vld [vmem:[#allocation58_spill] sm:$0xff] }
 0xa29   :  { %4248 = vrot.lane.b32.xlu1 %v8051_v58, %s5412_s17  ;;  %3706 = vmatprep.subr.mxu0 %v3483_v22  ;;  %v8393_v62 = vpop.permute.xlu0 %4080  ;;  %v8395_v4 = vpop.permute.xlu1 %4084 }
 0xa2a   :  { %3707 = vmatpush1.msra.mxu0 %v3482_v36  ;;  %v4090_v0 = vsel %vm356_vm3, %v8393_v62, %v4083_v35  ;;  %3777 = vmatprep.subr.mxu1 %v3485_v11  ;;  %v4089_v40 = vsel %vm356_vm3, %v4083_v35, %v8395_v4 }
 0xa2b   :  { %v4092_v9 = vmul.f32 %v4090_v0, %v9806_v24  ;;  %5123 = vmatprep.subr.msk.mxu0 %vm164_vm8, %v9828_v37  ;;  %3778 = vmatpush1.msra.mxu1 %v3484_v25  ;;  %v4093_v15 = vmul.f32 %v4089_v40, %v9807_v42 }
 0xa2c   :  { %5124 = vmatpush1.msk.msra.mxu0 %vm164_vm8, %v9828_v37  ;;  %4252 = vrot.lane.b32.xlu0 %v8055_v2, %s5412_s17 }
 0xa2d   :  { %4224 = vrot.lane.b32.xlu1 %v8051_v58, %s5413_s18  ;;  %5089 = vmatmul.mubr.msk.f32.vlgmr.msra.gmra.mxu0 %vm537_vm9, %v3634_v59  ;;  %v8416_v34 = vpop.permute.xlu0 %4058  ;;  %v4057_v48 = vpop.permute.xlu1 %4056 }
 0xa2e   :  { %5125 = vmatprep.subr.msk.mxu1 %vm164_vm8, %v9828_v37  ;;  %4669 = vmatprep.subr.mxu0 %v4093_v15  ;;  %v4066_v33 = vsel %vm315_vm4, %v4057_v48, %v8416_v34 }
 0xa2f   :  { %5126 = vmatpush1.msk.msra.mxu1 %vm164_vm8, %v9828_v37  ;;  %4670 = vmatpush1.msra.mxu0 %v4092_v9  ;;  %v4069_v7 = vmul.f32 %v4066_v33, %v5752_v30 }
 0xa30   :  { %5090 = vmatmul.mubr.msk.f32.vlgmr.msra.gmra.mxu1 %vm537_vm9, %v3634_v59  ;;  %4310 = vrot.lane.b32.xlu0 %v8081_v55, %s5409_s7 }
 0xa31   :  { %4204 = vrot.lane.b32.xlu1 %v8051_v58, %s5414_s19  ;;  %4671 = vmatprep.subr.mxu0 %v9830_v41  ;;  %v4037_v43 = vpop.permute.xlu0 %4036  ;;  %v8434_v28 = vpop.permute.xlu1 %4062 }
 0xa32   :  { %4672 = vmatpush1.msra.mxu0 %v9831_v26  ;;  %v4067_v14 = vsel %vm315_vm4, %v8434_v28, %v4057_v48  ;;  %4822 = vmatprep.mubr.f32.mxu1 %v9832_v27 }
 0xa33   :  { %4673 = vmatprep.subr.mxu0 %v4069_v7  ;;  %v4068_v8 = vmul.f32 %v4067_v14, %v5760_v38 }
 0xa34   :  { %4290 = vrot.lane.b32.xlu0 %v8081_v55, %s5410_s9 }
 0xa35   :  { %4184 = vrot.lane.b32.xlu1 %v8051_v58, %s5399_s24  ;;  %v8446_v35 = vpop.permute.xlu0 %4042  ;;  %4674 = vmatpush1.msra.mxu0 %v4068_v8  ;;  %v8448_v23 = vpop.permute.xlu1 %4038 }
 0xa36   :  { %v4047_v61 = vsel %vm278_vm5, %v8446_v35, %v4037_v43  ;;  %v4046_v39 = vsel %vm278_vm5, %v4037_v43, %v8448_v23 }
 0xa37   :  { %v4048_v25 = vmul.f32 %v4047_v61, %v5785_v56  ;;  %v4049_v22 = vmul.f32 %v4046_v39, %v5770_v47 }
 0xa38   :  { %4270 = vrot.lane.b32.xlu0 %v8081_v55, %s5411_s23 }
 0xa39   :  { %4164 = vrot.lane.b32.xlu1 %v8051_v58, %s5415_s5  ;;  %v4017_v11 = vpop.permute.xlu0 %4016  ;;  %4675 = vmatprep.subr.mxu0 %v4049_v22  ;;  %v8462_v36 = vpop.permute.xlu1 %4018 }
 0xa3a   :  { %9833 = vst [vmem:[#allocation33_spill] sm:$0xff] %v8462_v36  ;;  %v4026_v0 = vsel %vm241_vm6, %v4017_v11, %v8462_v36  ;;  %4676 = vmatpush1.msra.mxu0 %v4048_v25 }
 0xa3b   :  { %v4029_v40 = vmul.f32 %v4026_v0, %v5796_v17 }
 0xa3c   :  { %4226 = vrot.lane.b32.xlu0 %v8081_v55, %s5413_s18 }
 0xa3d   :  { %4250 = vrot.lane.b32.xlu1 %v8081_v55, %s5412_s17  ;;  %v8472_v59 = vpop.permute.xlu0 %4022  ;;  %4677 = vmatprep.subr.mxu0 %v4029_v40  ;;  %v8474_v9 = vpop.permute.xlu1 %3998 }
 0xa3e   :  { %9834 = vst [vmem:[#allocation60_spill] sm:$0xff] %v8474_v9  ;;  %v4027_v15 = vsel %vm241_vm6, %v8472_v59, %v4017_v11 }
 0xa3f   :  { %v4028_v48 = vmul.f32 %v4027_v15, %v5811_v29 }
 0xa40   :  { %4230 = vrot.lane.b32.xlu0 %v8087_v32, %s5413_s18 }
 0xa41   :  { %4314 = vrot.lane.b32.xlu1 %v8087_v32, %s5409_s7  ;;  %v3997_v33 = vpop.permute.xlu0 %3996  ;;  %4678 = vmatpush1.msra.mxu0 %v4028_v48  ;;  %v8484_v7 = vpop.permute.xlu1 %3976 }
 0xa42   :  { %v4006_v43 = vsel %vm204_vm7, %v3997_v33, %v8474_v9 }
 0xa43   :  { %v4009_v14 = vmul.f32 %v4006_v43, %v5822_v46 }
 0xa44   :  { %4206 = vrot.lane.b32.xlu0 %v8081_v55, %s5414_s19 }
 0xa45   :  { %v8492_v8 = vpop.permute.xlu0 %4002  ;;  %4679 = vmatprep.subr.mxu0 %v4009_v14  ;;  %v8494_v61 = vpop.permute.xlu1 %3956 }
 0xa46   :  { %9835 = vst [vmem:[#allocation31_spill] sm:$0xff] %v8492_v8  ;;  %9836 = vst [vmem:[#allocation67_spill] sm:$0xff] %v8494_v61  ;;  %v4007_v39 = vsel %vm204_vm7, %v8492_v8, %v3997_v33 }
 0xa47   :  { %v4008_v25 = vmul.f32 %v4007_v39, %v9827_v3 }
 0xa48   :  { %4210 = vrot.lane.b32.xlu0 %v8087_v32, %s5414_s19 }
 0xa49   :  { %v3975_v22 = vpop.permute.xlu0 %3974  ;;  %4680 = vmatpush1.msra.mxu0 %v4008_v25  ;;  %v3935_v11 = vpop.permute.xlu1 %3934 }
 0xa4a   :  { %v3981_v51 = vsel %vm467_vm0, %v3975_v22, %v8484_v7 }
 0xa4c   :  { %4186 = vrot.lane.b32.xlu0 %v8081_v55, %s5399_s24 }
 0xa4d   :  { %v8504_v0 = vpop.permute.xlu0 %3972  ;;  %v8506_v40 = vpop.permute.xlu1 %4086 }
 0xa4e   :  { %9837 = vst [vmem:[#allocation69_spill] sm:$0xff] %v8504_v0  ;;  %v3982_v13 = vsel %vm467_vm0, %v8504_v0, %v3975_v22 }
 0xa4f   :  { %v3984_v8 = vmul.f32 %v8013_v60, %v3982_v13 }
 0xa50   :  { %4190 = vrot.lane.b32.xlu0 %v8087_v32, %s5399_s24 }
 0xa51   :  { %v3955_v15 = vpop.permute.xlu0 %3954  ;;  %v3915_v48 = vpop.permute.xlu1 %3914 }
 0xa52   :  { %v3961_v0 = vsel %vm430_vm1, %v3955_v15, %v8494_v61 }
 0xa54   :  { %4166 = vrot.lane.b32.xlu0 %v8081_v55, %s5415_s5 }
 0xa55   :  { %v8512_v33 = vpop.permute.xlu0 %3952  ;;  %v8514_v43 = vpop.permute.xlu1 %3912 }
 0xa56   :  { %9838 = vst [vmem:[#allocation57_spill] sm:$0xff] %v8512_v33  ;;  %v3962_v20 = vsel %vm430_vm1, %v8512_v33, %v3955_v15 }
 0xa59   :  { %v8516_v14 = vpop.permute.xlu0 %3936  ;;  %v3889_v39 = vpop.permute.xlu1 %3888 }
 0xa5a   :  { %9839 = vst [vmem:[#allocation53_spill] sm:$0xff] %v8516_v14  ;;  %v3941_v60 = vsel %vm393_vm2, %v3935_v11, %v8516_v14 }
 0xa5d   :  { %v8518_v25 = vpop.permute.xlu0 %3932  ;;  %v8520_v58 = vpop.permute.xlu1 %4040 }
 0xa5e   :  { %9840 = vst [vmem:[#allocation64_spill] sm:$0xff] %v8518_v25  ;;  %v3942_v22 = vsel %vm393_vm2, %v8518_v25, %v3935_v11  ;;  %v3945_v11 = vmul.f32 %v3941_v60, %v9793_v53 }
 0xa5f   :  { %v3944_v15 = vmul.f32 %v3942_v22, %v9725_v54 }
 0xa61   :  { %v8522_v12 = vpop.permute.xlu0 %3916  ;;  %v3869_v31 = vpop.permute.xlu1 %3868 }
 0xa65   :  { %v8524_v1 = vpop.permute.xlu0 %4060  ;;  %v8526_v21 = vpop.permute.xlu1 %4020 }
 0xa66   :  { %9841 = vst [vmem:[#allocation73_spill] sm:$0xff] %v8526_v21  ;;  %v3985_v21 = vmul.f32 %v8007_v44, %v3981_v51  ;;  %v3921_v51 = vsel %vm356_vm3, %v3915_v48, %v8522_v12 }
 0xa68   :  { %4681 = vmatprep.subr.mxu0 %v3985_v21  ;;  %v3965_v21 = vmul.f32 %v3961_v0, %v5657_v19 }
 0xa69   :  { %v3891_v57 = vpop.permute.xlu0 %3890  ;;  %v3849_v55 = vpop.permute.xlu1 %3848  ;;  %4682 = vmatpush1.msra.mxu0 %v3984_v8  ;;  %v3925_v8 = vmul.f32 %v3921_v51, %v9807_v42 }
 0xa6a   :  { %4683 = vmatprep.subr.mxu0 %v3965_v21  ;;  %v3898_v25 = vsel %vm315_vm4, %v3889_v39, %v3891_v57 }
 0xa6d   :  { %v3895_v52 = vpop.permute.xlu0 %3894  ;;  %v8531_v9 = vpop.permute.xlu1 %4000 }
 0xa6e   :  { %9842 = vst [vmem:[#allocation34_spill] sm:$0xff] %v8531_v9  ;;  %v3964_v9 = vmul.f32 %v3962_v20, %v9755_v45  ;;  %v3922_v20 = vsel %vm356_vm3, %v8514_v43, %v3915_v48  ;;  %v3899_v0 = vsel %vm315_vm4, %v3895_v52, %v3889_v39 }
 0xa6f   :  { %v3924_v14 = vmul.f32 %v3922_v20, %v9806_v24  ;;  %v3900_v60 = vmul.f32 %v3899_v0, %v5760_v38 }
 0xa70   :  { %4684 = vmatpush1.msra.mxu0 %v3964_v9  ;;  %v3901_v9 = vmul.f32 %v3898_v25, %v5752_v30 }
 0xa71   :  { %v3871_v18 = vpop.permute.xlu0 %3870  ;;  %v3829_v36 = vpop.permute.xlu1 %3828  ;;  %4685 = vmatprep.subr.mxu0 %v3945_v11  ;;  %v9843_v11 = vld [vmem:[#allocation56_spill] sm:$0xff] }
 0xa72   :  { %v3878_v48 = vsel %vm278_vm5, %v3869_v31, %v3871_v18  ;;  %4686 = vmatpush1.msra.mxu0 %v3944_v15 }
 0xa73   :  { %4687 = vmatprep.subr.mxu0 %v3925_v8  ;;  %v3881_v21 = vmul.f32 %v3878_v48, %v5770_v47 }
 0xa74   :  { %4688 = vmatpush1.msra.mxu0 %v3924_v14 }
 0xa75   :  { %v3875_v44 = vpop.permute.xlu0 %3874  ;;  %v8554_v13 = vpop.permute.xlu1 %3978  ;;  %4689 = vmatprep.subr.mxu0 %v8159_v16 }
 0xa76   :  { %v3879_v22 = vsel %vm278_vm5, %v3875_v44, %v3869_v31  ;;  %4690 = vmatpush1.msra.mxu0 %v9843_v11 }
 0xa77   :  { %v3880_v20 = vmul.f32 %v3879_v22, %v5785_v56  ;;  %4691 = vmatprep.subr.mxu0 %v3901_v9 }
 0xa78   :  { %4692 = vmatpush1.msra.mxu0 %v3900_v60 }
 0xa79   :  { %v3851_v61 = vpop.permute.xlu0 %3850  ;;  %v8566_v33 = vpop.permute.xlu1 %3958  ;;  %4693 = vmatprep.subr.mxu0 %v3881_v21 }
 0xa7a   :  { %v3858_v51 = vsel %vm241_vm6, %v3849_v55, %v3851_v61  ;;  %4694 = vmatpush1.msra.mxu0 %v3880_v20 }
 0xa7b   :  { %v3861_v31 = vmul.f32 %v3858_v51, %v5796_v17 }
 0xa7d   :  { %4695 = vmatprep.subr.mxu0 %v3861_v31 }
 0xa7e   :  { %v3855_v39 = vpop.permute.xlu0 %3854  ;;  %v3893_v15 = vpop.permute.xlu1 %3892 }
 0xa7f   :  { %v3859_v25 = vsel %vm241_vm6, %v3855_v39, %v3849_v55  ;;  %v8587_v8 = vsel %vm315_vm4, %v3893_v15, %v3895_v52  ;;  %v8591_v14 = vsel %vm315_vm4, %v3891_v57, %v3893_v15 }
 0xa80   :  { %v3860_v16 = vmul.f32 %v3859_v25, %v5811_v29 }
 0xa82   :  { %v3831_v0 = vpop.permute.xlu0 %3830  ;;  %v3873_v48 = vpop.permute.xlu1 %3872  ;;  %4696 = vmatpush1.msra.mxu0 %v3860_v16 }
 0xa83   :  { %v3838_v55 = vsel %vm204_vm7, %v3829_v36, %v3831_v0  ;;  %v8599_v52 = vsel %vm278_vm5, %v3873_v48, %v3875_v44  ;;  %v8603_v57 = vsel %vm278_vm5, %v3871_v18, %v3873_v48 }
 0xa84   :  { %v3841_v22 = vmul.f32 %v3838_v55, %v5822_v46 }
 0xa86   :  { %v3835_v9 = vpop.permute.xlu0 %3834  ;;  %4697 = vmatprep.subr.mxu0 %v3841_v22  ;;  %v8607_v51 = vpop.permute.xlu1 %4312 }
 0xa87   :  { %v3839_v60 = vsel %vm204_vm7, %v3835_v9, %v3829_v36  ;;  %9844 = vst [vmem:[#allocation32_spill] sm:$0xff] %v8607_v51 }
 0xa88   :  { %v3840_v21 = vmul.f32 %v3839_v60, %v9827_v3 }
 0xa8a   :  { %v8610_v20 = vpop.permute.xlu0 %3938  ;;  %4698 = vmatpush1.msra.mxu0 %v3840_v21 }
 0xa8b   :  { %v3853_v44 = vpop.permute.xlu1 %3852  ;;  %5127 = vmatprep.subr.msk.mxu0 %vm164_vm8, %v9828_v37 }
 0xa8c   :  { %v8617_v18 = vsel %vm241_vm6, %v3853_v44, %v3855_v39  ;;  %v8621_v25 = vsel %vm241_vm6, %v3851_v61, %v3853_v44  ;;  %5128 = vmatpush1.msk.msra.mxu0 %vm164_vm8, %v9828_v37 }
 0xa8e   :  { %v8626_v36 = vpop.permute.xlu0 %3918 }
 0xa8f   :  { %v8632_v15 = vsel %vm356_vm3, %v8522_v12, %v8626_v36  ;;  %v8634_v11 = vpop.permute.xlu1 %4292 }
 0xa90   :  { %9845 = vst [vmem:[#allocation55_spill] sm:$0xff] %v8634_v11  ;;  %v8829_v11 = vld [vmem:[#allocation7 + $0x20] ss:$0 sm:$0xff] }
 0xa91   :  { %9877 = vst [vmem:[#allocation84_spill] sm:$0xff] %v8829_v11 }
 0xa92   :  { %v8636_v39 = vpop.permute.xlu0 %4308 }
 0xa93   :  { %9846 = vst [vmem:[#allocation29_spill] sm:$0xff] %v8636_v39  ;;  %v3833_v31 = vpop.permute.xlu1 %3832 }
 0xa94   :  { %v8640_v61 = vsel %vm204_vm7, %v3833_v31, %v3835_v9  ;;  %v8644_v16 = vsel %vm204_vm7, %v3831_v0, %v3833_v31  ;;  %v9853_v31 = vld [vmem:[#allocation27_spill] sm:$0xff] }
 0xa96   :  { %v8646_v55 = vpop.permute.xlu0 %4288 }
 0xa97   :  { %9847 = vst [vmem:[#allocation62_spill] sm:$0xff] %v8646_v55 }
 0xa9a   :  { %v8648_v48 = vpop.permute.xlu0 %4268 }
 0xa9b   :  { %9848 = vst [vmem:[#allocation71_spill] sm:$0xff] %v8648_v48  ;;  %v8744_v48 = vpop.permute.xlu1 %4272 }
 0xa9c   :  { %9857 = vst [vmem:[#allocation61_spill] sm:$0xff] %v8744_v48 }
 0xa9e   :  { %v8650_v22 = vpop.permute.xlu0 %4252 }
 0xa9f   :  { %9849 = vst [vmem:[#allocation26_spill] sm:$0xff] %v8650_v22 }
 0xaa2   :  { %v4311_v12 = vpop.permute.xlu0 %4310 }
 0xaa3   :  { %v8655_v60 = vsel %vm467_vm0, %v4311_v12, %v8607_v51  ;;  %v8660_v9 = vsel %vm467_vm0, %v8636_v39, %v4311_v12  ;;  %v8832_v51 = vld [vmem:[#allocation7 + $0x28] ss:$0 sm:$0xff] }
 0xaa4   :  { %9850 = vst [vmem:[#allocation66_spill] sm:$0xff] %v8655_v60  ;;  %9851 = vst [vmem:[#allocation59_spill] sm:$0xff] %v8660_v9 }
 0xaa5   :  { %9878 = vst [vmem:[#allocation85_spill] sm:$0xff] %v8832_v51 }
 0xaa6   :  { %v8732_v22 = vpop.permute.xlu0 %4290 }
 0xaa7   :  { %9855 = vst [vmem:[#allocation54_spill] sm:$0xff] %v8732_v22 }
 0xaed   :  { %v8662_v21 = vpop.f32.mrf.mxu0 }
 0xaee   :  { %4352 = vrot.lane.b32.xlu0 %v8662_v21, %s5399_s24 }
 0xaef   :  { %v8676_v44 = vpop.f32.mrf.mxu0 }
 0xaf0   :  { %v8666_v0 = vpop.f32.mrf.mxu1 }
 0xaf1   :  { %9852 = vst [vmem:[#allocation41_spill] sm:$0xff] %v8666_v0  ;;  %4480 = vrot.lane.b32.xlu1 %v8666_v0, %s5409_s7 }
 0xaf2   :  { %4332 = vrot.lane.b32.xlu0 %v8662_v21, %s5415_s5  ;;  %v8710_v12 = vpop.f32.mrf.mxu1 }
 0xaf3   :  { %9854 = vst [vmem:[#allocation38_spill] sm:$0xff] %v8710_v12 }
 0xaf5   :  { %4476 = vrot.lane.b32.xlu1 %v8662_v21, %s5409_s7 }
 0xaf6   :  { %4396 = vrot.lane.b32.xlu0 %v8666_v0, %s5413_s18 }
 0xaf9   :  { %4460 = vrot.lane.b32.xlu1 %v8666_v0, %s5410_s9 }
 0xafa   :  { %4478 = vrot.lane.b32.xlu0 %v8676_v44, %s5409_s7 }
 0xafd   :  { %4456 = vrot.lane.b32.xlu1 %v8662_v21, %s5410_s9 }
 0xafe   :  { %4458 = vrot.lane.b32.xlu0 %v8676_v44, %s5410_s9 }
 0xb01   :  { %4440 = vrot.lane.b32.xlu1 %v8666_v0, %s5411_s23 }
 0xb02   :  { %4438 = vrot.lane.b32.xlu0 %v8676_v44, %s5411_s23 }
 0xb05   :  { %4436 = vrot.lane.b32.xlu1 %v8662_v21, %s5411_s23 }
 0xb06   :  { %4418 = vrot.lane.b32.xlu0 %v8676_v44, %s5412_s17 }
 0xb09   :  { %4420 = vrot.lane.b32.xlu1 %v8666_v0, %s5412_s17 }
 0xb0a   :  { %4170 = vrot.lane.b32.xlu0 %v8087_v32, %s5415_s5 }
 0xb0d   :  { %4416 = vrot.lane.b32.xlu1 %v8662_v21, %s5412_s17 }
 0xb0e   :  { %4144 = vrot.lane.b32.xlu0 %v9853_v31, %s5409_s7 }
 0xb11   :  { %4392 = vrot.lane.b32.xlu1 %v8662_v21, %s5413_s18 }
 0xb12   :  { %4394 = vrot.lane.b32.xlu0 %v8676_v44, %s5413_s18 }
 0xb15   :  { %4372 = vrot.lane.b32.xlu1 %v8662_v21, %s5414_s19 }
 0xb16   :  { %4374 = vrot.lane.b32.xlu0 %v8676_v44, %s5414_s19 }
 0xb19   :  { %4376 = vrot.lane.b32.xlu1 %v8666_v0, %s5414_s19 }
 0xb1a   :  { %4358 = vrot.lane.b32.xlu0 %v8710_v12, %s5399_s24 }
 0xb1d   :  { %4356 = vrot.lane.b32.xlu1 %v8666_v0, %s5399_s24 }
 0xb1e   :  { %4338 = vrot.lane.b32.xlu0 %v8710_v12, %s5415_s5 }
 0xb21   :  { %4336 = vrot.lane.b32.xlu1 %v8666_v0, %s5415_s5  ;;  %v8740_v0 = vpop.permute.xlu0 %4270 }
 0xb22   :  { %4140 = vrot.lane.b32.xlu0 %v9831_v26, %s5409_s7  ;;  %9856 = vst [vmem:[#allocation74_spill] sm:$0xff] %v8740_v0  ;;  %v8756_v0 = vpop.permute.xlu1 %4248 }
 0xb23   :  { %9859 = vst [vmem:[#allocation70_spill] sm:$0xff] %v8756_v0  ;;  %v8778_v0 = vld [vmem:[#allocation18 + $0x8] sm:$0xff] }
 0xb24   :  { %4733 = vmatprep.mubr.f32.mxu0 %v8778_v0 }
 0xb25   :  { %4142 = vrot.lane.b32.xlu1 %v9830_v41, %s5409_s7  ;;  %v8750_v9 = vpop.permute.xlu0 %4226 }
 0xb26   :  { %4124 = vrot.lane.b32.xlu0 %v9853_v31, %s5410_s9  ;;  %9858 = vst [vmem:[#allocation68_spill] sm:$0xff] %v8750_v9  ;;  %v8764_v48 = vpop.permute.xlu1 %4224 }
 0xb27   :  { %9861 = vst [vmem:[#allocation30_spill] sm:$0xff] %v8764_v48 }
 0xb29   :  { %4294 = vrot.lane.b32.xlu1 %v8087_v32, %s5410_s9 }
 0xb2a   :  { %4120 = vrot.lane.b32.xlu0 %v9831_v26, %s5410_s9 }
 0xb2d   :  { %4398 = vrot.lane.b32.xlu1 %v8710_v12, %s5413_s18 }
 0xb2e   :  { %4104 = vrot.lane.b32.xlu0 %v9853_v31, %s5411_s23 }
 0xb31   :  { %4378 = vrot.lane.b32.xlu1 %v8710_v12, %s5414_s19 }
 0xb32   :  { %4100 = vrot.lane.b32.xlu0 %v9831_v26, %s5411_s23  ;;  %v8760_v26 = vpop.permute.xlu0 %4230 }
 0xb33   :  { %9860 = vst [vmem:[#allocation63_spill] sm:$0xff] %v8760_v26  ;;  %v8776_v26 = vpop.permute.xlu1 %4204 }
 0xb34   :  { %9863 = vst [vmem:[#allocation58_spill] sm:$0xff] %v8776_v26 }
 0xb35   :  { %4354 = vrot.lane.b32.xlu1 %v8676_v44, %s5399_s24 }
 0xb36   :  { %4208 = vrot.lane.b32.xlu0 %v8055_v2, %s5414_s19  ;;  %v8770_v9 = vpop.permute.xlu0 %4206 }
 0xb37   :  { %9862 = vst [vmem:[#allocation37_spill] sm:$0xff] %v8770_v9  ;;  %v8785_v60 = vpop.permute.xlu1 %4184 }
 0xb38   :  { %9865 = vst [vmem:[#allocation27_spill] sm:$0xff] %v8785_v60 }
 0xb39   :  { %4334 = vrot.lane.b32.xlu1 %v8676_v44, %s5415_s5 }
 0xb3a   :  { %4482 = vrot.lane.b32.xlu0 %v8710_v12, %s5409_s7  ;;  %v8783_v48 = vpop.permute.xlu0 %4210 }
 0xb3b   :  { %9864 = vst [vmem:[#allocation56_spill] sm:$0xff] %v8783_v48  ;;  %v9870_v48 = vld [vmem:[#allocation65_spill] sm:$0xff] }
 0xb3d   :  { %4122 = vrot.lane.b32.xlu1 %v9830_v41, %s5410_s9 }
 0xb3e   :  { %4462 = vrot.lane.b32.xlu0 %v8710_v12, %s5410_s9 }
 0xb41   :  { %4274 = vrot.lane.b32.xlu1 %v8087_v32, %s5411_s23 }
 0xb42   :  { %4442 = vrot.lane.b32.xlu0 %v8710_v12, %s5411_s23 }
 0xb45   :  { %4102 = vrot.lane.b32.xlu1 %v9830_v41, %s5411_s23  ;;  %v8789_v41 = vpop.permute.xlu0 %4186 }
 0xb46   :  { %4422 = vrot.lane.b32.xlu0 %v8710_v12, %s5412_s17  ;;  %9866 = vst [vmem:[#allocation75_spill] sm:$0xff] %v8789_v41  ;;  %v8793_v12 = vpop.permute.xlu1 %4164 }
 0xb47   :  { %9867 = vst [vmem:[#allocation76_spill] sm:$0xff] %v8793_v12 }
 0xb49   :  { %4254 = vrot.lane.b32.xlu1 %v8087_v32, %s5412_s17  ;;  %v8797_v32 = vpop.permute.xlu0 %4190 }
 0xb4a   :  { %9868 = vst [vmem:[#allocation77_spill] sm:$0xff] %v8797_v32  ;;  %v8799_v26 = vpop.permute.xlu1 %4250 }
 0xb4b   :  { %9869 = vst [vmem:[#allocation78_spill] sm:$0xff] %v8799_v26 }
 0xb4d   :  { %4228 = vrot.lane.b32.xlu1 %v8055_v2, %s5413_s18  ;;  %v8803_v60 = vpop.permute.xlu0 %4166 }
 0xb4e   :  { %9871 = vst [vmem:[#allocation65_spill] sm:$0xff] %v8803_v60  ;;  %v8807_v41 = vpop.permute.xlu1 %4314 }
 0xb4f   :  { %9872 = vst [vmem:[#allocation79_spill] sm:$0xff] %v8807_v41 }
 0xb51   :  { %4188 = vrot.lane.b32.xlu1 %v8055_v2, %s5399_s24  ;;  %s5051_s24 = sshll.u32 %s5418_s6, 4  ;;  %s5052_s24 = int_to_ptr.vmem [resolvable:$true] %s5051_s24 }
 0xb52   :  { %s5362_s8 = scalar_lea.vmem %s5052_s24, 512  ;;  %p5367_p4 = scmp.lt.s32.totalorder %s5052_s24, %s5052_s24 }
 0xb53   :  { %p5363_p3 = scmp.ne.s32.totalorder %s5052_s24, %s5362_s8  ;;  %p5368_p5 = scmp.lt.s32.totalorder %s5362_s8, %s5362_s8 }
 0xb55   :  { %4168 = vrot.lane.b32.xlu1 %v8055_v2, %s5415_s5  ;;  %p5369_p6 = por %p5368_p5, %p5367_p4 }
 0xb57   :  { %p5370_p7 = pnand %p5369_p6, %p5363_p3 }
 0xb59   :  { %4146 = vrot.lane.b32.xlu1 %v9870_v48, %s5409_s7 }
 0xb5d   :  { %4126 = vrot.lane.b32.xlu1 %v9870_v48, %s5410_s9 }
 0xb60   :  { %v8809_v9 = vpop.permute.xlu0 %4352 }
 0xb61   :  { %4106 = vrot.lane.b32.xlu1 %v9870_v48, %s5411_s23 }
 0xb63   :  { %v8813_v2 = vpop.permute.xlu1 %4480 }
 0xb64   :  { %9873 = vst [vmem:[#allocation80_spill] sm:$0xff] %v8813_v2  ;;  %v8815_v12 = vpop.permute.xlu0 %4332 }
 0xb65   :  { %9874 = vst [vmem:[#allocation81_spill] sm:$0xff] %v8815_v12 }
 0xb67   :  { %v8817_v32 = vpop.permute.xlu1 %4476 }
 0xb68   :  { %9875 = vst [vmem:[#allocation82_spill] sm:$0xff] %v8817_v32  ;;  %v8819_v26 = vpop.permute.xlu0 %4396 }
 0xb6b   :  { %v8821_v55 = vpop.permute.xlu1 %4460 }
 0xb6c   :  { %9876 = vst [vmem:[#allocation83_spill] sm:$0xff] %v8821_v55  ;;  %v4479_v60 = vpop.permute.xlu0 %4478 }
 0xb6d   :  { %v4485_v3 = vsel %vm467_vm0, %v4479_v60, %v8813_v2  ;;  %v4486_v22 = vsel %vm467_vm0, %v8817_v32, %v4479_v60 }
 0xb6e   :  { %v4488_v46 = vmul.f32 %v8829_v11, %v4486_v22  ;;  %v4489_v12 = vmul.f32 %v8832_v51, %v4485_v3 }
 0xb6f   :  { %v8835_v41 = vpop.permute.xlu1 %4456 }
 0xb70   :  { %9879 = vst [vmem:[#allocation86_spill] sm:$0xff] %v8835_v41  ;;  %v4459_v39 = vpop.permute.xlu0 %4458  ;;  %4780 = vmatprep.subr.mxu1 %v4489_v12 }
 0xb71   :  { %v4465_v2 = vsel %vm430_vm1, %v4459_v39, %v8821_v55  ;;  %v4466_v60 = vsel %vm430_vm1, %v8835_v41, %v4459_v39  ;;  %4781 = vmatpush1.msra.mxu1 %v4488_v46  ;;  %v9899_v41 = vld [vmem:[#allocation49_spill] sm:$0xff] }
 0xb72   :  { %v4468_v32 = vmul.f32 %v4466_v60, %v9755_v45  ;;  %v4469_v22 = vmul.f32 %v4465_v2, %v5657_v19 }
 0xb73   :  { %v8845_v11 = vpop.permute.xlu1 %4440 }
 0xb74   :  { %9880 = vst [vmem:[#allocation87_spill] sm:$0xff] %v8845_v11  ;;  %v4439_v3 = vpop.permute.xlu0 %4438  ;;  %4782 = vmatprep.subr.mxu1 %v4469_v22 }
 0xb75   :  { %v4445_v12 = vsel %vm393_vm2, %v4439_v3, %v8845_v11  ;;  %4783 = vmatpush1.msra.mxu1 %v4468_v32 }
 0xb76   :  { %v4449_v55 = vmul.f32 %v4445_v12, %v9793_v53 }
 0xb77   :  { %v8851_v51 = vpop.permute.xlu1 %4436 }
 0xb78   :  { %9881 = vst [vmem:[#allocation88_spill] sm:$0xff] %v8851_v51  ;;  %v4446_v46 = vsel %vm393_vm2, %v8851_v51, %v4439_v3  ;;  %v4419_v39 = vpop.permute.xlu0 %4418  ;;  %4784 = vmatprep.subr.mxu1 %v4449_v55 }
 0xb79   :  { %v4448_v2 = vmul.f32 %v4446_v46, %v9725_v54  ;;  %v4091_v46 = vsel %vm356_vm3, %v8506_v40, %v8393_v62 }
 0xb7b   :  { %4785 = vmatpush1.msra.mxu1 %v4448_v2  ;;  %v8857_v60 = vpop.permute.xlu1 %4420 }
 0xb7c   :  { %9882 = vst [vmem:[#allocation89_spill] sm:$0xff] %v8857_v60  ;;  %v4425_v22 = vsel %vm356_vm3, %v4419_v39, %v8857_v60  ;;  %v8862_v32 = vpop.permute.xlu0 %4170  ;;  %v8883_v60 = vld [vmem:[#allocation18 + $0x10] sm:$0xff] }
 0xb7d   :  { %9883 = vst [vmem:[#allocation90_spill] sm:$0xff] %v8862_v32  ;;  %v4429_v12 = vmul.f32 %v4425_v22, %v9807_v42  ;;  %v4088_v22 = vsel %vm356_vm3, %v8395_v4, %v8506_v40  ;;  %9886 = vst [vmem:[#allocation93_spill] sm:$0xff] %v8883_v60  ;;  %v4065_v40 = vsel %vm315_vm4, %v8416_v34, %v8524_v1  ;;  %v9905_v32 = vld [vmem:[#allocation35_spill] sm:$0xff] }
 0xb7e   :  { %v4094_v62 = vmul.f32 %v4088_v22, %v5735_v10 }
 0xb7f   :  { %4786 = vmatprep.subr.mxu1 %v4429_v12  ;;  %v8865_v11 = vpop.permute.xlu1 %4416 }
 0xb80   :  { %9884 = vst [vmem:[#allocation91_spill] sm:$0xff] %v8865_v11  ;;  %v4426_v55 = vsel %vm356_vm3, %v8865_v11, %v4419_v39  ;;  %v8870_v3 = vpop.permute.xlu0 %4144  ;;  %v4095_v11 = vmul.f32 %v4091_v46, %v5726_v63 }
 0xb81   :  { %9885 = vst [vmem:[#allocation92_spill] sm:$0xff] %v8870_v3  ;;  %v4428_v2 = vmul.f32 %v4426_v55, %v9806_v24  ;;  %v4064_v55 = vsel %vm315_vm4, %v8524_v1, %v8434_v28  ;;  %v4044_v28 = vsel %vm278_vm5, %v8520_v58, %v8446_v35  ;;  %v4045_v1 = vsel %vm278_vm5, %v8448_v23, %v8520_v58  ;;  %v9890_v23 = vld [vmem:[#allocation43_spill] sm:$0xff] }
 0xb82   :  { %v4071_v34 = vmul.f32 %v4064_v55, %v5773_v49  ;;  %v4070_v35 = vmul.f32 %v4065_v40, %v5776_v50  ;;  %v9891_v55 = vld [vmem:[#allocation44_spill] sm:$0xff]  ;;  %v9892_v40 = vld [vmem:[#allocation31_spill] sm:$0xff] }
 0xb83   :  { %4787 = vmatpush1.msra.mxu1 %v4428_v2  ;;  %v8881_v12 = vpop.permute.xlu1 %4392  ;;  %v9888_v2 = vld [vmem:[#allocation73_spill] sm:$0xff] }
 0xb84   :  { %4788 = vmatprep.subr.mxu1 %v8676_v44  ;;  %v8886_v39 = vpop.permute.xlu0 %4394  ;;  %v4024_v22 = vsel %vm241_vm6, %v9888_v2, %v8472_v59 }
 0xb85   :  { %v4402_v4 = vsel %vm315_vm4, %v8881_v12, %v8886_v39  ;;  %4789 = vmatpush1.msra.mxu1 %v8662_v21  ;;  %v8913_v21 = vld [vmem:[#allocation18 + $0x28] sm:$0xff] }
 0xb86   :  { %v4405_v44 = vmul.f32 %v4402_v4, %v5752_v30  ;;  %4847 = vmatprep.subr.mxu1 %v4095_v11  ;;  %5091 = vmatmul.mubr.msk.f32.vlgmr.msra.gmra.mxu1 %vm4656_vm12, %v8883_v60  ;;  %9887 = vst [vmem:[#allocation94_spill] sm:$0xff] %v8913_v21  ;;  %v4050_v4 = vmul.f32 %v4045_v1, %v9891_v55  ;;  %v8944_v60 = vld [vmem:[#allocation18 + $0x40] sm:$0xff]  ;;  %v9906_v30 = vld [vmem:[#allocation53_spill] sm:$0xff] }
 0xb87   :  { %4848 = vmatpush1.msra.mxu1 %v4094_v62  ;;  %v8910_v46 = vpop.permute.xlu1 %4372  ;;  %4828 = vmatprep.mubr.f32.mxu1 %v9832_v27  ;;  %v9889_v62 = vld [vmem:[#allocation33_spill] sm:$0xff]  ;;  %9894 = vst [vmem:[#allocation73_spill] sm:$0xff] %v8944_v60 }
 0xb88   :  { %4849 = vmatprep.subr.mxu1 %v9870_v48  ;;  %v8921_v11 = vpop.permute.xlu0 %4374  ;;  %4701 = vmatprep.subr.mxu0 %v4405_v44  ;;  %v4025_v58 = vsel %vm241_vm6, %v9889_v62, %v9888_v2  ;;  %v4051_v48 = vmul.f32 %v4044_v28, %v9890_v23  ;;  %v9893_v44 = vld [vmem:[#allocation34_spill] sm:$0xff]  ;;  %v9896_v28 = vld [vmem:[#allocation60_spill] sm:$0xff] }
 0xb89   :  { %4850 = vmatpush1.msra.mxu1 %v9853_v31  ;;  %v4004_v59 = vsel %vm204_vm7, %v9893_v44, %v9892_v40  ;;  %v4005_v62 = vsel %vm204_vm7, %v9896_v28, %v9893_v44  ;;  %v9898_v40 = vld [vmem:[#allocation69_spill] sm:$0xff] }
 0xb8a   :  { %4851 = vmatprep.subr.mxu1 %v4071_v34  ;;  %5092 = vmatmul.mubr.msk.f32.gmra.mxu1 %vm4656_vm12, %v8913_v21  ;;  %v9895_v34 = vld [vmem:[#allocation46_spill] sm:$0xff]  ;;  %v9897_v21 = vld [vmem:[#allocation47_spill] sm:$0xff]  ;;  %v4011_v3 = vmul.f32 %v4004_v59, %v9899_v41  ;;  %v8973_v59 = vld [vmem:[#allocation18 + $0x58] sm:$0xff] }
 0xb8b   :  { %4852 = vmatpush1.msra.mxu1 %v4070_v35  ;;  %v8941_v31 = vpop.permute.xlu1 %4376  ;;  %4834 = vmatprep.mubr.f32.mxu1 %v9832_v27  ;;  %v4031_v2 = vmul.f32 %v4024_v22, %v9895_v34  ;;  %v4030_v51 = vmul.f32 %v4025_v58, %v9897_v21  ;;  %v3983_v35 = vsel %vm467_vm0, %v8554_v13, %v9898_v40  ;;  %v9901_v58 = vld [vmem:[#allocation57_spill] sm:$0xff]  ;;  %v8975_v40 = vld [vmem:[#allocation7 + $0x38] ss:$0 sm:$0xff] }
 0xb8c   :  { %4853 = vmatprep.subr.mxu1 %v4051_v48  ;;  %v8951_v1 = vpop.permute.xlu0 %4358  ;;  %v3980_v22 = vsel %vm467_vm0, %v8484_v7, %v8554_v13  ;;  %v9900_v48 = vld [vmem:[#allocation50_spill] sm:$0xff]  ;;  %v3963_v28 = vsel %vm430_vm1, %v8566_v33, %v9901_v58  ;;  %9902 = vst [vmem:[#allocation33_spill] sm:$0xff] %v8973_v59  ;;  %v3987_v7 = vmul.f32 %v8975_v40, %v3983_v35  ;;  %v9903_v13 = vld [vmem:[#allocation67_spill] sm:$0xff] }
 0xb8d   :  { %4854 = vmatpush1.msra.mxu1 %v4050_v4  ;;  %v4010_v44 = vmul.f32 %v4005_v62, %v9900_v48  ;;  %v8984_v58 = vld [vmem:[#allocation7 + $0x30] ss:$0 sm:$0xff]  ;;  %v3967_v35 = vmul.f32 %v3963_v28, %v9905_v32  ;;  %v9962_v6 = vld [vmem:[#allocation94_spill] sm:$0xff] }
 0xb8e   :  { %4855 = vmatprep.subr.mxu1 %v4031_v2  ;;  %5093 = vmatmul.mubr.msk.f32.gmra.mxu1 %vm4656_vm12, %v8944_v60  ;;  %v3960_v2 = vsel %vm430_vm1, %v9903_v13, %v8566_v33  ;;  %v9904_v60 = vld [vmem:[#allocation64_spill] sm:$0xff]  ;;  %v3940_v33 = vsel %vm393_vm2, %v9906_v30, %v8610_v20 }
 0xb8f   :  { %4856 = vmatpush1.msra.mxu1 %v4030_v51  ;;  %v8970_v4 = vpop.permute.xlu1 %4356  ;;  %4840 = vmatprep.mubr.f32.mxu1 %v9832_v27  ;;  %v3986_v51 = vmul.f32 %v8984_v58, %v3980_v22  ;;  %v3943_v27 = vsel %vm393_vm2, %v8610_v20, %v9904_v60  ;;  %v3923_v22 = vsel %vm356_vm3, %v8626_v36, %v8514_v43  ;;  %v9910_v20 = vld [vmem:[#allocation40_spill] sm:$0xff] }
 0xb90   :  { %4857 = vmatprep.subr.mxu1 %v4011_v3  ;;  %v8982_v62 = vpop.permute.xlu0 %4338  ;;  %v9907_v3 = vld [vmem:[#allocation36_spill] sm:$0xff] }
 0xb91   :  { %4858 = vmatpush1.msra.mxu1 %v4010_v44  ;;  %v3966_v13 = vmul.f32 %v3960_v2, %v9907_v3  ;;  %v9908_v44 = vld [vmem:[#allocation39_spill] sm:$0xff]  ;;  %v3927_v2 = vmul.f32 %v3923_v22, %v5726_v63  ;;  %v4382_v22 = vsel %vm278_vm5, %v8910_v46, %v8921_v11 }
 0xb92   :  { %4859 = vmatprep.subr.mxu1 %v3987_v7  ;;  %5094 = vmatmul.mubr.msk.f32.gmra.mxu1 %vm4656_vm12, %v8973_v59  ;;  %v3947_v28 = vmul.f32 %v3943_v27, %v9908_v44  ;;  %v3946_v7 = vmul.f32 %v3940_v33, %v9910_v20  ;;  %v3926_v59 = vmul.f32 %v8632_v15, %v5735_v10 }
 0xb93   :  { %4860 = vmatpush1.msra.mxu1 %v3986_v51  ;;  %v9003_v60 = vpop.permute.xlu1 %4336  ;;  %4911 = vmatprep.mubr.f32.mxu1 %v8778_v0  ;;  %v3903_v27 = vmul.f32 %v8587_v8, %v5773_v49  ;;  %v5180_v0 = vld [vmem:[#allocation4 + $0x18] sm:$0xff]  ;;  %v3902_v51 = vmul.f32 %v8591_v14, %v5776_v50  ;;  %v3883_v15 = vmul.f32 %v8599_v52, %v9890_v23 }
 0xb94   :  { %4861 = vmatprep.subr.mxu1 %v3967_v35  ;;  %v9007_v30 = vpop.permute.xlu0 %4140  ;;  %v5181_v35 = vld [vmem:[#allocation4 + $0x10] sm:$0xff]  ;;  %v3863_v8 = vmul.f32 %v8617_v18, %v9895_v34  ;;  %v3862_v14 = vmul.f32 %v8621_v25, %v9897_v21  ;;  %v3842_v18 = vmul.f32 %v8644_v16, %v9900_v48  ;;  %v4381_v16 = vsel %vm278_vm5, %v8921_v11, %v8941_v31 }
 0xb95   :  { %9909 = vst [vmem:[#allocation43_spill] sm:$0xff] %v9007_v30  ;;  %4862 = vmatpush1.msra.mxu1 %v3966_v13  ;;  %v3882_v13 = vmul.f32 %v8603_v57, %v9891_v55  ;;  %v3843_v57 = vmul.f32 %v8640_v61, %v9899_v41  ;;  %v4401_v61 = vsel %vm315_vm4, %v8886_v39, %v8819_v26 }
 0xb96   :  { %4863 = vmatprep.subr.mxu1 %v3947_v28  ;;  %v4406_v39 = vmul.f32 %v4401_v61, %v5776_v50  ;;  %v4360_v11 = vsel %vm241_vm6, %v8970_v4, %v8951_v1 }
 0xb97   :  { %4864 = vmatpush1.msra.mxu1 %v3946_v7  ;;  %v9013_v43 = vpop.permute.xlu1 %4142 }
 0xb98   :  { %4865 = vmatprep.subr.mxu1 %v3927_v2  ;;  %v9015_v36 = vpop.permute.xlu0 %4124  ;;  %v4385_v2 = vmul.f32 %v4382_v22, %v5770_v47 }
 0xb99   :  { %4866 = vmatpush1.msra.mxu1 %v3926_v59 }
 0xb9a   :  { %4867 = vmatprep.subr.mxu1 %v5180_v0 }
 0xb9b   :  { %4868 = vmatpush1.msra.mxu1 %v5181_v35  ;;  %v9021_v33 = vpop.permute.xlu1 %4294 }
 0xb9c   :  { %4869 = vmatprep.subr.mxu1 %v3903_v27  ;;  %v9027_v59 = vpop.permute.xlu0 %4120 }
 0xb9d   :  { %4870 = vmatpush1.msra.mxu1 %v3902_v51 }
 0xb9e   :  { %4871 = vmatprep.subr.mxu1 %v3883_v15  ;;  %v4363_v15 = vsel %vm241_vm6, %v8951_v1, %v8809_v9 }
 0xb9f   :  { %4872 = vmatpush1.msra.mxu1 %v3882_v13  ;;  %v4399_v52 = vpop.permute.xlu1 %4398  ;;  %v4340_v13 = vsel %vm204_vm7, %v9003_v60, %v8982_v62 }
 0xba0   :  { %v4403_v28 = vsel %vm315_vm4, %v4399_v52, %v8881_v12  ;;  %4873 = vmatprep.subr.mxu1 %v3863_v8  ;;  %v4400_v25 = vsel %vm315_vm4, %v8819_v26, %v4399_v52  ;;  %v9057_v12 = vpop.permute.xlu0 %4104 }
 0xba1   :  { %v4404_v7 = vmul.f32 %v4403_v28, %v5760_v38  ;;  %4874 = vmatpush1.msra.mxu1 %v3862_v14  ;;  %v4407_v0 = vmul.f32 %v4400_v25, %v5773_v49  ;;  %v4367_v14 = vmul.f32 %v4360_v11, %v9895_v34  ;;  %v4347_v28 = vmul.f32 %v4340_v13, %v9899_v41  ;;  %v9912_v25 = vld [vmem:[#allocation79_spill] sm:$0xff]  ;;  %v9917_v11 = vld [vmem:[#allocation54_spill] sm:$0xff] }
 0xba2   :  { %4875 = vmatprep.subr.mxu1 %v3843_v57  ;;  %v4364_v57 = vmul.f32 %v4363_v15, %v5811_v29  ;;  %v9919_v15 = vld [vmem:[#allocation62_spill] sm:$0xff] }
 0xba3   :  { %4702 = vmatpush2.msra.mxu0 %v4404_v7  ;;  %4876 = vmatpush1.msra.mxu1 %v3842_v18  ;;  %v4379_v27 = vpop.permute.xlu1 %4378  ;;  %v9911_v18 = vld [vmem:[#allocation29_spill] sm:$0xff]  ;;  %v4299_v13 = vsel %vm430_vm1, %v9021_v33, %v9919_v15 }
 0xba4   :  { %v4380_v51 = vsel %vm278_vm5, %v8941_v31, %v4379_v27  ;;  %v4383_v26 = vsel %vm278_vm5, %v4379_v27, %v8910_v46  ;;  %4703 = vmatprep.subr.mxu0 %v4385_v2  ;;  %5129 = vmatprep.subr.msk.mxu1 %vm164_vm8, %v9828_v37  ;;  %v4386_v46 = vmul.f32 %v4381_v16, %v9891_v55  ;;  %v9095_v1 = vpop.permute.xlu0 %4100  ;;  %v9913_v7 = vld [vmem:[#allocation81_spill] sm:$0xff]  ;;  %v9914_v27 = vld [vmem:[#allocation32_spill] sm:$0xff] }
 0xba5   :  { %v4384_v35 = vmul.f32 %v4383_v26, %v5785_v56  ;;  %v4387_v31 = vmul.f32 %v4380_v51, %v9890_v23  ;;  %5130 = vmatpush1.msk.msra.mxu1 %vm164_vm8, %v9828_v37  ;;  %v9915_v51 = vld [vmem:[#allocation45_spill] sm:$0xff] }
 0xba6   :  { %4879 = vmatprep.subr.mxu1 %v4407_v0  ;;  %v4316_v0 = vsel %vm467_vm0, %v9914_v27, %v9912_v25  ;;  %v4303_v27 = vmul.f32 %v4299_v13, %v9905_v32 }
 0xba7   :  { %4704 = vmatpush2.msra.mxu0 %v4384_v35  ;;  %4880 = vmatpush2.msra.mxu1 %v4406_v39  ;;  %v4355_v8 = vpop.permute.xlu1 %4354  ;;  %v9916_v39 = vld [vmem:[#allocation55_spill] sm:$0xff] }
 0xba8   :  { %v4361_v37 = vsel %vm241_vm6, %v4355_v8, %v8970_v4  ;;  %v4362_v5 = vsel %vm241_vm6, %v8809_v9, %v4355_v8  ;;  %4881 = vmatprep.subr.mxu1 %v4387_v31  ;;  %v4319_v4 = vsel %vm467_vm0, %v9912_v25, %v9911_v18  ;;  %v4343_v9 = vsel %vm204_vm7, %v8982_v62, %v9913_v7  ;;  %v9918_v31 = vld [vmem:[#allocation48_spill] sm:$0xff]  ;;  %v9920_v8 = vld [vmem:[#allocation66_spill] sm:$0xff] }
 0xba9   :  { %v4365_v22 = vmul.f32 %v4362_v5, %v5796_v17  ;;  %v4366_v52 = vmul.f32 %v4361_v37, %v9897_v21  ;;  %4882 = vmatpush2.msra.mxu1 %v4386_v46  ;;  %v4323_v35 = vmul.f32 %v8975_v40, %v4319_v4  ;;  %v4344_v46 = vmul.f32 %v4343_v9, %v9918_v31  ;;  %v9923_v18 = vld [vmem:[#allocation84_spill] sm:$0xff]  ;;  %v9924_v4 = vld [vmem:[#allocation61_spill] sm:$0xff] }
 0xbaa   :  { %4883 = vmatprep.subr.mxu1 %v4367_v14  ;;  %v9921_v14 = vld [vmem:[#allocation85_spill] sm:$0xff]  ;;  %v4298_v5 = vsel %vm430_vm1, %v9919_v15, %v9917_v11 }
 0xbab   :  { %4705 = vmatprep.subr.mxu0 %v4365_v22  ;;  %4884 = vmatpush2.msra.mxu1 %v4366_v52  ;;  %v4335_v61 = vpop.permute.xlu1 %4334  ;;  %v4321_v37 = vmul.f32 %v9921_v14, %v9920_v8  ;;  %v4296_v22 = vsel %vm430_vm1, %v9916_v39, %v9021_v33  ;;  %v9141_v52 = vpop.permute.xlu0 %4208 }
 0xbac   :  { %v4341_v2 = vsel %vm204_vm7, %v4335_v61, %v9003_v60  ;;  %v4342_v16 = vsel %vm204_vm7, %v9913_v7, %v4335_v61  ;;  %4706 = vmatpush2.msra.mxu0 %v4364_v57  ;;  %4885 = vmatprep.subr.mxu1 %v4347_v28  ;;  %v4297_v60 = vsel %vm430_vm1, %v9917_v11, %v9916_v39  ;;  %v9922_v28 = vld [vmem:[#allocation59_spill] sm:$0xff]  ;;  %v9925_v7 = vld [vmem:[#allocation74_spill] sm:$0xff] }
 0xbad   :  { %v4345_v62 = vmul.f32 %v4342_v16, %v9915_v51  ;;  %v4346_v26 = vmul.f32 %v4341_v2, %v9900_v48  ;;  %v4320_v25 = vmul.f32 %v9923_v18, %v9922_v28  ;;  %v4277_v9 = vsel %vm393_vm2, %v9925_v7, %v9924_v4  ;;  %v9926_v2 = vld [vmem:[#allocation71_spill] sm:$0xff]  ;;  %v9928_v39 = vld [vmem:[#allocation78_spill] sm:$0xff] }
 0xbae   :  { %v4322_v61 = vmul.f32 %v8984_v58, %v4316_v0  ;;  %v4301_v33 = vmul.f32 %v4297_v60, %v5657_v19  ;;  %v4278_v16 = vsel %vm393_vm2, %v9926_v2, %v9925_v7  ;;  %v4302_v0 = vmul.f32 %v4296_v22, %v9907_v3  ;;  %v9930_v7 = vld [vmem:[#allocation68_spill] sm:$0xff] }
 0xbaf   :  { %4707 = vmatprep.subr.mxu0 %v4345_v62  ;;  %4886 = vmatpush2.msra.mxu1 %v4346_v26  ;;  %v9143_v57 = vpop.permute.xlu1 %4122  ;;  %v4300_v62 = vmul.f32 %v4298_v5, %v9755_v45  ;;  %v9927_v26 = vld [vmem:[#allocation26_spill] sm:$0xff]  ;;  %v4281_v60 = vmul.f32 %v4277_v9, %v9793_v53  ;;  %v4280_v13 = vmul.f32 %v4278_v16, %v9725_v54  ;;  %v9177_v22 = vpop.permute.xlu0 %4482 }
 0xbb0   :  { %4708 = vmatpush2.msra.mxu0 %v4344_v46  ;;  %4887 = vmatprep.subr.mxu1 %v4323_v35  ;;  %v4257_v11 = vsel %vm356_vm3, %v9928_v39, %v9927_v26  ;;  %v9929_v35 = vld [vmem:[#allocation70_spill] sm:$0xff] }
 0xbb1   :  { %4709 = vmatprep.subr.mxu0 %v4321_v37  ;;  %4888 = vmatpush2.msra.mxu1 %v4322_v61  ;;  %v4258_v46 = vsel %vm356_vm3, %v9929_v35, %v9928_v39  ;;  %v4261_v5 = vmul.f32 %v4257_v11, %v9807_v42  ;;  %v9931_v9 = vld [vmem:[#allocation30_spill] sm:$0xff]  ;;  %v9935_v39 = vld [vmem:[#allocation56_spill] sm:$0xff] }
 0xbb2   :  { %4710 = vmatpush2.msra.mxu0 %v4320_v25  ;;  %4889 = vmatprep.subr.mxu1 %v4303_v27  ;;  %v4234_v61 = vsel %vm315_vm4, %v9931_v9, %v9930_v7  ;;  %v9934_v16 = vld [vmem:[#allocation58_spill] sm:$0xff] }
 0xbb3   :  { %4711 = vmatprep.subr.mxu0 %v4301_v33  ;;  %v4275_v15 = vpop.permute.xlu1 %4274  ;;  %4890 = vmatpush2.msra.mxu1 %v4302_v0  ;;  %v9932_v33 = vld [vmem:[#allocation63_spill] sm:$0xff]  ;;  %v4215_v11 = vsel %vm278_vm5, %v9935_v39, %v9934_v16 }
 0xbb4   :  { %v4276_v8 = vsel %vm393_vm2, %v9924_v4, %v4275_v15  ;;  %v4279_v37 = vsel %vm393_vm2, %v4275_v15, %v9926_v2  ;;  %4712 = vmatpush2.msra.mxu0 %v4300_v62  ;;  %v4260_v4 = vmul.f32 %v4258_v46, %v9806_v24  ;;  %v4235_v42 = vsel %vm315_vm4, %v9932_v33, %v9931_v9  ;;  %v9933_v2 = vld [vmem:[#allocation37_spill] sm:$0xff]  ;;  %v9936_v24 = vld [vmem:[#allocation42_spill] sm:$0xff]  ;;  %v9941_v9 = vld [vmem:[#allocation28_spill] sm:$0xff] }
 0xbb5   :  { %v4282_v28 = vmul.f32 %v4276_v8, %v9910_v20  ;;  %v4283_v25 = vmul.f32 %v4279_v37, %v9908_v44  ;;  %4713 = vmatprep.subr.mxu0 %v4281_v60  ;;  %v4214_v27 = vsel %vm278_vm5, %v9934_v16, %v9933_v2  ;;  %v4237_v0 = vmul.f32 %v4234_v61, %v9936_v24  ;;  %v9937_v60 = vld [vmem:[#allocation52_spill] sm:$0xff]  ;;  %v9939_v8 = vld [vmem:[#allocation27_spill] sm:$0xff]  ;;  %v9942_v61 = vld [vmem:[#allocation65_spill] sm:$0xff] }
 0xbb6   :  { %4714 = vmatpush2.msra.mxu0 %v4280_v13  ;;  %v4236_v46 = vmul.f32 %v4235_v42, %v5760_v38  ;;  %v4217_v15 = vmul.f32 %v4214_v27, %v5770_v47  ;;  %v9938_v13 = vld [vmem:[#allocation75_spill] sm:$0xff]  ;;  %v9944_v47 = vld [vmem:[#allocation90_spill] sm:$0xff]  ;;  %v4150_v16 = vsel %vm467_vm0, %v9007_v30, %v9013_v43  ;;  %v9224_v27 = vpop.permute.xlu0 %4462 }
 0xbb7   :  { %4715 = vmatprep.subr.mxu0 %v4261_v5  ;;  %4891 = vmatprep.subr.mxu1 %v4283_v25  ;;  %v4103_v62 = vpop.permute.xlu1 %4102  ;;  %v4194_v37 = vsel %vm241_vm6, %v9939_v8, %v9938_v13  ;;  %v9940_v5 = vld [vmem:[#allocation77_spill] sm:$0xff] }
 0xbb8   :  { %4716 = vmatpush2.msra.mxu0 %v4260_v4  ;;  %4892 = vmatpush2.msra.mxu1 %v4282_v28  ;;  %v4195_v25 = vsel %vm241_vm6, %v9940_v5, %v9939_v8  ;;  %v4216_v28 = vmul.f32 %v4215_v11, %v5785_v56  ;;  %v9943_v4 = vld [vmem:[#allocation76_spill] sm:$0xff] }
 0xbb9   :  { %4717 = vmatprep.subr.mxu0 %v9937_v60  ;;  %v4174_v38 = vsel %vm204_vm7, %v9943_v4, %v9942_v61  ;;  %v4175_v42 = vsel %vm204_vm7, %v9944_v47, %v9943_v4  ;;  %v9945_v56 = vld [vmem:[#allocation92_spill] sm:$0xff]  ;;  %v4213_v60 = vsel %vm278_vm5, %v9933_v2, %v9141_v52  ;;  %v4196_v4 = vmul.f32 %v4195_v25, %v5811_v29 }
 0xbba   :  { %4718 = vmatpush2.msra.mxu0 %v9941_v9  ;;  %v4149_v11 = vsel %vm467_vm0, %v9013_v43, %v9945_v56  ;;  %v4177_v2 = vmul.f32 %v4174_v38, %v9915_v51  ;;  %v4176_v56 = vmul.f32 %v4175_v42, %v9918_v31  ;;  %v4218_v29 = vmul.f32 %v4213_v60, %v9891_v55  ;;  %v9950_v42 = vld [vmem:[#allocation86_spill] sm:$0xff]  ;;  %v9951_v60 = vld [vmem:[#allocation83_spill] sm:$0xff] }
 0xbbb   :  { %4719 = vmatprep.subr.mxu0 %v4237_v0  ;;  %v4255_v24 = vpop.permute.xlu1 %4254  ;;  %v4197_v0 = vmul.f32 %v4194_v37, %v5796_v17  ;;  %v4153_v17 = vmul.f32 %v9921_v14, %v4149_v11  ;;  %v4130_v31 = vsel %vm430_vm1, %v9027_v59, %v9143_v57  ;;  %v9948_v37 = vld [vmem:[#allocation82_spill] sm:$0xff] }
 0xbbc   :  { %v4256_v8 = vsel %vm356_vm3, %v9927_v26, %v4255_v24  ;;  %v4259_v9 = vsel %vm356_vm3, %v4255_v24, %v9929_v35  ;;  %4720 = vmatpush2.msra.mxu0 %v4236_v46  ;;  %v4152_v26 = vmul.f32 %v9923_v18, %v4150_v16  ;;  %v4212_v35 = vsel %vm278_vm5, %v9141_v52, %v9935_v39  ;;  %v4443_v18 = vpop.permute.xlu0 %4442 }
 0xbbd   :  { %v4262_v43 = vmul.f32 %v4256_v8, %v5735_v10  ;;  %v4263_v30 = vmul.f32 %v4259_v9, %v5726_v63  ;;  %4721 = vmatprep.subr.mxu0 %v4217_v15  ;;  %v4129_v46 = vsel %vm430_vm1, %v9143_v57, %v9015_v36  ;;  %v4219_v14 = vmul.f32 %v4212_v35, %v9890_v23  ;;  %v9946_v15 = vld [vmem:[#allocation51_spill] sm:$0xff]  ;;  %v9947_v57 = vld [vmem:[#allocation80_spill] sm:$0xff]  ;;  %v9311_v9 = vld [vmem:[#allocation18 + $0x20] sm:$0xff] }
 0xbbe   :  { %4722 = vmatpush2.msra.mxu0 %v4216_v28  ;;  %v4109_v23 = vsel %vm393_vm2, %v4103_v62, %v9057_v12  ;;  %v4133_v25 = vmul.f32 %v4129_v46, %v5657_v19  ;;  %v4110_v28 = vsel %vm393_vm2, %v9095_v1, %v4103_v62 }
 0xbbf   :  { %4723 = vmatprep.subr.mxu0 %v4197_v0  ;;  %4893 = vmatprep.subr.mxu1 %v4263_v30  ;;  %v4229_v51 = vpop.permute.xlu1 %4228  ;;  %v4112_v11 = vmul.f32 %v4110_v28, %v9725_v54  ;;  %v9952_v54 = vld [vmem:[#allocation88_spill] sm:$0xff] }
 0xbc0   :  { %v4232_v52 = vsel %vm315_vm4, %v4229_v51, %v9932_v33  ;;  %v4233_v55 = vsel %vm315_vm4, %v9930_v7, %v4229_v51  ;;  %4724 = vmatpush2.msra.mxu0 %v4196_v4  ;;  %4894 = vmatpush2.msra.mxu1 %v4262_v43  ;;  %v4484_v33 = vsel %vm467_vm0, %v9947_v57, %v9177_v22  ;;  %v9953_v43 = vld [vmem:[#allocation87_spill] sm:$0xff]  ;;  %v9955_v51 = vld [vmem:[#allocation89_spill] sm:$0xff] }
 0xbc1   :  { %v4238_v30 = vmul.f32 %v4233_v55, %v5776_v50  ;;  %v4239_v39 = vmul.f32 %v4232_v52, %v5773_v49  ;;  %4725 = vmatprep.subr.mxu0 %v4177_v2  ;;  %4895 = vmatprep.subr.mxu1 %v9946_v15  ;;  %v4487_v7 = vsel %vm467_vm0, %v9177_v22, %v9948_v37  ;;  %v9949_v50 = vld [vmem:[#allocation72_spill] sm:$0xff] }
 0xbc2   :  { %4726 = vmatpush2.msra.mxu0 %v4176_v56  ;;  %4896 = vmatpush2.msra.mxu1 %v9949_v50  ;;  %v4132_v49 = vmul.f32 %v4130_v31, %v9755_v45  ;;  %v4467_v22 = vsel %vm430_vm1, %v9224_v27, %v9950_v42  ;;  %v4113_v45 = vmul.f32 %v4109_v23, %v9793_v53  ;;  %v4503_v31 = vld [vmem:[#allocation18 + $0x38] sm:$0xff]  ;;  %v9956_v55 = vld [vmem:[#allocation92_spill] sm:$0xff] }
 0xbc3   :  { %4727 = vmatprep.subr.mxu0 %v4153_v17  ;;  %4897 = vmatprep.subr.mxu1 %v4239_v39  ;;  %v4189_v38 = vpop.permute.xlu1 %4188  ;;  %v4490_v56 = vmul.f32 %v8984_v58, %v4484_v33  ;;  %v4464_v53 = vsel %vm430_vm1, %v9951_v60, %v9224_v27  ;;  %v4447_v0 = vsel %vm393_vm2, %v4443_v18, %v9952_v54  ;;  %v4502_v37 = vld [vmem:[#allocation18 + $0x30] sm:$0xff]  ;;  %v9961_v42 = vld [vmem:[#allocation93_spill] sm:$0xff] }
 0xbc4   :  { %v4192_v16 = vsel %vm241_vm6, %v4189_v38, %v9940_v5  ;;  %v4193_v19 = vsel %vm241_vm6, %v9938_v13, %v4189_v38  ;;  %4728 = vmatpush2.msra.mxu0 %v4152_v26  ;;  %4898 = vmatpush2.msra.mxu1 %v4238_v30  ;;  %v9303_v5 = vld [vmem:[#allocation18] sm:$0xff]  ;;  %v4491_v13 = vmul.f32 %v8975_v40, %v4487_v7  ;;  %v4506_v23 = vld [vmem:[#allocation18 + $0x50] sm:$0xff]  ;;  %v9960_v38 = vmov 0.0  }
 0xbc5   :  { %v4198_v62 = vmul.f32 %v4193_v19, %v9897_v21  ;;  %v4199_v24 = vmul.f32 %v4192_v16, %v9895_v34  ;;  %4729 = vmatprep.subr.mxu0 %v4133_v25  ;;  %4899 = vmatprep.subr.mxu1 %v4219_v14  ;;  %v4471_v21 = vmul.f32 %v4467_v22, %v9905_v32  ;;  %v4423_v34 = vpop.permute.xlu0 %4422  ;;  %v4505_v25 = vld [vmem:[#allocation18 + $0x48] sm:$0xff] }
 0xbc6   :  { %4730 = vmatpush2.msra.mxu0 %v4132_v49  ;;  %4900 = vmatpush2.msra.mxu1 %v4218_v29  ;;  %v4444_v2 = vsel %vm393_vm2, %v9953_v43, %v4443_v18  ;;  %v4470_v17 = vmul.f32 %v4464_v53, %v9907_v3  ;;  %v4451_v46 = vmul.f32 %v4447_v0, %v9908_v44  ;;  %v9957_v18 = vld [vmem:[#allocation43_spill] sm:$0xff]  ;;  %v9959_v49 = vld [vmem:[#allocation41_spill] sm:$0xff] }
 0xbc7   :  { %4731 = vmatprep.subr.mxu0 %v4113_v45  ;;  %4901 = vmatprep.subr.mxu1 %v4199_v24  ;;  %v4169_v8 = vpop.permute.xlu1 %4168  ;;  %v4450_v52 = vmul.f32 %v4444_v2, %v9910_v20 }
 0xbc8   :  { %v4172_v4 = vsel %vm204_vm7, %v4169_v8, %v9944_v47  ;;  %v4173_v27 = vsel %vm204_vm7, %v9942_v61, %v4169_v8  ;;  %4732 = vmatpush2.msra.mxu0 %v4112_v11  ;;  %4902 = vmatpush2.msra.mxu1 %v4198_v62  ;;  %v9954_v47 = vld [vmem:[#allocation91_spill] sm:$0xff]  ;;  %v4499_v61 = vld [vmem:[#allocation18 + $0x18] sm:$0xff] }
 0xbc9   :  { %v4178_v26 = vmul.f32 %v4173_v27, %v9900_v48  ;;  %v4179_v35 = vmul.f32 %v4172_v4, %v9899_v41  ;;  %4734 = vmatmul.mubr.f32.vlgmr.msra.gmra.mxu0 %v9303_v5  ;;  %4958 = vmatprep.subr.mxu0 %v4491_v13  ;;  %v4427_v29 = vsel %vm356_vm3, %v4423_v34, %v9954_v47 }
 0xbca   :  { %4959 = vmatpush1.msra.mxu0 %v4490_v56  ;;  %4739 = vmatprep.mubr.f32.mxu0 %v9311_v9  ;;  %v4424_v48 = vsel %vm356_vm3, %v9955_v51, %v4423_v34  ;;  %v4431_v39 = vmul.f32 %v4427_v29, %v5726_v63 }
 0xbcb   :  { %4903 = vmatprep.subr.mxu1 %v4179_v35  ;;  %4960 = vmatprep.subr.mxu0 %v4471_v21  ;;  %v4147_v41 = vpop.permute.xlu1 %4146  ;;  %v4430_v33 = vmul.f32 %v4424_v48, %v5735_v10 }
 0xbcc   :  { %v4148_v14 = vsel %vm467_vm0, %v9956_v55, %v4147_v41  ;;  %v4151_v30 = vsel %vm467_vm0, %v4147_v41, %v9957_v18  ;;  %4904 = vmatpush2.msra.mxu1 %v4178_v26  ;;  %4961 = vmatpush1.msra.mxu0 %v4470_v17 }
 0xbcd   :  { %v4154_v15 = vmul.f32 %v8984_v58, %v4148_v14  ;;  %v4155_v57 = vmul.f32 %v8975_v40, %v4151_v30  ;;  %4740 = vmatmul.mubr.f32.gmra.mxu0 %v4499_v61  ;;  %4962 = vmatprep.subr.mxu0 %v4451_v46  ;;  %v9958_v58 = vld [vmem:[#allocation38_spill] sm:$0xff] }
 0xbce   :  { %4963 = vmatpush1.msra.mxu0 %v4450_v52  ;;  %4745 = vmatprep.mubr.f32.mxu0 %v4503_v31 }
 0xbcf   :  { %4905 = vmatprep.subr.mxu1 %v4155_v57  ;;  %4964 = vmatprep.subr.mxu0 %v4431_v39  ;;  %v4127_v7 = vpop.permute.xlu1 %4126 }
 0xbd0   :  { %v4128_v50 = vsel %vm430_vm1, %v9015_v36, %v4127_v7  ;;  %v4131_v63 = vsel %vm430_vm1, %v4127_v7, %v9027_v59  ;;  %4906 = vmatpush2.msra.mxu1 %v4154_v15  ;;  %4965 = vmatpush1.msra.mxu0 %v4430_v33 }
 0xbd1   :  { %v4134_v40 = vmul.f32 %v4128_v50, %v9907_v3  ;;  %v4135_v10 = vmul.f32 %v4131_v63, %v9905_v32  ;;  %4746 = vmatmul.mubr.f32.gmra.mxu0 %v4502_v37  ;;  %4966 = vmatprep.subr.mxu0 %v9958_v58 }
 0xbd2   :  { %4967 = vmatpush1.msra.mxu0 %v9959_v49  ;;  %4751 = vmatprep.mubr.f32.mxu0 %v4506_v23 }
 0xbd3   :  { %4907 = vmatprep.subr.mxu1 %v4135_v10  ;;  %v4107_v28 = vpop.permute.xlu1 %4106 }
 0xbd4   :  { %v4108_v36 = vsel %vm393_vm2, %v9057_v12, %v4107_v28  ;;  %v4111_v59 = vsel %vm393_vm2, %v4107_v28, %v9095_v1  ;;  %4908 = vmatpush2.msra.mxu1 %v4134_v40 }
 0xbd5   :  { %v4114_v32 = vmul.f32 %v4108_v36, %v9910_v20  ;;  %v4115_v3 = vmul.f32 %v4111_v59, %v9908_v44  ;;  %4752 = vmatmul.mubr.f32.gmra.mxu0 %v4505_v25  ;;  %v9963_v44 = vld [vmem:[#allocation73_spill] sm:$0xff] }
 0xbd6   :  { %5000 = vmatprep.mubr.f32.mxu0 %v9960_v38  ;;  %v9964_v20 = vld [vmem:[#allocation33_spill] sm:$0xff] }
 0xbd7   :  { %4909 = vmatprep.subr.mxu1 %v4115_v3 }
 0xbd8   :  { %4910 = vmatpush2.msra.mxu1 %v4114_v32 }
 0xbd9   :  { %4912 = vmatmul.mubr.f32.vlgmr.msra.gmra.mxu1 %v9303_v5  ;;  %5095 = vmatmul.mubr.msk.f32.vlgmr.msra.gmra.mxu0 %vm4656_vm12, %v9961_v42 }
 0xbda   :  { %4917 = vmatprep.mubr.f32.mxu1 %v9311_v9  ;;  %5006 = vmatprep.mubr.f32.mxu0 %v9960_v38 }
 0xbdd   :  { %4918 = vmatmul.mubr.f32.gmra.mxu1 %v4499_v61  ;;  %5096 = vmatmul.mubr.msk.f32.gmra.mxu0 %vm4656_vm12, %v9962_v6 }
 0xbde   :  { %4923 = vmatprep.mubr.f32.mxu1 %v4503_v31  ;;  %5012 = vmatprep.mubr.f32.mxu0 %v9960_v38 }
 0xbe1   :  { %4924 = vmatmul.mubr.f32.gmra.mxu1 %v4502_v37  ;;  %5097 = vmatmul.mubr.msk.f32.gmra.mxu0 %vm4656_vm12, %v9963_v44 }
 0xbe2   :  { %4929 = vmatprep.mubr.f32.mxu1 %v4506_v23  ;;  %5018 = vmatprep.mubr.f32.mxu0 %v9960_v38 }
 0xbe5   :  { %4930 = vmatmul.mubr.f32.gmra.mxu1 %v4505_v25  ;;  %5098 = vmatmul.mubr.msk.f32.gmra.mxu0 %vm4656_vm12, %v9964_v20 }
 0xc46   :  { %v4824_v12 = vpop.f32.mrf.mxu1 }
 0xc48   :  { %v4826_v1 = vpop.f32.mrf.mxu1 }
 0xc4a   :  { %v4830_v22 = vpop.f32.mrf.mxu1 }
 0xc4c   :  { %v4832_v16 = vpop.f32.mrf.mxu1 }
 0xc4e   :  { %v4836_v62 = vpop.f32.mrf.mxu1 }
 0xc50   :  { %v4838_v11 = vpop.f32.mrf.mxu1 }
 0xc52   :  { %v4842_v8 = vpop.f32.mrf.mxu1 }
 0xc54   :  { %v4844_v26 = vpop.f32.mrf.mxu1 }
 0xc89   :  { %v4735_v19 = vpop.f32.mrf.mxu0 }
 0xc8a   :  { %v4825_v60 = vadd.f32 %v4824_v12, %v4735_v19 }
 0xc8b   :  { %v4737_v45 = vpop.f32.mrf.mxu0 }
 0xc8c   :  { %v4827_v9 = vadd.f32 %v4826_v1, %v4737_v45 }
 0xc8d   :  { %v4741_v24 = vpop.f32.mrf.mxu0 }
 0xc8e   :  { %v4831_v5 = vadd.f32 %v4830_v22, %v4741_v24 }
 0xc8f   :  { %v4743_v56 = vpop.f32.mrf.mxu0 }
 0xc90   :  { %v4833_v53 = vadd.f32 %v4832_v16, %v4743_v56  ;;  %v5025_v54 = vadd.f32 %v4831_v5, %v4825_v60 }
 0xc91   :  { %v4747_v13 = vpop.f32.mrf.mxu0 }
 0xc92   :  { %v4837_v21 = vadd.f32 %v4836_v62, %v4747_v13  ;;  %v5026_v27 = vadd.f32 %v4833_v53, %v4827_v9 }
 0xc93   :  { %v4749_v34 = vpop.f32.mrf.mxu0 }
 0xc94   :  { %v4839_v0 = vadd.f32 %v4838_v11, %v4749_v34  ;;  %v5029_v43 = vadd.f32 %v5025_v54, %v4837_v21 }
 0xc95   :  { %v4753_v4 = vpop.f32.mrf.mxu0 }
 0xc96   :  { %v4843_v2 = vadd.f32 %v4842_v8, %v4753_v4  ;;  %v5030_v17 = vadd.f32 %v5026_v27, %v4839_v0 }
 0xc97   :  { %v4755_v35 = vpop.f32.mrf.mxu0 }
 0xc98   :  { %v5033_v47 = vadd.f32 %v5029_v43, %v4843_v2  ;;  %v4845_v29 = vadd.f32 %v4844_v26, %v4755_v35 }
 0xc99   :  { %v4913_v61 = vpop.f32.mrf.mxu1  ;;  %v5002_v46 = vpop.f32.mrf.mxu0 }
 0xc9a   :  { %v5037_v51 = vmul.f32 0.25, %v5033_v47  ;;  %v5034_v48 = vadd.f32 %v5030_v17, %v4845_v29  ;;  %v5003_v33 = vadd.f32 %v5002_v46, %v4913_v61 }
 0xc9b   :  { %v4915_v41 = vpop.f32.mrf.mxu1  ;;  %v5004_v31 = vpop.f32.mrf.mxu0 }
 0xc9c   :  { %5041 = vst [vmem:[#allocation19] sm:$0xff] %v5037_v51  ;;  %v5038_v52 = vmul.f32 0.25, %v5034_v48  ;;  %v5005_v63 = vadd.f32 %v5004_v31, %v4915_v41 }
 0xc9d   :  { %v4919_v55 = vpop.f32.mrf.mxu1  ;;  %v5008_v14 = vpop.f32.mrf.mxu0 }
 0xc9e   :  { %5042 = vst [vmem:[#allocation19 + $0x8] sm:$0xff] %v5038_v52  ;;  %v5009_v39 = vadd.f32 %v5008_v14, %v4919_v55 }
 0xc9f   :  { %v4921_v18 = vpop.f32.mrf.mxu1  ;;  %v5010_v30 = vpop.f32.mrf.mxu0 }
 0xca0   :  { %v5011_v37 = vadd.f32 %v5010_v30, %v4921_v18  ;;  %v5027_v40 = vadd.f32 %v5009_v39, %v5003_v33 }
 0xca1   :  { %v4925_v15 = vpop.f32.mrf.mxu1  ;;  %v5014_v57 = vpop.f32.mrf.mxu0 }
 0xca2   :  { %v5015_v7 = vadd.f32 %v5014_v57, %v4925_v15  ;;  %v5028_v25 = vadd.f32 %v5011_v37, %v5005_v63 }
 0xca3   :  { %v4927_v23 = vpop.f32.mrf.mxu1  ;;  %v5016_v50 = vpop.f32.mrf.mxu0 }
 0xca4   :  { %v5017_v10 = vadd.f32 %v5016_v50, %v4927_v23  ;;  %v5031_v28 = vadd.f32 %v5027_v40, %v5015_v7 }
 0xca5   :  { %v4931_v58 = vpop.f32.mrf.mxu1  ;;  %v5020_v49 = vpop.f32.mrf.mxu0 }
 0xca6   :  { %v5021_v36 = vadd.f32 %v5020_v49, %v4931_v58  ;;  %v5032_v3 = vadd.f32 %v5028_v25, %v5017_v10 }
 0xca7   :  { %v4933_v59 = vpop.f32.mrf.mxu1  ;;  %v5022_v32 = vpop.f32.mrf.mxu0 }
 0xca8   :  { %v5035_v38 = vadd.f32 %v5031_v28, %v5021_v36  ;;  %v5023_v42 = vadd.f32 %v5022_v32, %v4933_v59 }
 0xcaa   :  { %v5039_v6 = vmul.f32 0.25, %v5035_v38  ;;  %v5036_v44 = vadd.f32 %v5032_v3, %v5023_v42 }
 0xcac   :  { %5043 = vst [vmem:[#allocation19 + $0x10] sm:$0xff] %v5039_v6  ;;  %v5040_v20 = vmul.f32 0.25, %v5036_v44 }
 0xcae   :  { %5044 = vst [vmem:[#allocation19 + $0x18] sm:$0xff] %v5040_v20 }
 0xcaf   :  { %5373 = shalt.err (!%p5370_p7)
}
 0xcb0   :  { %5054 = dma.vmem_to_hbm [thread:$0]  %s5052_s24, 512, %s9393_s10, [#allocation6]  }
 0xcb1   :  { %5392 = dma.done.wait [#allocation6], 512  }
 0xcb2   :  { %5393 = vsyncadd [#allocation6], 4294966784 }
 0xcb3   :  { %5058 = vsyncpa [#allocation5], 1 }
 0xcb4   :  { %5059 = vsyncpa [#allocation8], 1 }
 0xcb5   :  { %5060 = vsyncpa [#allocation11], 1 }
 0xcb6   :  { %5061 = vsyncpa [#allocation14], 1 }
 0xcb7   :  { %5062 = vsyncpa [#allocation17], 1 }
 0xcb8   :  { %5063 = vsyncpa [#allocation6], 1 }

</bundles_post_ra>
